<compile_context>
chip_gen: v5e
topology: v5e:2x2
jax: 0.10.0
libtpu: 0.0.40
codegen_flags: <defaults>
</compile_context>

<pallas_src>
import jax
import jax.numpy as jnp
import numpy as np
from jax.experimental import pallas as pl
from jax.experimental.pallas import tpu as pltpu

CHANNELS = 64
CONVOLUTIONS = 8
GIN_HIDDEN = 256
HIDDEN = 1024
NODE_END = 16          # vocabulary size of the node embedding (Node.END)
EPS = 1e-5

_VMEM = pl.BlockSpec(memory_space=pltpu.MemorySpace.VMEM)


# ----------------------------- fused Pallas kernel ------------------------------

def _fused_forward_kernel(ids_ref, adj_ref, mask_ref, maskt_ref, invc_ref,
                          emb_ref,
                          w1o_ref, w1b_ref, b1_ref, w2_ref, b2_ref,
                          wh_ref, bh_ref, wo_ref, bo_ref,
                          out_ref):
    a = adj_ref[...]                     # [N, N]   dense directed adjacency (edge counts)
    m = mask_ref[...]                    # [B, N]   one-hot graph membership
    mt = maskt_ref[...]                  # [N, B]
    invc = invc_ref[...]                 # [B, 1]   1 / nodes-per-graph
    n_nodes = a.shape[0]
    n_graphs = m.shape[0]
    neg = jnp.float32(-1e30)             # sentinel for masked max (matches reference)

    # ---- embedding lookup as a one-hot matmul (keeps the gather in-kernel) ----
    ids = ids_ref[...]                                           # [N, 1] int32
    onehot = (jax.lax.broadcasted_iota(jnp.int32, (n_nodes, NODE_END), 1)
              == ids).astype(jnp.float32)                        # [N, V]
    x = jnp.dot(onehot, emb_ref[...], preferred_element_type=jnp.float32)  # [N, C]

    m_mean = m * invc                    # [B, N]  mean-weights, hoisted out of the loop

    def pool(v):
        # per-graph max over nodes -> [B, C]; uses mask_t columns (no transposes)
        rows = []
        for b in range(n_graphs):        # B is tiny & static: unrolled
            col = mt[:, b:b + 1]         # [N, 1]
            masked = jnp.where(col > 0.5, v, neg)
            rows.append(jnp.max(masked, axis=0, keepdims=True))   # [1, C]
        return jnp.concatenate(rows, axis=0)                       # [B, C]

    # head-MLP pre-activation accumulated per layer chunk of w_hidden ([9, C, HIDDEN])
    h_acc = jnp.dot(pool(x), wh_ref[0], preferred_element_type=jnp.float32)   # [B, HIDDEN]

    for l in range(CONVOLUTIONS):        # static unroll; all weights VMEM-resident
        # ---- directed GIN conv: cat(A^T x, A x) -> Linear -> relu -> Linear ----
        agg_out = jax.lax.dot_general(   # A^T x, no adj.T materialization
            a, x, (((0,), (0,)), ((), ())), preferred_element_type=jnp.float32)
        agg_back = jnp.dot(a, x, preferred_element_type=jnp.float32)           # A x
        h = (jnp.dot(agg_out, w1o_ref[l], preferred_element_type=jnp.float32)
             + jnp.dot(agg_back, w1b_ref[l], preferred_element_type=jnp.float32)
             + b1_ref[l])
        h = jnp.maximum(h, 0.0)
        y = jnp.dot(h, w2_ref[l], preferred_element_type=jnp.float32) + b2_ref[l]

        # ---- per-graph InstanceNorm (biased var) + residual + relu ----
        yy = jnp.concatenate([y, y * y], axis=-1)                               # [N, 2C]
        stats = jnp.dot(m_mean, yy, preferred_element_type=jnp.float32)         # [B, 2C]
        mean_g = stats[:, :CHANNELS]
        var_g = jnp.maximum(stats[:, CHANNELS:] - mean_g * mean_g, 0.0)
        inv_std_g = jax.lax.rsqrt(var_g + EPS)                                  # [B, C]
        aff = jnp.concatenate([mean_g * inv_std_g, inv_std_g], axis=-1)         # [B, 2C]
        bc = jnp.dot(mt, aff, preferred_element_type=jnp.float32)               # [N, 2C]
        normed = y * bc[:, CHANNELS:] - bc[:, :CHANNELS]
        x = jnp.maximum(x + normed, 0.0)

        h_acc = h_acc + jnp.dot(pool(x), wh_ref[l + 1],
                                preferred_element_type=jnp.float32)

    # ---- head MLP epilogue ----
    hid = jnp.maximum(h_acc + bh_ref[...], 0.0)                                 # [B, HIDDEN]
    out_ref[...] = (jnp.sum(hid * wo_ref[...], axis=-1, keepdims=True)
                    + bo_ref[...])                                              # [B, 1]


def model_forward(params, node_ids, adj, mask, mask_t, inv_counts):
    ids = node_ids.reshape(-1, 1).astype(jnp.int32)
    n_graphs = mask.shape[0]
    out = pl.pallas_call(
        _fused_forward_kernel,
        out_shape=jax.ShapeDtypeStruct((n_graphs, 1), jnp.float32),
        in_specs=[_VMEM] * 15,
        out_specs=_VMEM,
    )(ids, adj, mask, mask_t, inv_counts,
      params["embedding"],
      params["w1_out"], params["w1_back"], params["b1"],
      params["w2"], params["b2"],
      params["w_hidden"], params["b_hidden"],
      params["w_out"], params["b_out"])
    return out.reshape(-1)                             # [B]


model_forward = jax.jit(model_forward)


# ------------------------------- pure-JAX reference --------------------------------

def reference_forward(params, node_ids, adj, batch, num_graphs):
    x = params["embedding"][node_ids]
    a_t = adj.T
    onehot = (batch[None, :] == jnp.arange(num_graphs)[:, None]).astype(jnp.float32)
    cnt = jnp.maximum(onehot.sum(axis=1, keepdims=True), 1.0)
    xs = [x]
    for l in range(CONVOLUTIONS):
        agg_out = a_t @ x
        agg_back = adj @ x
        w1 = jnp.concatenate([params["w1_out"][l], params["w1_back"][l]], axis=0)
        h = jnp.maximum(jnp.concatenate([agg_out, agg_back], axis=-1) @ w1
                        + params["b1"][l], 0.0)
        y = h @ params["w2"][l] + params["b2"][l]
        mean = (onehot @ y) / cnt
        cen = y - mean[batch]
        var = (onehot @ (cen * cen)) / cnt
        x = jnp.maximum(x + cen / jnp.sqrt(var[batch] + EPS), 0.0)
        xs.append(x)
    xs_cat = jnp.concatenate(xs, axis=1)
    pooled = jnp.max(jnp.where(onehot[:, :, None] > 0.5, xs_cat[None, :, :],
                               jnp.float32(-1e30)), axis=1)
    wh = params["w_hidden"].reshape((CONVOLUTIONS + 1) * CHANNELS, HIDDEN)
    h = jnp.maximum(pooled @ wh + params["b_hidden"], 0.0)
    return (jnp.sum(h * params["w_out"], axis=-1, keepdims=True)
            + params["b_out"]).reshape(-1)


# ------------------------------ parameter init ------------------------------

def _linear_init(key, fan_in, fan_out):
    kw, kb = jax.random.split(key)
    bound = 1.0 / (fan_in ** 0.5)
    w = jax.random.uniform(kw, (fan_in, fan_out), jnp.float32, -bound, bound)
    b = jax.random.uniform(kb, (1, fan_out), jnp.float32, -bound, bound)
    return w, b


def init_params(key):
    keys = jax.random.split(key, 3 + 2 * CONVOLUTIONS)
    params = {"embedding": jax.random.normal(keys[0], (NODE_END, CHANNELS), jnp.float32)}
    w1s, b1s, w2s, b2s = [], [], [], []
    for i in range(CONVOLUTIONS):
        w1, b1 = _linear_init(keys[1 + 2 * i], 2 * CHANNELS, GIN_HIDDEN)
        w2, b2 = _linear_init(keys[2 + 2 * i], GIN_HIDDEN, CHANNELS)
        w1s.append(w1); b1s.append(b1); w2s.append(w2); b2s.append(b2)
    w1_all = jnp.stack(w1s)                              # [L, 2C, GH]
    params["w1_out"] = w1_all[:, :CHANNELS, :]           # multiplies A^T x
    params["w1_back"] = w1_all[:, CHANNELS:, :]          # multiplies A x
    params["b1"] = jnp.stack(b1s)                        # [L, 1, GH]
    params["w2"] = jnp.stack(w2s)                        # [L, GH, C]
    params["b2"] = jnp.stack(b2s)                        # [L, 1, C]
    wh, bh = _linear_init(keys[-2], (CONVOLUTIONS + 1) * CHANNELS, HIDDEN)
    params["w_hidden"] = wh.reshape(CONVOLUTIONS + 1, CHANNELS, HIDDEN)
    params["b_hidden"] = bh                              # [1, HIDDEN]
    wo, bo = _linear_init(keys[-1], HIDDEN, 1)
    params["w_out"] = wo.T                               # [1, HIDDEN]
    params["b_out"] = bo                                 # [1, 1]
    return params


# ----------------------------------- main -----------------------------------

if __name__ == "__main__":
    key = jax.random.PRNGKey(0)
    N_NODES, N_EDGES, N_GRAPHS = 16, 40, 3
    k_ids, k_src, k_dst, k_par = jax.random.split(key, 4)

    node_ids = jax.random.randint(k_ids, (N_NODES,), 0, NODE_END)
    src = jax.random.randint(k_src, (N_EDGES,), 0, N_NODES)
    dst = jax.random.randint(k_dst, (N_EDGES,), 0, N_NODES)
    # dense directed adjacency with per-edge multiplicity (matches scatter-add sum)
    adj = jnp.zeros((N_NODES, N_NODES), jnp.float32).at[src, dst].add(1.0)
    batch = jnp.array([0] * 6 + [1] * 5 + [2] * 5, dtype=jnp.int32)  # node -> graph

    mask = (batch[None, :] == jnp.arange(N_GRAPHS)[:, None]).astype(jnp.float32)
    mask_t = mask.T
    inv_counts = 1.0 / jnp.maximum(mask.sum(axis=1, keepdims=True), 1.0)

    params = init_params(k_par)

    out = model_forward(params, node_ids, adj, mask, mask_t, inv_counts)
    out = jax.block_until_ready(out)

    ref = reference_forward(params, node_ids, adj, batch, N_GRAPHS)
    assert out.shape == (N_GRAPHS,)
    np.testing.assert_allclose(np.asarray(out), np.asarray(ref), rtol=1e-4, atol=1e-4)
    print("KERNEL_OK")
</pallas_src>

<mosaic_0001>
module attributes {stable_mosaic.version = 11 : i64} {
  func.func @_fused_forward_kernel(%arg0: memref<16x1xi32, #tpu.memory_space<vmem>>, %arg1: memref<16x16xf32, #tpu.memory_space<vmem>>, %arg2: memref<3x16xf32, #tpu.memory_space<vmem>>, %arg3: memref<16x3xf32, #tpu.memory_space<vmem>>, %arg4: memref<3x1xf32, #tpu.memory_space<vmem>>, %arg5: memref<16x64xf32, #tpu.memory_space<vmem>>, %arg6: memref<8x64x256xf32, #tpu.memory_space<vmem>>, %arg7: memref<8x64x256xf32, #tpu.memory_space<vmem>>, %arg8: memref<8x1x256xf32, #tpu.memory_space<vmem>>, %arg9: memref<8x256x64xf32, #tpu.memory_space<vmem>>, %arg10: memref<8x1x64xf32, #tpu.memory_space<vmem>>, %arg11: memref<9x64x1024xf32, #tpu.memory_space<vmem>>, %arg12: memref<1x1024xf32, #tpu.memory_space<vmem>>, %arg13: memref<1x1024xf32, #tpu.memory_space<vmem>>, %arg14: memref<1x1xf32, #tpu.memory_space<vmem>>, %arg15: memref<3x1xf32, #tpu.memory_space<vmem>>) attributes {dimension_semantics = [], scalar_prefetch = 0 : i64, scratch_operands = 0 : i64, tpu.core_type = #tpu.core_type<tc>} {
    %c0 = arith.constant 0 : index
    %c0_0 = arith.constant 0 : index
    %0 = vector.load %arg1[%c0, %c0_0] : memref<16x16xf32, #tpu.memory_space<vmem>>, vector<16x16xf32>
    %c0_1 = arith.constant 0 : index
    %c0_2 = arith.constant 0 : index
    %1 = vector.load %arg2[%c0_1, %c0_2] : memref<3x16xf32, #tpu.memory_space<vmem>>, vector<3x16xf32>
    %c0_3 = arith.constant 0 : index
    %c0_4 = arith.constant 0 : index
    %2 = vector.load %arg3[%c0_3, %c0_4] : memref<16x3xf32, #tpu.memory_space<vmem>>, vector<16x3xf32>
    %c0_5 = arith.constant 0 : index
    %c0_6 = arith.constant 0 : index
    %3 = vector.load %arg4[%c0_5, %c0_6] : memref<3x1xf32, #tpu.memory_space<vmem>>, vector<3x1xf32>
    %c0_7 = arith.constant 0 : index
    %c0_8 = arith.constant 0 : index
    %4 = vector.load %arg0[%c0_7, %c0_8] : memref<16x1xi32, #tpu.memory_space<vmem>>, vector<16x1xi32>
    %5 = tpu.iota {dimensions = array<i32: 1>} : vector<16x16xi32>
    %6 = vector.broadcast %4 : vector<16x1xi32> to vector<16x16xi32>
    %7 = arith.cmpi eq, %5, %6 : vector<16x16xi32>
    %8 = arith.extui %7 : vector<16x16xi1> to vector<16x16xi32>
    %9 = arith.sitofp %8 : vector<16x16xi32> to vector<16x16xf32>
    %c0_9 = arith.constant 0 : index
    %c0_10 = arith.constant 0 : index
    %10 = vector.load %arg5[%c0_9, %c0_10] : memref<16x64xf32, #tpu.memory_space<vmem>>, vector<16x64xf32>
    %cst = arith.constant dense<0.000000e+00> : vector<16x64xf32>
    %11 = tpu.matmul %9, %10, %cst {dimension_numbers = #tpu.dot_dimension_numbers<[1], [0], [0], [1], [0, 0, 1, 1], [], []>} : vector<16x16xf32>, vector<16x64xf32>, vector<16x64xf32> -> vector<16x64xf32>
    %12 = vector.broadcast %3 : vector<3x1xf32> to vector<3x16xf32>
    %13 = arith.mulf %1, %12 : vector<3x16xf32>
    %14 = vector.extract_strided_slice %2 {offsets = [0, 0], sizes = [16, 1], strides = [1, 1]} : vector<16x3xf32> to vector<16x1xf32>
    %cst_11 = arith.constant 5.000000e-01 : f32
    %15 = vector.broadcast %cst_11 : f32 to vector<16x1xf32>
    %16 = arith.cmpf ogt, %14, %15 : vector<16x1xf32>
    %cst_12 = arith.constant -1.000000e+30 : f32
    %17 = vector.shape_cast %16 : vector<16x1xi1> to vector<16x1xi1>
    %18 = vector.broadcast %17 : vector<16x1xi1> to vector<16x64xi1>
    %19 = vector.broadcast %cst_12 : f32 to vector<16x64xf32>
    %20 = arith.select %18, %11, %19 : vector<16x64xi1>, vector<16x64xf32>
    %cst_13 = arith.constant dense<0xFF800000> : vector<64xf32>
    %21 = vector.multi_reduction <maximumf>, %20, %cst_13 [0] : vector<16x64xf32> to vector<64xf32>
    %22 = vector.shape_cast %21 : vector<64xf32> to vector<1x64xf32>
    %23 = vector.extract_strided_slice %2 {offsets = [0, 1], sizes = [16, 1], strides = [1, 1]} : vector<16x3xf32> to vector<16x1xf32>
    %cst_14 = arith.constant 5.000000e-01 : f32
    %24 = vector.broadcast %cst_14 : f32 to vector<16x1xf32>
    %25 = arith.cmpf ogt, %23, %24 : vector<16x1xf32>
    %cst_15 = arith.constant -1.000000e+30 : f32
    %26 = vector.shape_cast %25 : vector<16x1xi1> to vector<16x1xi1>
    %27 = vector.broadcast %26 : vector<16x1xi1> to vector<16x64xi1>
    %28 = vector.broadcast %cst_15 : f32 to vector<16x64xf32>
    %29 = arith.select %27, %11, %28 : vector<16x64xi1>, vector<16x64xf32>
    %cst_16 = arith.constant dense<0xFF800000> : vector<64xf32>
    %30 = vector.multi_reduction <maximumf>, %29, %cst_16 [0] : vector<16x64xf32> to vector<64xf32>
    %31 = vector.shape_cast %30 : vector<64xf32> to vector<1x64xf32>
    %32 = vector.extract_strided_slice %2 {offsets = [0, 2], sizes = [16, 1], strides = [1, 1]} : vector<16x3xf32> to vector<16x1xf32>
    %cst_17 = arith.constant 5.000000e-01 : f32
    %33 = vector.broadcast %cst_17 : f32 to vector<16x1xf32>
    %34 = arith.cmpf ogt, %32, %33 : vector<16x1xf32>
    %cst_18 = arith.constant -1.000000e+30 : f32
    %35 = vector.shape_cast %34 : vector<16x1xi1> to vector<16x1xi1>
    %36 = vector.broadcast %35 : vector<16x1xi1> to vector<16x64xi1>
    %37 = vector.broadcast %cst_18 : f32 to vector<16x64xf32>
    %38 = arith.select %36, %11, %37 : vector<16x64xi1>, vector<16x64xf32>
    %cst_19 = arith.constant dense<0xFF800000> : vector<64xf32>
    %39 = vector.multi_reduction <maximumf>, %38, %cst_19 [0] : vector<16x64xf32> to vector<64xf32>
    %40 = vector.shape_cast %39 : vector<64xf32> to vector<1x64xf32>
    %41 = tpu.concatenate %22, %31, %40 in 0 : vector<1x64xf32>, vector<1x64xf32>, vector<1x64xf32> -> vector<3x64xf32>
    %c0_20 = arith.constant 0 : index
    %c0_21 = arith.constant 0 : index
    %c0_22 = arith.constant 0 : index
    %42 = vector.load %arg11[%c0_20, %c0_21, %c0_22] : memref<9x64x1024xf32, #tpu.memory_space<vmem>>, vector<1x64x1024xf32>
    %43 = vector.shape_cast %42 : vector<1x64x1024xf32> to vector<64x1024xf32>
    %cst_23 = arith.constant dense<0.000000e+00> : vector<3x1024xf32>
    %44 = tpu.matmul %41, %43, %cst_23 {dimension_numbers = #tpu.dot_dimension_numbers<[1], [0], [0], [1], [0, 0, 1, 1], [], []>} : vector<3x64xf32>, vector<64x1024xf32>, vector<3x1024xf32> -> vector<3x1024xf32>
    %cst_24 = arith.constant dense<0.000000e+00> : vector<16x64xf32>
    %45 = tpu.matmul %0, %11, %cst_24 {dimension_numbers = #tpu.dot_dimension_numbers<[0], [0], [1], [1], [0, 1, 1, 1], [], []>} : vector<16x16xf32>, vector<16x64xf32>, vector<16x64xf32> -> vector<16x64xf32>
    %cst_25 = arith.constant dense<0.000000e+00> : vector<16x64xf32>
    %46 = tpu.matmul %0, %11, %cst_25 {dimension_numbers = #tpu.dot_dimension_numbers<[1], [0], [0], [1], [0, 0, 1, 1], [], []>} : vector<16x16xf32>, vector<16x64xf32>, vector<16x64xf32> -> vector<16x64xf32>
    %c0_26 = arith.constant 0 : index
    %c0_27 = arith.constant 0 : index
    %c0_28 = arith.constant 0 : index
    %47 = vector.load %arg6[%c0_26, %c0_27, %c0_28] : memref<8x64x256xf32, #tpu.memory_space<vmem>>, vector<1x64x256xf32>
    %48 = vector.shape_cast %47 : vector<1x64x256xf32> to vector<64x256xf32>
    %cst_29 = arith.constant dense<0.000000e+00> : vector<16x256xf32>
    %49 = tpu.matmul %45, %48, %cst_29 {dimension_numbers = #tpu.dot_dimension_numbers<[1], [0], [0], [1], [0, 0, 1, 1], [], []>} : vector<16x64xf32>, vector<64x256xf32>, vector<16x256xf32> -> vector<16x256xf32>
    %c0_30 = arith.constant 0 : index
    %c0_31 = arith.constant 0 : index
    %c0_32 = arith.constant 0 : index
    %50 = vector.load %arg7[%c0_30, %c0_31, %c0_32] : memref<8x64x256xf32, #tpu.memory_space<vmem>>, vector<1x64x256xf32>
    %51 = vector.shape_cast %50 : vector<1x64x256xf32> to vector<64x256xf32>
    %cst_33 = arith.constant dense<0.000000e+00> : vector<16x256xf32>
    %52 = tpu.matmul %46, %51, %cst_33 {dimension_numbers = #tpu.dot_dimension_numbers<[1], [0], [0], [1], [0, 0, 1, 1], [], []>} : vector<16x64xf32>, vector<64x256xf32>, vector<16x256xf32> -> vector<16x256xf32>
    %53 = arith.addf %49, %52 : vector<16x256xf32>
    %c0_34 = arith.constant 0 : index
    %c0_35 = arith.constant 0 : index
    %c0_36 = arith.constant 0 : index
    %54 = vector.load %arg8[%c0_34, %c0_35, %c0_36] : memref<8x1x256xf32, #tpu.memory_space<vmem>>, vector<1x1x256xf32>
    %55 = vector.shape_cast %54 : vector<1x1x256xf32> to vector<1x256xf32>
    %56 = vector.broadcast %55 : vector<1x256xf32> to vector<16x256xf32>
    %57 = arith.addf %53, %56 : vector<16x256xf32>
    %cst_37 = arith.constant 0.000000e+00 : f32
    %58 = vector.broadcast %cst_37 : f32 to vector<16x256xf32>
    %59 = arith.maximumf %57, %58 : vector<16x256xf32>
    %c0_38 = arith.constant 0 : index
    %c0_39 = arith.constant 0 : index
    %c0_40 = arith.constant 0 : index
    %60 = vector.load %arg9[%c0_38, %c0_39, %c0_40] : memref<8x256x64xf32, #tpu.memory_space<vmem>>, vector<1x256x64xf32>
    %61 = vector.shape_cast %60 : vector<1x256x64xf32> to vector<256x64xf32>
    %cst_41 = arith.constant dense<0.000000e+00> : vector<16x64xf32>
    %62 = tpu.matmul %59, %61, %cst_41 {dimension_numbers = #tpu.dot_dimension_numbers<[1], [0], [0], [1], [0, 0, 1, 1], [], []>} : vector<16x256xf32>, vector<256x64xf32>, vector<16x64xf32> -> vector<16x64xf32>
    %c0_42 = arith.constant 0 : index
    %c0_43 = arith.constant 0 : index
    %c0_44 = arith.constant 0 : index
    %63 = vector.load %arg10[%c0_42, %c0_43, %c0_44] : memref<8x1x64xf32, #tpu.memory_space<vmem>>, vector<1x1x64xf32>
    %64 = vector.shape_cast %63 : vector<1x1x64xf32> to vector<1x64xf32>
    %65 = vector.broadcast %64 : vector<1x64xf32> to vector<16x64xf32>
    %66 = arith.addf %62, %65 : vector<16x64xf32>
    %67 = arith.mulf %66, %66 : vector<16x64xf32>
    %68 = tpu.concatenate %66, %67 in 1 : vector<16x64xf32>, vector<16x64xf32> -> vector<16x128xf32>
    %cst_45 = arith.constant dense<0.000000e+00> : vector<3x128xf32>
    %69 = tpu.matmul %13, %68, %cst_45 {dimension_numbers = #tpu.dot_dimension_numbers<[1], [0], [0], [1], [0, 0, 1, 1], [], []>} : vector<3x16xf32>, vector<16x128xf32>, vector<3x128xf32> -> vector<3x128xf32>
    %70 = vector.extract_strided_slice %69 {offsets = [0, 0], sizes = [3, 64], strides = [1, 1]} : vector<3x128xf32> to vector<3x64xf32>
    %71 = vector.extract_strided_slice %69 {offsets = [0, 64], sizes = [3, 64], strides = [1, 1]} : vector<3x128xf32> to vector<3x64xf32>
    %72 = arith.mulf %70, %70 : vector<3x64xf32>
    %73 = arith.subf %71, %72 : vector<3x64xf32>
    %cst_46 = arith.constant 0.000000e+00 : f32
    %74 = vector.broadcast %cst_46 : f32 to vector<3x64xf32>
    %75 = arith.maximumf %73, %74 : vector<3x64xf32>
    %cst_47 = arith.constant 9.99999974E-6 : f32
    %76 = vector.broadcast %cst_47 : f32 to vector<3x64xf32>
    %77 = arith.addf %75, %76 : vector<3x64xf32>
    %78 = math.rsqrt %77 : vector<3x64xf32>
    %79 = arith.mulf %70, %78 : vector<3x64xf32>
    %80 = tpu.concatenate %79, %78 in 1 : vector<3x64xf32>, vector<3x64xf32> -> vector<3x128xf32>
    %cst_48 = arith.constant dense<0.000000e+00> : vector<16x128xf32>
    %81 = tpu.matmul %2, %80, %cst_48 {dimension_numbers = #tpu.dot_dimension_numbers<[1], [0], [0], [1], [0, 0, 1, 1], [], []>} : vector<16x3xf32>, vector<3x128xf32>, vector<16x128xf32> -> vector<16x128xf32>
    %82 = vector.extract_strided_slice %81 {offsets = [0, 64], sizes = [16, 64], strides = [1, 1]} : vector<16x128xf32> to vector<16x64xf32>
    %83 = arith.mulf %66, %82 : vector<16x64xf32>
    %84 = vector.extract_strided_slice %81 {offsets = [0, 0], sizes = [16, 64], strides = [1, 1]} : vector<16x128xf32> to vector<16x64xf32>
    %85 = arith.subf %83, %84 : vector<16x64xf32>
    %86 = arith.addf %11, %85 : vector<16x64xf32>
    %cst_49 = arith.constant 0.000000e+00 : f32
    %87 = vector.broadcast %cst_49 : f32 to vector<16x64xf32>
    %88 = arith.maximumf %86, %87 : vector<16x64xf32>
    %89 = vector.extract_strided_slice %2 {offsets = [0, 0], sizes = [16, 1], strides = [1, 1]} : vector<16x3xf32> to vector<16x1xf32>
    %cst_50 = arith.constant 5.000000e-01 : f32
    %90 = vector.broadcast %cst_50 : f32 to vector<16x1xf32>
    %91 = arith.cmpf ogt, %89, %90 : vector<16x1xf32>
    %cst_51 = arith.constant -1.000000e+30 : f32
    %92 = vector.shape_cast %91 : vector<16x1xi1> to vector<16x1xi1>
    %93 = vector.broadcast %92 : vector<16x1xi1> to vector<16x64xi1>
    %94 = vector.broadcast %cst_51 : f32 to vector<16x64xf32>
    %95 = arith.select %93, %88, %94 : vector<16x64xi1>, vector<16x64xf32>
    %cst_52 = arith.constant dense<0xFF800000> : vector<64xf32>
    %96 = vector.multi_reduction <maximumf>, %95, %cst_52 [0] : vector<16x64xf32> to vector<64xf32>
    %97 = vector.shape_cast %96 : vector<64xf32> to vector<1x64xf32>
    %98 = vector.extract_strided_slice %2 {offsets = [0, 1], sizes = [16, 1], strides = [1, 1]} : vector<16x3xf32> to vector<16x1xf32>
    %cst_53 = arith.constant 5.000000e-01 : f32
    %99 = vector.broadcast %cst_53 : f32 to vector<16x1xf32>
    %100 = arith.cmpf ogt, %98, %99 : vector<16x1xf32>
    %cst_54 = arith.constant -1.000000e+30 : f32
    %101 = vector.shape_cast %100 : vector<16x1xi1> to vector<16x1xi1>
    %102 = vector.broadcast %101 : vector<16x1xi1> to vector<16x64xi1>
    %103 = vector.broadcast %cst_54 : f32 to vector<16x64xf32>
    %104 = arith.select %102, %88, %103 : vector<16x64xi1>, vector<16x64xf32>
    %cst_55 = arith.constant dense<0xFF800000> : vector<64xf32>
    %105 = vector.multi_reduction <maximumf>, %104, %cst_55 [0] : vector<16x64xf32> to vector<64xf32>
    %106 = vector.shape_cast %105 : vector<64xf32> to vector<1x64xf32>
    %107 = vector.extract_strided_slice %2 {offsets = [0, 2], sizes = [16, 1], strides = [1, 1]} : vector<16x3xf32> to vector<16x1xf32>
    %cst_56 = arith.constant 5.000000e-01 : f32
    %108 = vector.broadcast %cst_56 : f32 to vector<16x1xf32>
    %109 = arith.cmpf ogt, %107, %108 : vector<16x1xf32>
    %cst_57 = arith.constant -1.000000e+30 : f32
    %110 = vector.shape_cast %109 : vector<16x1xi1> to vector<16x1xi1>
    %111 = vector.broadcast %110 : vector<16x1xi1> to vector<16x64xi1>
    %112 = vector.broadcast %cst_57 : f32 to vector<16x64xf32>
    %113 = arith.select %111, %88, %112 : vector<16x64xi1>, vector<16x64xf32>
    %cst_58 = arith.constant dense<0xFF800000> : vector<64xf32>
    %114 = vector.multi_reduction <maximumf>, %113, %cst_58 [0] : vector<16x64xf32> to vector<64xf32>
    %115 = vector.shape_cast %114 : vector<64xf32> to vector<1x64xf32>
    %116 = tpu.concatenate %97, %106, %115 in 0 : vector<1x64xf32>, vector<1x64xf32>, vector<1x64xf32> -> vector<3x64xf32>
    %c1 = arith.constant 1 : index
    %c0_59 = arith.constant 0 : index
    %c0_60 = arith.constant 0 : index
    %117 = vector.load %arg11[%c1, %c0_59, %c0_60] : memref<9x64x1024xf32, #tpu.memory_space<vmem>>, vector<1x64x1024xf32>
    %118 = vector.shape_cast %117 : vector<1x64x1024xf32> to vector<64x1024xf32>
    %cst_61 = arith.constant dense<0.000000e+00> : vector<3x1024xf32>
    %119 = tpu.matmul %116, %118, %cst_61 {dimension_numbers = #tpu.dot_dimension_numbers<[1], [0], [0], [1], [0, 0, 1, 1], [], []>} : vector<3x64xf32>, vector<64x1024xf32>, vector<3x1024xf32> -> vector<3x1024xf32>
    %120 = arith.addf %44, %119 : vector<3x1024xf32>
    %cst_62 = arith.constant dense<0.000000e+00> : vector<16x64xf32>
    %121 = tpu.matmul %0, %88, %cst_62 {dimension_numbers = #tpu.dot_dimension_numbers<[0], [0], [1], [1], [0, 1, 1, 1], [], []>} : vector<16x16xf32>, vector<16x64xf32>, vector<16x64xf32> -> vector<16x64xf32>
    %cst_63 = arith.constant dense<0.000000e+00> : vector<16x64xf32>
    %122 = tpu.matmul %0, %88, %cst_63 {dimension_numbers = #tpu.dot_dimension_numbers<[1], [0], [0], [1], [0, 0, 1, 1], [], []>} : vector<16x16xf32>, vector<16x64xf32>, vector<16x64xf32> -> vector<16x64xf32>
    %c1_64 = arith.constant 1 : index
    %c0_65 = arith.constant 0 : index
    %c0_66 = arith.constant 0 : index
    %123 = vector.load %arg6[%c1_64, %c0_65, %c0_66] : memref<8x64x256xf32, #tpu.memory_space<vmem>>, vector<1x64x256xf32>
    %124 = vector.shape_cast %123 : vector<1x64x256xf32> to vector<64x256xf32>
    %cst_67 = arith.constant dense<0.000000e+00> : vector<16x256xf32>
    %125 = tpu.matmul %121, %124, %cst_67 {dimension_numbers = #tpu.dot_dimension_numbers<[1], [0], [0], [1], [0, 0, 1, 1], [], []>} : vector<16x64xf32>, vector<64x256xf32>, vector<16x256xf32> -> vector<16x256xf32>
    %c1_68 = arith.constant 1 : index
    %c0_69 = arith.constant 0 : index
    %c0_70 = arith.constant 0 : index
    %126 = vector.load %arg7[%c1_68, %c0_69, %c0_70] : memref<8x64x256xf32, #tpu.memory_space<vmem>>, vector<1x64x256xf32>
    %127 = vector.shape_cast %126 : vector<1x64x256xf32> to vector<64x256xf32>
    %cst_71 = arith.constant dense<0.000000e+00> : vector<16x256xf32>
    %128 = tpu.matmul %122, %127, %cst_71 {dimension_numbers = #tpu.dot_dimension_numbers<[1], [0], [0], [1], [0, 0, 1, 1], [], []>} : vector<16x64xf32>, vector<64x256xf32>, vector<16x256xf32> -> vector<16x256xf32>
    %129 = arith.addf %125, %128 : vector<16x256xf32>
    %c1_72 = arith.constant 1 : index
    %c0_73 = arith.constant 0 : index
    %c0_74 = arith.constant 0 : index
    %130 = vector.load %arg8[%c1_72, %c0_73, %c0_74] : memref<8x1x256xf32, #tpu.memory_space<vmem>>, vector<1x1x256xf32>
    %131 = vector.shape_cast %130 : vector<1x1x256xf32> to vector<1x256xf32>
    %132 = vector.broadcast %131 : vector<1x256xf32> to vector<16x256xf32>
    %133 = arith.addf %129, %132 : vector<16x256xf32>
    %cst_75 = arith.constant 0.000000e+00 : f32
    %134 = vector.broadcast %cst_75 : f32 to vector<16x256xf32>
    %135 = arith.maximumf %133, %134 : vector<16x256xf32>
    %c1_76 = arith.constant 1 : index
    %c0_77 = arith.constant 0 : index
    %c0_78 = arith.constant 0 : index
    %136 = vector.load %arg9[%c1_76, %c0_77, %c0_78] : memref<8x256x64xf32, #tpu.memory_space<vmem>>, vector<1x256x64xf32>
    %137 = vector.shape_cast %136 : vector<1x256x64xf32> to vector<256x64xf32>
    %cst_79 = arith.constant dense<0.000000e+00> : vector<16x64xf32>
    %138 = tpu.matmul %135, %137, %cst_79 {dimension_numbers = #tpu.dot_dimension_numbers<[1], [0], [0], [1], [0, 0, 1, 1], [], []>} : vector<16x256xf32>, vector<256x64xf32>, vector<16x64xf32> -> vector<16x64xf32>
    %c1_80 = arith.constant 1 : index
    %c0_81 = arith.constant 0 : index
    %c0_82 = arith.constant 0 : index
    %139 = vector.load %arg10[%c1_80, %c0_81, %c0_82] : memref<8x1x64xf32, #tpu.memory_space<vmem>>, vector<1x1x64xf32>
    %140 = vector.shape_cast %139 : vector<1x1x64xf32> to vector<1x64xf32>
    %141 = vector.broadcast %140 : vector<1x64xf32> to vector<16x64xf32>
    %142 = arith.addf %138, %141 : vector<16x64xf32>
    %143 = arith.mulf %142, %142 : vector<16x64xf32>
    %144 = tpu.concatenate %142, %143 in 1 : vector<16x64xf32>, vector<16x64xf32> -> vector<16x128xf32>
    %cst_83 = arith.constant dense<0.000000e+00> : vector<3x128xf32>
    %145 = tpu.matmul %13, %144, %cst_83 {dimension_numbers = #tpu.dot_dimension_numbers<[1], [0], [0], [1], [0, 0, 1, 1], [], []>} : vector<3x16xf32>, vector<16x128xf32>, vector<3x128xf32> -> vector<3x128xf32>
    %146 = vector.extract_strided_slice %145 {offsets = [0, 0], sizes = [3, 64], strides = [1, 1]} : vector<3x128xf32> to vector<3x64xf32>
    %147 = vector.extract_strided_slice %145 {offsets = [0, 64], sizes = [3, 64], strides = [1, 1]} : vector<3x128xf32> to vector<3x64xf32>
    %148 = arith.mulf %146, %146 : vector<3x64xf32>
    %149 = arith.subf %147, %148 : vector<3x64xf32>
    %cst_84 = arith.constant 0.000000e+00 : f32
    %150 = vector.broadcast %cst_84 : f32 to vector<3x64xf32>
    %151 = arith.maximumf %149, %150 : vector<3x64xf32>
    %cst_85 = arith.constant 9.99999974E-6 : f32
    %152 = vector.broadcast %cst_85 : f32 to vector<3x64xf32>
    %153 = arith.addf %151, %152 : vector<3x64xf32>
    %154 = math.rsqrt %153 : vector<3x64xf32>
    %155 = arith.mulf %146, %154 : vector<3x64xf32>
    %156 = tpu.concatenate %155, %154 in 1 : vector<3x64xf32>, vector<3x64xf32> -> vector<3x128xf32>
    %cst_86 = arith.constant dense<0.000000e+00> : vector<16x128xf32>
    %157 = tpu.matmul %2, %156, %cst_86 {dimension_numbers = #tpu.dot_dimension_numbers<[1], [0], [0], [1], [0, 0, 1, 1], [], []>} : vector<16x3xf32>, vector<3x128xf32>, vector<16x128xf32> -> vector<16x128xf32>
    %158 = vector.extract_strided_slice %157 {offsets = [0, 64], sizes = [16, 64], strides = [1, 1]} : vector<16x128xf32> to vector<16x64xf32>
    %159 = arith.mulf %142, %158 : vector<16x64xf32>
    %160 = vector.extract_strided_slice %157 {offsets = [0, 0], sizes = [16, 64], strides = [1, 1]} : vector<16x128xf32> to vector<16x64xf32>
    %161 = arith.subf %159, %160 : vector<16x64xf32>
    %162 = arith.addf %88, %161 : vector<16x64xf32>
    %cst_87 = arith.constant 0.000000e+00 : f32
    %163 = vector.broadcast %cst_87 : f32 to vector<16x64xf32>
    %164 = arith.maximumf %162, %163 : vector<16x64xf32>
    %165 = vector.extract_strided_slice %2 {offsets = [0, 0], sizes = [16, 1], strides = [1, 1]} : vector<16x3xf32> to vector<16x1xf32>
    %cst_88 = arith.constant 5.000000e-01 : f32
    %166 = vector.broadcast %cst_88 : f32 to vector<16x1xf32>
    %167 = arith.cmpf ogt, %165, %166 : vector<16x1xf32>
    %cst_89 = arith.constant -1.000000e+30 : f32
    %168 = vector.shape_cast %167 : vector<16x1xi1> to vector<16x1xi1>
    %169 = vector.broadcast %168 : vector<16x1xi1> to vector<16x64xi1>
    %170 = vector.broadcast %cst_89 : f32 to vector<16x64xf32>
    %171 = arith.select %169, %164, %170 : vector<16x64xi1>, vector<16x64xf32>
    %cst_90 = arith.constant dense<0xFF800000> : vector<64xf32>
    %172 = vector.multi_reduction <maximumf>, %171, %cst_90 [0] : vector<16x64xf32> to vector<64xf32>
    %173 = vector.shape_cast %172 : vector<64xf32> to vector<1x64xf32>
    %174 = vector.extract_strided_slice %2 {offsets = [0, 1], sizes = [16, 1], strides = [1, 1]} : vector<16x3xf32> to vector<16x1xf32>
    %cst_91 = arith.constant 5.000000e-01 : f32
    %175 = vector.broadcast %cst_91 : f32 to vector<16x1xf32>
    %176 = arith.cmpf ogt, %174, %175 : vector<16x1xf32>
    %cst_92 = arith.constant -1.000000e+30 : f32
    %177 = vector.shape_cast %176 : vector<16x1xi1> to vector<16x1xi1>
    %178 = vector.broadcast %177 : vector<16x1xi1> to vector<16x64xi1>
    %179 = vector.broadcast %cst_92 : f32 to vector<16x64xf32>
    %180 = arith.select %178, %164, %179 : vector<16x64xi1>, vector<16x64xf32>
    %cst_93 = arith.constant dense<0xFF800000> : vector<64xf32>
    %181 = vector.multi_reduction <maximumf>, %180, %cst_93 [0] : vector<16x64xf32> to vector<64xf32>
    %182 = vector.shape_cast %181 : vector<64xf32> to vector<1x64xf32>
    %183 = vector.extract_strided_slice %2 {offsets = [0, 2], sizes = [16, 1], strides = [1, 1]} : vector<16x3xf32> to vector<16x1xf32>
    %cst_94 = arith.constant 5.000000e-01 : f32
    %184 = vector.broadcast %cst_94 : f32 to vector<16x1xf32>
    %185 = arith.cmpf ogt, %183, %184 : vector<16x1xf32>
    %cst_95 = arith.constant -1.000000e+30 : f32
    %186 = vector.shape_cast %185 : vector<16x1xi1> to vector<16x1xi1>
    %187 = vector.broadcast %186 : vector<16x1xi1> to vector<16x64xi1>
    %188 = vector.broadcast %cst_95 : f32 to vector<16x64xf32>
    %189 = arith.select %187, %164, %188 : vector<16x64xi1>, vector<16x64xf32>
    %cst_96 = arith.constant dense<0xFF800000> : vector<64xf32>
    %190 = vector.multi_reduction <maximumf>, %189, %cst_96 [0] : vector<16x64xf32> to vector<64xf32>
    %191 = vector.shape_cast %190 : vector<64xf32> to vector<1x64xf32>
    %192 = tpu.concatenate %173, %182, %191 in 0 : vector<1x64xf32>, vector<1x64xf32>, vector<1x64xf32> -> vector<3x64xf32>
    %c2 = arith.constant 2 : index
    %c0_97 = arith.constant 0 : index
    %c0_98 = arith.constant 0 : index
    %193 = vector.load %arg11[%c2, %c0_97, %c0_98] : memref<9x64x1024xf32, #tpu.memory_space<vmem>>, vector<1x64x1024xf32>
    %194 = vector.shape_cast %193 : vector<1x64x1024xf32> to vector<64x1024xf32>
    %cst_99 = arith.constant dense<0.000000e+00> : vector<3x1024xf32>
    %195 = tpu.matmul %192, %194, %cst_99 {dimension_numbers = #tpu.dot_dimension_numbers<[1], [0], [0], [1], [0, 0, 1, 1], [], []>} : vector<3x64xf32>, vector<64x1024xf32>, vector<3x1024xf32> -> vector<3x1024xf32>
    %196 = arith.addf %120, %195 : vector<3x1024xf32>
    %cst_100 = arith.constant dense<0.000000e+00> : vector<16x64xf32>
    %197 = tpu.matmul %0, %164, %cst_100 {dimension_numbers = #tpu.dot_dimension_numbers<[0], [0], [1], [1], [0, 1, 1, 1], [], []>} : vector<16x16xf32>, vector<16x64xf32>, vector<16x64xf32> -> vector<16x64xf32>
    %cst_101 = arith.constant dense<0.000000e+00> : vector<16x64xf32>
    %198 = tpu.matmul %0, %164, %cst_101 {dimension_numbers = #tpu.dot_dimension_numbers<[1], [0], [0], [1], [0, 0, 1, 1], [], []>} : vector<16x16xf32>, vector<16x64xf32>, vector<16x64xf32> -> vector<16x64xf32>
    %c2_102 = arith.constant 2 : index
    %c0_103 = arith.constant 0 : index
    %c0_104 = arith.constant 0 : index
    %199 = vector.load %arg6[%c2_102, %c0_103, %c0_104] : memref<8x64x256xf32, #tpu.memory_space<vmem>>, vector<1x64x256xf32>
    %200 = vector.shape_cast %199 : vector<1x64x256xf32> to vector<64x256xf32>
    %cst_105 = arith.constant dense<0.000000e+00> : vector<16x256xf32>
    %201 = tpu.matmul %197, %200, %cst_105 {dimension_numbers = #tpu.dot_dimension_numbers<[1], [0], [0], [1], [0, 0, 1, 1], [], []>} : vector<16x64xf32>, vector<64x256xf32>, vector<16x256xf32> -> vector<16x256xf32>
    %c2_106 = arith.constant 2 : index
    %c0_107 = arith.constant 0 : index
    %c0_108 = arith.constant 0 : index
    %202 = vector.load %arg7[%c2_106, %c0_107, %c0_108] : memref<8x64x256xf32, #tpu.memory_space<vmem>>, vector<1x64x256xf32>
    %203 = vector.shape_cast %202 : vector<1x64x256xf32> to vector<64x256xf32>
    %cst_109 = arith.constant dense<0.000000e+00> : vector<16x256xf32>
    %204 = tpu.matmul %198, %203, %cst_109 {dimension_numbers = #tpu.dot_dimension_numbers<[1], [0], [0], [1], [0, 0, 1, 1], [], []>} : vector<16x64xf32>, vector<64x256xf32>, vector<16x256xf32> -> vector<16x256xf32>
    %205 = arith.addf %201, %204 : vector<16x256xf32>
    %c2_110 = arith.constant 2 : index
    %c0_111 = arith.constant 0 : index
    %c0_112 = arith.constant 0 : index
    %206 = vector.load %arg8[%c2_110, %c0_111, %c0_112] : memref<8x1x256xf32, #tpu.memory_space<vmem>>, vector<1x1x256xf32>
    %207 = vector.shape_cast %206 : vector<1x1x256xf32> to vector<1x256xf32>
    %208 = vector.broadcast %207 : vector<1x256xf32> to vector<16x256xf32>
    %209 = arith.addf %205, %208 : vector<16x256xf32>
    %cst_113 = arith.constant 0.000000e+00 : f32
    %210 = vector.broadcast %cst_113 : f32 to vector<16x256xf32>
    %211 = arith.maximumf %209, %210 : vector<16x256xf32>
    %c2_114 = arith.constant 2 : index
    %c0_115 = arith.constant 0 : index
    %c0_116 = arith.constant 0 : index
    %212 = vector.load %arg9[%c2_114, %c0_115, %c0_116] : memref<8x256x64xf32, #tpu.memory_space<vmem>>, vector<1x256x64xf32>
    %213 = vector.shape_cast %212 : vector<1x256x64xf32> to vector<256x64xf32>
    %cst_117 = arith.constant dense<0.000000e+00> : vector<16x64xf32>
    %214 = tpu.matmul %211, %213, %cst_117 {dimension_numbers = #tpu.dot_dimension_numbers<[1], [0], [0], [1], [0, 0, 1, 1], [], []>} : vector<16x256xf32>, vector<256x64xf32>, vector<16x64xf32> -> vector<16x64xf32>
    %c2_118 = arith.constant 2 : index
    %c0_119 = arith.constant 0 : index
    %c0_120 = arith.constant 0 : index
    %215 = vector.load %arg10[%c2_118, %c0_119, %c0_120] : memref<8x1x64xf32, #tpu.memory_space<vmem>>, vector<1x1x64xf32>
    %216 = vector.shape_cast %215 : vector<1x1x64xf32> to vector<1x64xf32>
    %217 = vector.broadcast %216 : vector<1x64xf32> to vector<16x64xf32>
    %218 = arith.addf %214, %217 : vector<16x64xf32>
    %219 = arith.mulf %218, %218 : vector<16x64xf32>
    %220 = tpu.concatenate %218, %219 in 1 : vector<16x64xf32>, vector<16x64xf32> -> vector<16x128xf32>
    %cst_121 = arith.constant dense<0.000000e+00> : vector<3x128xf32>
    %221 = tpu.matmul %13, %220, %cst_121 {dimension_numbers = #tpu.dot_dimension_numbers<[1], [0], [0], [1], [0, 0, 1, 1], [], []>} : vector<3x16xf32>, vector<16x128xf32>, vector<3x128xf32> -> vector<3x128xf32>
    %222 = vector.extract_strided_slice %221 {offsets = [0, 0], sizes = [3, 64], strides = [1, 1]} : vector<3x128xf32> to vector<3x64xf32>
    %223 = vector.extract_strided_slice %221 {offsets = [0, 64], sizes = [3, 64], strides = [1, 1]} : vector<3x128xf32> to vector<3x64xf32>
    %224 = arith.mulf %222, %222 : vector<3x64xf32>
    %225 = arith.subf %223, %224 : vector<3x64xf32>
    %cst_122 = arith.constant 0.000000e+00 : f32
    %226 = vector.broadcast %cst_122 : f32 to vector<3x64xf32>
    %227 = arith.maximumf %225, %226 : vector<3x64xf32>
    %cst_123 = arith.constant 9.99999974E-6 : f32
    %228 = vector.broadcast %cst_123 : f32 to vector<3x64xf32>
    %229 = arith.addf %227, %228 : vector<3x64xf32>
    %230 = math.rsqrt %229 : vector<3x64xf32>
    %231 = arith.mulf %222, %230 : vector<3x64xf32>
    %232 = tpu.concatenate %231, %230 in 1 : vector<3x64xf32>, vector<3x64xf32> -> vector<3x128xf32>
    %cst_124 = arith.constant dense<0.000000e+00> : vector<16x128xf32>
    %233 = tpu.matmul %2, %232, %cst_124 {dimension_numbers = #tpu.dot_dimension_numbers<[1], [0], [0], [1], [0, 0, 1, 1], [], []>} : vector<16x3xf32>, vector<3x128xf32>, vector<16x128xf32> -> vector<16x128xf32>
    %234 = vector.extract_strided_slice %233 {offsets = [0, 64], sizes = [16, 64], strides = [1, 1]} : vector<16x128xf32> to vector<16x64xf32>
    %235 = arith.mulf %218, %234 : vector<16x64xf32>
    %236 = vector.extract_strided_slice %233 {offsets = [0, 0], sizes = [16, 64], strides = [1, 1]} : vector<16x128xf32> to vector<16x64xf32>
    %237 = arith.subf %235, %236 : vector<16x64xf32>
    %238 = arith.addf %164, %237 : vector<16x64xf32>
    %cst_125 = arith.constant 0.000000e+00 : f32
    %239 = vector.broadcast %cst_125 : f32 to vector<16x64xf32>
    %240 = arith.maximumf %238, %239 : vector<16x64xf32>
    %241 = vector.extract_strided_slice %2 {offsets = [0, 0], sizes = [16, 1], strides = [1, 1]} : vector<16x3xf32> to vector<16x1xf32>
    %cst_126 = arith.constant 5.000000e-01 : f32
    %242 = vector.broadcast %cst_126 : f32 to vector<16x1xf32>
    %243 = arith.cmpf ogt, %241, %242 : vector<16x1xf32>
    %cst_127 = arith.constant -1.000000e+30 : f32
    %244 = vector.shape_cast %243 : vector<16x1xi1> to vector<16x1xi1>
    %245 = vector.broadcast %244 : vector<16x1xi1> to vector<16x64xi1>
    %246 = vector.broadcast %cst_127 : f32 to vector<16x64xf32>
    %247 = arith.select %245, %240, %246 : vector<16x64xi1>, vector<16x64xf32>
    %cst_128 = arith.constant dense<0xFF800000> : vector<64xf32>
    %248 = vector.multi_reduction <maximumf>, %247, %cst_128 [0] : vector<16x64xf32> to vector<64xf32>
    %249 = vector.shape_cast %248 : vector<64xf32> to vector<1x64xf32>
    %250 = vector.extract_strided_slice %2 {offsets = [0, 1], sizes = [16, 1], strides = [1, 1]} : vector<16x3xf32> to vector<16x1xf32>
    %cst_129 = arith.constant 5.000000e-01 : f32
    %251 = vector.broadcast %cst_129 : f32 to vector<16x1xf32>
    %252 = arith.cmpf ogt, %250, %251 : vector<16x1xf32>
    %cst_130 = arith.constant -1.000000e+30 : f32
    %253 = vector.shape_cast %252 : vector<16x1xi1> to vector<16x1xi1>
    %254 = vector.broadcast %253 : vector<16x1xi1> to vector<16x64xi1>
    %255 = vector.broadcast %cst_130 : f32 to vector<16x64xf32>
    %256 = arith.select %254, %240, %255 : vector<16x64xi1>, vector<16x64xf32>
    %cst_131 = arith.constant dense<0xFF800000> : vector<64xf32>
    %257 = vector.multi_reduction <maximumf>, %256, %cst_131 [0] : vector<16x64xf32> to vector<64xf32>
    %258 = vector.shape_cast %257 : vector<64xf32> to vector<1x64xf32>
    %259 = vector.extract_strided_slice %2 {offsets = [0, 2], sizes = [16, 1], strides = [1, 1]} : vector<16x3xf32> to vector<16x1xf32>
    %cst_132 = arith.constant 5.000000e-01 : f32
    %260 = vector.broadcast %cst_132 : f32 to vector<16x1xf32>
    %261 = arith.cmpf ogt, %259, %260 : vector<16x1xf32>
    %cst_133 = arith.constant -1.000000e+30 : f32
    %262 = vector.shape_cast %261 : vector<16x1xi1> to vector<16x1xi1>
    %263 = vector.broadcast %262 : vector<16x1xi1> to vector<16x64xi1>
    %264 = vector.broadcast %cst_133 : f32 to vector<16x64xf32>
    %265 = arith.select %263, %240, %264 : vector<16x64xi1>, vector<16x64xf32>
    %cst_134 = arith.constant dense<0xFF800000> : vector<64xf32>
    %266 = vector.multi_reduction <maximumf>, %265, %cst_134 [0] : vector<16x64xf32> to vector<64xf32>
    %267 = vector.shape_cast %266 : vector<64xf32> to vector<1x64xf32>
    %268 = tpu.concatenate %249, %258, %267 in 0 : vector<1x64xf32>, vector<1x64xf32>, vector<1x64xf32> -> vector<3x64xf32>
    %c3 = arith.constant 3 : index
    %c0_135 = arith.constant 0 : index
    %c0_136 = arith.constant 0 : index
    %269 = vector.load %arg11[%c3, %c0_135, %c0_136] : memref<9x64x1024xf32, #tpu.memory_space<vmem>>, vector<1x64x1024xf32>
    %270 = vector.shape_cast %269 : vector<1x64x1024xf32> to vector<64x1024xf32>
    %cst_137 = arith.constant dense<0.000000e+00> : vector<3x1024xf32>
    %271 = tpu.matmul %268, %270, %cst_137 {dimension_numbers = #tpu.dot_dimension_numbers<[1], [0], [0], [1], [0, 0, 1, 1], [], []>} : vector<3x64xf32>, vector<64x1024xf32>, vector<3x1024xf32> -> vector<3x1024xf32>
    %272 = arith.addf %196, %271 : vector<3x1024xf32>
    %cst_138 = arith.constant dense<0.000000e+00> : vector<16x64xf32>
    %273 = tpu.matmul %0, %240, %cst_138 {dimension_numbers = #tpu.dot_dimension_numbers<[0], [0], [1], [1], [0, 1, 1, 1], [], []>} : vector<16x16xf32>, vector<16x64xf32>, vector<16x64xf32> -> vector<16x64xf32>
    %cst_139 = arith.constant dense<0.000000e+00> : vector<16x64xf32>
    %274 = tpu.matmul %0, %240, %cst_139 {dimension_numbers = #tpu.dot_dimension_numbers<[1], [0], [0], [1], [0, 0, 1, 1], [], []>} : vector<16x16xf32>, vector<16x64xf32>, vector<16x64xf32> -> vector<16x64xf32>
    %c3_140 = arith.constant 3 : index
    %c0_141 = arith.constant 0 : index
    %c0_142 = arith.constant 0 : index
    %275 = vector.load %arg6[%c3_140, %c0_141, %c0_142] : memref<8x64x256xf32, #tpu.memory_space<vmem>>, vector<1x64x256xf32>
    %276 = vector.shape_cast %275 : vector<1x64x256xf32> to vector<64x256xf32>
    %cst_143 = arith.constant dense<0.000000e+00> : vector<16x256xf32>
    %277 = tpu.matmul %273, %276, %cst_143 {dimension_numbers = #tpu.dot_dimension_numbers<[1], [0], [0], [1], [0, 0, 1, 1], [], []>} : vector<16x64xf32>, vector<64x256xf32>, vector<16x256xf32> -> vector<16x256xf32>
    %c3_144 = arith.constant 3 : index
    %c0_145 = arith.constant 0 : index
    %c0_146 = arith.constant 0 : index
    %278 = vector.load %arg7[%c3_144, %c0_145, %c0_146] : memref<8x64x256xf32, #tpu.memory_space<vmem>>, vector<1x64x256xf32>
    %279 = vector.shape_cast %278 : vector<1x64x256xf32> to vector<64x256xf32>
    %cst_147 = arith.constant dense<0.000000e+00> : vector<16x256xf32>
    %280 = tpu.matmul %274, %279, %cst_147 {dimension_numbers = #tpu.dot_dimension_numbers<[1], [0], [0], [1], [0, 0, 1, 1], [], []>} : vector<16x64xf32>, vector<64x256xf32>, vector<16x256xf32> -> vector<16x256xf32>
    %281 = arith.addf %277, %280 : vector<16x256xf32>
    %c3_148 = arith.constant 3 : index
    %c0_149 = arith.constant 0 : index
    %c0_150 = arith.constant 0 : index
    %282 = vector.load %arg8[%c3_148, %c0_149, %c0_150] : memref<8x1x256xf32, #tpu.memory_space<vmem>>, vector<1x1x256xf32>
    %283 = vector.shape_cast %282 : vector<1x1x256xf32> to vector<1x256xf32>
    %284 = vector.broadcast %283 : vector<1x256xf32> to vector<16x256xf32>
    %285 = arith.addf %281, %284 : vector<16x256xf32>
    %cst_151 = arith.constant 0.000000e+00 : f32
    %286 = vector.broadcast %cst_151 : f32 to vector<16x256xf32>
    %287 = arith.maximumf %285, %286 : vector<16x256xf32>
    %c3_152 = arith.constant 3 : index
    %c0_153 = arith.constant 0 : index
    %c0_154 = arith.constant 0 : index
    %288 = vector.load %arg9[%c3_152, %c0_153, %c0_154] : memref<8x256x64xf32, #tpu.memory_space<vmem>>, vector<1x256x64xf32>
    %289 = vector.shape_cast %288 : vector<1x256x64xf32> to vector<256x64xf32>
    %cst_155 = arith.constant dense<0.000000e+00> : vector<16x64xf32>
    %290 = tpu.matmul %287, %289, %cst_155 {dimension_numbers = #tpu.dot_dimension_numbers<[1], [0], [0], [1], [0, 0, 1, 1], [], []>} : vector<16x256xf32>, vector<256x64xf32>, vector<16x64xf32> -> vector<16x64xf32>
    %c3_156 = arith.constant 3 : index
    %c0_157 = arith.constant 0 : index
    %c0_158 = arith.constant 0 : index
    %291 = vector.load %arg10[%c3_156, %c0_157, %c0_158] : memref<8x1x64xf32, #tpu.memory_space<vmem>>, vector<1x1x64xf32>
    %292 = vector.shape_cast %291 : vector<1x1x64xf32> to vector<1x64xf32>
    %293 = vector.broadcast %292 : vector<1x64xf32> to vector<16x64xf32>
    %294 = arith.addf %290, %293 : vector<16x64xf32>
    %295 = arith.mulf %294, %294 : vector<16x64xf32>
    %296 = tpu.concatenate %294, %295 in 1 : vector<16x64xf32>, vector<16x64xf32> -> vector<16x128xf32>
    %cst_159 = arith.constant dense<0.000000e+00> : vector<3x128xf32>
    %297 = tpu.matmul %13, %296, %cst_159 {dimension_numbers = #tpu.dot_dimension_numbers<[1], [0], [0], [1], [0, 0, 1, 1], [], []>} : vector<3x16xf32>, vector<16x128xf32>, vector<3x128xf32> -> vector<3x128xf32>
    %298 = vector.extract_strided_slice %297 {offsets = [0, 0], sizes = [3, 64], strides = [1, 1]} : vector<3x128xf32> to vector<3x64xf32>
    %299 = vector.extract_strided_slice %297 {offsets = [0, 64], sizes = [3, 64], strides = [1, 1]} : vector<3x128xf32> to vector<3x64xf32>
    %300 = arith.mulf %298, %298 : vector<3x64xf32>
    %301 = arith.subf %299, %300 : vector<3x64xf32>
    %cst_160 = arith.constant 0.000000e+00 : f32
    %302 = vector.broadcast %cst_160 : f32 to vector<3x64xf32>
    %303 = arith.maximumf %301, %302 : vector<3x64xf32>
    %cst_161 = arith.constant 9.99999974E-6 : f32
    %304 = vector.broadcast %cst_161 : f32 to vector<3x64xf32>
    %305 = arith.addf %303, %304 : vector<3x64xf32>
    %306 = math.rsqrt %305 : vector<3x64xf32>
    %307 = arith.mulf %298, %306 : vector<3x64xf32>
    %308 = tpu.concatenate %307, %306 in 1 : vector<3x64xf32>, vector<3x64xf32> -> vector<3x128xf32>
    %cst_162 = arith.constant dense<0.000000e+00> : vector<16x128xf32>
    %309 = tpu.matmul %2, %308, %cst_162 {dimension_numbers = #tpu.dot_dimension_numbers<[1], [0], [0], [1], [0, 0, 1, 1], [], []>} : vector<16x3xf32>, vector<3x128xf32>, vector<16x128xf32> -> vector<16x128xf32>
    %310 = vector.extract_strided_slice %309 {offsets = [0, 64], sizes = [16, 64], strides = [1, 1]} : vector<16x128xf32> to vector<16x64xf32>
    %311 = arith.mulf %294, %310 : vector<16x64xf32>
    %312 = vector.extract_strided_slice %309 {offsets = [0, 0], sizes = [16, 64], strides = [1, 1]} : vector<16x128xf32> to vector<16x64xf32>
    %313 = arith.subf %311, %312 : vector<16x64xf32>
    %314 = arith.addf %240, %313 : vector<16x64xf32>
    %cst_163 = arith.constant 0.000000e+00 : f32
    %315 = vector.broadcast %cst_163 : f32 to vector<16x64xf32>
    %316 = arith.maximumf %314, %315 : vector<16x64xf32>
    %317 = vector.extract_strided_slice %2 {offsets = [0, 0], sizes = [16, 1], strides = [1, 1]} : vector<16x3xf32> to vector<16x1xf32>
    %cst_164 = arith.constant 5.000000e-01 : f32
    %318 = vector.broadcast %cst_164 : f32 to vector<16x1xf32>
    %319 = arith.cmpf ogt, %317, %318 : vector<16x1xf32>
    %cst_165 = arith.constant -1.000000e+30 : f32
    %320 = vector.shape_cast %319 : vector<16x1xi1> to vector<16x1xi1>
    %321 = vector.broadcast %320 : vector<16x1xi1> to vector<16x64xi1>
    %322 = vector.broadcast %cst_165 : f32 to vector<16x64xf32>
    %323 = arith.select %321, %316, %322 : vector<16x64xi1>, vector<16x64xf32>
    %cst_166 = arith.constant dense<0xFF800000> : vector<64xf32>
    %324 = vector.multi_reduction <maximumf>, %323, %cst_166 [0] : vector<16x64xf32> to vector<64xf32>
    %325 = vector.shape_cast %324 : vector<64xf32> to vector<1x64xf32>
    %326 = vector.extract_strided_slice %2 {offsets = [0, 1], sizes = [16, 1], strides = [1, 1]} : vector<16x3xf32> to vector<16x1xf32>
    %cst_167 = arith.constant 5.000000e-01 : f32
    %327 = vector.broadcast %cst_167 : f32 to vector<16x1xf32>
    %328 = arith.cmpf ogt, %326, %327 : vector<16x1xf32>
    %cst_168 = arith.constant -1.000000e+30 : f32
    %329 = vector.shape_cast %328 : vector<16x1xi1> to vector<16x1xi1>
    %330 = vector.broadcast %329 : vector<16x1xi1> to vector<16x64xi1>
    %331 = vector.broadcast %cst_168 : f32 to vector<16x64xf32>
    %332 = arith.select %330, %316, %331 : vector<16x64xi1>, vector<16x64xf32>
    %cst_169 = arith.constant dense<0xFF800000> : vector<64xf32>
    %333 = vector.multi_reduction <maximumf>, %332, %cst_169 [0] : vector<16x64xf32> to vector<64xf32>
    %334 = vector.shape_cast %333 : vector<64xf32> to vector<1x64xf32>
    %335 = vector.extract_strided_slice %2 {offsets = [0, 2], sizes = [16, 1], strides = [1, 1]} : vector<16x3xf32> to vector<16x1xf32>
    %cst_170 = arith.constant 5.000000e-01 : f32
    %336 = vector.broadcast %cst_170 : f32 to vector<16x1xf32>
    %337 = arith.cmpf ogt, %335, %336 : vector<16x1xf32>
    %cst_171 = arith.constant -1.000000e+30 : f32
    %338 = vector.shape_cast %337 : vector<16x1xi1> to vector<16x1xi1>
    %339 = vector.broadcast %338 : vector<16x1xi1> to vector<16x64xi1>
    %340 = vector.broadcast %cst_171 : f32 to vector<16x64xf32>
    %341 = arith.select %339, %316, %340 : vector<16x64xi1>, vector<16x64xf32>
    %cst_172 = arith.constant dense<0xFF800000> : vector<64xf32>
    %342 = vector.multi_reduction <maximumf>, %341, %cst_172 [0] : vector<16x64xf32> to vector<64xf32>
    %343 = vector.shape_cast %342 : vector<64xf32> to vector<1x64xf32>
    %344 = tpu.concatenate %325, %334, %343 in 0 : vector<1x64xf32>, vector<1x64xf32>, vector<1x64xf32> -> vector<3x64xf32>
    %c4 = arith.constant 4 : index
    %c0_173 = arith.constant 0 : index
    %c0_174 = arith.constant 0 : index
    %345 = vector.load %arg11[%c4, %c0_173, %c0_174] : memref<9x64x1024xf32, #tpu.memory_space<vmem>>, vector<1x64x1024xf32>
    %346 = vector.shape_cast %345 : vector<1x64x1024xf32> to vector<64x1024xf32>
    %cst_175 = arith.constant dense<0.000000e+00> : vector<3x1024xf32>
    %347 = tpu.matmul %344, %346, %cst_175 {dimension_numbers = #tpu.dot_dimension_numbers<[1], [0], [0], [1], [0, 0, 1, 1], [], []>} : vector<3x64xf32>, vector<64x1024xf32>, vector<3x1024xf32> -> vector<3x1024xf32>
    %348 = arith.addf %272, %347 : vector<3x1024xf32>
    %cst_176 = arith.constant dense<0.000000e+00> : vector<16x64xf32>
    %349 = tpu.matmul %0, %316, %cst_176 {dimension_numbers = #tpu.dot_dimension_numbers<[0], [0], [1], [1], [0, 1, 1, 1], [], []>} : vector<16x16xf32>, vector<16x64xf32>, vector<16x64xf32> -> vector<16x64xf32>
    %cst_177 = arith.constant dense<0.000000e+00> : vector<16x64xf32>
    %350 = tpu.matmul %0, %316, %cst_177 {dimension_numbers = #tpu.dot_dimension_numbers<[1], [0], [0], [1], [0, 0, 1, 1], [], []>} : vector<16x16xf32>, vector<16x64xf32>, vector<16x64xf32> -> vector<16x64xf32>
    %c4_178 = arith.constant 4 : index
    %c0_179 = arith.constant 0 : index
    %c0_180 = arith.constant 0 : index
    %351 = vector.load %arg6[%c4_178, %c0_179, %c0_180] : memref<8x64x256xf32, #tpu.memory_space<vmem>>, vector<1x64x256xf32>
    %352 = vector.shape_cast %351 : vector<1x64x256xf32> to vector<64x256xf32>
    %cst_181 = arith.constant dense<0.000000e+00> : vector<16x256xf32>
    %353 = tpu.matmul %349, %352, %cst_181 {dimension_numbers = #tpu.dot_dimension_numbers<[1], [0], [0], [1], [0, 0, 1, 1], [], []>} : vector<16x64xf32>, vector<64x256xf32>, vector<16x256xf32> -> vector<16x256xf32>
    %c4_182 = arith.constant 4 : index
    %c0_183 = arith.constant 0 : index
    %c0_184 = arith.constant 0 : index
    %354 = vector.load %arg7[%c4_182, %c0_183, %c0_184] : memref<8x64x256xf32, #tpu.memory_space<vmem>>, vector<1x64x256xf32>
    %355 = vector.shape_cast %354 : vector<1x64x256xf32> to vector<64x256xf32>
    %cst_185 = arith.constant dense<0.000000e+00> : vector<16x256xf32>
    %356 = tpu.matmul %350, %355, %cst_185 {dimension_numbers = #tpu.dot_dimension_numbers<[1], [0], [0], [1], [0, 0, 1, 1], [], []>} : vector<16x64xf32>, vector<64x256xf32>, vector<16x256xf32> -> vector<16x256xf32>
    %357 = arith.addf %353, %356 : vector<16x256xf32>
    %c4_186 = arith.constant 4 : index
    %c0_187 = arith.constant 0 : index
    %c0_188 = arith.constant 0 : index
    %358 = vector.load %arg8[%c4_186, %c0_187, %c0_188] : memref<8x1x256xf32, #tpu.memory_space<vmem>>, vector<1x1x256xf32>
    %359 = vector.shape_cast %358 : vector<1x1x256xf32> to vector<1x256xf32>
    %360 = vector.broadcast %359 : vector<1x256xf32> to vector<16x256xf32>
    %361 = arith.addf %357, %360 : vector<16x256xf32>
    %cst_189 = arith.constant 0.000000e+00 : f32
    %362 = vector.broadcast %cst_189 : f32 to vector<16x256xf32>
    %363 = arith.maximumf %361, %362 : vector<16x256xf32>
    %c4_190 = arith.constant 4 : index
    %c0_191 = arith.constant 0 : index
    %c0_192 = arith.constant 0 : index
    %364 = vector.load %arg9[%c4_190, %c0_191, %c0_192] : memref<8x256x64xf32, #tpu.memory_space<vmem>>, vector<1x256x64xf32>
    %365 = vector.shape_cast %364 : vector<1x256x64xf32> to vector<256x64xf32>
    %cst_193 = arith.constant dense<0.000000e+00> : vector<16x64xf32>
    %366 = tpu.matmul %363, %365, %cst_193 {dimension_numbers = #tpu.dot_dimension_numbers<[1], [0], [0], [1], [0, 0, 1, 1], [], []>} : vector<16x256xf32>, vector<256x64xf32>, vector<16x64xf32> -> vector<16x64xf32>
    %c4_194 = arith.constant 4 : index
    %c0_195 = arith.constant 0 : index
    %c0_196 = arith.constant 0 : index
    %367 = vector.load %arg10[%c4_194, %c0_195, %c0_196] : memref<8x1x64xf32, #tpu.memory_space<vmem>>, vector<1x1x64xf32>
    %368 = vector.shape_cast %367 : vector<1x1x64xf32> to vector<1x64xf32>
    %369 = vector.broadcast %368 : vector<1x64xf32> to vector<16x64xf32>
    %370 = arith.addf %366, %369 : vector<16x64xf32>
    %371 = arith.mulf %370, %370 : vector<16x64xf32>
    %372 = tpu.concatenate %370, %371 in 1 : vector<16x64xf32>, vector<16x64xf32> -> vector<16x128xf32>
    %cst_197 = arith.constant dense<0.000000e+00> : vector<3x128xf32>
    %373 = tpu.matmul %13, %372, %cst_197 {dimension_numbers = #tpu.dot_dimension_numbers<[1], [0], [0], [1], [0, 0, 1, 1], [], []>} : vector<3x16xf32>, vector<16x128xf32>, vector<3x128xf32> -> vector<3x128xf32>
    %374 = vector.extract_strided_slice %373 {offsets = [0, 0], sizes = [3, 64], strides = [1, 1]} : vector<3x128xf32> to vector<3x64xf32>
    %375 = vector.extract_strided_slice %373 {offsets = [0, 64], sizes = [3, 64], strides = [1, 1]} : vector<3x128xf32> to vector<3x64xf32>
    %376 = arith.mulf %374, %374 : vector<3x64xf32>
    %377 = arith.subf %375, %376 : vector<3x64xf32>
    %cst_198 = arith.constant 0.000000e+00 : f32
    %378 = vector.broadcast %cst_198 : f32 to vector<3x64xf32>
    %379 = arith.maximumf %377, %378 : vector<3x64xf32>
    %cst_199 = arith.constant 9.99999974E-6 : f32
    %380 = vector.broadcast %cst_199 : f32 to vector<3x64xf32>
    %381 = arith.addf %379, %380 : vector<3x64xf32>
    %382 = math.rsqrt %381 : vector<3x64xf32>
    %383 = arith.mulf %374, %382 : vector<3x64xf32>
    %384 = tpu.concatenate %383, %382 in 1 : vector<3x64xf32>, vector<3x64xf32> -> vector<3x128xf32>
    %cst_200 = arith.constant dense<0.000000e+00> : vector<16x128xf32>
    %385 = tpu.matmul %2, %384, %cst_200 {dimension_numbers = #tpu.dot_dimension_numbers<[1], [0], [0], [1], [0, 0, 1, 1], [], []>} : vector<16x3xf32>, vector<3x128xf32>, vector<16x128xf32> -> vector<16x128xf32>
    %386 = vector.extract_strided_slice %385 {offsets = [0, 64], sizes = [16, 64], strides = [1, 1]} : vector<16x128xf32> to vector<16x64xf32>
    %387 = arith.mulf %370, %386 : vector<16x64xf32>
    %388 = vector.extract_strided_slice %385 {offsets = [0, 0], sizes = [16, 64], strides = [1, 1]} : vector<16x128xf32> to vector<16x64xf32>
    %389 = arith.subf %387, %388 : vector<16x64xf32>
    %390 = arith.addf %316, %389 : vector<16x64xf32>
    %cst_201 = arith.constant 0.000000e+00 : f32
    %391 = vector.broadcast %cst_201 : f32 to vector<16x64xf32>
    %392 = arith.maximumf %390, %391 : vector<16x64xf32>
    %393 = vector.extract_strided_slice %2 {offsets = [0, 0], sizes = [16, 1], strides = [1, 1]} : vector<16x3xf32> to vector<16x1xf32>
    %cst_202 = arith.constant 5.000000e-01 : f32
    %394 = vector.broadcast %cst_202 : f32 to vector<16x1xf32>
    %395 = arith.cmpf ogt, %393, %394 : vector<16x1xf32>
    %cst_203 = arith.constant -1.000000e+30 : f32
    %396 = vector.shape_cast %395 : vector<16x1xi1> to vector<16x1xi1>
    %397 = vector.broadcast %396 : vector<16x1xi1> to vector<16x64xi1>
    %398 = vector.broadcast %cst_203 : f32 to vector<16x64xf32>
    %399 = arith.select %397, %392, %398 : vector<16x64xi1>, vector<16x64xf32>
    %cst_204 = arith.constant dense<0xFF800000> : vector<64xf32>
    %400 = vector.multi_reduction <maximumf>, %399, %cst_204 [0] : vector<16x64xf32> to vector<64xf32>
    %401 = vector.shape_cast %400 : vector<64xf32> to vector<1x64xf32>
    %402 = vector.extract_strided_slice %2 {offsets = [0, 1], sizes = [16, 1], strides = [1, 1]} : vector<16x3xf32> to vector<16x1xf32>
    %cst_205 = arith.constant 5.000000e-01 : f32
    %403 = vector.broadcast %cst_205 : f32 to vector<16x1xf32>
    %404 = arith.cmpf ogt, %402, %403 : vector<16x1xf32>
    %cst_206 = arith.constant -1.000000e+30 : f32
    %405 = vector.shape_cast %404 : vector<16x1xi1> to vector<16x1xi1>
    %406 = vector.broadcast %405 : vector<16x1xi1> to vector<16x64xi1>
    %407 = vector.broadcast %cst_206 : f32 to vector<16x64xf32>
    %408 = arith.select %406, %392, %407 : vector<16x64xi1>, vector<16x64xf32>
    %cst_207 = arith.constant dense<0xFF800000> : vector<64xf32>
    %409 = vector.multi_reduction <maximumf>, %408, %cst_207 [0] : vector<16x64xf32> to vector<64xf32>
    %410 = vector.shape_cast %409 : vector<64xf32> to vector<1x64xf32>
    %411 = vector.extract_strided_slice %2 {offsets = [0, 2], sizes = [16, 1], strides = [1, 1]} : vector<16x3xf32> to vector<16x1xf32>
    %cst_208 = arith.constant 5.000000e-01 : f32
    %412 = vector.broadcast %cst_208 : f32 to vector<16x1xf32>
    %413 = arith.cmpf ogt, %411, %412 : vector<16x1xf32>
    %cst_209 = arith.constant -1.000000e+30 : f32
    %414 = vector.shape_cast %413 : vector<16x1xi1> to vector<16x1xi1>
    %415 = vector.broadcast %414 : vector<16x1xi1> to vector<16x64xi1>
    %416 = vector.broadcast %cst_209 : f32 to vector<16x64xf32>
    %417 = arith.select %415, %392, %416 : vector<16x64xi1>, vector<16x64xf32>
    %cst_210 = arith.constant dense<0xFF800000> : vector<64xf32>
    %418 = vector.multi_reduction <maximumf>, %417, %cst_210 [0] : vector<16x64xf32> to vector<64xf32>
    %419 = vector.shape_cast %418 : vector<64xf32> to vector<1x64xf32>
    %420 = tpu.concatenate %401, %410, %419 in 0 : vector<1x64xf32>, vector<1x64xf32>, vector<1x64xf32> -> vector<3x64xf32>
    %c5 = arith.constant 5 : index
    %c0_211 = arith.constant 0 : index
    %c0_212 = arith.constant 0 : index
    %421 = vector.load %arg11[%c5, %c0_211, %c0_212] : memref<9x64x1024xf32, #tpu.memory_space<vmem>>, vector<1x64x1024xf32>
    %422 = vector.shape_cast %421 : vector<1x64x1024xf32> to vector<64x1024xf32>
    %cst_213 = arith.constant dense<0.000000e+00> : vector<3x1024xf32>
    %423 = tpu.matmul %420, %422, %cst_213 {dimension_numbers = #tpu.dot_dimension_numbers<[1], [0], [0], [1], [0, 0, 1, 1], [], []>} : vector<3x64xf32>, vector<64x1024xf32>, vector<3x1024xf32> -> vector<3x1024xf32>
    %424 = arith.addf %348, %423 : vector<3x1024xf32>
    %cst_214 = arith.constant dense<0.000000e+00> : vector<16x64xf32>
    %425 = tpu.matmul %0, %392, %cst_214 {dimension_numbers = #tpu.dot_dimension_numbers<[0], [0], [1], [1], [0, 1, 1, 1], [], []>} : vector<16x16xf32>, vector<16x64xf32>, vector<16x64xf32> -> vector<16x64xf32>
    %cst_215 = arith.constant dense<0.000000e+00> : vector<16x64xf32>
    %426 = tpu.matmul %0, %392, %cst_215 {dimension_numbers = #tpu.dot_dimension_numbers<[1], [0], [0], [1], [0, 0, 1, 1], [], []>} : vector<16x16xf32>, vector<16x64xf32>, vector<16x64xf32> -> vector<16x64xf32>
    %c5_216 = arith.constant 5 : index
    %c0_217 = arith.constant 0 : index
    %c0_218 = arith.constant 0 : index
    %427 = vector.load %arg6[%c5_216, %c0_217, %c0_218] : memref<8x64x256xf32, #tpu.memory_space<vmem>>, vector<1x64x256xf32>
    %428 = vector.shape_cast %427 : vector<1x64x256xf32> to vector<64x256xf32>
    %cst_219 = arith.constant dense<0.000000e+00> : vector<16x256xf32>
    %429 = tpu.matmul %425, %428, %cst_219 {dimension_numbers = #tpu.dot_dimension_numbers<[1], [0], [0], [1], [0, 0, 1, 1], [], []>} : vector<16x64xf32>, vector<64x256xf32>, vector<16x256xf32> -> vector<16x256xf32>
    %c5_220 = arith.constant 5 : index
    %c0_221 = arith.constant 0 : index
    %c0_222 = arith.constant 0 : index
    %430 = vector.load %arg7[%c5_220, %c0_221, %c0_222] : memref<8x64x256xf32, #tpu.memory_space<vmem>>, vector<1x64x256xf32>
    %431 = vector.shape_cast %430 : vector<1x64x256xf32> to vector<64x256xf32>
    %cst_223 = arith.constant dense<0.000000e+00> : vector<16x256xf32>
    %432 = tpu.matmul %426, %431, %cst_223 {dimension_numbers = #tpu.dot_dimension_numbers<[1], [0], [0], [1], [0, 0, 1, 1], [], []>} : vector<16x64xf32>, vector<64x256xf32>, vector<16x256xf32> -> vector<16x256xf32>
    %433 = arith.addf %429, %432 : vector<16x256xf32>
    %c5_224 = arith.constant 5 : index
    %c0_225 = arith.constant 0 : index
    %c0_226 = arith.constant 0 : index
    %434 = vector.load %arg8[%c5_224, %c0_225, %c0_226] : memref<8x1x256xf32, #tpu.memory_space<vmem>>, vector<1x1x256xf32>
    %435 = vector.shape_cast %434 : vector<1x1x256xf32> to vector<1x256xf32>
    %436 = vector.broadcast %435 : vector<1x256xf32> to vector<16x256xf32>
    %437 = arith.addf %433, %436 : vector<16x256xf32>
    %cst_227 = arith.constant 0.000000e+00 : f32
    %438 = vector.broadcast %cst_227 : f32 to vector<16x256xf32>
    %439 = arith.maximumf %437, %438 : vector<16x256xf32>
    %c5_228 = arith.constant 5 : index
    %c0_229 = arith.constant 0 : index
    %c0_230 = arith.constant 0 : index
    %440 = vector.load %arg9[%c5_228, %c0_229, %c0_230] : memref<8x256x64xf32, #tpu.memory_space<vmem>>, vector<1x256x64xf32>
    %441 = vector.shape_cast %440 : vector<1x256x64xf32> to vector<256x64xf32>
    %cst_231 = arith.constant dense<0.000000e+00> : vector<16x64xf32>
    %442 = tpu.matmul %439, %441, %cst_231 {dimension_numbers = #tpu.dot_dimension_numbers<[1], [0], [0], [1], [0, 0, 1, 1], [], []>} : vector<16x256xf32>, vector<256x64xf32>, vector<16x64xf32> -> vector<16x64xf32>
    %c5_232 = arith.constant 5 : index
    %c0_233 = arith.constant 0 : index
    %c0_234 = arith.constant 0 : index
    %443 = vector.load %arg10[%c5_232, %c0_233, %c0_234] : memref<8x1x64xf32, #tpu.memory_space<vmem>>, vector<1x1x64xf32>
    %444 = vector.shape_cast %443 : vector<1x1x64xf32> to vector<1x64xf32>
    %445 = vector.broadcast %444 : vector<1x64xf32> to vector<16x64xf32>
    %446 = arith.addf %442, %445 : vector<16x64xf32>
    %447 = arith.mulf %446, %446 : vector<16x64xf32>
    %448 = tpu.concatenate %446, %447 in 1 : vector<16x64xf32>, vector<16x64xf32> -> vector<16x128xf32>
    %cst_235 = arith.constant dense<0.000000e+00> : vector<3x128xf32>
    %449 = tpu.matmul %13, %448, %cst_235 {dimension_numbers = #tpu.dot_dimension_numbers<[1], [0], [0], [1], [0, 0, 1, 1], [], []>} : vector<3x16xf32>, vector<16x128xf32>, vector<3x128xf32> -> vector<3x128xf32>
    %450 = vector.extract_strided_slice %449 {offsets = [0, 0], sizes = [3, 64], strides = [1, 1]} : vector<3x128xf32> to vector<3x64xf32>
    %451 = vector.extract_strided_slice %449 {offsets = [0, 64], sizes = [3, 64], strides = [1, 1]} : vector<3x128xf32> to vector<3x64xf32>
    %452 = arith.mulf %450, %450 : vector<3x64xf32>
    %453 = arith.subf %451, %452 : vector<3x64xf32>
    %cst_236 = arith.constant 0.000000e+00 : f32
    %454 = vector.broadcast %cst_236 : f32 to vector<3x64xf32>
    %455 = arith.maximumf %453, %454 : vector<3x64xf32>
    %cst_237 = arith.constant 9.99999974E-6 : f32
    %456 = vector.broadcast %cst_237 : f32 to vector<3x64xf32>
    %457 = arith.addf %455, %456 : vector<3x64xf32>
    %458 = math.rsqrt %457 : vector<3x64xf32>
    %459 = arith.mulf %450, %458 : vector<3x64xf32>
    %460 = tpu.concatenate %459, %458 in 1 : vector<3x64xf32>, vector<3x64xf32> -> vector<3x128xf32>
    %cst_238 = arith.constant dense<0.000000e+00> : vector<16x128xf32>
    %461 = tpu.matmul %2, %460, %cst_238 {dimension_numbers = #tpu.dot_dimension_numbers<[1], [0], [0], [1], [0, 0, 1, 1], [], []>} : vector<16x3xf32>, vector<3x128xf32>, vector<16x128xf32> -> vector<16x128xf32>
    %462 = vector.extract_strided_slice %461 {offsets = [0, 64], sizes = [16, 64], strides = [1, 1]} : vector<16x128xf32> to vector<16x64xf32>
    %463 = arith.mulf %446, %462 : vector<16x64xf32>
    %464 = vector.extract_strided_slice %461 {offsets = [0, 0], sizes = [16, 64], strides = [1, 1]} : vector<16x128xf32> to vector<16x64xf32>
    %465 = arith.subf %463, %464 : vector<16x64xf32>
    %466 = arith.addf %392, %465 : vector<16x64xf32>
    %cst_239 = arith.constant 0.000000e+00 : f32
    %467 = vector.broadcast %cst_239 : f32 to vector<16x64xf32>
    %468 = arith.maximumf %466, %467 : vector<16x64xf32>
    %469 = vector.extract_strided_slice %2 {offsets = [0, 0], sizes = [16, 1], strides = [1, 1]} : vector<16x3xf32> to vector<16x1xf32>
    %cst_240 = arith.constant 5.000000e-01 : f32
    %470 = vector.broadcast %cst_240 : f32 to vector<16x1xf32>
    %471 = arith.cmpf ogt, %469, %470 : vector<16x1xf32>
    %cst_241 = arith.constant -1.000000e+30 : f32
    %472 = vector.shape_cast %471 : vector<16x1xi1> to vector<16x1xi1>
    %473 = vector.broadcast %472 : vector<16x1xi1> to vector<16x64xi1>
    %474 = vector.broadcast %cst_241 : f32 to vector<16x64xf32>
    %475 = arith.select %473, %468, %474 : vector<16x64xi1>, vector<16x64xf32>
    %cst_242 = arith.constant dense<0xFF800000> : vector<64xf32>
    %476 = vector.multi_reduction <maximumf>, %475, %cst_242 [0] : vector<16x64xf32> to vector<64xf32>
    %477 = vector.shape_cast %476 : vector<64xf32> to vector<1x64xf32>
    %478 = vector.extract_strided_slice %2 {offsets = [0, 1], sizes = [16, 1], strides = [1, 1]} : vector<16x3xf32> to vector<16x1xf32>
    %cst_243 = arith.constant 5.000000e-01 : f32
    %479 = vector.broadcast %cst_243 : f32 to vector<16x1xf32>
    %480 = arith.cmpf ogt, %478, %479 : vector<16x1xf32>
    %cst_244 = arith.constant -1.000000e+30 : f32
    %481 = vector.shape_cast %480 : vector<16x1xi1> to vector<16x1xi1>
    %482 = vector.broadcast %481 : vector<16x1xi1> to vector<16x64xi1>
    %483 = vector.broadcast %cst_244 : f32 to vector<16x64xf32>
    %484 = arith.select %482, %468, %483 : vector<16x64xi1>, vector<16x64xf32>
    %cst_245 = arith.constant dense<0xFF800000> : vector<64xf32>
    %485 = vector.multi_reduction <maximumf>, %484, %cst_245 [0] : vector<16x64xf32> to vector<64xf32>
    %486 = vector.shape_cast %485 : vector<64xf32> to vector<1x64xf32>
    %487 = vector.extract_strided_slice %2 {offsets = [0, 2], sizes = [16, 1], strides = [1, 1]} : vector<16x3xf32> to vector<16x1xf32>
    %cst_246 = arith.constant 5.000000e-01 : f32
    %488 = vector.broadcast %cst_246 : f32 to vector<16x1xf32>
    %489 = arith.cmpf ogt, %487, %488 : vector<16x1xf32>
    %cst_247 = arith.constant -1.000000e+30 : f32
    %490 = vector.shape_cast %489 : vector<16x1xi1> to vector<16x1xi1>
    %491 = vector.broadcast %490 : vector<16x1xi1> to vector<16x64xi1>
    %492 = vector.broadcast %cst_247 : f32 to vector<16x64xf32>
    %493 = arith.select %491, %468, %492 : vector<16x64xi1>, vector<16x64xf32>
    %cst_248 = arith.constant dense<0xFF800000> : vector<64xf32>
    %494 = vector.multi_reduction <maximumf>, %493, %cst_248 [0] : vector<16x64xf32> to vector<64xf32>
    %495 = vector.shape_cast %494 : vector<64xf32> to vector<1x64xf32>
    %496 = tpu.concatenate %477, %486, %495 in 0 : vector<1x64xf32>, vector<1x64xf32>, vector<1x64xf32> -> vector<3x64xf32>
    %c6 = arith.constant 6 : index
    %c0_249 = arith.constant 0 : index
    %c0_250 = arith.constant 0 : index
    %497 = vector.load %arg11[%c6, %c0_249, %c0_250] : memref<9x64x1024xf32, #tpu.memory_space<vmem>>, vector<1x64x1024xf32>
    %498 = vector.shape_cast %497 : vector<1x64x1024xf32> to vector<64x1024xf32>
    %cst_251 = arith.constant dense<0.000000e+00> : vector<3x1024xf32>
    %499 = tpu.matmul %496, %498, %cst_251 {dimension_numbers = #tpu.dot_dimension_numbers<[1], [0], [0], [1], [0, 0, 1, 1], [], []>} : vector<3x64xf32>, vector<64x1024xf32>, vector<3x1024xf32> -> vector<3x1024xf32>
    %500 = arith.addf %424, %499 : vector<3x1024xf32>
    %cst_252 = arith.constant dense<0.000000e+00> : vector<16x64xf32>
    %501 = tpu.matmul %0, %468, %cst_252 {dimension_numbers = #tpu.dot_dimension_numbers<[0], [0], [1], [1], [0, 1, 1, 1], [], []>} : vector<16x16xf32>, vector<16x64xf32>, vector<16x64xf32> -> vector<16x64xf32>
    %cst_253 = arith.constant dense<0.000000e+00> : vector<16x64xf32>
    %502 = tpu.matmul %0, %468, %cst_253 {dimension_numbers = #tpu.dot_dimension_numbers<[1], [0], [0], [1], [0, 0, 1, 1], [], []>} : vector<16x16xf32>, vector<16x64xf32>, vector<16x64xf32> -> vector<16x64xf32>
    %c6_254 = arith.constant 6 : index
    %c0_255 = arith.constant 0 : index
    %c0_256 = arith.constant 0 : index
    %503 = vector.load %arg6[%c6_254, %c0_255, %c0_256] : memref<8x64x256xf32, #tpu.memory_space<vmem>>, vector<1x64x256xf32>
    %504 = vector.shape_cast %503 : vector<1x64x256xf32> to vector<64x256xf32>
    %cst_257 = arith.constant dense<0.000000e+00> : vector<16x256xf32>
    %505 = tpu.matmul %501, %504, %cst_257 {dimension_numbers = #tpu.dot_dimension_numbers<[1], [0], [0], [1], [0, 0, 1, 1], [], []>} : vector<16x64xf32>, vector<64x256xf32>, vector<16x256xf32> -> vector<16x256xf32>
    %c6_258 = arith.constant 6 : index
    %c0_259 = arith.constant 0 : index
    %c0_260 = arith.constant 0 : index
    %506 = vector.load %arg7[%c6_258, %c0_259, %c0_260] : memref<8x64x256xf32, #tpu.memory_space<vmem>>, vector<1x64x256xf32>
    %507 = vector.shape_cast %506 : vector<1x64x256xf32> to vector<64x256xf32>
    %cst_261 = arith.constant dense<0.000000e+00> : vector<16x256xf32>
    %508 = tpu.matmul %502, %507, %cst_261 {dimension_numbers = #tpu.dot_dimension_numbers<[1], [0], [0], [1], [0, 0, 1, 1], [], []>} : vector<16x64xf32>, vector<64x256xf32>, vector<16x256xf32> -> vector<16x256xf32>
    %509 = arith.addf %505, %508 : vector<16x256xf32>
    %c6_262 = arith.constant 6 : index
    %c0_263 = arith.constant 0 : index
    %c0_264 = arith.constant 0 : index
    %510 = vector.load %arg8[%c6_262, %c0_263, %c0_264] : memref<8x1x256xf32, #tpu.memory_space<vmem>>, vector<1x1x256xf32>
    %511 = vector.shape_cast %510 : vector<1x1x256xf32> to vector<1x256xf32>
    %512 = vector.broadcast %511 : vector<1x256xf32> to vector<16x256xf32>
    %513 = arith.addf %509, %512 : vector<16x256xf32>
    %cst_265 = arith.constant 0.000000e+00 : f32
    %514 = vector.broadcast %cst_265 : f32 to vector<16x256xf32>
    %515 = arith.maximumf %513, %514 : vector<16x256xf32>
    %c6_266 = arith.constant 6 : index
    %c0_267 = arith.constant 0 : index
    %c0_268 = arith.constant 0 : index
    %516 = vector.load %arg9[%c6_266, %c0_267, %c0_268] : memref<8x256x64xf32, #tpu.memory_space<vmem>>, vector<1x256x64xf32>
    %517 = vector.shape_cast %516 : vector<1x256x64xf32> to vector<256x64xf32>
    %cst_269 = arith.constant dense<0.000000e+00> : vector<16x64xf32>
    %518 = tpu.matmul %515, %517, %cst_269 {dimension_numbers = #tpu.dot_dimension_numbers<[1], [0], [0], [1], [0, 0, 1, 1], [], []>} : vector<16x256xf32>, vector<256x64xf32>, vector<16x64xf32> -> vector<16x64xf32>
    %c6_270 = arith.constant 6 : index
    %c0_271 = arith.constant 0 : index
    %c0_272 = arith.constant 0 : index
    %519 = vector.load %arg10[%c6_270, %c0_271, %c0_272] : memref<8x1x64xf32, #tpu.memory_space<vmem>>, vector<1x1x64xf32>
    %520 = vector.shape_cast %519 : vector<1x1x64xf32> to vector<1x64xf32>
    %521 = vector.broadcast %520 : vector<1x64xf32> to vector<16x64xf32>
    %522 = arith.addf %518, %521 : vector<16x64xf32>
    %523 = arith.mulf %522, %522 : vector<16x64xf32>
    %524 = tpu.concatenate %522, %523 in 1 : vector<16x64xf32>, vector<16x64xf32> -> vector<16x128xf32>
    %cst_273 = arith.constant dense<0.000000e+00> : vector<3x128xf32>
    %525 = tpu.matmul %13, %524, %cst_273 {dimension_numbers = #tpu.dot_dimension_numbers<[1], [0], [0], [1], [0, 0, 1, 1], [], []>} : vector<3x16xf32>, vector<16x128xf32>, vector<3x128xf32> -> vector<3x128xf32>
    %526 = vector.extract_strided_slice %525 {offsets = [0, 0], sizes = [3, 64], strides = [1, 1]} : vector<3x128xf32> to vector<3x64xf32>
    %527 = vector.extract_strided_slice %525 {offsets = [0, 64], sizes = [3, 64], strides = [1, 1]} : vector<3x128xf32> to vector<3x64xf32>
    %528 = arith.mulf %526, %526 : vector<3x64xf32>
    %529 = arith.subf %527, %528 : vector<3x64xf32>
    %cst_274 = arith.constant 0.000000e+00 : f32
    %530 = vector.broadcast %cst_274 : f32 to vector<3x64xf32>
    %531 = arith.maximumf %529, %530 : vector<3x64xf32>
    %cst_275 = arith.constant 9.99999974E-6 : f32
    %532 = vector.broadcast %cst_275 : f32 to vector<3x64xf32>
    %533 = arith.addf %531, %532 : vector<3x64xf32>
    %534 = math.rsqrt %533 : vector<3x64xf32>
    %535 = arith.mulf %526, %534 : vector<3x64xf32>
    %536 = tpu.concatenate %535, %534 in 1 : vector<3x64xf32>, vector<3x64xf32> -> vector<3x128xf32>
    %cst_276 = arith.constant dense<0.000000e+00> : vector<16x128xf32>
    %537 = tpu.matmul %2, %536, %cst_276 {dimension_numbers = #tpu.dot_dimension_numbers<[1], [0], [0], [1], [0, 0, 1, 1], [], []>} : vector<16x3xf32>, vector<3x128xf32>, vector<16x128xf32> -> vector<16x128xf32>
    %538 = vector.extract_strided_slice %537 {offsets = [0, 64], sizes = [16, 64], strides = [1, 1]} : vector<16x128xf32> to vector<16x64xf32>
    %539 = arith.mulf %522, %538 : vector<16x64xf32>
    %540 = vector.extract_strided_slice %537 {offsets = [0, 0], sizes = [16, 64], strides = [1, 1]} : vector<16x128xf32> to vector<16x64xf32>
    %541 = arith.subf %539, %540 : vector<16x64xf32>
    %542 = arith.addf %468, %541 : vector<16x64xf32>
    %cst_277 = arith.constant 0.000000e+00 : f32
    %543 = vector.broadcast %cst_277 : f32 to vector<16x64xf32>
    %544 = arith.maximumf %542, %543 : vector<16x64xf32>
    %545 = vector.extract_strided_slice %2 {offsets = [0, 0], sizes = [16, 1], strides = [1, 1]} : vector<16x3xf32> to vector<16x1xf32>
    %cst_278 = arith.constant 5.000000e-01 : f32
    %546 = vector.broadcast %cst_278 : f32 to vector<16x1xf32>
    %547 = arith.cmpf ogt, %545, %546 : vector<16x1xf32>
    %cst_279 = arith.constant -1.000000e+30 : f32
    %548 = vector.shape_cast %547 : vector<16x1xi1> to vector<16x1xi1>
    %549 = vector.broadcast %548 : vector<16x1xi1> to vector<16x64xi1>
    %550 = vector.broadcast %cst_279 : f32 to vector<16x64xf32>
    %551 = arith.select %549, %544, %550 : vector<16x64xi1>, vector<16x64xf32>
    %cst_280 = arith.constant dense<0xFF800000> : vector<64xf32>
    %552 = vector.multi_reduction <maximumf>, %551, %cst_280 [0] : vector<16x64xf32> to vector<64xf32>
    %553 = vector.shape_cast %552 : vector<64xf32> to vector<1x64xf32>
    %554 = vector.extract_strided_slice %2 {offsets = [0, 1], sizes = [16, 1], strides = [1, 1]} : vector<16x3xf32> to vector<16x1xf32>
    %cst_281 = arith.constant 5.000000e-01 : f32
    %555 = vector.broadcast %cst_281 : f32 to vector<16x1xf32>
    %556 = arith.cmpf ogt, %554, %555 : vector<16x1xf32>
    %cst_282 = arith.constant -1.000000e+30 : f32
    %557 = vector.shape_cast %556 : vector<16x1xi1> to vector<16x1xi1>
    %558 = vector.broadcast %557 : vector<16x1xi1> to vector<16x64xi1>
    %559 = vector.broadcast %cst_282 : f32 to vector<16x64xf32>
    %560 = arith.select %558, %544, %559 : vector<16x64xi1>, vector<16x64xf32>
    %cst_283 = arith.constant dense<0xFF800000> : vector<64xf32>
    %561 = vector.multi_reduction <maximumf>, %560, %cst_283 [0] : vector<16x64xf32> to vector<64xf32>
    %562 = vector.shape_cast %561 : vector<64xf32> to vector<1x64xf32>
    %563 = vector.extract_strided_slice %2 {offsets = [0, 2], sizes = [16, 1], strides = [1, 1]} : vector<16x3xf32> to vector<16x1xf32>
    %cst_284 = arith.constant 5.000000e-01 : f32
    %564 = vector.broadcast %cst_284 : f32 to vector<16x1xf32>
    %565 = arith.cmpf ogt, %563, %564 : vector<16x1xf32>
    %cst_285 = arith.constant -1.000000e+30 : f32
    %566 = vector.shape_cast %565 : vector<16x1xi1> to vector<16x1xi1>
    %567 = vector.broadcast %566 : vector<16x1xi1> to vector<16x64xi1>
    %568 = vector.broadcast %cst_285 : f32 to vector<16x64xf32>
    %569 = arith.select %567, %544, %568 : vector<16x64xi1>, vector<16x64xf32>
    %cst_286 = arith.constant dense<0xFF800000> : vector<64xf32>
    %570 = vector.multi_reduction <maximumf>, %569, %cst_286 [0] : vector<16x64xf32> to vector<64xf32>
    %571 = vector.shape_cast %570 : vector<64xf32> to vector<1x64xf32>
    %572 = tpu.concatenate %553, %562, %571 in 0 : vector<1x64xf32>, vector<1x64xf32>, vector<1x64xf32> -> vector<3x64xf32>
    %c7 = arith.constant 7 : index
    %c0_287 = arith.constant 0 : index
    %c0_288 = arith.constant 0 : index
    %573 = vector.load %arg11[%c7, %c0_287, %c0_288] : memref<9x64x1024xf32, #tpu.memory_space<vmem>>, vector<1x64x1024xf32>
    %574 = vector.shape_cast %573 : vector<1x64x1024xf32> to vector<64x1024xf32>
    %cst_289 = arith.constant dense<0.000000e+00> : vector<3x1024xf32>
    %575 = tpu.matmul %572, %574, %cst_289 {dimension_numbers = #tpu.dot_dimension_numbers<[1], [0], [0], [1], [0, 0, 1, 1], [], []>} : vector<3x64xf32>, vector<64x1024xf32>, vector<3x1024xf32> -> vector<3x1024xf32>
    %576 = arith.addf %500, %575 : vector<3x1024xf32>
    %cst_290 = arith.constant dense<0.000000e+00> : vector<16x64xf32>
    %577 = tpu.matmul %0, %544, %cst_290 {dimension_numbers = #tpu.dot_dimension_numbers<[0], [0], [1], [1], [0, 1, 1, 1], [], []>} : vector<16x16xf32>, vector<16x64xf32>, vector<16x64xf32> -> vector<16x64xf32>
    %cst_291 = arith.constant dense<0.000000e+00> : vector<16x64xf32>
    %578 = tpu.matmul %0, %544, %cst_291 {dimension_numbers = #tpu.dot_dimension_numbers<[1], [0], [0], [1], [0, 0, 1, 1], [], []>} : vector<16x16xf32>, vector<16x64xf32>, vector<16x64xf32> -> vector<16x64xf32>
    %c7_292 = arith.constant 7 : index
    %c0_293 = arith.constant 0 : index
    %c0_294 = arith.constant 0 : index
    %579 = vector.load %arg6[%c7_292, %c0_293, %c0_294] : memref<8x64x256xf32, #tpu.memory_space<vmem>>, vector<1x64x256xf32>
    %580 = vector.shape_cast %579 : vector<1x64x256xf32> to vector<64x256xf32>
    %cst_295 = arith.constant dense<0.000000e+00> : vector<16x256xf32>
    %581 = tpu.matmul %577, %580, %cst_295 {dimension_numbers = #tpu.dot_dimension_numbers<[1], [0], [0], [1], [0, 0, 1, 1], [], []>} : vector<16x64xf32>, vector<64x256xf32>, vector<16x256xf32> -> vector<16x256xf32>
    %c7_296 = arith.constant 7 : index
    %c0_297 = arith.constant 0 : index
    %c0_298 = arith.constant 0 : index
    %582 = vector.load %arg7[%c7_296, %c0_297, %c0_298] : memref<8x64x256xf32, #tpu.memory_space<vmem>>, vector<1x64x256xf32>
    %583 = vector.shape_cast %582 : vector<1x64x256xf32> to vector<64x256xf32>
    %cst_299 = arith.constant dense<0.000000e+00> : vector<16x256xf32>
    %584 = tpu.matmul %578, %583, %cst_299 {dimension_numbers = #tpu.dot_dimension_numbers<[1], [0], [0], [1], [0, 0, 1, 1], [], []>} : vector<16x64xf32>, vector<64x256xf32>, vector<16x256xf32> -> vector<16x256xf32>
    %585 = arith.addf %581, %584 : vector<16x256xf32>
    %c7_300 = arith.constant 7 : index
    %c0_301 = arith.constant 0 : index
    %c0_302 = arith.constant 0 : index
    %586 = vector.load %arg8[%c7_300, %c0_301, %c0_302] : memref<8x1x256xf32, #tpu.memory_space<vmem>>, vector<1x1x256xf32>
    %587 = vector.shape_cast %586 : vector<1x1x256xf32> to vector<1x256xf32>
    %588 = vector.broadcast %587 : vector<1x256xf32> to vector<16x256xf32>
    %589 = arith.addf %585, %588 : vector<16x256xf32>
    %cst_303 = arith.constant 0.000000e+00 : f32
    %590 = vector.broadcast %cst_303 : f32 to vector<16x256xf32>
    %591 = arith.maximumf %589, %590 : vector<16x256xf32>
    %c7_304 = arith.constant 7 : index
    %c0_305 = arith.constant 0 : index
    %c0_306 = arith.constant 0 : index
    %592 = vector.load %arg9[%c7_304, %c0_305, %c0_306] : memref<8x256x64xf32, #tpu.memory_space<vmem>>, vector<1x256x64xf32>
    %593 = vector.shape_cast %592 : vector<1x256x64xf32> to vector<256x64xf32>
    %cst_307 = arith.constant dense<0.000000e+00> : vector<16x64xf32>
    %594 = tpu.matmul %591, %593, %cst_307 {dimension_numbers = #tpu.dot_dimension_numbers<[1], [0], [0], [1], [0, 0, 1, 1], [], []>} : vector<16x256xf32>, vector<256x64xf32>, vector<16x64xf32> -> vector<16x64xf32>
    %c7_308 = arith.constant 7 : index
    %c0_309 = arith.constant 0 : index
    %c0_310 = arith.constant 0 : index
    %595 = vector.load %arg10[%c7_308, %c0_309, %c0_310] : memref<8x1x64xf32, #tpu.memory_space<vmem>>, vector<1x1x64xf32>
    %596 = vector.shape_cast %595 : vector<1x1x64xf32> to vector<1x64xf32>
    %597 = vector.broadcast %596 : vector<1x64xf32> to vector<16x64xf32>
    %598 = arith.addf %594, %597 : vector<16x64xf32>
    %599 = arith.mulf %598, %598 : vector<16x64xf32>
    %600 = tpu.concatenate %598, %599 in 1 : vector<16x64xf32>, vector<16x64xf32> -> vector<16x128xf32>
    %cst_311 = arith.constant dense<0.000000e+00> : vector<3x128xf32>
    %601 = tpu.matmul %13, %600, %cst_311 {dimension_numbers = #tpu.dot_dimension_numbers<[1], [0], [0], [1], [0, 0, 1, 1], [], []>} : vector<3x16xf32>, vector<16x128xf32>, vector<3x128xf32> -> vector<3x128xf32>
    %602 = vector.extract_strided_slice %601 {offsets = [0, 0], sizes = [3, 64], strides = [1, 1]} : vector<3x128xf32> to vector<3x64xf32>
    %603 = vector.extract_strided_slice %601 {offsets = [0, 64], sizes = [3, 64], strides = [1, 1]} : vector<3x128xf32> to vector<3x64xf32>
    %604 = arith.mulf %602, %602 : vector<3x64xf32>
    %605 = arith.subf %603, %604 : vector<3x64xf32>
    %cst_312 = arith.constant 0.000000e+00 : f32
    %606 = vector.broadcast %cst_312 : f32 to vector<3x64xf32>
    %607 = arith.maximumf %605, %606 : vector<3x64xf32>
    %cst_313 = arith.constant 9.99999974E-6 : f32
    %608 = vector.broadcast %cst_313 : f32 to vector<3x64xf32>
    %609 = arith.addf %607, %608 : vector<3x64xf32>
    %610 = math.rsqrt %609 : vector<3x64xf32>
    %611 = arith.mulf %602, %610 : vector<3x64xf32>
    %612 = tpu.concatenate %611, %610 in 1 : vector<3x64xf32>, vector<3x64xf32> -> vector<3x128xf32>
    %cst_314 = arith.constant dense<0.000000e+00> : vector<16x128xf32>
    %613 = tpu.matmul %2, %612, %cst_314 {dimension_numbers = #tpu.dot_dimension_numbers<[1], [0], [0], [1], [0, 0, 1, 1], [], []>} : vector<16x3xf32>, vector<3x128xf32>, vector<16x128xf32> -> vector<16x128xf32>
    %614 = vector.extract_strided_slice %613 {offsets = [0, 64], sizes = [16, 64], strides = [1, 1]} : vector<16x128xf32> to vector<16x64xf32>
    %615 = arith.mulf %598, %614 : vector<16x64xf32>
    %616 = vector.extract_strided_slice %613 {offsets = [0, 0], sizes = [16, 64], strides = [1, 1]} : vector<16x128xf32> to vector<16x64xf32>
    %617 = arith.subf %615, %616 : vector<16x64xf32>
    %618 = arith.addf %544, %617 : vector<16x64xf32>
    %cst_315 = arith.constant 0.000000e+00 : f32
    %619 = vector.broadcast %cst_315 : f32 to vector<16x64xf32>
    %620 = arith.maximumf %618, %619 : vector<16x64xf32>
    %621 = vector.extract_strided_slice %2 {offsets = [0, 0], sizes = [16, 1], strides = [1, 1]} : vector<16x3xf32> to vector<16x1xf32>
    %cst_316 = arith.constant 5.000000e-01 : f32
    %622 = vector.broadcast %cst_316 : f32 to vector<16x1xf32>
    %623 = arith.cmpf ogt, %621, %622 : vector<16x1xf32>
    %cst_317 = arith.constant -1.000000e+30 : f32
    %624 = vector.shape_cast %623 : vector<16x1xi1> to vector<16x1xi1>
    %625 = vector.broadcast %624 : vector<16x1xi1> to vector<16x64xi1>
    %626 = vector.broadcast %cst_317 : f32 to vector<16x64xf32>
    %627 = arith.select %625, %620, %626 : vector<16x64xi1>, vector<16x64xf32>
    %cst_318 = arith.constant dense<0xFF800000> : vector<64xf32>
    %628 = vector.multi_reduction <maximumf>, %627, %cst_318 [0] : vector<16x64xf32> to vector<64xf32>
    %629 = vector.shape_cast %628 : vector<64xf32> to vector<1x64xf32>
    %630 = vector.extract_strided_slice %2 {offsets = [0, 1], sizes = [16, 1], strides = [1, 1]} : vector<16x3xf32> to vector<16x1xf32>
    %cst_319 = arith.constant 5.000000e-01 : f32
    %631 = vector.broadcast %cst_319 : f32 to vector<16x1xf32>
    %632 = arith.cmpf ogt, %630, %631 : vector<16x1xf32>
    %cst_320 = arith.constant -1.000000e+30 : f32
    %633 = vector.shape_cast %632 : vector<16x1xi1> to vector<16x1xi1>
    %634 = vector.broadcast %633 : vector<16x1xi1> to vector<16x64xi1>
    %635 = vector.broadcast %cst_320 : f32 to vector<16x64xf32>
    %636 = arith.select %634, %620, %635 : vector<16x64xi1>, vector<16x64xf32>
    %cst_321 = arith.constant dense<0xFF800000> : vector<64xf32>
    %637 = vector.multi_reduction <maximumf>, %636, %cst_321 [0] : vector<16x64xf32> to vector<64xf32>
    %638 = vector.shape_cast %637 : vector<64xf32> to vector<1x64xf32>
    %639 = vector.extract_strided_slice %2 {offsets = [0, 2], sizes = [16, 1], strides = [1, 1]} : vector<16x3xf32> to vector<16x1xf32>
    %cst_322 = arith.constant 5.000000e-01 : f32
    %640 = vector.broadcast %cst_322 : f32 to vector<16x1xf32>
    %641 = arith.cmpf ogt, %639, %640 : vector<16x1xf32>
    %cst_323 = arith.constant -1.000000e+30 : f32
    %642 = vector.shape_cast %641 : vector<16x1xi1> to vector<16x1xi1>
    %643 = vector.broadcast %642 : vector<16x1xi1> to vector<16x64xi1>
    %644 = vector.broadcast %cst_323 : f32 to vector<16x64xf32>
    %645 = arith.select %643, %620, %644 : vector<16x64xi1>, vector<16x64xf32>
    %cst_324 = arith.constant dense<0xFF800000> : vector<64xf32>
    %646 = vector.multi_reduction <maximumf>, %645, %cst_324 [0] : vector<16x64xf32> to vector<64xf32>
    %647 = vector.shape_cast %646 : vector<64xf32> to vector<1x64xf32>
    %648 = tpu.concatenate %629, %638, %647 in 0 : vector<1x64xf32>, vector<1x64xf32>, vector<1x64xf32> -> vector<3x64xf32>
    %c8 = arith.constant 8 : index
    %c0_325 = arith.constant 0 : index
    %c0_326 = arith.constant 0 : index
    %649 = vector.load %arg11[%c8, %c0_325, %c0_326] : memref<9x64x1024xf32, #tpu.memory_space<vmem>>, vector<1x64x1024xf32>
    %650 = vector.shape_cast %649 : vector<1x64x1024xf32> to vector<64x1024xf32>
    %cst_327 = arith.constant dense<0.000000e+00> : vector<3x1024xf32>
    %651 = tpu.matmul %648, %650, %cst_327 {dimension_numbers = #tpu.dot_dimension_numbers<[1], [0], [0], [1], [0, 0, 1, 1], [], []>} : vector<3x64xf32>, vector<64x1024xf32>, vector<3x1024xf32> -> vector<3x1024xf32>
    %652 = arith.addf %576, %651 : vector<3x1024xf32>
    %c0_328 = arith.constant 0 : index
    %c0_329 = arith.constant 0 : index
    %653 = vector.load %arg12[%c0_328, %c0_329] : memref<1x1024xf32, #tpu.memory_space<vmem>>, vector<1x1024xf32>
    %654 = vector.broadcast %653 : vector<1x1024xf32> to vector<3x1024xf32>
    %655 = arith.addf %652, %654 : vector<3x1024xf32>
    %cst_330 = arith.constant 0.000000e+00 : f32
    %656 = vector.broadcast %cst_330 : f32 to vector<3x1024xf32>
    %657 = arith.maximumf %655, %656 : vector<3x1024xf32>
    %c0_331 = arith.constant 0 : index
    %c0_332 = arith.constant 0 : index
    %658 = vector.load %arg13[%c0_331, %c0_332] : memref<1x1024xf32, #tpu.memory_space<vmem>>, vector<1x1024xf32>
    %659 = vector.broadcast %658 : vector<1x1024xf32> to vector<3x1024xf32>
    %660 = arith.mulf %657, %659 : vector<3x1024xf32>
    %cst_333 = arith.constant dense<0.000000e+00> : vector<3xf32>
    %661 = vector.multi_reduction <add>, %660, %cst_333 [1] : vector<3x1024xf32> to vector<3xf32>
    %662 = vector.shape_cast %661 : vector<3xf32> to vector<3x1xf32>
    %c0_334 = arith.constant 0 : index
    %c0_335 = arith.constant 0 : index
    %663 = vector.load %arg14[%c0_334, %c0_335] : memref<1x1xf32, #tpu.memory_space<vmem>>, vector<1x1xf32>
    %664 = vector.broadcast %663 : vector<1x1xf32> to vector<3x1xf32>
    %665 = arith.addf %662, %664 : vector<3x1xf32>
    %c0_336 = arith.constant 0 : index
    %c0_337 = arith.constant 0 : index
    %666 = vector.load %arg15[%c0_336, %c0_337] : memref<3x1xf32, #tpu.memory_space<vmem>>, vector<3x1xf32>
    tpu.vector_store %arg15[%c0_336, %c0_337], %665 {strides = array<i32>} : memref<3x1xf32, #tpu.memory_space<vmem>>, vector<3x1xf32>,
    return
  }
}

</mosaic_0001>

<bundles_post_ra>
// kernel: model_forward.1
= control target key start
LH: loop header
LB: loop body
LE: loop exit
PB: predicated region body
PF: predicated region fallthrough
CT: control target
= control target key end

     0   :  { %s8720_s0 = inlined_call_operand.vmem [shape: s32[16,1], index: 0, kind: input, shape index: {}]   ;;  %s8721_s1 = inlined_call_operand.hbm [shape: f32[16,16], index: 1, kind: input, shape index: {}]   ;;  %s8722_s2 = inlined_call_operand.hbm [shape: f32[3,16], index: 2, kind: input, shape index: {}]   ;;  %s8723_s3 = inlined_call_operand.vmem [shape: f32[16,3], index: 3, kind: input, shape index: {}]   ;;  %s8724_s4 = inlined_call_operand.vmem [shape: f32[3,1], index: 4, kind: input, shape index: {}]   ;;  %s8725_s5 = inlined_call_operand.hbm [shape: f32[16,64], index: 5, kind: input, shape index: {}]   ;;  %s8726_s6 = inlined_call_operand.hbm [shape: f32[8,64,256], index: 6, kind: input, shape index: {}]   ;;  %s8727_s7 = inlined_call_operand.hbm [shape: f32[8,64,256], index: 7, kind: input, shape index: {}]   ;;  %s8728_s8 = inlined_call_operand.hbm [shape: f32[8,1,256], index: 8, kind: input, shape index: {}]   ;;  %s8729_s9 = inlined_call_operand.vmem [shape: f32[8,256,64], index: 9, kind: input, shape index: {}]   ;;  %s8730_s10 = inlined_call_operand.hbm [shape: f32[8,1,64], index: 10, kind: input, shape index: {}]   ;;  %s8731_s11 = inlined_call_operand.hbm [shape: f32[9,64,1024], index: 11, kind: input, shape index: {}]   ;;  %s8732_s12 = inlined_call_operand.hbm [shape: f32[1,1024], index: 12, kind: input, shape index: {}]   ;;  %s8733_s13 = inlined_call_operand.hbm [shape: f32[1,1024], index: 13, kind: input, shape index: {}]   ;;  %s8734_s14 = inlined_call_operand.<no memory space> [shape: f32[1,1], index: 14, kind: input, shape index: {}]   ;;  %s8735_s15 = inlined_call_operand.vmem [shape: f32[3,1], index: 15, kind: output, shape index: {}]  }
   0x1   :  { %v20_v0 = vstv %s8734_s14 }
   0x2   :  { %21 = vst [vmem:[#allocation2] sm:$0x1] %v20_v0 }
   0x3   :  { %22 = vsyncpa [#allocation4], 0 }
   0x4   :  { %23 = vsyncpa [#allocation6], 0 }
   0x5   :  { %24 = vsyncpa [#allocation9], 0 }
   0x6   :  { %25 = vsyncpa [#allocation12], 0 }
   0x7   :  { %26 = vsyncpa [#allocation15], 0  ;;  %s48_s22 = sshll.u32 %s8722_s2, 4  ;;  %s49_s22 = int_to_ptr.hbm [resolvable:$true] %s48_s22 }
   0x8   :  { %27 = vsyncpa [#allocation18], 0  ;;  %s6697_s23 = smov [#allocation5]   ;;  %s75_s27 = sshll.u32 %s8726_s6, 4  ;;  %s76_s27 = int_to_ptr.hbm [resolvable:$true] %s75_s27 }
   0x9   :  { %s50_s24 = sshll.u32 %s6697_s23, 4  ;;  %s6698_s14 = smov [#allocation8]   ;;  %s51_s24 = int_to_ptr.vmem [resolvable:$true] %s50_s24 }
   0xa   :  { %53 = dma.hbm_to_vmem [thread:$0]  %s49_s22, 64, %s51_s24, [#allocation6]  }
   0xb   :  { %s77_s28 = sshll.u32 %s6698_s14, 4  ;;  %s6699_s29 = smov 256   ;;  %s78_s28 = int_to_ptr.vmem [resolvable:$true] %s77_s28 }
   0xc   :  { %s6700_s30 = smov 16   ;;  %s101_s17 = sshll.u32 %s8728_s8, 4  ;;  %s102_s17 = int_to_ptr.hbm [resolvable:$true] %s101_s17 }
   0xd   :  { %83 = dma.hbm_to_vmem [thread:$0]  %s76_s27, 16384, %s78_s28, [#allocation9], %s6699_s29, %s6699_s29, %s6700_s30  }
   0xe   :  { %s6701_s18 = smov [#allocation11]   ;;  %s129_s21 = sshll.u32 %s8731_s11, 4  ;;  %s130_s21 = int_to_ptr.hbm [resolvable:$true] %s129_s21 }
   0xf   :  { %s103_s19 = sshll.u32 %s6701_s18, 4  ;;  %s6702_s22 = smov 32   ;;  %s104_s19 = int_to_ptr.vmem [resolvable:$true] %s103_s19 }
  0x10   :  { %s6703_s23 = smov 2   ;;  %s6704_s24 = smov [#allocation14]  }
  0x11   :  { %109 = dma.hbm_to_vmem [thread:$0]  %s102_s17, 256, %s104_s19, [#allocation12], %s6702_s22, %s6702_s22, %s6703_s23  }
  0x12   :  { %s131_s25 = sshll.u32 %s6704_s24, 4  ;;  %s6705_s26 = smov 1024   ;;  %s132_s25 = int_to_ptr.vmem [resolvable:$true] %s131_s25 }
  0x13   :  { %s6706_s27 = smov 64   ;;  %s34_s28 = sshll.u32 %s8721_s1, 4  ;;  %s35_s28 = int_to_ptr.hbm [resolvable:$true] %s34_s28 }
  0x14   :  { %137 = dma.hbm_to_vmem [thread:$0]  %s130_s21, 73728, %s132_s25, [#allocation15], %s6705_s26, %s6705_s26, %s6706_s27  }
  0x15   :  { %s6707_s2 = smov [#allocation3]   ;;  %s62_s17 = sshll.u32 %s8725_s5, 4  ;;  %s63_s17 = int_to_ptr.hbm [resolvable:$true] %s62_s17 }
  0x16   :  { %s36_s16 = sshll.u32 %s6707_s2, 4  ;;  %s6708_s19 = smov 128   ;;  %s37_s16 = int_to_ptr.vmem [resolvable:$true] %s36_s16 }
  0x17   :  { %s6709_s6 = smov 8   ;;  %s6710_s20 = smov [#allocation7]  }
  0x18   :  { %42 = dma.hbm_to_vmem [thread:$0]  %s35_s28, 256, %s37_s16, [#allocation4], %s6708_s19, %s6708_s19, %s6709_s6  }
  0x19   :  { %s64_s22 = sshll.u32 %s6710_s20, 4  ;;  %s88_s24 = sshll.u32 %s8727_s7, 4  ;;  %s65_s22 = int_to_ptr.vmem [resolvable:$true] %s64_s22  ;;  %s89_s24 = int_to_ptr.hbm [resolvable:$true] %s88_s24 }
  0x1a   :  { %70 = dma.hbm_to_vmem [thread:$0]  %s63_s17, 256, %s65_s22, [#allocation6], %s6708_s19, %s6708_s19, %s6709_s6  }
  0x1b   :  { %s116_s26 = sshll.u32 %s8730_s10, 4  ;;  %s6711_s8 = smov [#allocation10]   ;;  %s117_s26 = int_to_ptr.hbm [resolvable:$true] %s116_s26 }
  0x1c   :  { %s90_s14 = sshll.u32 %s6711_s8, 4  ;;  %s6712_s5 = smov [#allocation13]   ;;  %s91_s14 = int_to_ptr.vmem [resolvable:$true] %s90_s14 }
  0x1d   :  { %96 = dma.hbm_to_vmem [thread:$0]  %s89_s24, 16384, %s91_s14, [#allocation9], %s6699_s29, %s6699_s29, %s6700_s30  }
  0x1e   :  { %s118_s28 = sshll.u32 %s6712_s5, 4  ;;  %s143_s16 = sshll.u32 %s8732_s12, 4  ;;  %s119_s28 = int_to_ptr.vmem [resolvable:$true] %s118_s28  ;;  %s144_s16 = int_to_ptr.hbm [resolvable:$true] %s143_s16 }
  0x1f   :  { %s6713_s11 = smov 1   ;;  %s6714_s10 = smov [#allocation16]  }
  0x20   :  { %124 = dma.hbm_to_vmem [thread:$0]  %s117_s26, 128, %s119_s28, [#allocation12], %s6700_s30, %s6700_s30, %s6713_s11  }
  0x21   :  { %s145_s18 = sshll.u32 %s6714_s10, 4  ;;  %s154_s6 = sshll.u32 %s8733_s13, 4  ;;  %s146_s18 = int_to_ptr.vmem [resolvable:$true] %s145_s18  ;;  %s155_s6 = int_to_ptr.hbm [resolvable:$true] %s154_s6 }
  0x22   :  { %148 = dma.hbm_to_vmem [thread:$0]  %s144_s16, 128, %s146_s18, [#allocation15]  }
  0x23   :  { %s6715_s29 = smov [#allocation17]  }
  0x24   :  { %s156_s20 = sshll.u32 %s6715_s29, 4  ;;  %s157_s20 = int_to_ptr.vmem [resolvable:$true] %s156_s20 }
  0x25   :  { %159 = dma.hbm_to_vmem [thread:$0]  %s155_s6, 128, %s157_s20, [#allocation18]  }
  0x26   :  { %6685 = dma.done.wait [#allocation4], 256  }
  0x27   :  { %6686 = vsyncadd [#allocation4], 4294967040 }
  0x28   :  { %6687 = dma.done.wait [#allocation6], 320  }
  0x29   :  { %6688 = vsyncadd [#allocation6], 4294966976 }
  0x2a   :  { %6689 = dma.done.wait [#allocation9], 32768  }
  0x2b   :  { %6690 = vsyncadd [#allocation9], 4294934528 }
  0x2c   :  { %6691 = dma.done.wait [#allocation12], 384  }
  0x2d   :  { %6692 = vsyncadd [#allocation12], 4294966912 }
  0x2e   :  { %6693 = dma.done.wait [#allocation15], 73856  }
  0x2f   :  { %6694 = vsyncadd [#allocation15], 4294893440 }
  0x30   :  { %6695 = dma.done.wait [#allocation18], 128  }
  0x31   :  { %6696 = vsyncadd [#allocation18], 4294967168  ;;  %v6716_v1 = vmov 0   ;;  %v208_v2 = vld [vmem:[%s8720_s0] sm:$0xff]  ;;  %v209_v5 = vld [vmem:[%s8720_s0 + $0x8] sm:$0xff]  ;;  %v210_v8 = vlaneseq  ;;  %vm226_vm0 = vcmask 130048  }
  0x32   :  { %6358 = vset.pattern.permute.xlu0 %v6716_v1  ;;  %6364 = vset.pattern.permute.xlu2 %v6716_v1  ;;  %v202_v3 = vld [vmem:[#allocation3] sm:$0xff]  ;;  %v6850_v6 = vld [vmem:[#allocation3 + $0x8] sm:$0xff]  ;;  %v224_v7 = vld [vmem:[#allocation7] sm:$0xff]  ;;  %v6717_v11 = vmov 0.0   ;;  %vm276_vm3 = vcmask 523264   ;;  %vm780_vm9 = vcmask 1042432  }
  0x33   :  { %213 = vperm.xlu0 %6358, %v208_v2   ;;  %392 = vxpose.xlu1.b32.start [1/2] (short) (narrow) %v202_v3, 16  ;;  %v225_v4 = vld [vmem:[#allocation7 + $0x8] sm:$0xff]  ;;  %v211_v9 = vand.u32 127, %v210_v8  ;;  %v511_v16 = vld [vmem:[#allocation10 + $0x68] sm:$0xff]  ;;  %v496_v18 = vld [vmem:[#allocation8 + $0x70] sm:$0xff]  ;;  %vm773_vm10 = vcmask 23552  }
  0x34   :  { %247 = vmatpush.msra.mxu0 %v225_v4  ;;  %v513_v15 = vld [vmem:[#allocation10 + $0x78] sm:$0xff]  ;;  %v507_v19 = vld [vmem:[#allocation10 + $0x48] sm:$0xff]  ;;  %580 = vmatpush.msra.mxu1 %v496_v18  ;;  %v494_v20 = vld [vmem:[#allocation8 + $0x60] sm:$0xff] }
  0x35   :  { %v509_v17 = vld [vmem:[#allocation10 + $0x58] sm:$0xff]  ;;  %v492_v22 = vld [vmem:[#allocation8 + $0x50] sm:$0xff]  ;;  %v490_v23 = vld [vmem:[#allocation8 + $0x40] sm:$0xff] }
  0x36   :  { %248 = vmatpush.msra.mxu0 %v224_v7  ;;  %v505_v21 = vld [vmem:[#allocation10 + $0x38] sm:$0xff]  ;;  %581 = vmatpush.msra.mxu1 %v494_v20  ;;  %v503_v24 = vld [vmem:[#allocation10 + $0x28] sm:$0xff]  ;;  %v512_v29 = vld [vmem:[#allocation10 + $0x70] sm:$0xff] }
  0x37   :  { %v501_v25 = vld [vmem:[#allocation10 + $0x18] sm:$0xff]  ;;  %v510_v31 = vld [vmem:[#allocation10 + $0x60] sm:$0xff]  ;;  %v495_v32 = vld [vmem:[#allocation8 + $0x68] sm:$0xff] }
  0x38   :  { %551 = vmatpush.msrb.mxu0 %v513_v15  ;;  %582 = vmatpush.msra.mxu1 %v492_v22  ;;  %v497_v30 = vld [vmem:[#allocation8 + $0x78] sm:$0xff]  ;;  %v508_v33 = vld [vmem:[#allocation10 + $0x50] sm:$0xff]  ;;  %v506_v35 = vld [vmem:[#allocation10 + $0x40] sm:$0xff] }
  0x39   :  { %v493_v34 = vld [vmem:[#allocation8 + $0x58] sm:$0xff]  ;;  %v491_v36 = vld [vmem:[#allocation8 + $0x48] sm:$0xff]  ;;  %v504_v38 = vld [vmem:[#allocation10 + $0x30] sm:$0xff] }
  0x3a   :  { %552 = vmatpush.msrb.mxu0 %v511_v16  ;;  %583 = vmatpush.msra.mxu1 %v490_v23  ;;  %v489_v39 = vld [vmem:[#allocation8 + $0x38] sm:$0xff]  ;;  %v502_v40 = vld [vmem:[#allocation10 + $0x20] sm:$0xff]  ;;  %v487_v41 = vld [vmem:[#allocation8 + $0x28] sm:$0xff] }
  0x3b   :  { %216 = vperm.xlu0 %6358, %v209_v5   ;;  %393 = vxpose.xlu1.b32.end [2/2] (short) (narrow) %v6850_v6, 16  ;;  %v500_v42 = vld [vmem:[#allocation10 + $0x10] sm:$0xff]  ;;  %v485_v43 = vld [vmem:[#allocation8 + $0x18] sm:$0xff]  ;;  %v498_v44 = vld [vmem:[#allocation10] sm:$0xff] }
  0x3c   :  { %553 = vmatpush.msrb.mxu0 %v509_v17  ;;  %v499_v45 = vld [vmem:[#allocation10 + $0x8] sm:$0xff]  ;;  %v488_v46 = vld [vmem:[#allocation8 + $0x30] sm:$0xff]  ;;  %v486_v48 = vld [vmem:[#allocation8 + $0x20] sm:$0xff] }
  0x3d   :  { %v483_v47 = vld [vmem:[#allocation8 + $0x8] sm:$0xff]  ;;  %584 = vmatpush.msra.mxu1 %v488_v46  ;;  %v484_v49 = vld [vmem:[#allocation8 + $0x10] sm:$0xff]  ;;  %v482_v50 = vld [vmem:[#allocation8] sm:$0xff] }
  0x3e   :  { %554 = vmatpush.msrb.mxu0 %v507_v19  ;;  %v647_v51 = vld [vmem:[%s8729_s9 + $0x78] sm:$0xff]  ;;  %v646_v53 = vld [vmem:[%s8729_s9 + $0x70] sm:$0xff]  ;;  %v645_v55 = vld [vmem:[%s8729_s9 + $0x68] sm:$0xff] }
  0x3f   :  { %585 = vmatpush.msra.mxu1 %v486_v48  ;;  %v663_v52 = vld [vmem:[%s8729_s9 + $0xf8] sm:$0xff]  ;;  %v662_v54 = vld [vmem:[%s8729_s9 + $0xf0] sm:$0xff]  ;;  %v661_v56 = vld [vmem:[%s8729_s9 + $0xe8] sm:$0xff] }
  0x40   :  { %555 = vmatpush.msrb.mxu0 %v505_v21  ;;  %v644_v57 = vld [vmem:[%s8729_s9 + $0x60] sm:$0xff]  ;;  %v643_v59 = vld [vmem:[%s8729_s9 + $0x58] sm:$0xff]  ;;  %v642_v61 = vld [vmem:[%s8729_s9 + $0x50] sm:$0xff] }
  0x41   :  { %586 = vmatpush.msra.mxu1 %v484_v49  ;;  %v660_v58 = vld [vmem:[%s8729_s9 + $0xe0] sm:$0xff]  ;;  %v659_v60 = vld [vmem:[%s8729_s9 + $0xd8] sm:$0xff]  ;;  %v658_v62 = vld [vmem:[%s8729_s9 + $0xd0] sm:$0xff] }
  0x42   :  { %556 = vmatpush.msrb.mxu0 %v503_v24  ;;  %v641_v63 = vld [vmem:[%s8729_s9 + $0x48] sm:$0xff]  ;;  %v640_v2 = vld [vmem:[%s8729_s9 + $0x40] sm:$0xff]  ;;  %v639_v4 = vld [vmem:[%s8729_s9 + $0x38] sm:$0xff] }
  0x43   :  { %587 = vmatpush.msra.mxu1 %v482_v50  ;;  %v657_v0 = vld [vmem:[%s8729_s9 + $0xc8] sm:$0xff]  ;;  %v655_v5 = vld [vmem:[%s8729_s9 + $0xb8] sm:$0xff]  ;;  %v652_v15 = vld [vmem:[%s8729_s9 + $0xa0] sm:$0xff] }
  0x44   :  { %557 = vmatpush.msrb.mxu0 %v501_v25  ;;  %v635_v16 = vld [vmem:[%s8729_s9 + $0x18] sm:$0xff]  ;;  %v634_v18 = vld [vmem:[%s8729_s9 + $0x10] sm:$0xff]  ;;  %v633_v20 = vld [vmem:[%s8729_s9 + $0x8] sm:$0xff] }
  0x45   :  { %v651_v17 = vld [vmem:[%s8729_s9 + $0x98] sm:$0xff]  ;;  %v650_v19 = vld [vmem:[%s8729_s9 + $0x90] sm:$0xff]  ;;  %v649_v21 = vld [vmem:[%s8729_s9 + $0x88] sm:$0xff] }
  0x46   :  { %558 = vmatpush.msrb.mxu0 %v499_v45  ;;  %v632_v22 = vld [vmem:[%s8729_s9] sm:$0xff] }
  0x47   :  { %v648_v23 = vld [vmem:[%s8729_s9 + $0x80] sm:$0xff] }
  0x48   :  { %v618_v25 = vld [vmem:[#allocation11] sm:$0x3] }
  0xa5   :  { %v214_v10 = vpop.permute.xlu0 %213 }
  0xa6   :  { %vm218_vm1 = vcmp.eq.s32.totalorder %v211_v9, %v214_v10  ;;  %v638_v10 = vld [vmem:[%s8729_s9 + $0x30] sm:$0xff] }
  0xa7   :  { %v5907_v12 = vsel %vm218_vm1, 1.0, %v6717_v11 }
  0xa8   :  { %5909 = vmatmul.msk.f32.vlgmr.msra.gmra.mxu0 %vm226_vm0, %v5907_v12  ;;  %v637_v12 = vld [vmem:[%s8729_s9 + $0x28] sm:$0xff] }
  0xa9   :  { %691 = vmatpush.msra.mxu0 %v663_v52 }
  0xab   :  { %692 = vmatpush.msra.mxu0 %v662_v54 }
  0xad   :  { %v217_v13 = vpop.permute.xlu0 %216  ;;  %693 = vmatpush.msra.mxu0 %v661_v56 }
  0xae   :  { %vm219_vm2 = vcmp.eq.s32.totalorder %v211_v9, %v217_v13  ;;  %v653_v13 = vld [vmem:[%s8729_s9 + $0xa8] sm:$0xff] }
  0xaf   :  { %v5908_v14 = vsel %vm219_vm2, 1.0, %v6717_v11  ;;  %694 = vmatpush.msra.mxu0 %v660_v58  ;;  %v654_v11 = vld [vmem:[%s8729_s9 + $0xb0] sm:$0xff]  ;;  %vm324_vm2 = vcmask 1040384  }
  0xb0   :  { %5910 = vmatmul.msk.f32.gmra.mxu0 %vm226_vm0, %v5908_v14  ;;  %v636_v14 = vld [vmem:[%s8729_s9 + $0x20] sm:$0xff] }
  0xb1   :  { %695 = vmatpush.msra.mxu0 %v659_v60 }
  0xb3   :  { %696 = vmatpush.msra.mxu0 %v658_v62 }
  0xb5   :  { %697 = vmatpush.msra.mxu0 %v657_v0  ;;  %v205_v0 = vld [vmem:[%s8723_s3] sm:$0xff] }
  0xb6   :  { %vm262_vm4 = vcmp.gt.f32.partialorder %v205_v0, 0.5 }
  0xd7   :  { %v6857_v27 = vpop.trf.xlu1 }
  0xdf   :  { %v6868_v37 = vpop.trf.xlu1 }
 0x125   :  { %v6855_v26 = vpop.f32.mrf.mxu0 }
 0x12d   :  { %v6859_v28 = vpop.f32.mrf.mxu0 }
 0x12e   :  { %444 = vmatpush.msra.mxu3 %v6859_v28  ;;  %473 = vmatpush.msra.mxu2 %v6859_v28 }
 0x130   :  { %445 = vmatpush.msra.mxu3 %v6855_v26  ;;  %474 = vmatpush.msra.mxu2 %v6855_v26 }
 0x131   :  { %5911 = vmatmul.msk.f32.vlgmr.msra.gmra.mxu3 %vm226_vm0, %v6857_v27  ;;  %5913 = vmatmul.msk.f32.vlgmr.msra.gmra.mxu2 %vm226_vm0, %v202_v3  ;;  %v656_v3 = vld [vmem:[%s8729_s9 + $0xc0] sm:$0xff] }
 0x132   :  { %528 = vmatpush.msrb.mxu3 %v512_v29  ;;  %603 = vmatpush.msrb.mxu2 %v497_v30  ;;  %v620_v30 = vperm.slane %v618_v25, 0 }
 0x133   :  { %698 = vmatpush.msra.mxu0 %v656_v3  ;;  %v6718_v3 = vmov 1  }
 0x134   :  { %529 = vmatpush.msrb.mxu3 %v510_v31  ;;  %604 = vmatpush.msrb.mxu2 %v495_v32  ;;  %v621_v32 = vperm.slane %v618_v25, 1 }
 0x135   :  { %699 = vmatpush.msra.mxu0 %v655_v5 }
 0x136   :  { %530 = vmatpush.msrb.mxu3 %v508_v33  ;;  %605 = vmatpush.msrb.mxu2 %v493_v34 }
 0x137   :  { %700 = vmatpush.msra.mxu0 %v654_v11 }
 0x138   :  { %531 = vmatpush.msrb.mxu3 %v506_v35  ;;  %606 = vmatpush.msrb.mxu2 %v491_v36 }
 0x139   :  { %5912 = vmatmul.msk.f32.gmra.mxu3 %vm226_vm0, %v6868_v37  ;;  %5914 = vmatmul.msk.f32.gmra.mxu2 %vm226_vm0, %v6850_v6 }
 0x13a   :  { %532 = vmatpush.msrb.mxu3 %v504_v38  ;;  %607 = vmatpush.msrb.mxu2 %v489_v39 }
 0x13b   :  { %701 = vmatpush.msra.mxu0 %v653_v13 }
 0x13c   :  { %533 = vmatpush.msrb.mxu3 %v502_v40  ;;  %608 = vmatpush.msrb.mxu2 %v487_v41 }
 0x13d   :  { %702 = vmatpush.msra.mxu0 %v652_v15 }
 0x13e   :  { %534 = vmatpush.msrb.mxu3 %v500_v42  ;;  %609 = vmatpush.msrb.mxu2 %v485_v43 }
 0x13f   :  { %703 = vmatpush.msra.mxu0 %v651_v17 }
 0x140   :  { %535 = vmatpush.msrb.mxu3 %v498_v44  ;;  %610 = vmatpush.msrb.mxu2 %v483_v47 }
 0x141   :  { %704 = vmatpush.msra.mxu0 %v650_v19 }
 0x142   :  { %668 = vmatpush.msra.mxu3 %v647_v51 }
 0x143   :  { %705 = vmatpush.msra.mxu0 %v649_v21 }
 0x144   :  { %669 = vmatpush.msra.mxu3 %v646_v53  ;;  %v6404_v53 = vld [vmem:[#allocation13] ss:$0 sm:$0xff] }
 0x145   :  { %706 = vmatpush.msra.mxu0 %v648_v23 }
 0x146   :  { %670 = vmatpush.msra.mxu3 %v645_v55 }
 0x148   :  { %671 = vmatpush.msra.mxu3 %v644_v57 }
 0x14a   :  { %672 = vmatpush.msra.mxu3 %v643_v59 }
 0x14c   :  { %673 = vmatpush.msra.mxu3 %v642_v61 }
 0x14e   :  { %674 = vmatpush.msra.mxu3 %v641_v63  ;;  %v207_v63 = vld [vmem:[%s8724_s4] sm:$0x7] }
 0x150   :  { %675 = vmatpush.msra.mxu3 %v640_v2  ;;  %v264_v2 = vsel %vm262_vm4, 1, %v6716_v1  ;;  %vm326_vm4 = vcmask 1041408  }
 0x152   :  { %676 = vmatpush.msra.mxu3 %v639_v4 }
 0x154   :  { %677 = vmatpush.msra.mxu3 %v638_v10 }
 0x156   :  { %678 = vmatpush.msra.mxu3 %v637_v12 }
 0x158   :  { %679 = vmatpush.msra.mxu3 %v636_v14  ;;  %v206_v14 = vld [vmem:[%s8723_s3 + $0x8] sm:$0xff] }
 0x159   :  { %vm263_vm5 = vcmp.gt.f32.partialorder %v206_v14, 0.5 }
 0x15a   :  { %680 = vmatpush.msra.mxu3 %v635_v16  ;;  %v265_v15 = vsel %vm263_vm5, 1, %v6716_v1 }
 0x15c   :  { %681 = vmatpush.msra.mxu3 %v634_v18 }
 0x15e   :  { %682 = vmatpush.msra.mxu3 %v633_v20 }
 0x160   :  { %683 = vmatpush.msra.mxu3 %v632_v22 }
 0x1b4   :  { %v447_v6 = vpop.f32.mrf.mxu3  ;;  %v476_v7 = vpop.f32.mrf.mxu2 }
 0x1b5   :  { %5915 = vmatmul.msk.f32.vlgmr.msrb.gmra.mxu3 %vm276_vm3, %v476_v7  ;;  %5917 = vmatmul.msk.f32.vlgmr.msrb.gmra.mxu0 %vm276_vm3, %v476_v7 }
 0x1b6   :  { %5921 = vmatmul.msk.f32.vlgmr.msrb.gmra.mxu2 %vm276_vm3, %v447_v6  ;;  %5919 = vmatmul.msk.f32.vlgmr.msra.gmra.mxu1 %vm276_vm3, %v447_v6 }
 0x1bc   :  { %v450_v8 = vpop.f32.mrf.mxu3  ;;  %v479_v9 = vpop.f32.mrf.mxu2 }
 0x1bd   :  { %5916 = vmatmul.msk.f32.gmra.mxu3 %vm276_vm3, %v479_v9  ;;  %5918 = vmatmul.msk.f32.gmra.mxu0 %vm276_vm3, %v479_v9  ;;  %v204_v9 = vld [vmem:[#allocation5] sm:$0x7] }
 0x1be   :  { %5922 = vmatmul.msk.f32.gmra.mxu2 %vm276_vm3, %v450_v8  ;;  %5920 = vmatmul.msk.f32.gmra.mxu1 %vm276_vm3, %v450_v8 }
 0x232   :  { %v560_v29 = vpop.f32.mrf.mxu0 }
 0x233   :  { %v589_v24 = vpop.f32.mrf.mxu1 }
 0x238   :  { %v537_v31 = vpop.f32.mrf.mxu3 }
 0x239   :  { %v590_v33 = vadd.f32 %v589_v24, %v537_v31  ;;  %v612_v34 = vpop.f32.mrf.mxu2 }
 0x23a   :  { %v613_v35 = vadd.f32 %v612_v34, %v560_v29  ;;  %v563_v43 = vpop.f32.mrf.mxu0 }
 0x23b   :  { %v624_v36 = vadd.f32 %v620_v30, %v590_v33  ;;  %v592_v41 = vpop.f32.mrf.mxu1 }
 0x23c   :  { %v625_v38 = vadd.f32 %v621_v32, %v613_v35  ;;  %v915_v35 = vld [vmem:[#allocation14 + $0x3c0] sm:$0xff] }
 0x23d   :  { %v628_v39 = vmax.f32 %v624_v36, 0.0  ;;  %v916_v36 = vld [vmem:[#allocation14 + $0x3c8] sm:$0xff] }
 0x23e   :  { %v629_v40 = vmax.f32 %v625_v38, 0.0  ;;  %v917_v38 = vld [vmem:[#allocation14 + $0x3d0] sm:$0xff] }
 0x23f   :  { %684 = vmatmul.f32.vlgmr.msra.gmra.mxu3 %v628_v39  ;;  %v918_v39 = vld [vmem:[#allocation14 + $0x3d8] sm:$0xff] }
 0x240   :  { %707 = vmatmul.f32.vlgmr.msra.gmra.mxu0 %v629_v40  ;;  %v540_v42 = vpop.f32.mrf.mxu3  ;;  %v907_v40 = vld [vmem:[#allocation14 + $0x380] sm:$0xff]  ;;  %974 = vmatpush.msrb.mxu3 %v917_v38  ;;  %v880_v38 = vld [vmem:[#allocation14 + $0x2a8] sm:$0xff] }
 0x241   :  { %v593_v44 = vadd.f32 %v592_v41, %v540_v42  ;;  %v615_v45 = vpop.f32.mrf.mxu2  ;;  %v908_v41 = vld [vmem:[#allocation14 + $0x388] sm:$0xff]  ;;  %994 = vmatpush.msrb.mxu0 %v918_v39  ;;  %v909_v42 = vld [vmem:[#allocation14 + $0x390] sm:$0xff] }
 0x242   :  { %v616_v46 = vadd.f32 %v615_v45, %v563_v43  ;;  %v910_v43 = vld [vmem:[#allocation14 + $0x398] sm:$0xff]  ;;  %975 = vmatpush.msrb.mxu3 %v909_v42  ;;  %v899_v45 = vld [vmem:[#allocation14 + $0x340] sm:$0xff] }
 0x243   :  { %v626_v47 = vadd.f32 %v620_v30, %v593_v44  ;;  %995 = vmatpush.msrb.mxu0 %v910_v43  ;;  %v871_v42 = vld [vmem:[#allocation14 + $0x260] sm:$0xff]  ;;  %v872_v43 = vld [vmem:[#allocation14 + $0x268] sm:$0xff] }
 0x244   :  { %v627_v48 = vadd.f32 %v621_v32, %v616_v46  ;;  %v6719_v32 = vmov 2   ;;  %v900_v46 = vld [vmem:[#allocation14 + $0x348] sm:$0xff] }
 0x245   :  { %v630_v49 = vmax.f32 %v626_v47, 0.0  ;;  %v901_v47 = vld [vmem:[#allocation14 + $0x350] sm:$0xff] }
 0x246   :  { %v631_v50 = vmax.f32 %v627_v48, 0.0  ;;  %v902_v48 = vld [vmem:[#allocation14 + $0x358] sm:$0xff]  ;;  %976 = vmatpush.msrb.mxu3 %v901_v47 }
 0x247   :  { %687 = vmatmul.f32.gmra.mxu3 %v630_v49  ;;  %996 = vmatpush.msrb.mxu0 %v902_v48  ;;  %v891_v49 = vld [vmem:[#allocation14 + $0x300] sm:$0xff] }
 0x248   :  { %710 = vmatmul.f32.gmra.mxu0 %v631_v50  ;;  %v892_v50 = vld [vmem:[#allocation14 + $0x308] sm:$0xff]  ;;  %v863_v48 = vld [vmem:[#allocation14 + $0x220] sm:$0xff] }
 0x2bd   :  { %v708_v51 = vpop.f32.mrf.mxu0 }
 0x2c2   :  { %v685_v52 = vpop.f32.mrf.mxu3 }
 0x2c3   :  { %v686_v54 = vadd.f32 %v6404_v53, %v685_v52  ;;  %v894_v52 = vld [vmem:[#allocation14 + $0x318] sm:$0xff] }
 0x2c4   :  { %997 = vmatpush.msrb.mxu0 %v894_v52 }
 0x2c5   :  { %v6978_v56 = vadd.f32 %v708_v51, %v686_v54  ;;  %v711_v58 = vpop.f32.mrf.mxu0  ;;  %v893_v51 = vld [vmem:[#allocation14 + $0x310] sm:$0xff]  ;;  %v884_v54 = vld [vmem:[#allocation14 + $0x2c8] sm:$0xff] }
 0x2c6   :  { %977 = vmatpush.msrb.mxu3 %v893_v51  ;;  %v866_v51 = vld [vmem:[#allocation14 + $0x238] sm:$0xff] }
 0x2c7   :  { %v714_v60 = vmul.f32 %v6978_v56, %v6978_v56 }
 0x2ca   :  { %v688_v55 = vpop.f32.mrf.mxu3 }
 0x2cb   :  { %v689_v57 = vadd.f32 %v6404_v53, %v688_v55  ;;  %v883_v53 = vld [vmem:[#allocation14 + $0x2c0] sm:$0xff]  ;;  %v885_v55 = vld [vmem:[#allocation14 + $0x2d0] sm:$0xff] }
 0x2cc   :  { %978 = vmatpush.msrb.mxu3 %v885_v55 }
 0x2cd   :  { %v6980_v59 = vadd.f32 %v711_v58, %v689_v57  ;;  %v886_v57 = vld [vmem:[#allocation14 + $0x2d8] sm:$0xff]  ;;  %v875_v58 = vld [vmem:[#allocation14 + $0x280] sm:$0xff] }
 0x2ce   :  { %998 = vmatpush.msrb.mxu0 %v886_v57 }
 0x2cf   :  { %v715_v61 = vmul.f32 %v6980_v59, %v6980_v59 }
 0x2d1   :  { %v6359_v62 = vpack.i.bf16 %v714_v60, %v715_v61  ;;  %v876_v60 = vld [vmem:[#allocation14 + $0x288] sm:$0xff]  ;;  %v877_v61 = vld [vmem:[#allocation14 + $0x290] sm:$0xff] }
 0x2d2   :  { %979 = vmatpush.msrb.mxu3 %v877_v61 }
 0x2d3   :  { %6360 = vrot.lane.b32.xlu2 %v6359_v62, %s6706_s27 }
 0x2db   :  { %258 = vperm.xlu2 %6364, %v207_v63   ;;  %v878_v63 = vld [vmem:[#allocation14 + $0x298] sm:$0xff] }
 0x2dc   :  { %999 = vmatpush.msrb.mxu0 %v878_v63 }
 0x2e3   :  { %267 = vperm.xlu2 %6364, %v264_v2  }
 0x2eb   :  { %6365 = vset.pattern.permute.xlu2 %v6718_v3 }
 0x2ec   :  { %287 = vperm.xlu2 %6365, %v264_v2  }
 0x2f4   :  { %6367 = vset.pattern.permute.xlu2 %v6719_v32 }
 0x32d   :  { %v6361_v4 = vpop.permute.xlu2 %6360 }
 0x32e   :  { %v6363_v5 = vunpack.i.h.bf16 %v6361_v4  ;;  %v6362_v6 = vunpack.i.l.bf16 %v6361_v4  ;;  %v870_v4 = vld [vmem:[#allocation14 + $0x258] sm:$0xff] }
 0x32f   :  { %1000 = vmatpush.msrb.mxu0 %v870_v4 }
 0x330   :  { %v725_v7 = vsel %vm276_vm3, %v6980_v59, %v6362_v6  ;;  %v724_v8 = vsel %vm276_vm3, %v6978_v56, %v6363_v5  ;;  %v859_v5 = vld [vmem:[#allocation14 + $0x200] sm:$0xff]  ;;  %v860_v6 = vld [vmem:[#allocation14 + $0x208] sm:$0xff] }
 0x331   :  { %743 = vmatpush.msrb.mxu1 %v725_v7  ;;  %v861_v7 = vld [vmem:[#allocation14 + $0x210] sm:$0xff] }
 0x333   :  { %744 = vmatpush.msrb.mxu1 %v724_v8  ;;  %v862_v8 = vld [vmem:[#allocation14 + $0x218] sm:$0xff] }
 0x334   :  { %1001 = vmatpush.msrb.mxu0 %v862_v8 }
 0x335   :  { %v259_v10 = vpop.permute.xlu2 %258  ;;  %934 = vmatpush.msra.mxu1 %v915_v35  ;;  %v890_v35 = vld [vmem:[#allocation14 + $0x2f8] sm:$0xff] }
 0x336   :  { %v6998_v11 = vmul.f32 %v259_v10, %v204_v9  ;;  %v919_v9 = vld [vmem:[#allocation14 + $0x3e0] sm:$0xff]  ;;  %v920_v10 = vld [vmem:[#allocation14 + $0x3e8] sm:$0xff] }
 0x337   :  { %935 = vmatpush.msra.mxu1 %v907_v40  ;;  %v881_v40 = vld [vmem:[#allocation14 + $0x2b0] sm:$0xff] }
 0x338   :  { %5923 = vmatmul.msk.f32.vlgmr.msrb.gmra.mxu1 %vm226_vm0, %v6998_v11 }
 0x339   :  { %936 = vmatpush.msra.mxu1 %v899_v45  ;;  %v873_v45 = vld [vmem:[#allocation14 + $0x270] sm:$0xff] }
 0x33b   :  { %937 = vmatpush.msra.mxu1 %v891_v49  ;;  %v864_v49 = vld [vmem:[#allocation14 + $0x228] sm:$0xff] }
 0x33d   :  { %v7020_v44 = vpop.permute.xlu2 %267  ;;  %938 = vmatpush.msra.mxu1 %v883_v53 }
 0x33e   :  { %vm272_vm12 = vcmp.eq.s32.totalorder %v7020_v44, 1 }
 0x33f   :  { %939 = vmatpush.msra.mxu1 %v875_v58 }
 0x346   :  { %v7022_v62 = vpop.permute.xlu2 %287 }
 0x347   :  { %8747 = vst [vmem:[#allocation25_spill] sm:$0xff] %v7022_v62  ;;  %vm292_vm13 = vcmp.eq.s32.totalorder %v7022_v62, 1 }
 0x3b5   :  { %v746_v12 = vpop.f32.mrf.mxu1 }
 0x3b6   :  { %v749_v13 = vmul.f32 %v746_v12, %v746_v12 }
 0x3b8   :  { %751 = vrot.lane.b32.xlu0 %v749_v13, %s6706_s27  ;;  %v922_v13 = vld [vmem:[#allocation14 + $0x3f8] sm:$0xff] }
 0x3b9   :  { %1074 = vmatpush.msra.mxu0 %v922_v13 }
 0x3c0   :  { %270 = vperm.xlu0 %6358, %v265_v15  }
 0x3c8   :  { %6366 = vset.pattern.permute.xlu0 %v6718_v3  ;;  %v869_v3 = vld [vmem:[#allocation14 + $0x250] sm:$0xff] }
 0x3c9   :  { %980 = vmatpush.msrb.mxu3 %v869_v3 }
 0x3cb   :  { %981 = vmatpush.msrb.mxu3 %v861_v7 }
 0x42a   :  { %v752_v16 = vpop.permute.xlu0 %751 }
 0x42b   :  { %v754_v17 = vsub.f32 %v746_v12, %v752_v16  ;;  %v913_v16 = vld [vmem:[#allocation14 + $0x3b0] sm:$0xff] }
 0x42d   :  { %v755_v18 = vmax.f32 %v754_v17, 0.0  ;;  %v914_v17 = vld [vmem:[#allocation14 + $0x3b8] sm:$0xff] }
 0x42e   :  { %1075 = vmatpush.msra.mxu0 %v914_v17 }
 0x42f   :  { %v756_v19 = vadd.f32 1e-05, %v755_v18 }
 0x431   :  { %6413 = vrsqrt.f32 %v756_v19  ;;  %vm763_vm7 = vweird.f32 %v756_v19 }
 0x432   :  { %v7025_v39 = vpop.permute.xlu0 %270 }
 0x433   :  { %8748 = vst [vmem:[#allocation26_spill] sm:$0xff] %v7025_v39  ;;  %vm273_vm14 = vcmp.eq.s32.totalorder %v7025_v39, 1 }
 0x437   :  { %v6414_v20 = vpop.eup %6413 }
 0x438   :  { %v758_v21 = vmul.f32 %v6414_v20, %v756_v19  ;;  %vm764_vm6 = vweird.f32 %v6414_v20  ;;  %v903_v19 = vld [vmem:[#allocation14 + $0x360] sm:$0xff] }
 0x439   :  { %vm765_vm8 = vmor %vm763_vm7, %vm764_vm6 }
 0x43a   :  { %v759_v22 = vmul.f32 %v6414_v20, %v758_v21  ;;  %v905_v21 = vld [vmem:[#allocation14 + $0x370] sm:$0xff] }
 0x43c   :  { %v760_v23 = vmul.f32 0.5, %v759_v22  ;;  %v906_v22 = vld [vmem:[#allocation14 + $0x378] sm:$0xff] }
 0x43d   :  { %1076 = vmatpush.msra.mxu0 %v906_v22 }
 0x43e   :  { %v761_v24 = vsub.f32 1.5, %v760_v23  ;;  %v895_v23 = vld [vmem:[#allocation14 + $0x320] sm:$0xff] }
 0x440   :  { %v762_v25 = vmul.f32 %v6414_v20, %v761_v24  ;;  %v896_v24 = vld [vmem:[#allocation14 + $0x328] sm:$0xff] }
 0x442   :  { %v766_v29 = vsel %vm765_vm8, %v6414_v20, %v762_v25  ;;  %v904_v20 = vld [vmem:[#allocation14 + $0x368] sm:$0xff]  ;;  %v897_v25 = vld [vmem:[#allocation14 + $0x330] sm:$0xff] }
 0x443   :  { %768 = vrot.lane.b32.xlu1 %v766_v29, %s6706_s27 }
 0x4b5   :  { %v769_v1 = vpop.permute.xlu1 %768 }
 0x4b6   :  { %v771_v30 = vmul.f32 %v769_v1, %v746_v12  ;;  %v921_v12 = vld [vmem:[#allocation14 + $0x3f0] sm:$0xff]  ;;  %v887_v1 = vld [vmem:[#allocation14 + $0x2e0] sm:$0xff] }
 0x4b7   :  { %1054 = vmatpush.msra.mxu3 %v921_v12 }
 0x4b8   :  { %v772_v31 = vsel %vm276_vm3, %v771_v30, %v766_v29  ;;  %v898_v29 = vld [vmem:[#allocation14 + $0x338] sm:$0xff]  ;;  %v888_v30 = vld [vmem:[#allocation14 + $0x2e8] sm:$0xff] }
 0x4b9   :  { %5924 = vmatpush.msk.msra.mxu2 %vm780_vm9, %v772_v31  ;;  %1055 = vmatpush.msra.mxu3 %v913_v16 }
 0x4ba   :  { %5925 = vmatmul.msk.f32.vlgmr.msra.gmra.mxu2 %vm773_vm10, %v205_v0  ;;  %v867_v0 = vld [vmem:[#allocation14 + $0x240] sm:$0xff]  ;;  %1077 = vmatpush.msra.mxu0 %v898_v29 }
 0x4bb   :  { %954 = vmatpush.msrb.mxu2 %v916_v36  ;;  %940 = vmatpush.msra.mxu1 %v867_v0  ;;  %v879_v36 = vld [vmem:[#allocation14 + $0x2a0] sm:$0xff] }
 0x4bc   :  { %1056 = vmatpush.msra.mxu3 %v905_v21  ;;  %1078 = vmatpush.msra.mxu0 %v890_v35 }
 0x4bd   :  { %955 = vmatpush.msrb.mxu2 %v908_v41  ;;  %941 = vmatpush.msra.mxu1 %v859_v5  ;;  %v882_v41 = vld [vmem:[#allocation14 + $0x2b8] sm:$0xff] }
 0x4be   :  { %1057 = vmatpush.msra.mxu3 %v897_v25  ;;  %1079 = vmatpush.msra.mxu0 %v882_v41 }
 0x4bf   :  { %956 = vmatpush.msrb.mxu2 %v900_v46  ;;  %1014 = vmatpush.msrb.mxu1 %v919_v9  ;;  %v874_v46 = vld [vmem:[#allocation14 + $0x278] sm:$0xff] }
 0x4c0   :  { %1080 = vmatpush.msra.mxu0 %v874_v46 }
 0x4c1   :  { %957 = vmatpush.msrb.mxu2 %v892_v50  ;;  %v865_v50 = vld [vmem:[#allocation14 + $0x230] sm:$0xff] }
 0x4c2   :  { %5926 = vmatmul.msk.f32.gmra.mxu2 %vm773_vm10, %v206_v14  ;;  %v911_v14 = vld [vmem:[#allocation14 + $0x3a0] sm:$0xff]  ;;  %1081 = vmatpush.msra.mxu0 %v866_v51 }
 0x4c3   :  { %958 = vmatpush.msrb.mxu2 %v884_v54  ;;  %1015 = vmatpush.msrb.mxu1 %v911_v14 }
 0x4c5   :  { %959 = vmatpush.msrb.mxu2 %v876_v60  ;;  %1016 = vmatpush.msrb.mxu1 %v903_v19 }
 0x4c7   :  { %1017 = vmatpush.msrb.mxu1 %v895_v23  ;;  %v274_v23 = vsel %vm272_vm12, %v6855_v26, -1e+30 }
 0x4c9   :  { %1018 = vmatpush.msrb.mxu1 %v887_v1 }
 0x4cb   :  { %1019 = vmatpush.msrb.mxu1 %v879_v36  ;;  %v277_v36 = vsel %vm276_vm3, %v274_v23, -inf  ;;  %v352_v23 = vld [vmem:[#allocation14 + $0xc0] sm:$0xff] }
 0x4cd   :  { %1020 = vmatpush.msrb.mxu1 %v871_v42 }
 0x4cf   :  { %1021 = vmatpush.msrb.mxu1 %v863_v48 }
 0x53d   :  { %v7012_v33 = vpop.f32.mrf.mxu2 }
 0x53e   :  { %809 = vrot.lane.b32.xlu2 %v7012_v33, %s6706_s27 }
 0x545   :  { %v7016_v34 = vpop.f32.mrf.mxu2 }
 0x546   :  { %306 = vperm.xlu2 %6367, %v264_v2   ;;  %811 = vrot.lane.b32.xlu0 %v7016_v34, %s6706_s27  ;;  %v868_v2 = vld [vmem:[#allocation14 + $0x248] sm:$0xff] }
 0x547   :  { %960 = vmatpush.msrb.mxu2 %v868_v2 }
 0x549   :  { %961 = vmatpush.msrb.mxu2 %v860_v6 }
 0x54b   :  { %1034 = vmatpush.msra.mxu2 %v920_v10 }
 0x54e   :  { %309 = vperm.xlu2 %6367, %v265_v15   ;;  %290 = vperm.xlu0 %6366, %v265_v15   ;;  %v912_v15 = vld [vmem:[#allocation14 + $0x3a8] sm:$0xff] }
 0x54f   :  { %1035 = vmatpush.msra.mxu2 %v912_v15  ;;  %v294_v15 = vsel %vm292_vm13, %v6855_v26, -1e+30 }
 0x551   :  { %1036 = vmatpush.msra.mxu2 %v904_v20 }
 0x553   :  { %1037 = vmatpush.msra.mxu2 %v896_v24  ;;  %v296_v24 = vsel %vm276_vm3, %v294_v15, -inf }
 0x555   :  { %1038 = vmatpush.msra.mxu2 %v888_v30 }
 0x556   :  { %6403 = vset.pattern.permute.xlu0 %v6719_v32  ;;  %v889_v32 = vld [vmem:[#allocation14 + $0x2f0] sm:$0xff] }
 0x557   :  { %1058 = vmatpush.msra.mxu3 %v889_v32  ;;  %1039 = vmatpush.msra.mxu2 %v880_v38 }
 0x559   :  { %1059 = vmatpush.msra.mxu3 %v881_v40  ;;  %1040 = vmatpush.msra.mxu2 %v872_v43 }
 0x55b   :  { %1060 = vmatpush.msra.mxu3 %v873_v45  ;;  %1041 = vmatpush.msra.mxu2 %v864_v49 }
 0x55d   :  { %1061 = vmatpush.msra.mxu3 %v865_v50 }
 0x598   :  { %v810_v18 = vpop.permute.xlu2 %809 }
 0x599   :  { %v815_v31 = vmul.f32 %v810_v18, %v6978_v56  ;;  %v275_v18 = vsel %vm273_vm14, %v6859_v28, -1e+30 }
 0x59a   :  { %v278_v29 = vsel %vm276_vm3, %v275_v18, -inf  ;;  %v362_v18 = vld [vmem:[#allocation14 + $0x110] sm:$0xff] }
 0x59b   :  { %v817_v56 = vsub.f32 %v815_v31, %v7012_v33  ;;  %v279_v42 = vmax.f32 %v277_v36, %v278_v29  ;;  %v355_v29 = vld [vmem:[#allocation14 + $0xd8] sm:$0xff] }
 0x59c   :  { %v347_v36 = vld [vmem:[#allocation14 + $0x98] sm:$0xff] }
 0x59d   :  { %v819_v52 = vadd.f32 %v817_v56, %v6855_v26 }
 0x59f   :  { %v7032_v54 = vmax.f32 %v819_v52, 0.0  ;;  %v280_v52 = vrot.slane %v279_v42, 4 }
 0x5a0   :  { %v7028_v47 = vpop.permute.xlu2 %306 }
 0x5a1   :  { %8749 = vst [vmem:[#allocation27_spill] sm:$0xff] %v7028_v47  ;;  %vm311_vm11 = vcmp.eq.s32.totalorder %v7028_v47, 1  ;;  %v823_v60 = vsel %vm272_vm12, %v7032_v54, -1e+30 }
 0x5a2   :  { %v825_v0 = vsel %vm276_vm3, %v823_v60, -inf  ;;  %v313_v38 = vsel %vm311_vm11, %v6855_v26, -1e+30 }
 0x5a8   :  { %v7037_v57 = vpop.permute.xlu2 %309 }
 0x5a9   :  { %8750 = vst [vmem:[#allocation28_spill] sm:$0xff] %v7037_v57  ;;  %vm312_vm15 = vcmp.eq.s32.totalorder %v7037_v57, 1 }
 0x5aa   :  { %v314_v1 = vsel %vm312_vm15, %v6859_v28, -1e+30 }
 0x5ab   :  { %v316_v43 = vsel %vm276_vm3, %v314_v1, -inf }
 0x5b8   :  { %v812_v33 = vpop.permute.xlu0 %811 }
 0x5b9   :  { %v816_v53 = vmul.f32 %v812_v33, %v6980_v59  ;;  %v845_v59 = vsel %vm311_vm11, %v7032_v54, -1e+30 }
 0x5ba   :  { %v847_v4 = vsel %vm276_vm3, %v845_v59, -inf  ;;  %v384_v59 = vld [vmem:[#allocation14 + $0x1c0] sm:$0xff] }
 0x5bb   :  { %v818_v55 = vsub.f32 %v816_v53, %v7016_v34  ;;  %v834_v34 = vsel %vm292_vm13, %v7032_v54, -1e+30 }
 0x5bc   :  { %v836_v10 = vsel %vm276_vm3, %v834_v34, -inf  ;;  %v385_v34 = vld [vmem:[#allocation14 + $0x1c8] sm:$0xff] }
 0x5bd   :  { %v820_v58 = vadd.f32 %v818_v55, %v6859_v28 }
 0x5bf   :  { %v7047_v61 = vmax.f32 %v820_v58, 0.0 }
 0x5c0   :  { %v7054_v63 = vpop.permute.xlu0 %290 }
 0x5c1   :  { %8751 = vst [vmem:[#allocation29_spill] sm:$0xff] %v7054_v63  ;;  %v824_v2 = vsel %vm273_vm14, %v7047_v61, -1e+30  ;;  %v846_v3 = vsel %vm312_vm15, %v7047_v61, -1e+30  ;;  %vm293_vm1 = vcmp.eq.s32.totalorder %v7054_v63, 1 }
 0x5c2   :  { %v826_v5 = vsel %vm276_vm3, %v824_v2, -inf  ;;  %v848_v6 = vsel %vm276_vm3, %v846_v3, -inf  ;;  %v835_v7 = vsel %vm293_vm1, %v7047_v61, -1e+30  ;;  %v295_v13 = vsel %vm293_vm1, %v6859_v28, -1e+30 }
 0x5c3   :  { %v827_v8 = vmax.f32 %v825_v0, %v826_v5  ;;  %v849_v9 = vmax.f32 %v847_v4, %v848_v6  ;;  %v837_v12 = vsel %vm276_vm3, %v835_v7, -inf  ;;  %v297_v20 = vsel %vm276_vm3, %v295_v13, -inf  ;;  %v386_v2 = vld [vmem:[#allocation14 + $0x1d0] sm:$0xff]  ;;  %v387_v3 = vld [vmem:[#allocation14 + $0x1d8] sm:$0xff]  ;;  %v376_v4 = vld [vmem:[#allocation14 + $0x180] sm:$0xff] }
 0x5c4   :  { %v838_v14 = vmax.f32 %v836_v10, %v837_v12  ;;  %v298_v32 = vmax.f32 %v296_v24, %v297_v20  ;;  %v315_v28 = vsel %vm276_vm3, %v313_v38, -inf  ;;  %v281_v0 = vmax.f32 %v279_v42, %v280_v52  ;;  %v377_v5 = vld [vmem:[#allocation14 + $0x188] sm:$0xff]  ;;  %v378_v6 = vld [vmem:[#allocation14 + $0x190] sm:$0xff]  ;;  %v379_v7 = vld [vmem:[#allocation14 + $0x198] sm:$0xff] }
 0x5c5   :  { %v828_v16 = vrot.slane %v827_v8, 4  ;;  %v850_v17 = vrot.slane %v849_v9, 4  ;;  %v317_v50 = vmax.f32 %v315_v28, %v316_v43  ;;  %v369_v10 = vld [vmem:[#allocation14 + $0x148] sm:$0xff]  ;;  %v370_v13 = vld [vmem:[#allocation14 + $0x150] sm:$0xff]  ;;  %v339_v43 = vld [vmem:[#allocation14 + $0x58] sm:$0xff] }
 0x5c6   :  { %v839_v19 = vrot.slane %v838_v14, 4  ;;  %v299_v48 = vrot.slane %v298_v32, 4  ;;  %v282_v15 = vrot.slane %v281_v0, 2  ;;  %v353_v24 = vld [vmem:[#allocation14 + $0xc8] sm:$0xff]  ;;  %v338_v42 = vld [vmem:[#allocation14 + $0x50] sm:$0xff] }
 0x5c7   :  { %v829_v21 = vmax.f32 %v827_v8, %v828_v16  ;;  %v851_v22 = vmax.f32 %v849_v9, %v850_v17  ;;  %v318_v58 = vrot.slane %v317_v50, 4  ;;  %v368_v9 = vld [vmem:[#allocation14 + $0x140] sm:$0xff]  ;;  %v361_v17 = vld [vmem:[#allocation14 + $0x108] sm:$0xff] }
 0x5c8   :  { %v840_v25 = vmax.f32 %v838_v14, %v839_v19  ;;  %v300_v26 = vmax.f32 %v298_v32, %v299_v48  ;;  %v371_v14 = vld [vmem:[#allocation14 + $0x158] sm:$0xff]  ;;  %v360_v16 = vld [vmem:[#allocation14 + $0x100] sm:$0xff]  ;;  %v330_v48 = vld [vmem:[#allocation14 + $0x10] sm:$0xff] }
 0x5c9   :  { %v830_v30 = vrot.slane %v829_v21, 2  ;;  %v852_v31 = vrot.slane %v851_v22, 2  ;;  %v319_v12 = vmax.f32 %v317_v50, %v318_v58  ;;  %v363_v19 = vld [vmem:[#allocation14 + $0x118] sm:$0xff]  ;;  %v389_v52 = vld [vmem:[#allocation14 + $0x1e8] sm:$0xff] }
 0x5ca   :  { %v841_v35 = vrot.slane %v840_v25, 2  ;;  %v301_v8 = vrot.slane %v300_v26, 2 }
 0x5cb   :  { %v831_v40 = vmax.f32 %v829_v21, %v830_v30  ;;  %v853_v41 = vmax.f32 %v851_v22, %v852_v31  ;;  %v320_v21 = vrot.slane %v319_v12, 2  ;;  %v283_v22 = vmax.f32 %v281_v0, %v282_v15  ;;  %v344_v30 = vld [vmem:[#allocation14 + $0x80] sm:$0xff]  ;;  %v345_v31 = vld [vmem:[#allocation14 + $0x88] sm:$0xff]  ;;  %v383_v0 = vld [vmem:[#allocation14 + $0x1b8] sm:$0xff] }
 0x5cc   :  { %v842_v56 = vmax.f32 %v840_v25, %v841_v35  ;;  %v302_v20 = vmax.f32 %v300_v26, %v301_v8  ;;  %v354_v25 = vld [vmem:[#allocation14 + $0xd0] sm:$0xff]  ;;  %v348_v15 = vld [vmem:[#allocation14 + $0xa0] sm:$0xff] }
 0x5cd   :  { %v832_v45 = vrot.slane %v831_v40, 1  ;;  %v854_v46 = vrot.slane %v853_v41, 1  ;;  %v321_v32 = vmax.f32 %v319_v12, %v320_v21  ;;  %v346_v35 = vld [vmem:[#allocation14 + $0x90] sm:$0xff]  ;;  %v284_v38 = vrot.slane %v283_v22, 1  ;;  %v357_v12 = vld [vmem:[#allocation14 + $0xe8] sm:$0xff] }
 0x5ce   :  { %v843_v49 = vrot.slane %v842_v56, 1  ;;  %v303_v1 = vrot.slane %v302_v20, 1  ;;  %v366_v8 = vld [vmem:[#allocation14 + $0x130] sm:$0xff] }
 0x5cf   :  { %v833_v51 = vmax.f32 %v831_v40, %v832_v45  ;;  %v855_v53 = vmax.f32 %v853_v41, %v854_v46  ;;  %v336_v40 = vld [vmem:[#allocation14 + $0x40] sm:$0xff]  ;;  %v337_v41 = vld [vmem:[#allocation14 + $0x48] sm:$0xff]  ;;  %v322_v28 = vrot.slane %v321_v32, 1  ;;  %v285_v50 = vmax.f32 %v283_v22, %v284_v38  ;;  %v342_v21 = vld [vmem:[#allocation14 + $0x70] sm:$0xff] }
 0x5d0   :  { %v844_v33 = vmax.f32 %v842_v56, %v843_v49  ;;  %v304_v56 = vmax.f32 %v302_v20, %v303_v1  ;;  %v328_v45 = vld [vmem:[#allocation14] sm:$0xff]  ;;  %v329_v46 = vld [vmem:[#allocation14 + $0x8] sm:$0xff]  ;;  %v331_v49 = vld [vmem:[#allocation14 + $0x18] sm:$0xff] }
 0x5d1   :  { %v341_v20 = vld [vmem:[#allocation14 + $0x68] sm:$0xff]  ;;  %v343_v22 = vld [vmem:[#allocation14 + $0x78] sm:$0xff] }
 0x5d2   :  { %v856_v55 = vsel %vm324_vm2, %v833_v51, %v844_v33  ;;  %v388_v51 = vld [vmem:[#allocation14 + $0x1e0] sm:$0xff]  ;;  %v390_v33 = vld [vmem:[#allocation14 + $0x1f0] sm:$0xff]  ;;  %v325_v26 = vsel %vm324_vm2, %v285_v50, %v304_v56  ;;  %v1306_v38 = vld [vmem:[#allocation8 + $0xd0] sm:$0xff] }
 0x5d3   :  { %v857_v60 = vsel %vm326_vm4, %v856_v55, %v855_v53  ;;  %v391_v53 = vld [vmem:[#allocation14 + $0x1f8] sm:$0xff]  ;;  %v323_v55 = vmax.f32 %v321_v32, %v322_v28  ;;  %v7132_v1 = vld [vmem:[#allocation3] sm:$0xff]  ;;  %v1305_v56 = vld [vmem:[#allocation8 + $0xc8] sm:$0xff] }
 0x5d4   :  { %5927 = vmatmul.msk.f32.vlgmr.msra.gmra.mxu1 %vm276_vm3, %v857_v60  ;;  %5928 = vmatmul.msk.f32.vlgmr.msrb.gmra.mxu2 %vm276_vm3, %v857_v60  ;;  %v1311_v32 = vld [vmem:[#allocation8 + $0xf8] sm:$0xff]  ;;  %v1302_v28 = vld [vmem:[#allocation8 + $0xb0] sm:$0xff] }
 0x5d5   :  { %5929 = vmatmul.msk.f32.vlgmr.msrb.gmra.mxu3 %vm276_vm3, %v857_v60  ;;  %5930 = vmatmul.msk.f32.vlgmr.msrb.gmra.mxu0 %vm276_vm3, %v857_v60  ;;  %v7108_v58 = vsel %vm326_vm4, %v325_v26, %v323_v55  ;;  %v1322_v26 = vld [vmem:[#allocation10 + $0xc8] sm:$0xff]  ;;  %v1298_v55 = vld [vmem:[#allocation8 + $0x90] sm:$0xff] }
 0x5d6   :  { %1097 = vmatpush.msra.mxu1 %v384_v59  ;;  %1117 = vmatpush.msrb.mxu2 %v385_v34  ;;  %v381_v59 = vld [vmem:[#allocation14 + $0x1a8] sm:$0xff]  ;;  %v382_v34 = vld [vmem:[#allocation14 + $0x1b0] sm:$0xff] }
 0x5d7   :  { %1137 = vmatpush.msrb.mxu3 %v386_v2  ;;  %1157 = vmatpush.msrb.mxu0 %v387_v3  ;;  %v372_v2 = vld [vmem:[#allocation14 + $0x160] sm:$0xff]  ;;  %v373_v3 = vld [vmem:[#allocation14 + $0x168] sm:$0xff] }
 0x5d8   :  { %1098 = vmatpush.msra.mxu1 %v376_v4  ;;  %1118 = vmatpush.msrb.mxu2 %v377_v5  ;;  %v374_v4 = vld [vmem:[#allocation14 + $0x170] sm:$0xff]  ;;  %v375_v5 = vld [vmem:[#allocation14 + $0x178] sm:$0xff] }
 0x5d9   :  { %1138 = vmatpush.msrb.mxu3 %v378_v6  ;;  %1158 = vmatpush.msrb.mxu0 %v379_v7  ;;  %v364_v6 = vld [vmem:[#allocation14 + $0x120] sm:$0xff]  ;;  %v365_v7 = vld [vmem:[#allocation14 + $0x128] sm:$0xff] }
 0x5da   :  { %1099 = vmatpush.msra.mxu1 %v368_v9  ;;  %1119 = vmatpush.msrb.mxu2 %v369_v10  ;;  %v367_v9 = vld [vmem:[#allocation14 + $0x138] sm:$0xff]  ;;  %v356_v10 = vld [vmem:[#allocation14 + $0xe0] sm:$0xff] }
 0x5db   :  { %1139 = vmatpush.msrb.mxu3 %v370_v13  ;;  %1159 = vmatpush.msrb.mxu0 %v371_v14  ;;  %v358_v13 = vld [vmem:[#allocation14 + $0xf0] sm:$0xff]  ;;  %v359_v14 = vld [vmem:[#allocation14 + $0xf8] sm:$0xff] }
 0x5dc   :  { %1100 = vmatpush.msra.mxu1 %v360_v16  ;;  %1120 = vmatpush.msrb.mxu2 %v361_v17  ;;  %v349_v16 = vld [vmem:[#allocation14 + $0xa8] sm:$0xff]  ;;  %v350_v17 = vld [vmem:[#allocation14 + $0xb0] sm:$0xff] }
 0x5dd   :  { %1140 = vmatpush.msrb.mxu3 %v362_v18  ;;  %1160 = vmatpush.msrb.mxu0 %v363_v19  ;;  %v351_v18 = vld [vmem:[#allocation14 + $0xb8] sm:$0xff]  ;;  %v340_v19 = vld [vmem:[#allocation14 + $0x60] sm:$0xff] }
 0x5de   :  { %5931 = vmatmul.msk.f32.vlgmr.msrb.gmra.mxu1 %vm276_vm3, %v857_v60  ;;  %5932 = vmatmul.msk.f32.vlgmr.msra.gmra.mxu2 %vm276_vm3, %v857_v60 }
 0x5df   :  { %5933 = vmatmul.msk.f32.vlgmr.msra.gmra.mxu3 %vm276_vm3, %v857_v60  ;;  %5934 = vmatmul.msk.f32.vlgmr.msra.gmra.mxu0 %vm276_vm3, %v857_v60  ;;  %v380_v60 = vld [vmem:[#allocation14 + $0x1a0] sm:$0xff] }
 0x5e0   :  { %1101 = vmatpush.msra.mxu1 %v352_v23  ;;  %1121 = vmatpush.msrb.mxu2 %v353_v24  ;;  %v332_v23 = vld [vmem:[#allocation14 + $0x20] sm:$0xff]  ;;  %v333_v24 = vld [vmem:[#allocation14 + $0x28] sm:$0xff] }
 0x5e1   :  { %1141 = vmatpush.msrb.mxu3 %v354_v25  ;;  %1161 = vmatpush.msrb.mxu0 %v355_v29  ;;  %v334_v25 = vld [vmem:[#allocation14 + $0x30] sm:$0xff]  ;;  %v335_v29 = vld [vmem:[#allocation14 + $0x38] sm:$0xff] }
 0x5e2   :  { %1102 = vmatpush.msra.mxu1 %v344_v30  ;;  %1122 = vmatpush.msrb.mxu2 %v345_v31  ;;  %v7138_v30 = vld [vmem:[#allocation3 + $0x8] sm:$0xff]  ;;  %v1310_v31 = vld [vmem:[#allocation8 + $0xf0] sm:$0xff] }
 0x5e3   :  { %1142 = vmatpush.msrb.mxu3 %v346_v35  ;;  %1162 = vmatpush.msrb.mxu0 %v347_v36  ;;  %v1308_v35 = vld [vmem:[#allocation8 + $0xe0] sm:$0xff]  ;;  %v1309_v36 = vld [vmem:[#allocation8 + $0xe8] sm:$0xff] }
 0x5e4   :  { %1103 = vmatpush.msra.mxu1 %v336_v40  ;;  %1123 = vmatpush.msrb.mxu2 %v337_v41  ;;  %v1307_v40 = vld [vmem:[#allocation8 + $0xd8] sm:$0xff]  ;;  %v1327_v41 = vld [vmem:[#allocation10 + $0xf0] sm:$0xff] }
 0x5e5   :  { %1143 = vmatpush.msrb.mxu3 %v338_v42  ;;  %1163 = vmatpush.msrb.mxu0 %v339_v43  ;;  %v1328_v42 = vld [vmem:[#allocation10 + $0xf8] sm:$0xff]  ;;  %v1304_v43 = vld [vmem:[#allocation8 + $0xc0] sm:$0xff] }
 0x5e6   :  { %1104 = vmatpush.msra.mxu1 %v328_v45  ;;  %1124 = vmatpush.msrb.mxu2 %v329_v46  ;;  %v1325_v45 = vld [vmem:[#allocation10 + $0xe0] sm:$0xff]  ;;  %v1326_v46 = vld [vmem:[#allocation10 + $0xe8] sm:$0xff] }
 0x5e7   :  { %1144 = vmatpush.msrb.mxu3 %v330_v48  ;;  %1164 = vmatpush.msrb.mxu0 %v331_v49  ;;  %v1303_v48 = vld [vmem:[#allocation8 + $0xb8] sm:$0xff]  ;;  %v1323_v49 = vld [vmem:[#allocation10 + $0xd0] sm:$0xff] }
 0x5e8   :  { %1177 = vmatpush.msrb.mxu1 %v388_v51  ;;  %1197 = vmatpush.msra.mxu2 %v389_v52  ;;  %v1324_v51 = vld [vmem:[#allocation10 + $0xd8] sm:$0xff]  ;;  %v1300_v52 = vld [vmem:[#allocation8 + $0xa0] sm:$0xff] }
 0x5e9   :  { %1217 = vmatpush.msra.mxu3 %v390_v33  ;;  %1237 = vmatpush.msra.mxu0 %v391_v53  ;;  %v1301_v33 = vld [vmem:[#allocation8 + $0xa8] sm:$0xff]  ;;  %v1321_v53 = vld [vmem:[#allocation10 + $0xc0] sm:$0xff] }
 0x5ea   :  { %5935 = vmatmul.msk.f32.vlgmr.msra.gmra.mxu1 %vm276_vm3, %v7108_v58  ;;  %5936 = vmatmul.msk.f32.vlgmr.msrb.gmra.mxu2 %vm276_vm3, %v7108_v58 }
 0x5eb   :  { %5937 = vmatmul.msk.f32.vlgmr.msrb.gmra.mxu3 %vm276_vm3, %v7108_v58  ;;  %5938 = vmatmul.msk.f32.vlgmr.msrb.gmra.mxu0 %vm276_vm3, %v7108_v58 }
 0x5ec   :  { %1178 = vmatpush.msrb.mxu1 %v380_v60  ;;  %1198 = vmatpush.msra.mxu2 %v381_v59  ;;  %v1319_v60 = vld [vmem:[#allocation10 + $0xb0] sm:$0xff]  ;;  %v1320_v59 = vld [vmem:[#allocation10 + $0xb8] sm:$0xff] }
 0x5ed   :  { %1218 = vmatpush.msra.mxu3 %v382_v34  ;;  %1238 = vmatpush.msra.mxu0 %v383_v0  ;;  %v1296_v34 = vld [vmem:[#allocation8 + $0x80] sm:$0xff]  ;;  %v1297_v0 = vld [vmem:[#allocation8 + $0x88] sm:$0xff] }
 0x5ee   :  { %1179 = vmatpush.msrb.mxu1 %v372_v2  ;;  %1199 = vmatpush.msra.mxu2 %v373_v3  ;;  %v1317_v2 = vld [vmem:[#allocation10 + $0xa0] sm:$0xff] }
 0x5ef   :  { %1219 = vmatpush.msra.mxu3 %v374_v4  ;;  %1239 = vmatpush.msra.mxu0 %v375_v5  ;;  %v1318_v4 = vld [vmem:[#allocation10 + $0xa8] sm:$0xff]  ;;  %v1315_v5 = vld [vmem:[#allocation10 + $0x90] sm:$0xff] }
 0x5f0   :  { %1180 = vmatpush.msrb.mxu1 %v364_v6  ;;  %1200 = vmatpush.msra.mxu2 %v365_v7  ;;  %v1316_v6 = vld [vmem:[#allocation10 + $0x98] sm:$0xff] }
 0x5f1   :  { %1220 = vmatpush.msra.mxu3 %v366_v8  ;;  %1240 = vmatpush.msra.mxu0 %v367_v9  ;;  %v1313_v8 = vld [vmem:[#allocation10 + $0x80] sm:$0xff]  ;;  %v1314_v9 = vld [vmem:[#allocation10 + $0x88] sm:$0xff] }
 0x5f2   :  { %1181 = vmatpush.msrb.mxu1 %v356_v10  ;;  %1201 = vmatpush.msra.mxu2 %v357_v12  ;;  %v5970_v12 = vld [vmem:[%s8729_s9 + $0x178] sm:$0xff] }
 0x5f3   :  { %1221 = vmatpush.msra.mxu3 %v358_v13  ;;  %1241 = vmatpush.msra.mxu0 %v359_v14  ;;  %v5969_v13 = vld [vmem:[%s8729_s9 + $0x170] sm:$0xff] }
 0x5f4   :  { %1182 = vmatpush.msrb.mxu1 %v348_v15  ;;  %1202 = vmatpush.msra.mxu2 %v349_v16  ;;  %v5986_v15 = vld [vmem:[%s8729_s9 + $0x1f8] sm:$0xff]  ;;  %v5968_v16 = vld [vmem:[%s8729_s9 + $0x168] sm:$0xff] }
 0x5f5   :  { %1222 = vmatpush.msra.mxu3 %v350_v17  ;;  %1242 = vmatpush.msra.mxu0 %v351_v18  ;;  %v5985_v17 = vld [vmem:[%s8729_s9 + $0x1f0] sm:$0xff]  ;;  %v5984_v18 = vld [vmem:[%s8729_s9 + $0x1e8] sm:$0xff] }
 0x5f6   :  { %1183 = vmatpush.msrb.mxu1 %v340_v19  ;;  %1203 = vmatpush.msra.mxu2 %v341_v20  ;;  %v5967_v19 = vld [vmem:[%s8729_s9 + $0x160] sm:$0xff] }
 0x5f7   :  { %1223 = vmatpush.msra.mxu3 %v342_v21  ;;  %1243 = vmatpush.msra.mxu0 %v343_v22  ;;  %v5983_v20 = vld [vmem:[%s8729_s9 + $0x1e0] sm:$0xff]  ;;  %v5966_v21 = vld [vmem:[%s8729_s9 + $0x158] sm:$0xff] }
 0x5f8   :  { %1184 = vmatpush.msrb.mxu1 %v332_v23  ;;  %1204 = vmatpush.msra.mxu2 %v333_v24  ;;  %v5982_v23 = vld [vmem:[%s8729_s9 + $0x1d8] sm:$0xff]  ;;  %v5965_v24 = vld [vmem:[%s8729_s9 + $0x150] sm:$0xff] }
 0x5f9   :  { %1224 = vmatpush.msra.mxu3 %v334_v25  ;;  %1244 = vmatpush.msra.mxu0 %v335_v29  ;;  %v5981_v29 = vld [vmem:[%s8729_s9 + $0x1d0] sm:$0xff] }
 0x5fa   :  { %5939 = vmatmul.msk.f32.vlgmr.msrb.gmra.mxu1 %vm276_vm3, %v7108_v58  ;;  %5940 = vmatmul.msk.f32.vlgmr.msra.gmra.mxu2 %vm276_vm3, %v7108_v58 }
 0x5fb   :  { %5941 = vmatmul.msk.f32.vlgmr.msra.gmra.mxu3 %vm276_vm3, %v7108_v58  ;;  %5942 = vmatmul.msk.f32.vlgmr.msra.gmra.mxu0 %vm276_vm3, %v7108_v58  ;;  %v1299_v58 = vld [vmem:[#allocation8 + $0x98] sm:$0xff] }
 0x5fc   :  { %1263 = vmatpush.msra.mxu1 %v7047_v61  ;;  %1286 = vmatpush.msrb.mxu2 %v7047_v61 }
 0x5fd   :  { %1395 = vmatpush.msrb.mxu3 %v1310_v31  ;;  %1418 = vmatpush.msrb.mxu0 %v1311_v32  ;;  %v5964_v31 = vld [vmem:[%s8729_s9 + $0x148] sm:$0xff]  ;;  %v5963_v32 = vld [vmem:[%s8729_s9 + $0x140] sm:$0xff] }
 0x5fe   :  { %1264 = vmatpush.msra.mxu1 %v7032_v54  ;;  %1287 = vmatpush.msrb.mxu2 %v7032_v54 }
 0x5ff   :  { %1396 = vmatpush.msrb.mxu3 %v1308_v35  ;;  %1419 = vmatpush.msrb.mxu0 %v1309_v36  ;;  %v5962_v35 = vld [vmem:[%s8729_s9 + $0x138] sm:$0xff] }
 0x600   :  { %1343 = vmatpush.msrb.mxu1 %v1327_v41  ;;  %1366 = vmatpush.msra.mxu2 %v1328_v42 }
 0x601   :  { %1397 = vmatpush.msrb.mxu3 %v1306_v38  ;;  %1420 = vmatpush.msrb.mxu0 %v1307_v40 }
 0x602   :  { %5943 = vmatmul.msk.f32.vlgmr.msra.gmra.mxu1 %vm226_vm0, %v6857_v27  ;;  %5945 = vmatmul.msk.f32.vlgmr.msrb.gmra.mxu2 %vm226_vm0, %v7132_v1 }
 0x603   :  { %1398 = vmatpush.msrb.mxu3 %v1304_v43  ;;  %1421 = vmatpush.msrb.mxu0 %v1305_v56  ;;  %v5961_v43 = vld [vmem:[%s8729_s9 + $0x130] sm:$0xff]  ;;  %v5980_v56 = vld [vmem:[%s8729_s9 + $0x1c8] sm:$0xff] }
 0x604   :  { %1344 = vmatpush.msrb.mxu1 %v1325_v45  ;;  %1367 = vmatpush.msra.mxu2 %v1326_v46  ;;  %v5960_v45 = vld [vmem:[%s8729_s9 + $0x128] sm:$0xff]  ;;  %v5979_v46 = vld [vmem:[%s8729_s9 + $0x1c0] sm:$0xff] }
 0x605   :  { %1399 = vmatpush.msrb.mxu3 %v1302_v28  ;;  %1422 = vmatpush.msrb.mxu0 %v1303_v48  ;;  %v5959_v48 = vld [vmem:[%s8729_s9 + $0x120] sm:$0xff] }
 0x606   :  { %1345 = vmatpush.msrb.mxu1 %v1323_v49  ;;  %1368 = vmatpush.msra.mxu2 %v1324_v51  ;;  %v5978_v49 = vld [vmem:[%s8729_s9 + $0x1b8] sm:$0xff] }
 0x607   :  { %1400 = vmatpush.msrb.mxu3 %v1300_v52  ;;  %1423 = vmatpush.msrb.mxu0 %v1301_v33  ;;  %v5958_v52 = vld [vmem:[%s8729_s9 + $0x118] sm:$0xff]  ;;  %v5977_v33 = vld [vmem:[%s8729_s9 + $0x1b0] sm:$0xff] }
 0x608   :  { %1346 = vmatpush.msrb.mxu1 %v1321_v53  ;;  %1369 = vmatpush.msra.mxu2 %v1322_v26  ;;  %v5957_v53 = vld [vmem:[%s8729_s9 + $0x110] sm:$0xff]  ;;  %v5976_v26 = vld [vmem:[%s8729_s9 + $0x1a8] sm:$0xff] }
 0x609   :  { %1401 = vmatpush.msrb.mxu3 %v1298_v55  ;;  %1424 = vmatpush.msrb.mxu0 %v1299_v58  ;;  %v5956_v55 = vld [vmem:[%s8729_s9 + $0x108] sm:$0xff]  ;;  %v5975_v58 = vld [vmem:[%s8729_s9 + $0x1a0] sm:$0xff] }
 0x60a   :  { %5944 = vmatmul.msk.f32.gmra.mxu1 %vm226_vm0, %v6868_v37  ;;  %5946 = vmatmul.msk.f32.gmra.mxu2 %vm226_vm0, %v7138_v30 }
 0x60b   :  { %1347 = vmatpush.msrb.mxu1 %v1319_v60  ;;  %1370 = vmatpush.msra.mxu2 %v1320_v59  ;;  %v5955_v59 = vld [vmem:[%s8729_s9 + $0x100] sm:$0xff] }
 0x60c   :  { %1402 = vmatpush.msrb.mxu3 %v1296_v34  ;;  %1425 = vmatpush.msrb.mxu0 %v1297_v0  ;;  %v5974_v34 = vld [vmem:[%s8729_s9 + $0x198] sm:$0xff]  ;;  %v5973_v0 = vld [vmem:[%s8729_s9 + $0x190] sm:$0xff] }
 0x60d   :  { %1348 = vmatpush.msrb.mxu1 %v1317_v2  ;;  %1371 = vmatpush.msra.mxu2 %v1318_v4  ;;  %v5972_v4 = vld [vmem:[%s8729_s9 + $0x188] sm:$0xff] }
 0x60f   :  { %1349 = vmatpush.msrb.mxu1 %v1315_v5  ;;  %1372 = vmatpush.msra.mxu2 %v1316_v6  ;;  %v5971_v5 = vld [vmem:[%s8729_s9 + $0x180] sm:$0xff] }
 0x611   :  { %1350 = vmatpush.msrb.mxu1 %v1313_v8  ;;  %1373 = vmatpush.msra.mxu2 %v1314_v9 }
 0x613   :  { %1486 = vmatpush.msra.mxu1 %v5970_v12  ;;  %1509 = vmatpush.msrb.mxu2 %v5986_v15 }
 0x615   :  { %1487 = vmatpush.msra.mxu1 %v5969_v13  ;;  %1510 = vmatpush.msrb.mxu2 %v5985_v17  ;;  %v1434_v13 = vld [vmem:[#allocation11 + $0x2] sm:$0x3] }
 0x616   :  { %v1436_v15 = vperm.slane %v1434_v13, 0 }
 0x617   :  { %1488 = vmatpush.msra.mxu1 %v5968_v16  ;;  %1511 = vmatpush.msrb.mxu2 %v5984_v18 }
 0x619   :  { %1489 = vmatpush.msra.mxu1 %v5967_v19  ;;  %1512 = vmatpush.msrb.mxu2 %v5983_v20 }
 0x61b   :  { %1490 = vmatpush.msra.mxu1 %v5966_v21  ;;  %1513 = vmatpush.msrb.mxu2 %v5982_v23  ;;  %v1437_v23 = vperm.slane %v1434_v13, 1 }
 0x61d   :  { %1491 = vmatpush.msra.mxu1 %v5965_v24  ;;  %1514 = vmatpush.msrb.mxu2 %v5981_v29 }
 0x61f   :  { %1492 = vmatpush.msra.mxu1 %v5964_v31  ;;  %1515 = vmatpush.msrb.mxu2 %v5980_v56 }
 0x621   :  { %1493 = vmatpush.msra.mxu1 %v5963_v32  ;;  %1516 = vmatpush.msrb.mxu2 %v5979_v46 }
 0x623   :  { %1494 = vmatpush.msra.mxu1 %v5962_v35  ;;  %1517 = vmatpush.msrb.mxu2 %v5978_v49 }
 0x625   :  { %1495 = vmatpush.msra.mxu1 %v5961_v43  ;;  %1518 = vmatpush.msrb.mxu2 %v5977_v33  ;;  %v6405_v33 = vld [vmem:[#allocation13 + $0x1] ss:$0 sm:$0xff] }
 0x627   :  { %1496 = vmatpush.msra.mxu1 %v5960_v45  ;;  %1519 = vmatpush.msrb.mxu2 %v5976_v26 }
 0x629   :  { %1497 = vmatpush.msra.mxu1 %v5959_v48  ;;  %1520 = vmatpush.msrb.mxu2 %v5975_v58 }
 0x62b   :  { %1498 = vmatpush.msra.mxu1 %v5958_v52  ;;  %1521 = vmatpush.msrb.mxu2 %v5974_v34 }
 0x62d   :  { %1499 = vmatpush.msra.mxu1 %v5957_v53  ;;  %1522 = vmatpush.msrb.mxu2 %v5973_v0 }
 0x62f   :  { %1500 = vmatpush.msra.mxu1 %v5956_v55  ;;  %1523 = vmatpush.msrb.mxu2 %v5972_v4 }
 0x631   :  { %1501 = vmatpush.msra.mxu1 %v5955_v59  ;;  %1524 = vmatpush.msrb.mxu2 %v5971_v5 }
 0x651   :  { %v7142_v50 = vpop.f32.mrf.mxu1 }
 0x652   :  { %v7231_v51 = vpop.f32.mrf.mxu0 }
 0x657   :  { %v7144_v3 = vpop.f32.mrf.mxu2 }
 0x658   :  { %v7223_v28 = vpop.f32.mrf.mxu3 }
 0x65b   :  { %v7146_v7 = vpop.f32.mrf.mxu1 }
 0x65c   :  { %v7262_v2 = vpop.f32.mrf.mxu0 }
 0x65d   :  { %8753 = vst [vmem:[#allocation31_spill] sm:$0xff] %v7262_v2 }
 0x661   :  { %v7148_v10 = vpop.f32.mrf.mxu2 }
 0x662   :  { %v7251_v60 = vpop.f32.mrf.mxu3 }
 0x663   :  { %8752 = vst [vmem:[#allocation30_spill] sm:$0xff] %v7251_v60 }
 0x667   :  { %v7156_v14 = vpop.f32.mrf.mxu1 }
 0x668   :  { %v7272_v8 = vpop.f32.mrf.mxu0 }
 0x66d   :  { %v7179_v22 = vpop.f32.mrf.mxu2 }
 0x66e   :  { %v7270_v6 = vpop.f32.mrf.mxu3 }
 0x677   :  { %v7187_v25 = vpop.f32.mrf.mxu1 }
 0x678   :  { %v7276_v12 = vpop.f32.mrf.mxu0 }
 0x679   :  { %8755 = vst [vmem:[#allocation33_spill] sm:$0xff] %v7276_v12 }
 0x67d   :  { %v7201_v36 = vpop.f32.mrf.mxu2 }
 0x67e   :  { %v7274_v9 = vpop.f32.mrf.mxu3 }
 0x67f   :  { %v1266_v38 = vpop.f32.mrf.mxu1  ;;  %8754 = vst [vmem:[#allocation32_spill] sm:$0xff] %v7274_v9 }
 0x680   :  { %5951 = vmatmul.msk.f32.vlgmr.msrb.gmra.mxu3 %vm276_vm3, %v1266_v38  ;;  %5953 = vmatmul.msk.f32.vlgmr.msrb.gmra.mxu0 %vm276_vm3, %v1266_v38 }
 0x685   :  { %v1289_v40 = vpop.f32.mrf.mxu2 }
 0x686   :  { %5947 = vmatmul.msk.f32.vlgmr.msrb.gmra.mxu1 %vm276_vm3, %v1289_v40  ;;  %5949 = vmatmul.msk.f32.vlgmr.msra.gmra.mxu2 %vm276_vm3, %v1289_v40 }
 0x687   :  { %v1269_v41 = vpop.f32.mrf.mxu1 }
 0x688   :  { %5952 = vmatmul.msk.f32.gmra.mxu3 %vm276_vm3, %v1269_v41  ;;  %5954 = vmatmul.msk.f32.gmra.mxu0 %vm276_vm3, %v1269_v41 }
 0x68d   :  { %v1292_v42 = vpop.f32.mrf.mxu2 }
 0x68e   :  { %5948 = vmatmul.msk.f32.gmra.mxu1 %vm276_vm3, %v1292_v42  ;;  %5950 = vmatmul.msk.f32.gmra.mxu2 %vm276_vm3, %v1292_v42 }
 0x6fd   :  { %v1427_v20 = vpop.f32.mrf.mxu0 }
 0x703   :  { %v1352_v16 = vpop.f32.mrf.mxu1  ;;  %v1404_v17 = vpop.f32.mrf.mxu3 }
 0x704   :  { %v1405_v18 = vadd.f32 %v1404_v17, %v1352_v16 }
 0x705   :  { %v1430_v43 = vpop.f32.mrf.mxu0 }
 0x706   :  { %v1440_v19 = vadd.f32 %v1436_v15, %v1405_v18 }
 0x708   :  { %v1444_v21 = vmax.f32 %v1440_v19, 0.0 }
 0x709   :  { %v1375_v24 = vpop.f32.mrf.mxu2 }
 0x70a   :  { %v1428_v29 = vadd.f32 %v1427_v20, %v1375_v24  ;;  %1502 = vmatmul.f32.vlgmr.msra.gmra.mxu1 %v1444_v21 }
 0x70b   :  { %v1355_v31 = vpop.f32.mrf.mxu1  ;;  %v1407_v32 = vpop.f32.mrf.mxu3 }
 0x70c   :  { %v1441_v35 = vadd.f32 %v1437_v23, %v1428_v29  ;;  %v1408_v38 = vadd.f32 %v1407_v32, %v1355_v31 }
 0x70e   :  { %v1445_v40 = vmax.f32 %v1441_v35, 0.0  ;;  %v1442_v41 = vadd.f32 %v1436_v15, %v1408_v38 }
 0x710   :  { %1525 = vmatmul.f32.vlgmr.msrb.gmra.mxu2 %v1445_v40  ;;  %v1446_v42 = vmax.f32 %v1442_v41, 0.0 }
 0x711   :  { %v1378_v56 = vpop.f32.mrf.mxu2 }
 0x712   :  { %v1431_v45 = vadd.f32 %v1430_v43, %v1378_v56  ;;  %1505 = vmatmul.f32.gmra.mxu1 %v1446_v42 }
 0x714   :  { %v1443_v46 = vadd.f32 %v1437_v23, %v1431_v45 }
 0x716   :  { %v1447_v48 = vmax.f32 %v1443_v46, 0.0  ;;  %v7300_v46 = vld [vmem:[%s8723_s3] sm:$0xff] }
 0x718   :  { %1528 = vmatmul.f32.gmra.mxu2 %v1447_v48  ;;  %v7307_v48 = vld [vmem:[%s8723_s3 + $0x8] sm:$0xff] }
 0x787   :  { %v1503_v49 = vpop.f32.mrf.mxu1 }
 0x788   :  { %v1504_v26 = vadd.f32 %v6405_v33, %v1503_v49 }
 0x78f   :  { %v1506_v53 = vpop.f32.mrf.mxu1 }
 0x790   :  { %v1507_v55 = vadd.f32 %v6405_v33, %v1506_v53  ;;  %v1722_v33 = vld [vmem:[#allocation14 + $0x5c0] sm:$0xff]  ;;  %v1723_v53 = vld [vmem:[#allocation14 + $0x5c8] sm:$0xff] }
 0x793   :  { %v1526_v52 = vpop.f32.mrf.mxu2 }
 0x794   :  { %v7278_v58 = vadd.f32 %v1526_v52, %v1504_v26  ;;  %v1714_v26 = vld [vmem:[#allocation14 + $0x580] sm:$0xff] }
 0x796   :  { %v1532_v0 = vmul.f32 %v7278_v58, %v7278_v58 }
 0x79b   :  { %v1529_v59 = vpop.f32.mrf.mxu2 }
 0x79c   :  { %v7280_v34 = vadd.f32 %v1529_v59, %v1507_v55  ;;  %v1715_v55 = vld [vmem:[#allocation14 + $0x588] sm:$0xff]  ;;  %v1706_v59 = vld [vmem:[#allocation14 + $0x540] sm:$0xff] }
 0x79e   :  { %v1533_v4 = vmul.f32 %v7280_v34, %v7280_v34 }
 0x7a0   :  { %v6368_v5 = vpack.i.bf16 %v1532_v0, %v1533_v4  ;;  %v1707_v0 = vld [vmem:[#allocation14 + $0x548] sm:$0xff]  ;;  %v1698_v4 = vld [vmem:[#allocation14 + $0x500] sm:$0xff] }
 0x7a2   :  { %6369 = vrot.lane.b32.xlu0 %v6368_v5, %s6706_s27  ;;  %v1699_v5 = vld [vmem:[#allocation14 + $0x508] sm:$0xff] }
 0x814   :  { %v6370_v13 = vpop.permute.xlu0 %6369 }
 0x815   :  { %v6372_v15 = vunpack.i.h.bf16 %v6370_v13  ;;  %v6371_v16 = vunpack.i.l.bf16 %v6370_v13  ;;  %v1690_v13 = vld [vmem:[#allocation14 + $0x4c0] sm:$0xff] }
 0x817   :  { %v1543_v17 = vsel %vm276_vm3, %v7280_v34, %v6371_v16  ;;  %v1542_v18 = vsel %vm276_vm3, %v7278_v58, %v6372_v15  ;;  %v1691_v15 = vld [vmem:[#allocation14 + $0x4c8] sm:$0xff]  ;;  %v1724_v16 = vld [vmem:[#allocation14 + $0x5d0] sm:$0xff] }
 0x818   :  { %1558 = vmatpush.msra.mxu3 %v1543_v17  ;;  %v1725_v17 = vld [vmem:[#allocation14 + $0x5d8] sm:$0xff]  ;;  %1781 = vmatpush.msrb.mxu1 %v1724_v16  ;;  %v1668_v16 = vld [vmem:[#allocation14 + $0x410] sm:$0xff] }
 0x819   :  { %1801 = vmatpush.msra.mxu2 %v1725_v17  ;;  %v1669_v17 = vld [vmem:[#allocation14 + $0x418] sm:$0xff] }
 0x81a   :  { %1559 = vmatpush.msra.mxu3 %v1542_v18  ;;  %v1682_v18 = vld [vmem:[#allocation14 + $0x480] sm:$0xff] }
 0x81b   :  { %5987 = vmatmul.msk.f32.vlgmr.msra.gmra.mxu3 %vm226_vm0, %v6998_v11 }
 0x81c   :  { %1741 = vmatpush.msrb.mxu3 %v1722_v33  ;;  %v1719_v33 = vld [vmem:[#allocation14 + $0x5a8] sm:$0xff] }
 0x81e   :  { %1742 = vmatpush.msrb.mxu3 %v1714_v26  ;;  %v1685_v26 = vld [vmem:[#allocation14 + $0x498] sm:$0xff] }
 0x820   :  { %1743 = vmatpush.msrb.mxu3 %v1706_v59  ;;  %v1711_v59 = vld [vmem:[#allocation14 + $0x568] sm:$0xff] }
 0x822   :  { %1744 = vmatpush.msrb.mxu3 %v1698_v4 }
 0x824   :  { %1745 = vmatpush.msrb.mxu3 %v1690_v13  ;;  %v1702_v13 = vld [vmem:[#allocation14 + $0x520] sm:$0xff] }
 0x826   :  { %1746 = vmatpush.msrb.mxu3 %v1682_v18  ;;  %v1694_v18 = vld [vmem:[#allocation14 + $0x4e0] sm:$0xff] }
 0x89e   :  { %v1561_v19 = vpop.f32.mrf.mxu3 }
 0x89f   :  { %v1564_v20 = vmul.f32 %v1561_v19, %v1561_v19 }
 0x8a1   :  { %1566 = vrot.lane.b32.xlu2 %v1564_v20, %s6706_s27  ;;  %v1716_v20 = vld [vmem:[#allocation14 + $0x590] sm:$0xff] }
 0x8a2   :  { %1782 = vmatpush.msrb.mxu1 %v1716_v20  ;;  %v1695_v20 = vld [vmem:[#allocation14 + $0x4e8] sm:$0xff] }
 0x8fb   :  { %v1567_v21 = vpop.permute.xlu2 %1566 }
 0x8fc   :  { %v1569_v23 = vsub.f32 %v1561_v19, %v1567_v21  ;;  %v1717_v21 = vld [vmem:[#allocation14 + $0x598] sm:$0xff] }
 0x8fd   :  { %1802 = vmatpush.msra.mxu2 %v1717_v21  ;;  %v1728_v21 = vld [vmem:[#allocation14 + $0x5f0] sm:$0xff] }
 0x8fe   :  { %v1570_v24 = vmax.f32 %v1569_v23, 0.0  ;;  %v1674_v23 = vld [vmem:[#allocation14 + $0x440] sm:$0xff] }
 0x8ff   :  { %1747 = vmatpush.msrb.mxu3 %v1674_v23  ;;  %v1729_v23 = vld [vmem:[#allocation14 + $0x5f8] sm:$0xff] }
 0x900   :  { %v1571_v29 = vadd.f32 1e-05, %v1570_v24  ;;  %v1675_v24 = vld [vmem:[#allocation14 + $0x448] sm:$0xff] }
 0x902   :  { %6415 = vrsqrt.f32 %v1571_v29  ;;  %vm1578_vm6 = vweird.f32 %v1571_v29 }
 0x908   :  { %v6416_v31 = vpop.eup %6415 }
 0x909   :  { %v1573_v32 = vmul.f32 %v6416_v31, %v1571_v29  ;;  %vm1579_vm5 = vweird.f32 %v6416_v31  ;;  %v1708_v29 = vld [vmem:[#allocation14 + $0x550] sm:$0xff] }
 0x90a   :  { %vm1580_vm7 = vmor %vm1578_vm6, %vm1579_vm5  ;;  %1783 = vmatpush.msrb.mxu1 %v1708_v29  ;;  %v1687_v29 = vld [vmem:[#allocation14 + $0x4a8] sm:$0xff] }
 0x90b   :  { %v1574_v35 = vmul.f32 %v6416_v31, %v1573_v32  ;;  %v1666_v32 = vld [vmem:[#allocation14 + $0x400] sm:$0xff] }
 0x90c   :  { %1748 = vmatpush.msrb.mxu3 %v1666_v32  ;;  %v1721_v32 = vld [vmem:[#allocation14 + $0x5b8] sm:$0xff] }
 0x90d   :  { %v1575_v38 = vmul.f32 0.5, %v1574_v35  ;;  %v1667_v35 = vld [vmem:[#allocation14 + $0x408] sm:$0xff] }
 0x90f   :  { %v1576_v40 = vsub.f32 1.5, %v1575_v38  ;;  %v1700_v38 = vld [vmem:[#allocation14 + $0x510] sm:$0xff] }
 0x910   :  { %1784 = vmatpush.msrb.mxu1 %v1700_v38 }
 0x911   :  { %v1577_v41 = vmul.f32 %v6416_v31, %v1576_v40  ;;  %v1701_v40 = vld [vmem:[#allocation14 + $0x518] sm:$0xff] }
 0x913   :  { %v1581_v42 = vsel %vm1580_vm7, %v6416_v31, %v1577_v41  ;;  %v1709_v31 = vld [vmem:[#allocation14 + $0x558] sm:$0xff]  ;;  %v1726_v41 = vld [vmem:[#allocation14 + $0x5e0] sm:$0xff] }
 0x914   :  { %1583 = vrot.lane.b32.xlu0 %v1581_v42, %s6706_s27  ;;  %1803 = vmatpush.msra.mxu2 %v1709_v31  ;;  %v1720_v31 = vld [vmem:[#allocation14 + $0x5b0] sm:$0xff] }
 0x915   :  { %1821 = vmatpush.msra.mxu3 %v1726_v41  ;;  %v1713_v41 = vld [vmem:[#allocation14 + $0x578] sm:$0xff] }
 0x916   :  { %1804 = vmatpush.msra.mxu2 %v1701_v40  ;;  %v1712_v40 = vld [vmem:[#allocation14 + $0x570] sm:$0xff] }
 0x986   :  { %v1584_v43 = vpop.permute.xlu0 %1583 }
 0x987   :  { %v1586_v56 = vmul.f32 %v1584_v43, %v1561_v19  ;;  %v1683_v19 = vld [vmem:[#allocation14 + $0x488] sm:$0xff]  ;;  %v1692_v43 = vld [vmem:[#allocation14 + $0x4d0] sm:$0xff] }
 0x988   :  { %1785 = vmatpush.msrb.mxu1 %v1692_v43  ;;  %v1671_v43 = vld [vmem:[#allocation14 + $0x428] sm:$0xff] }
 0x989   :  { %v1587_v45 = vsel %vm276_vm3, %v1586_v56, %v1581_v42  ;;  %v1727_v42 = vld [vmem:[#allocation14 + $0x5e8] sm:$0xff]  ;;  %v1693_v56 = vld [vmem:[#allocation14 + $0x4d8] sm:$0xff] }
 0x98a   :  { %5988 = vmatpush.msk.msra.mxu0 %vm780_vm9, %v1587_v45  ;;  %v1718_v45 = vld [vmem:[#allocation14 + $0x5a0] sm:$0xff]  ;;  %1805 = vmatpush.msra.mxu2 %v1693_v56  ;;  %v1704_v56 = vld [vmem:[#allocation14 + $0x530] sm:$0xff] }
 0x98b   :  { %5989 = vmatmul.msk.f32.vlgmr.msra.gmra.mxu0 %vm773_vm10, %v7300_v46  ;;  %1822 = vmatpush.msra.mxu3 %v1718_v45  ;;  %v1705_v45 = vld [vmem:[#allocation14 + $0x538] sm:$0xff] }
 0x98c   :  { %1761 = vmatpush.msrb.mxu0 %v1723_v53  ;;  %v1684_v53 = vld [vmem:[#allocation14 + $0x490] sm:$0xff]  ;;  %1806 = vmatpush.msra.mxu2 %v1685_v26 }
 0x98d   :  { %1786 = vmatpush.msrb.mxu1 %v1684_v53  ;;  %v1697_v53 = vld [vmem:[#allocation14 + $0x4f8] sm:$0xff]  ;;  %v1688_v26 = vld [vmem:[#allocation14 + $0x4b0] sm:$0xff] }
 0x98e   :  { %1762 = vmatpush.msrb.mxu0 %v1715_v55  ;;  %v1710_v55 = vld [vmem:[#allocation14 + $0x560] sm:$0xff] }
 0x98f   :  { %1823 = vmatpush.msra.mxu3 %v1710_v55 }
 0x990   :  { %1763 = vmatpush.msrb.mxu0 %v1707_v0  ;;  %v1676_v0 = vld [vmem:[#allocation14 + $0x450] sm:$0xff] }
 0x991   :  { %1787 = vmatpush.msrb.mxu1 %v1676_v0  ;;  %1824 = vmatpush.msra.mxu3 %v1702_v13  ;;  %v1681_v13 = vld [vmem:[#allocation14 + $0x478] sm:$0xff] }
 0x992   :  { %1764 = vmatpush.msrb.mxu0 %v1699_v5  ;;  %v1677_v5 = vld [vmem:[#allocation14 + $0x458] sm:$0xff] }
 0x993   :  { %5990 = vmatmul.msk.f32.gmra.mxu0 %vm773_vm10, %v7307_v48  ;;  %1807 = vmatpush.msra.mxu2 %v1677_v5  ;;  %v1680_v5 = vld [vmem:[#allocation14 + $0x470] sm:$0xff] }
 0x994   :  { %1765 = vmatpush.msrb.mxu0 %v1691_v15  ;;  %v1703_v15 = vld [vmem:[#allocation14 + $0x528] sm:$0xff]  ;;  %1788 = vmatpush.msrb.mxu1 %v1668_v16  ;;  %v1673_v16 = vld [vmem:[#allocation14 + $0x438] sm:$0xff] }
 0x995   :  { %1808 = vmatpush.msra.mxu2 %v1669_v17  ;;  %1825 = vmatpush.msra.mxu3 %v1694_v18 }
 0x996   :  { %1766 = vmatpush.msrb.mxu0 %v1683_v19  ;;  %1861 = vmatpush.msra.mxu1 %v1728_v21 }
 0x997   :  { %1881 = vmatpush.msrb.mxu2 %v1729_v23 }
 0x998   :  { %1767 = vmatpush.msrb.mxu0 %v1675_v24  ;;  %v1686_v24 = vld [vmem:[#allocation14 + $0x4a0] sm:$0xff]  ;;  %1862 = vmatpush.msra.mxu1 %v1720_v31 }
 0x999   :  { %1826 = vmatpush.msra.mxu3 %v1686_v24  ;;  %1882 = vmatpush.msrb.mxu2 %v1721_v32 }
 0x99a   :  { %1768 = vmatpush.msrb.mxu0 %v1667_v35  ;;  %v1678_v35 = vld [vmem:[#allocation14 + $0x460] sm:$0xff]  ;;  %1863 = vmatpush.msra.mxu1 %v1712_v40 }
 0x99b   :  { %1827 = vmatpush.msra.mxu3 %v1678_v35  ;;  %1883 = vmatpush.msrb.mxu2 %v1713_v41 }
 0x99c   :  { %1841 = vmatpush.msra.mxu0 %v1727_v42  ;;  %v1670_v42 = vld [vmem:[#allocation14 + $0x420] sm:$0xff]  ;;  %1864 = vmatpush.msra.mxu1 %v1704_v56 }
 0x99d   :  { %1828 = vmatpush.msra.mxu3 %v1670_v42  ;;  %1884 = vmatpush.msrb.mxu2 %v1705_v45 }
 0x99e   :  { %1842 = vmatpush.msra.mxu0 %v1719_v33 }
 0x99f   :  { %1885 = vmatpush.msrb.mxu2 %v1697_v53 }
 0x9a0   :  { %1843 = vmatpush.msra.mxu0 %v1711_v59  ;;  %v1689_v59 = vld [vmem:[#allocation14 + $0x4b8] sm:$0xff] }
 0x9a1   :  { %1886 = vmatpush.msrb.mxu2 %v1689_v59 }
 0x9a2   :  { %1844 = vmatpush.msra.mxu0 %v1703_v15  ;;  %v1672_v15 = vld [vmem:[#allocation14 + $0x430] sm:$0xff] }
 0x9a3   :  { %1887 = vmatpush.msrb.mxu2 %v1681_v13 }
 0x9a4   :  { %1845 = vmatpush.msra.mxu0 %v1695_v20 }
 0x9a5   :  { %1888 = vmatpush.msrb.mxu2 %v1673_v16 }
 0x9a6   :  { %1846 = vmatpush.msra.mxu0 %v1687_v29 }
 0xa08   :  { %v7311_v49 = vpop.f32.mrf.mxu0 }
 0xa09   :  { %1616 = vrot.lane.b32.xlu2 %v7311_v49, %s6706_s27 }
 0xa10   :  { %v7315_v52 = vpop.f32.mrf.mxu0 }
 0xa11   :  { %1618 = vrot.lane.b32.xlu0 %v7315_v52, %s6706_s27 }
 0xa63   :  { %v1617_v4 = vpop.permute.xlu2 %1616 }
 0xa64   :  { %v1622_v19 = vmul.f32 %v1617_v4, %v7278_v58  ;;  %v1679_v58 = vld [vmem:[#allocation14 + $0x468] sm:$0xff] }
 0xa65   :  { %1847 = vmatpush.msra.mxu0 %v1679_v58 }
 0xa66   :  { %v1624_v38 = vsub.f32 %v1622_v19, %v7311_v49  ;;  %v1696_v49 = vld [vmem:[#allocation14 + $0x4f0] sm:$0xff] }
 0xa67   :  { %1848 = vmatpush.msra.mxu0 %v1671_v43  ;;  %1865 = vmatpush.msra.mxu1 %v1696_v49 }
 0xa68   :  { %v1626_v33 = vadd.f32 %v1624_v38, %v7032_v54 }
 0xa69   :  { %1866 = vmatpush.msra.mxu1 %v1688_v26 }
 0xa6a   :  { %v7322_v0 = vmax.f32 %v1626_v33, 0.0 }
 0xa6b   :  { %1867 = vmatpush.msra.mxu1 %v1680_v5 }
 0xa6c   :  { %v1630_v17 = vsel %vm272_vm12, %v7322_v0, -1e+30  ;;  %v1641_v18 = vsel %vm292_vm13, %v7322_v0, -1e+30 }
 0xa6d   :  { %1868 = vmatpush.msra.mxu1 %v1672_v15  ;;  %v1632_v20 = vsel %vm276_vm3, %v1630_v17, -inf  ;;  %v1643_v21 = vsel %vm276_vm3, %v1641_v18, -inf }
 0xa83   :  { %v1619_v55 = vpop.permute.xlu0 %1618 }
 0xa84   :  { %v1623_v4 = vmul.f32 %v1619_v55, %v7280_v34 }
 0xa86   :  { %v1625_v54 = vsub.f32 %v1623_v4, %v7315_v52  ;;  %v1652_v52 = vsel %vm311_vm11, %v7322_v0, -1e+30 }
 0xa87   :  { %v1654_v29 = vsel %vm276_vm3, %v1652_v52, -inf  ;;  %v1979_v52 = vld [vmem:[#allocation10 + $0x170] sm:$0xff] }
 0xa88   :  { %v1627_v34 = vadd.f32 %v1625_v54, %v7047_v61 }
 0xa8a   :  { %v7336_v19 = vmax.f32 %v1627_v34, 0.0 }
 0xa8c   :  { %v1631_v23 = vsel %vm273_vm14, %v7336_v19, -1e+30  ;;  %v1642_v61 = vsel %vm293_vm1, %v7336_v19, -1e+30  ;;  %v1653_v24 = vsel %vm312_vm15, %v7336_v19, -1e+30 }
 0xa8d   :  { %v1633_v31 = vsel %vm276_vm3, %v1631_v23, -inf  ;;  %v1644_v32 = vsel %vm276_vm3, %v1642_v61, -inf  ;;  %v1655_v35 = vsel %vm276_vm3, %v1653_v24, -inf  ;;  %v1978_v23 = vld [vmem:[#allocation10 + $0x168] sm:$0xff]  ;;  %v1975_v61 = vld [vmem:[#allocation10 + $0x150] sm:$0xff]  ;;  %v1976_v24 = vld [vmem:[#allocation10 + $0x158] sm:$0xff] }
 0xa8e   :  { %v1634_v38 = vmax.f32 %v1632_v20, %v1633_v31  ;;  %v1645_v58 = vmax.f32 %v1643_v21, %v1644_v32  ;;  %v1656_v40 = vmax.f32 %v1654_v29, %v1655_v35  ;;  %v1980_v20 = vld [vmem:[#allocation10 + $0x178] sm:$0xff]  ;;  %v1977_v21 = vld [vmem:[#allocation10 + $0x160] sm:$0xff]  ;;  %v1962_v31 = vld [vmem:[#allocation8 + $0x170] sm:$0xff] }
 0xa8f   :  { %v1973_v29 = vld [vmem:[#allocation10 + $0x140] sm:$0xff]  ;;  %v1963_v32 = vld [vmem:[#allocation8 + $0x178] sm:$0xff]  ;;  %v1971_v35 = vld [vmem:[#allocation10 + $0x130] sm:$0xff] }
 0xa90   :  { %v1635_v41 = vrot.slane %v1634_v38, 4  ;;  %v1646_v42 = vrot.slane %v1645_v58, 4  ;;  %v1657_v43 = vrot.slane %v1656_v40, 4 }
 0xa92   :  { %v1636_v56 = vmax.f32 %v1634_v38, %v1635_v41  ;;  %v1647_v45 = vmax.f32 %v1645_v58, %v1646_v42  ;;  %v1658_v33 = vmax.f32 %v1656_v40, %v1657_v43  ;;  %v1960_v38 = vld [vmem:[#allocation8 + $0x160] sm:$0xff]  ;;  %v1961_v58 = vld [vmem:[#allocation8 + $0x168] sm:$0xff]  ;;  %v1958_v42 = vld [vmem:[#allocation8 + $0x150] sm:$0xff] }
 0xa93   :  { %v1969_v40 = vld [vmem:[#allocation10 + $0x120] sm:$0xff]  ;;  %v1970_v41 = vld [vmem:[#allocation10 + $0x128] sm:$0xff]  ;;  %v1959_v43 = vld [vmem:[#allocation8 + $0x158] sm:$0xff] }
 0xa94   :  { %v1637_v49 = vrot.slane %v1636_v56, 2  ;;  %v1648_v53 = vrot.slane %v1647_v45, 2  ;;  %v1659_v26 = vrot.slane %v1658_v33, 2 }
 0xa96   :  { %v1638_v55 = vmax.f32 %v1636_v56, %v1637_v49  ;;  %v1649_v59 = vmax.f32 %v1647_v45, %v1648_v53  ;;  %v1660_v4 = vmax.f32 %v1658_v33, %v1659_v26  ;;  %v1967_v56 = vld [vmem:[#allocation10 + $0x110] sm:$0xff]  ;;  %v1968_v45 = vld [vmem:[#allocation10 + $0x118] sm:$0xff]  ;;  %v1956_v33 = vld [vmem:[#allocation8 + $0x140] sm:$0xff] }
 0xa97   :  { %v1957_v49 = vld [vmem:[#allocation8 + $0x148] sm:$0xff]  ;;  %v1965_v53 = vld [vmem:[#allocation10 + $0x100] sm:$0xff] }
 0xa98   :  { %v1639_v5 = vrot.slane %v1638_v55, 1  ;;  %v1650_v13 = vrot.slane %v1649_v59, 1  ;;  %v1661_v54 = vrot.slane %v1660_v4, 1  ;;  %v1966_v26 = vld [vmem:[#allocation10 + $0x108] sm:$0xff] }
 0xa9a   :  { %v1640_v15 = vmax.f32 %v1638_v55, %v1639_v5  ;;  %v1651_v16 = vmax.f32 %v1649_v59, %v1650_v13  ;;  %v1662_v17 = vmax.f32 %v1660_v4, %v1661_v54  ;;  %v1954_v55 = vld [vmem:[#allocation8 + $0x130] sm:$0xff]  ;;  %v1955_v59 = vld [vmem:[#allocation8 + $0x138] sm:$0xff]  ;;  %v1952_v4 = vld [vmem:[#allocation8 + $0x120] sm:$0xff] }
 0xa9b   :  { %v1953_v5 = vld [vmem:[#allocation8 + $0x128] sm:$0xff]  ;;  %v1950_v13 = vld [vmem:[#allocation8 + $0x110] sm:$0xff]  ;;  %v1951_v54 = vld [vmem:[#allocation8 + $0x118] sm:$0xff] }
 0xa9c   :  { %v1663_v18 = vsel %vm324_vm2, %v1640_v15, %v1651_v16  ;;  %v1948_v15 = vld [vmem:[#allocation8 + $0x100] sm:$0xff]  ;;  %v1949_v16 = vld [vmem:[#allocation8 + $0x108] sm:$0xff] }
 0xa9d   :  { %v1664_v34 = vsel %vm326_vm4, %v1663_v18, %v1662_v17  ;;  %v6026_v17 = vld [vmem:[%s8729_s9 + $0x278] sm:$0xff]  ;;  %v6025_v18 = vld [vmem:[%s8729_s9 + $0x270] sm:$0xff] }
 0xa9e   :  { %5991 = vmatmul.msk.f32.vlgmr.msrb.gmra.mxu3 %vm276_vm3, %v1664_v34  ;;  %5992 = vmatmul.msk.f32.vlgmr.msrb.gmra.mxu0 %vm276_vm3, %v1664_v34 }
 0xa9f   :  { %5993 = vmatmul.msk.f32.vlgmr.msrb.gmra.mxu1 %vm276_vm3, %v1664_v34  ;;  %5994 = vmatmul.msk.f32.vlgmr.msra.gmra.mxu2 %vm276_vm3, %v1664_v34 }
 0xaa0   :  { %1915 = vmatpush.msrb.mxu3 %v7336_v19  ;;  %1938 = vmatpush.msrb.mxu0 %v7336_v19 }
 0xaa1   :  { %2047 = vmatpush.msrb.mxu1 %v1962_v31  ;;  %2070 = vmatpush.msra.mxu2 %v1963_v32  ;;  %v6038_v31 = vld [vmem:[%s8729_s9 + $0x2d8] sm:$0xff]  ;;  %v6021_v32 = vld [vmem:[%s8729_s9 + $0x250] sm:$0xff] }
 0xaa2   :  { %1916 = vmatpush.msrb.mxu3 %v7322_v0  ;;  %1939 = vmatpush.msrb.mxu0 %v7322_v0 }
 0xaa3   :  { %2048 = vmatpush.msrb.mxu1 %v1960_v38  ;;  %2071 = vmatpush.msra.mxu2 %v1961_v58  ;;  %v6020_v38 = vld [vmem:[%s8729_s9 + $0x248] sm:$0xff]  ;;  %v6019_v58 = vld [vmem:[%s8729_s9 + $0x240] sm:$0xff] }
 0xaa5   :  { %2049 = vmatpush.msrb.mxu1 %v1958_v42  ;;  %2072 = vmatpush.msra.mxu2 %v1959_v43 }
 0xaa6   :  { %5995 = vmatmul.msk.f32.vlgmr.msra.gmra.mxu3 %vm276_vm3, %v1664_v34  ;;  %5996 = vmatmul.msk.f32.vlgmr.msra.gmra.mxu0 %vm276_vm3, %v1664_v34 }
 0xaa7   :  { %5997 = vmatmul.msk.f32.vlgmr.msra.gmra.mxu1 %vm276_vm3, %v1664_v34  ;;  %5998 = vmatmul.msk.f32.vlgmr.msrb.gmra.mxu2 %vm276_vm3, %v1664_v34 }
 0xaa8   :  { %1995 = vmatpush.msra.mxu3 %v1979_v52  ;;  %2018 = vmatpush.msra.mxu0 %v1980_v20  ;;  %v6042_v52 = vld [vmem:[%s8729_s9 + $0x2f8] sm:$0xff]  ;;  %v6024_v20 = vld [vmem:[%s8729_s9 + $0x268] sm:$0xff] }
 0xaa9   :  { %2050 = vmatpush.msrb.mxu1 %v1956_v33  ;;  %2073 = vmatpush.msra.mxu2 %v1957_v49  ;;  %v6017_v33 = vld [vmem:[%s8729_s9 + $0x230] sm:$0xff]  ;;  %v6036_v49 = vld [vmem:[%s8729_s9 + $0x2c8] sm:$0xff] }
 0xaaa   :  { %1996 = vmatpush.msra.mxu3 %v1977_v21  ;;  %2019 = vmatpush.msra.mxu0 %v1978_v23  ;;  %v6041_v21 = vld [vmem:[%s8729_s9 + $0x2f0] sm:$0xff]  ;;  %v6040_v23 = vld [vmem:[%s8729_s9 + $0x2e8] sm:$0xff] }
 0xaab   :  { %2051 = vmatpush.msrb.mxu1 %v1954_v55  ;;  %2074 = vmatpush.msra.mxu2 %v1955_v59  ;;  %v6015_v55 = vld [vmem:[%s8729_s9 + $0x220] sm:$0xff]  ;;  %v6034_v59 = vld [vmem:[%s8729_s9 + $0x2b8] sm:$0xff] }
 0xaac   :  { %1997 = vmatpush.msra.mxu3 %v1975_v61  ;;  %2020 = vmatpush.msra.mxu0 %v1976_v24  ;;  %v6023_v61 = vld [vmem:[%s8729_s9 + $0x260] sm:$0xff] }
 0xaad   :  { %2052 = vmatpush.msrb.mxu1 %v1952_v4  ;;  %2075 = vmatpush.msra.mxu2 %v1953_v5  ;;  %v6039_v24 = vld [vmem:[%s8729_s9 + $0x2e0] sm:$0xff]  ;;  %v6014_v4 = vld [vmem:[%s8729_s9 + $0x218] sm:$0xff]  ;;  %v6033_v5 = vld [vmem:[%s8729_s9 + $0x2b0] sm:$0xff] }
 0xaae   :  { %5999 = vmatmul.msk.f32.vlgmr.msrb.gmra.mxu3 %vm226_vm0, %v6857_v27  ;;  %6001 = vmatmul.msk.f32.vlgmr.msrb.gmra.mxu0 %vm226_vm0, %v7132_v1  ;;  %v1974_v1 = vld [vmem:[#allocation10 + $0x148] sm:$0xff] }
 0xaaf   :  { %1998 = vmatpush.msra.mxu3 %v1973_v29  ;;  %2021 = vmatpush.msra.mxu0 %v1974_v1  ;;  %v6022_v29 = vld [vmem:[%s8729_s9 + $0x258] sm:$0xff] }
 0xab0   :  { %2053 = vmatpush.msrb.mxu1 %v1950_v13  ;;  %2076 = vmatpush.msra.mxu2 %v1951_v54  ;;  %v6013_v13 = vld [vmem:[%s8729_s9 + $0x210] sm:$0xff]  ;;  %v6032_v54 = vld [vmem:[%s8729_s9 + $0x2a8] sm:$0xff] }
 0xab1   :  { %1999 = vmatpush.msra.mxu3 %v1971_v35 }
 0xab2   :  { %2054 = vmatpush.msrb.mxu1 %v1948_v15  ;;  %2077 = vmatpush.msra.mxu2 %v1949_v16  ;;  %v6012_v15 = vld [vmem:[%s8729_s9 + $0x208] sm:$0xff]  ;;  %v6031_v16 = vld [vmem:[%s8729_s9 + $0x2a0] sm:$0xff] }
 0xab3   :  { %2000 = vmatpush.msra.mxu3 %v1969_v40  ;;  %v6018_v40 = vld [vmem:[%s8729_s9 + $0x238] sm:$0xff] }
 0xab5   :  { %2001 = vmatpush.msra.mxu3 %v1967_v56 }
 0xab6   :  { %6000 = vmatmul.msk.f32.gmra.mxu3 %vm226_vm0, %v6868_v37  ;;  %6002 = vmatmul.msk.f32.gmra.mxu0 %vm226_vm0, %v7138_v30  ;;  %v1972_v30 = vld [vmem:[#allocation10 + $0x138] sm:$0xff] }
 0xab7   :  { %2022 = vmatpush.msra.mxu0 %v1972_v30  ;;  %2002 = vmatpush.msra.mxu3 %v1965_v53  ;;  %v6037_v30 = vld [vmem:[%s8729_s9 + $0x2d0] sm:$0xff]  ;;  %v6016_v53 = vld [vmem:[%s8729_s9 + $0x228] sm:$0xff] }
 0xab9   :  { %2023 = vmatpush.msra.mxu0 %v1970_v41  ;;  %2138 = vmatpush.msrb.mxu3 %v6026_v17  ;;  %v6011_v17 = vld [vmem:[%s8729_s9 + $0x200] sm:$0xff] }
 0xabb   :  { %2024 = vmatpush.msra.mxu0 %v1968_v45  ;;  %2139 = vmatpush.msrb.mxu3 %v6025_v18  ;;  %v6030_v18 = vld [vmem:[%s8729_s9 + $0x298] sm:$0xff] }
 0xabd   :  { %2025 = vmatpush.msra.mxu0 %v1966_v26  ;;  %2140 = vmatpush.msrb.mxu3 %v6024_v20  ;;  %v6035_v26 = vld [vmem:[%s8729_s9 + $0x2c0] sm:$0xff]  ;;  %v6028_v20 = vld [vmem:[%s8729_s9 + $0x288] sm:$0xff] }
 0xabf   :  { %2161 = vmatpush.msrb.mxu0 %v6042_v52  ;;  %2141 = vmatpush.msrb.mxu3 %v6023_v61  ;;  %v6029_v52 = vld [vmem:[%s8729_s9 + $0x290] sm:$0xff] }
 0xac1   :  { %2162 = vmatpush.msrb.mxu0 %v6041_v21  ;;  %2142 = vmatpush.msrb.mxu3 %v6022_v29  ;;  %v6027_v21 = vld [vmem:[%s8729_s9 + $0x280] sm:$0xff]  ;;  %v2086_v29 = vld [vmem:[#allocation11 + $0x4] sm:$0x3] }
 0xac3   :  { %2163 = vmatpush.msrb.mxu0 %v6040_v23  ;;  %2143 = vmatpush.msrb.mxu3 %v6021_v32  ;;  %v2088_v32 = vperm.slane %v2086_v29, 0 }
 0xac5   :  { %2164 = vmatpush.msrb.mxu0 %v6039_v24  ;;  %2144 = vmatpush.msrb.mxu3 %v6020_v38 }
 0xac7   :  { %2165 = vmatpush.msrb.mxu0 %v6038_v31  ;;  %2145 = vmatpush.msrb.mxu3 %v6019_v58 }
 0xac9   :  { %2166 = vmatpush.msrb.mxu0 %v6037_v30  ;;  %2146 = vmatpush.msrb.mxu3 %v6018_v40 }
 0xacb   :  { %2147 = vmatpush.msrb.mxu3 %v6017_v33  ;;  %2167 = vmatpush.msrb.mxu0 %v6036_v49 }
 0xacd   :  { %2148 = vmatpush.msrb.mxu3 %v6016_v53  ;;  %2168 = vmatpush.msrb.mxu0 %v6035_v26 }
 0xacf   :  { %2149 = vmatpush.msrb.mxu3 %v6015_v55  ;;  %2169 = vmatpush.msrb.mxu0 %v6034_v59 }
 0xad1   :  { %2150 = vmatpush.msrb.mxu3 %v6014_v4  ;;  %2170 = vmatpush.msrb.mxu0 %v6033_v5 }
 0xad3   :  { %2151 = vmatpush.msrb.mxu3 %v6013_v13  ;;  %2171 = vmatpush.msrb.mxu0 %v6032_v54 }
 0xad5   :  { %2152 = vmatpush.msrb.mxu3 %v6012_v15  ;;  %2172 = vmatpush.msrb.mxu0 %v6031_v16 }
 0xad7   :  { %2153 = vmatpush.msrb.mxu3 %v6011_v17  ;;  %2173 = vmatpush.msrb.mxu0 %v6030_v18 }
 0xad9   :  { %2174 = vmatpush.msrb.mxu0 %v6029_v52 }
 0xadb   :  { %2175 = vmatpush.msrb.mxu0 %v6028_v20  ;;  %v6406_v20 = vld [vmem:[#allocation13 + $0x2] ss:$0 sm:$0xff] }
 0xadd   :  { %2176 = vmatpush.msrb.mxu0 %v6027_v21 }
 0xb1b   :  { %v7381_v34 = vpop.f32.mrf.mxu0 }
 0xb1c   :  { %v7487_v23 = vpop.f32.mrf.mxu1 }
 0xb21   :  { %v7404_v1 = vpop.f32.mrf.mxu3 }
 0xb22   :  { %v7489_v61 = vpop.f32.mrf.mxu2 }
 0xb23   :  { %v7412_v35 = vpop.f32.mrf.mxu0 }
 0xb24   :  { %v7491_v24 = vpop.f32.mrf.mxu1 }
 0xb25   :  { %8757 = vst [vmem:[#allocation35_spill] sm:$0xff] %v7491_v24 }
 0xb29   :  { %v7426_v41 = vpop.f32.mrf.mxu3 }
 0xb2a   :  { %8756 = vst [vmem:[#allocation34_spill] sm:$0xff] %v7426_v41  ;;  %v7493_v31 = vpop.f32.mrf.mxu2 }
 0xb2b   :  { %v1941_v42 = vpop.f32.mrf.mxu0  ;;  %8758 = vst [vmem:[#allocation36_spill] sm:$0xff] %v7493_v31 }
 0xb2c   :  { %6003 = vmatmul.msk.f32.vlgmr.msra.gmra.mxu3 %vm276_vm3, %v1941_v42  ;;  %6005 = vmatmul.msk.f32.vlgmr.msra.gmra.mxu0 %vm276_vm3, %v1941_v42 }
 0xb31   :  { %v1918_v43 = vpop.f32.mrf.mxu3 }
 0xb32   :  { %6007 = vmatmul.msk.f32.vlgmr.msrb.gmra.mxu1 %vm276_vm3, %v1918_v43  ;;  %6009 = vmatmul.msk.f32.vlgmr.msra.gmra.mxu2 %vm276_vm3, %v1918_v43 }
 0xb33   :  { %v1944_v56 = vpop.f32.mrf.mxu0 }
 0xb34   :  { %6004 = vmatmul.msk.f32.gmra.mxu3 %vm276_vm3, %v1944_v56  ;;  %6006 = vmatmul.msk.f32.gmra.mxu0 %vm276_vm3, %v1944_v56  ;;  %v2089_v56 = vperm.slane %v2086_v29, 1 }
 0xb39   :  { %v1921_v45 = vpop.f32.mrf.mxu3 }
 0xb3a   :  { %6008 = vmatmul.msk.f32.gmra.mxu1 %vm276_vm3, %v1921_v45  ;;  %6010 = vmatmul.msk.f32.gmra.mxu2 %vm276_vm3, %v1921_v45 }
 0xba9   :  { %v2027_v42 = vpop.f32.mrf.mxu0 }
 0xbaf   :  { %v2004_v30 = vpop.f32.mrf.mxu3  ;;  %v2056_v38 = vpop.f32.mrf.mxu1 }
 0xbb0   :  { %v2057_v58 = vadd.f32 %v2056_v38, %v2004_v30 }
 0xbb1   :  { %v2030_v13 = vpop.f32.mrf.mxu0 }
 0xbb2   :  { %v2092_v40 = vadd.f32 %v2088_v32, %v2057_v58 }
 0xbb4   :  { %v2096_v43 = vmax.f32 %v2092_v40, 0.0 }
 0xbb5   :  { %v2079_v45 = vpop.f32.mrf.mxu2 }
 0xbb6   :  { %v2080_v33 = vadd.f32 %v2079_v45, %v2027_v42  ;;  %2154 = vmatmul.f32.vlgmr.msrb.gmra.mxu3 %v2096_v43 }
 0xbb7   :  { %v2007_v49 = vpop.f32.mrf.mxu3  ;;  %v2059_v53 = vpop.f32.mrf.mxu1 }
 0xbb8   :  { %v2093_v26 = vadd.f32 %v2089_v56, %v2080_v33  ;;  %v2060_v55 = vadd.f32 %v2059_v53, %v2007_v49 }
 0xbba   :  { %v2097_v59 = vmax.f32 %v2093_v26, 0.0  ;;  %v2094_v4 = vadd.f32 %v2088_v32, %v2060_v55 }
 0xbbc   :  { %2177 = vmatmul.f32.vlgmr.msrb.gmra.mxu0 %v2097_v59  ;;  %v2098_v5 = vmax.f32 %v2094_v4, 0.0 }
 0xbbd   :  { %v2082_v54 = vpop.f32.mrf.mxu2 }
 0xbbe   :  { %v2083_v15 = vadd.f32 %v2082_v54, %v2030_v13  ;;  %2157 = vmatmul.f32.gmra.mxu3 %v2098_v5 }
 0xbc0   :  { %v2095_v16 = vadd.f32 %v2089_v56, %v2083_v15 }
 0xbc2   :  { %v2099_v17 = vmax.f32 %v2095_v16, 0.0 }
 0xbc4   :  { %2180 = vmatmul.f32.gmra.mxu0 %v2099_v17 }
 0xc39   :  { %v2155_v18 = vpop.f32.mrf.mxu3  ;;  %v2178_v52 = vpop.f32.mrf.mxu0 }
 0xc3a   :  { %v2156_v21 = vadd.f32 %v6406_v20, %v2155_v18 }
 0xc3c   :  { %v7495_v30 = vadd.f32 %v2178_v52, %v2156_v21 }
 0xc3e   :  { %v2184_v32 = vmul.f32 %v7495_v30, %v7495_v30 }
 0xc41   :  { %v2158_v29 = vpop.f32.mrf.mxu3  ;;  %v2181_v58 = vpop.f32.mrf.mxu0 }
 0xc42   :  { %v2159_v38 = vadd.f32 %v6406_v20, %v2158_v29 }
 0xc44   :  { %v7497_v40 = vadd.f32 %v2181_v58, %v2159_v38 }
 0xc46   :  { %v2185_v42 = vmul.f32 %v7497_v40, %v7497_v40 }
 0xc48   :  { %v6373_v43 = vpack.i.bf16 %v2184_v32, %v2185_v42  ;;  %v2374_v42 = vld [vmem:[#allocation14 + $0x7c0] sm:$0xff] }
 0xc4a   :  { %6374 = vrot.lane.b32.xlu2 %v6373_v43, %s6706_s27  ;;  %v2375_v43 = vld [vmem:[#allocation14 + $0x7c8] sm:$0xff] }
 0xca4   :  { %v6375_v56 = vpop.permute.xlu2 %6374 }
 0xca5   :  { %v6377_v45 = vunpack.i.h.bf16 %v6375_v56  ;;  %v6376_v33 = vunpack.i.l.bf16 %v6375_v56  ;;  %v2366_v56 = vld [vmem:[#allocation14 + $0x780] sm:$0xff] }
 0xca7   :  { %v2195_v49 = vsel %vm276_vm3, %v7497_v40, %v6376_v33  ;;  %v2194_v53 = vsel %vm276_vm3, %v7495_v30, %v6377_v45  ;;  %v2367_v45 = vld [vmem:[#allocation14 + $0x788] sm:$0xff]  ;;  %v2350_v33 = vld [vmem:[#allocation14 + $0x700] sm:$0xff] }
 0xca8   :  { %2210 = vmatpush.msra.mxu1 %v2195_v49  ;;  %v2351_v49 = vld [vmem:[#allocation14 + $0x708] sm:$0xff] }
 0xcaa   :  { %2211 = vmatpush.msra.mxu1 %v2194_v53  ;;  %v2342_v53 = vld [vmem:[#allocation14 + $0x6c0] sm:$0xff] }
 0xcab   :  { %6043 = vmatmul.msk.f32.vlgmr.msra.gmra.mxu1 %vm226_vm0, %v6998_v11 }
 0xcac   :  { %2393 = vmatpush.msrb.mxu1 %v2374_v42  ;;  %v2379_v42 = vld [vmem:[#allocation14 + $0x7e8] sm:$0xff] }
 0xcae   :  { %2394 = vmatpush.msrb.mxu1 %v2366_v56  ;;  %v2345_v56 = vld [vmem:[#allocation14 + $0x6d8] sm:$0xff] }
 0xd28   :  { %v2213_v26 = vpop.f32.mrf.mxu1 }
 0xd29   :  { %v2216_v55 = vmul.f32 %v2213_v26, %v2213_v26 }
 0xd2b   :  { %2218 = vrot.lane.b32.xlu0 %v2216_v55, %s6706_s27  ;;  %v2376_v55 = vld [vmem:[#allocation14 + $0x7d0] sm:$0xff] }
 0xd2c   :  { %2433 = vmatpush.msra.mxu3 %v2376_v55  ;;  %v2329_v55 = vld [vmem:[#allocation14 + $0x658] sm:$0xff] }
 0xd9d   :  { %v2219_v59 = vpop.permute.xlu0 %2218 }
 0xd9e   :  { %v2221_v4 = vsub.f32 %v2213_v26, %v2219_v59  ;;  %v2377_v59 = vld [vmem:[#allocation14 + $0x7d8] sm:$0xff] }
 0xd9f   :  { %2453 = vmatpush.msra.mxu0 %v2377_v59 }
 0xda0   :  { %v2222_v5 = vmax.f32 %v2221_v4, 0.0  ;;  %v2334_v4 = vld [vmem:[#allocation14 + $0x680] sm:$0xff] }
 0xda2   :  { %v2223_v13 = vadd.f32 1e-05, %v2222_v5  ;;  %v2335_v5 = vld [vmem:[#allocation14 + $0x688] sm:$0xff] }
 0xda4   :  { %6417 = vrsqrt.f32 %v2223_v13  ;;  %vm2230_vm5 = vweird.f32 %v2223_v13 }
 0xdaa   :  { %v6418_v54 = vpop.eup %6417 }
 0xdab   :  { %v2225_v15 = vmul.f32 %v6418_v54, %v2223_v13  ;;  %vm2231_vm8 = vweird.f32 %v6418_v54  ;;  %v2368_v13 = vld [vmem:[#allocation14 + $0x790] sm:$0xff] }
 0xdac   :  { %vm2232_vm6 = vmor %vm2230_vm5, %vm2231_vm8  ;;  %2434 = vmatpush.msra.mxu3 %v2368_v13  ;;  %v2320_v13 = vld [vmem:[#allocation14 + $0x610] sm:$0xff] }
 0xdad   :  { %v2226_v16 = vmul.f32 %v6418_v54, %v2225_v15  ;;  %v2326_v15 = vld [vmem:[#allocation14 + $0x640] sm:$0xff] }
 0xdaf   :  { %v2227_v17 = vmul.f32 0.5, %v2226_v16  ;;  %v2327_v16 = vld [vmem:[#allocation14 + $0x648] sm:$0xff] }
 0xdb1   :  { %v2228_v18 = vsub.f32 1.5, %v2227_v17  ;;  %v2360_v17 = vld [vmem:[#allocation14 + $0x750] sm:$0xff] }
 0xdb2   :  { %2435 = vmatpush.msra.mxu3 %v2360_v17 }
 0xdb3   :  { %v2229_v52 = vmul.f32 %v6418_v54, %v2228_v18  ;;  %v2361_v18 = vld [vmem:[#allocation14 + $0x758] sm:$0xff] }
 0xdb5   :  { %v2233_v20 = vsel %vm2232_vm6, %v6418_v54, %v2229_v52  ;;  %v2369_v54 = vld [vmem:[#allocation14 + $0x798] sm:$0xff]  ;;  %v2318_v52 = vld [vmem:[#allocation14 + $0x600] sm:$0xff] }
 0xdb6   :  { %2235 = vrot.lane.b32.xlu2 %v2233_v20, %s6706_s27  ;;  %2454 = vmatpush.msra.mxu0 %v2369_v54  ;;  %v2321_v54 = vld [vmem:[#allocation14 + $0x618] sm:$0xff] }
 0xdb8   :  { %2455 = vmatpush.msra.mxu0 %v2361_v18  ;;  %v2380_v18 = vld [vmem:[#allocation14 + $0x7f0] sm:$0xff] }
 0xe10   :  { %v2236_v21 = vpop.permute.xlu2 %2235 }
 0xe11   :  { %v2238_v29 = vmul.f32 %v2236_v21, %v2213_v26  ;;  %v2343_v26 = vld [vmem:[#allocation14 + $0x6c8] sm:$0xff]  ;;  %v2352_v21 = vld [vmem:[#allocation14 + $0x710] sm:$0xff] }
 0xe12   :  { %2436 = vmatpush.msra.mxu3 %v2352_v21  ;;  %v2339_v21 = vld [vmem:[#allocation14 + $0x6a8] sm:$0xff] }
 0xe13   :  { %v2239_v38 = vsel %vm276_vm3, %v2238_v29, %v2233_v20  ;;  %v2319_v20 = vld [vmem:[#allocation14 + $0x608] sm:$0xff]  ;;  %v2353_v29 = vld [vmem:[#allocation14 + $0x718] sm:$0xff] }
 0xe14   :  { %6044 = vmatpush.msk.msrb.mxu2 %vm780_vm9, %v2239_v38  ;;  %v2378_v38 = vld [vmem:[#allocation14 + $0x7e0] sm:$0xff]  ;;  %2456 = vmatpush.msra.mxu0 %v2353_v29  ;;  %v2372_v29 = vld [vmem:[#allocation14 + $0x7b0] sm:$0xff] }
 0xe15   :  { %6045 = vmatmul.msk.f32.vlgmr.msrb.gmra.mxu2 %vm773_vm10, %v7300_v46  ;;  %v2358_v46 = vld [vmem:[#allocation14 + $0x740] sm:$0xff] }
 0xe16   :  { %2413 = vmatpush.msra.mxu2 %v2375_v43  ;;  %2395 = vmatpush.msrb.mxu1 %v2358_v46  ;;  %v2344_v43 = vld [vmem:[#allocation14 + $0x6d0] sm:$0xff]  ;;  %v2371_v46 = vld [vmem:[#allocation14 + $0x7a8] sm:$0xff] }
 0xe17   :  { %2437 = vmatpush.msra.mxu3 %v2344_v43  ;;  %2457 = vmatpush.msra.mxu0 %v2345_v56  ;;  %v2331_v43 = vld [vmem:[#allocation14 + $0x668] sm:$0xff] }
 0xe18   :  { %2414 = vmatpush.msra.mxu2 %v2367_v45  ;;  %2396 = vmatpush.msrb.mxu1 %v2350_v33  ;;  %v2370_v45 = vld [vmem:[#allocation14 + $0x7a0] sm:$0xff]  ;;  %v2337_v33 = vld [vmem:[#allocation14 + $0x698] sm:$0xff] }
 0xe19   :  { %2458 = vmatpush.msra.mxu0 %v2337_v33  ;;  %v2356_v33 = vld [vmem:[#allocation14 + $0x730] sm:$0xff] }
 0xe1a   :  { %2397 = vmatpush.msrb.mxu1 %v2342_v53  ;;  %v2363_v53 = vld [vmem:[#allocation14 + $0x768] sm:$0xff] }
 0xe1b   :  { %2459 = vmatpush.msra.mxu0 %v2329_v55  ;;  %v2340_v55 = vld [vmem:[#allocation14 + $0x6b0] sm:$0xff] }
 0xe1c   :  { %2398 = vmatpush.msrb.mxu1 %v2334_v4  ;;  %v2354_v4 = vld [vmem:[#allocation14 + $0x720] sm:$0xff] }
 0xe1d   :  { %6046 = vmatmul.msk.f32.gmra.mxu2 %vm773_vm10, %v7307_v48  ;;  %v2359_v48 = vld [vmem:[#allocation14 + $0x748] sm:$0xff]  ;;  %2460 = vmatpush.msra.mxu0 %v2321_v54  ;;  %v2332_v54 = vld [vmem:[#allocation14 + $0x670] sm:$0xff] }
 0xe1e   :  { %2415 = vmatpush.msra.mxu2 %v2359_v48  ;;  %2399 = vmatpush.msrb.mxu1 %v2326_v15  ;;  %v2336_v48 = vld [vmem:[#allocation14 + $0x690] sm:$0xff]  ;;  %v2346_v15 = vld [vmem:[#allocation14 + $0x6e0] sm:$0xff] }
 0xe1f   :  { %2438 = vmatpush.msra.mxu3 %v2336_v48  ;;  %v2323_v48 = vld [vmem:[#allocation14 + $0x628] sm:$0xff] }
 0xe20   :  { %2416 = vmatpush.msra.mxu2 %v2351_v49  ;;  %2400 = vmatpush.msrb.mxu1 %v2318_v52  ;;  %v2362_v49 = vld [vmem:[#allocation14 + $0x760] sm:$0xff]  ;;  %v2381_v52 = vld [vmem:[#allocation14 + $0x7f8] sm:$0xff] }
 0xe21   :  { %2533 = vmatpush.msrb.mxu0 %v2381_v52 }
 0xe22   :  { %2417 = vmatpush.msra.mxu2 %v2343_v26  ;;  %2473 = vmatpush.msra.mxu1 %v2378_v38  ;;  %v2328_v26 = vld [vmem:[#allocation14 + $0x650] sm:$0xff]  ;;  %v2373_v38 = vld [vmem:[#allocation14 + $0x7b8] sm:$0xff] }
 0xe23   :  { %2439 = vmatpush.msra.mxu3 %v2328_v26  ;;  %2534 = vmatpush.msrb.mxu0 %v2373_v38  ;;  %v2348_v26 = vld [vmem:[#allocation14 + $0x6f0] sm:$0xff] }
 0xe24   :  { %2418 = vmatpush.msra.mxu2 %v2335_v5  ;;  %2474 = vmatpush.msra.mxu1 %v2370_v45  ;;  %v2355_v5 = vld [vmem:[#allocation14 + $0x728] sm:$0xff]  ;;  %v2365_v45 = vld [vmem:[#allocation14 + $0x778] sm:$0xff] }
 0xe25   :  { %2440 = vmatpush.msra.mxu3 %v2320_v13  ;;  %2535 = vmatpush.msrb.mxu0 %v2365_v45 }
 0xe26   :  { %2419 = vmatpush.msra.mxu2 %v2327_v16  ;;  %2475 = vmatpush.msra.mxu1 %v2362_v49  ;;  %v2347_v16 = vld [vmem:[#allocation14 + $0x6e8] sm:$0xff]  ;;  %v2357_v49 = vld [vmem:[#allocation14 + $0x738] sm:$0xff] }
 0xe27   :  { %2513 = vmatpush.msrb.mxu3 %v2380_v18  ;;  %2536 = vmatpush.msrb.mxu0 %v2357_v49 }
 0xe28   :  { %2420 = vmatpush.msra.mxu2 %v2319_v20  ;;  %2476 = vmatpush.msra.mxu1 %v2354_v4  ;;  %v2338_v20 = vld [vmem:[#allocation14 + $0x6a0] sm:$0xff] }
 0xe29   :  { %2514 = vmatpush.msrb.mxu3 %v2372_v29 }
 0xe2a   :  { %2493 = vmatpush.msrb.mxu2 %v2379_v42  ;;  %2477 = vmatpush.msra.mxu1 %v2346_v15  ;;  %v2330_v42 = vld [vmem:[#allocation14 + $0x660] sm:$0xff]  ;;  %v2333_v15 = vld [vmem:[#allocation14 + $0x678] sm:$0xff] }
 0xe2c   :  { %2494 = vmatpush.msrb.mxu2 %v2371_v46  ;;  %2478 = vmatpush.msra.mxu1 %v2338_v20  ;;  %v2322_v46 = vld [vmem:[#allocation14 + $0x620] sm:$0xff] }
 0xe2e   :  { %2495 = vmatpush.msrb.mxu2 %v2363_v53  ;;  %2479 = vmatpush.msra.mxu1 %v2330_v42 }
 0xe30   :  { %2496 = vmatpush.msrb.mxu2 %v2355_v5  ;;  %2480 = vmatpush.msra.mxu1 %v2322_v46 }
 0xe32   :  { %2497 = vmatpush.msrb.mxu2 %v2347_v16  ;;  %v2324_v16 = vld [vmem:[#allocation14 + $0x630] sm:$0xff] }
 0xe34   :  { %2498 = vmatpush.msrb.mxu2 %v2339_v21 }
 0xe36   :  { %2499 = vmatpush.msrb.mxu2 %v2331_v43 }
 0xe38   :  { %2500 = vmatpush.msrb.mxu2 %v2323_v48 }
 0xe98   :  { %v7518_v58 = vpop.f32.mrf.mxu2 }
 0xe99   :  { %2268 = vrot.lane.b32.xlu0 %v7518_v58, %s6706_s27 }
 0xea0   :  { %v7522_v32 = vpop.f32.mrf.mxu2 }
 0xea1   :  { %2270 = vrot.lane.b32.xlu2 %v7522_v32, %s6706_s27 }
 0xefb   :  { %v2271_v59 = vpop.permute.xlu2 %2270 }
 0xefc   :  { %v2275_v17 = vmul.f32 %v2271_v59, %v7497_v40  ;;  %v2364_v40 = vld [vmem:[#allocation14 + $0x770] sm:$0xff]  ;;  %v2341_v59 = vld [vmem:[#allocation14 + $0x6b8] sm:$0xff] }
 0xefd   :  { %2515 = vmatpush.msrb.mxu3 %v2364_v40 }
 0xefe   :  { %v2277_v56 = vsub.f32 %v2275_v17, %v7522_v32  ;;  %v2349_v32 = vld [vmem:[#allocation14 + $0x6f8] sm:$0xff] }
 0xeff   :  { %2516 = vmatpush.msrb.mxu3 %v2356_v33  ;;  %2537 = vmatpush.msrb.mxu0 %v2349_v32  ;;  %v2325_v17 = vld [vmem:[#allocation14 + $0x638] sm:$0xff] }
 0xf00   :  { %v2279_v53 = vadd.f32 %v2277_v56, %v7336_v19 }
 0xf01   :  { %2517 = vmatpush.msrb.mxu3 %v2348_v26  ;;  %2538 = vmatpush.msrb.mxu0 %v2341_v59 }
 0xf02   :  { %v7529_v5 = vmax.f32 %v2279_v53, 0.0 }
 0xf03   :  { %2518 = vmatpush.msrb.mxu3 %v2340_v55  ;;  %2539 = vmatpush.msrb.mxu0 %v2333_v15 }
 0xf04   :  { %v2283_v18 = vsel %vm273_vm14, %v7529_v5, -1e+30  ;;  %v2294_v52 = vsel %vm293_vm1, %v7529_v5, -1e+30 }
 0xf05   :  { %2519 = vmatpush.msrb.mxu3 %v2332_v54  ;;  %2540 = vmatpush.msrb.mxu0 %v2325_v17  ;;  %v2285_v21 = vsel %vm276_vm3, %v2283_v18, -inf  ;;  %v2296_v29 = vsel %vm276_vm3, %v2294_v52, -inf }
 0xf07   :  { %2520 = vmatpush.msrb.mxu3 %v2324_v16 }
 0xf0b   :  { %v2269_v4 = vpop.permute.xlu0 %2268 }
 0xf0c   :  { %v2274_v13 = vmul.f32 %v2269_v4, %v7495_v30 }
 0xf0e   :  { %v2276_v19 = vsub.f32 %v2274_v13, %v7518_v58  ;;  %v2305_v58 = vsel %vm312_vm15, %v7529_v5, -1e+30 }
 0xf0f   :  { %v2307_v43 = vsel %vm276_vm3, %v2305_v58, -inf }
 0xf10   :  { %v2278_v30 = vadd.f32 %v2276_v19, %v7322_v0 }
 0xf12   :  { %v7543_v20 = vmax.f32 %v2278_v30, 0.0 }
 0xf14   :  { %v2282_v38 = vsel %vm272_vm12, %v7543_v20, -1e+30  ;;  %v2293_v0 = vsel %vm292_vm13, %v7543_v20, -1e+30  ;;  %v2304_v42 = vsel %vm311_vm11, %v7543_v20, -1e+30 }
 0xf15   :  { %v2284_v56 = vsel %vm276_vm3, %v2282_v38, -inf  ;;  %v2295_v40 = vsel %vm276_vm3, %v2293_v0, -inf  ;;  %v2306_v45 = vsel %vm276_vm3, %v2304_v42, -inf  ;;  %v7576_v0 = vld [vmem:[#allocation3] sm:$0xff]  ;;  %v7582_v42 = vld [vmem:[#allocation3 + $0x8] sm:$0xff] }
 0xf16   :  { %v2286_v46 = vmax.f32 %v2284_v56, %v2285_v21  ;;  %v2297_v48 = vmax.f32 %v2295_v40, %v2296_v29  ;;  %v2308_v33 = vmax.f32 %v2306_v45, %v2307_v43  ;;  %v2614_v43 = vld [vmem:[#allocation8 + $0x1f0] sm:$0xff]  ;;  %v2615_v56 = vld [vmem:[#allocation8 + $0x1f8] sm:$0xff]  ;;  %v2612_v40 = vld [vmem:[#allocation8 + $0x1e0] sm:$0xff] }
 0xf17   :  { %v2613_v45 = vld [vmem:[#allocation8 + $0x1e8] sm:$0xff] }
 0xf18   :  { %v2287_v49 = vrot.slane %v2286_v46, 4  ;;  %v2298_v53 = vrot.slane %v2297_v48, 4  ;;  %v2309_v26 = vrot.slane %v2308_v33, 4 }
 0xf1a   :  { %v2288_v32 = vmax.f32 %v2286_v46, %v2287_v49  ;;  %v2299_v55 = vmax.f32 %v2297_v48, %v2298_v53  ;;  %v2310_v59 = vmax.f32 %v2308_v33, %v2309_v26  ;;  %v2610_v46 = vld [vmem:[#allocation8 + $0x1d0] sm:$0xff]  ;;  %v2611_v48 = vld [vmem:[#allocation8 + $0x1d8] sm:$0xff]  ;;  %v2608_v53 = vld [vmem:[#allocation8 + $0x1c0] sm:$0xff] }
 0xf1b   :  { %v2631_v33 = vld [vmem:[#allocation10 + $0x1f0] sm:$0xff]  ;;  %v2632_v49 = vld [vmem:[#allocation10 + $0x1f8] sm:$0xff]  ;;  %v2609_v26 = vld [vmem:[#allocation8 + $0x1c8] sm:$0xff] }
 0xf1c   :  { %v2289_v4 = vrot.slane %v2288_v32, 2  ;;  %v2300_v13 = vrot.slane %v2299_v55, 2  ;;  %v2311_v54 = vrot.slane %v2310_v59, 2 }
 0xf1e   :  { %v2290_v15 = vmax.f32 %v2288_v32, %v2289_v4  ;;  %v2301_v19 = vmax.f32 %v2299_v55, %v2300_v13  ;;  %v2312_v16 = vmax.f32 %v2310_v59, %v2311_v54  ;;  %v2629_v32 = vld [vmem:[#allocation10 + $0x1e0] sm:$0xff]  ;;  %v2630_v55 = vld [vmem:[#allocation10 + $0x1e8] sm:$0xff]  ;;  %v2606_v59 = vld [vmem:[#allocation8 + $0x1b0] sm:$0xff] }
 0xf1f   :  { %v2607_v4 = vld [vmem:[#allocation8 + $0x1b8] sm:$0xff]  ;;  %v2627_v13 = vld [vmem:[#allocation10 + $0x1d0] sm:$0xff] }
 0xf20   :  { %v2291_v17 = vrot.slane %v2290_v15, 1  ;;  %v2302_v18 = vrot.slane %v2301_v19, 1  ;;  %v2313_v52 = vrot.slane %v2312_v16, 1  ;;  %v2628_v54 = vld [vmem:[#allocation10 + $0x1d8] sm:$0xff] }
 0xf22   :  { %v2292_v30 = vmax.f32 %v2290_v15, %v2291_v17  ;;  %v2303_v58 = vmax.f32 %v2301_v19, %v2302_v18  ;;  %v2314_v21 = vmax.f32 %v2312_v16, %v2313_v52  ;;  %v2604_v15 = vld [vmem:[#allocation8 + $0x1a0] sm:$0xff]  ;;  %v2605_v19 = vld [vmem:[#allocation8 + $0x1a8] sm:$0xff]  ;;  %v2602_v18 = vld [vmem:[#allocation8 + $0x190] sm:$0xff] }
 0xf23   :  { %v2625_v16 = vld [vmem:[#allocation10 + $0x1c0] sm:$0xff]  ;;  %v2626_v17 = vld [vmem:[#allocation10 + $0x1c8] sm:$0xff]  ;;  %v2603_v52 = vld [vmem:[#allocation8 + $0x198] sm:$0xff] }
 0xf24   :  { %v2315_v29 = vsel %vm324_vm2, %v2292_v30, %v2303_v58  ;;  %v2623_v30 = vld [vmem:[#allocation10 + $0x1b0] sm:$0xff]  ;;  %v2624_v58 = vld [vmem:[#allocation10 + $0x1b8] sm:$0xff] }
 0xf25   :  { %v2316_v38 = vsel %vm326_vm4, %v2315_v29, %v2314_v21  ;;  %v2600_v21 = vld [vmem:[#allocation8 + $0x180] sm:$0xff]  ;;  %v2601_v29 = vld [vmem:[#allocation8 + $0x188] sm:$0xff] }
 0xf26   :  { %6047 = vmatmul.msk.f32.vlgmr.msrb.gmra.mxu1 %vm276_vm3, %v2316_v38  ;;  %6048 = vmatmul.msk.f32.vlgmr.msra.gmra.mxu2 %vm276_vm3, %v2316_v38 }
 0xf27   :  { %6049 = vmatmul.msk.f32.vlgmr.msra.gmra.mxu3 %vm276_vm3, %v2316_v38  ;;  %6050 = vmatmul.msk.f32.vlgmr.msra.gmra.mxu0 %vm276_vm3, %v2316_v38 }
 0xf28   :  { %2567 = vmatpush.msrb.mxu1 %v7529_v5  ;;  %2590 = vmatpush.msra.mxu2 %v7529_v5 }
 0xf29   :  { %2699 = vmatpush.msra.mxu3 %v2614_v43  ;;  %2722 = vmatpush.msra.mxu0 %v2615_v56  ;;  %v2622_v43 = vld [vmem:[#allocation10 + $0x1a8] sm:$0xff]  ;;  %v2619_v56 = vld [vmem:[#allocation10 + $0x190] sm:$0xff] }
 0xf2a   :  { %2568 = vmatpush.msrb.mxu1 %v7543_v20  ;;  %2591 = vmatpush.msra.mxu2 %v7543_v20 }
 0xf2b   :  { %2700 = vmatpush.msra.mxu3 %v2612_v40  ;;  %2723 = vmatpush.msra.mxu0 %v2613_v45  ;;  %v2620_v40 = vld [vmem:[#allocation10 + $0x198] sm:$0xff]  ;;  %v2617_v45 = vld [vmem:[#allocation10 + $0x180] sm:$0xff] }
 0xf2d   :  { %2701 = vmatpush.msra.mxu3 %v2610_v46  ;;  %2724 = vmatpush.msra.mxu0 %v2611_v48  ;;  %v2618_v46 = vld [vmem:[#allocation10 + $0x188] sm:$0xff]  ;;  %v6082_v48 = vld [vmem:[%s8729_s9 + $0x378] sm:$0xff] }
 0xf2e   :  { %6051 = vmatmul.msk.f32.vlgmr.msra.gmra.mxu1 %vm276_vm3, %v2316_v38  ;;  %6052 = vmatmul.msk.f32.vlgmr.msrb.gmra.mxu2 %vm276_vm3, %v2316_v38 }
 0xf2f   :  { %6053 = vmatmul.msk.f32.vlgmr.msrb.gmra.mxu3 %vm276_vm3, %v2316_v38  ;;  %6054 = vmatmul.msk.f32.vlgmr.msrb.gmra.mxu0 %vm276_vm3, %v2316_v38  ;;  %v2621_v38 = vld [vmem:[#allocation10 + $0x1a0] sm:$0xff] }
 0xf30   :  { %2647 = vmatpush.msra.mxu1 %v2631_v33  ;;  %2670 = vmatpush.msrb.mxu2 %v2632_v49  ;;  %v6081_v33 = vld [vmem:[%s8729_s9 + $0x370] sm:$0xff] }
 0xf31   :  { %2702 = vmatpush.msra.mxu3 %v2608_v53  ;;  %2725 = vmatpush.msra.mxu0 %v2609_v26  ;;  %v6098_v53 = vld [vmem:[%s8729_s9 + $0x3f8] sm:$0xff]  ;;  %v6080_v26 = vld [vmem:[%s8729_s9 + $0x368] sm:$0xff] }
 0xf32   :  { %2648 = vmatpush.msra.mxu1 %v2629_v32  ;;  %2671 = vmatpush.msrb.mxu2 %v2630_v55  ;;  %v6097_v32 = vld [vmem:[%s8729_s9 + $0x3f0] sm:$0xff]  ;;  %v6096_v55 = vld [vmem:[%s8729_s9 + $0x3e8] sm:$0xff] }
 0xf33   :  { %2703 = vmatpush.msra.mxu3 %v2606_v59  ;;  %2726 = vmatpush.msra.mxu0 %v2607_v4  ;;  %v6079_v59 = vld [vmem:[%s8729_s9 + $0x360] sm:$0xff] }
 0xf34   :  { %2649 = vmatpush.msra.mxu1 %v2627_v13  ;;  %2672 = vmatpush.msrb.mxu2 %v2628_v54  ;;  %v6095_v4 = vld [vmem:[%s8729_s9 + $0x3e0] sm:$0xff]  ;;  %v6078_v13 = vld [vmem:[%s8729_s9 + $0x358] sm:$0xff] }
 0xf35   :  { %2704 = vmatpush.msra.mxu3 %v2604_v15  ;;  %2727 = vmatpush.msra.mxu0 %v2605_v19  ;;  %v6094_v15 = vld [vmem:[%s8729_s9 + $0x3d8] sm:$0xff]  ;;  %v6077_v19 = vld [vmem:[%s8729_s9 + $0x350] sm:$0xff] }
 0xf36   :  { %6055 = vmatmul.msk.f32.vlgmr.msrb.gmra.mxu1 %vm226_vm0, %v6857_v27  ;;  %6057 = vmatmul.msk.f32.vlgmr.msra.gmra.mxu2 %vm226_vm0, %v7576_v0 }
 0xf37   :  { %2650 = vmatpush.msra.mxu1 %v2625_v16  ;;  %2673 = vmatpush.msrb.mxu2 %v2626_v17  ;;  %v6093_v17 = vld [vmem:[%s8729_s9 + $0x3d0] sm:$0xff] }
 0xf38   :  { %2705 = vmatpush.msra.mxu3 %v2602_v18  ;;  %2728 = vmatpush.msra.mxu0 %v2603_v52  ;;  %v6076_v18 = vld [vmem:[%s8729_s9 + $0x348] sm:$0xff]  ;;  %v6075_v52 = vld [vmem:[%s8729_s9 + $0x340] sm:$0xff] }
 0xf39   :  { %2651 = vmatpush.msra.mxu1 %v2623_v30  ;;  %2674 = vmatpush.msrb.mxu2 %v2624_v58  ;;  %v6074_v30 = vld [vmem:[%s8729_s9 + $0x338] sm:$0xff] }
 0xf3a   :  { %2706 = vmatpush.msra.mxu3 %v2600_v21  ;;  %2729 = vmatpush.msra.mxu0 %v2601_v29 }
 0xf3b   :  { %2652 = vmatpush.msra.mxu1 %v2621_v38  ;;  %2675 = vmatpush.msrb.mxu2 %v2622_v43 }
 0xf3d   :  { %2653 = vmatpush.msra.mxu1 %v2619_v56  ;;  %2676 = vmatpush.msrb.mxu2 %v2620_v40  ;;  %v6073_v56 = vld [vmem:[%s8729_s9 + $0x330] sm:$0xff]  ;;  %v6092_v40 = vld [vmem:[%s8729_s9 + $0x3c8] sm:$0xff] }
 0xf3e   :  { %6056 = vmatmul.msk.f32.gmra.mxu1 %vm226_vm0, %v6868_v37  ;;  %6058 = vmatmul.msk.f32.gmra.mxu2 %vm226_vm0, %v7582_v42 }
 0xf3f   :  { %2654 = vmatpush.msra.mxu1 %v2617_v45  ;;  %2677 = vmatpush.msrb.mxu2 %v2618_v46  ;;  %v6072_v45 = vld [vmem:[%s8729_s9 + $0x328] sm:$0xff]  ;;  %v6091_v46 = vld [vmem:[%s8729_s9 + $0x3c0] sm:$0xff] }
 0xf41   :  { %2790 = vmatpush.msrb.mxu1 %v6082_v48  ;;  %2813 = vmatpush.msra.mxu2 %v6098_v53  ;;  %v6071_v48 = vld [vmem:[%s8729_s9 + $0x320] sm:$0xff]  ;;  %v6070_v53 = vld [vmem:[%s8729_s9 + $0x318] sm:$0xff] }
 0xf43   :  { %2791 = vmatpush.msrb.mxu1 %v6081_v33  ;;  %2814 = vmatpush.msra.mxu2 %v6097_v32  ;;  %v6090_v33 = vld [vmem:[%s8729_s9 + $0x3b8] sm:$0xff]  ;;  %v6069_v32 = vld [vmem:[%s8729_s9 + $0x310] sm:$0xff] }
 0xf45   :  { %2792 = vmatpush.msrb.mxu1 %v6080_v26  ;;  %2815 = vmatpush.msra.mxu2 %v6096_v55  ;;  %v6089_v26 = vld [vmem:[%s8729_s9 + $0x3b0] sm:$0xff]  ;;  %v6088_v55 = vld [vmem:[%s8729_s9 + $0x3a8] sm:$0xff] }
 0xf47   :  { %2793 = vmatpush.msrb.mxu1 %v6079_v59  ;;  %2816 = vmatpush.msra.mxu2 %v6095_v4  ;;  %v6068_v59 = vld [vmem:[%s8729_s9 + $0x308] sm:$0xff]  ;;  %v6087_v4 = vld [vmem:[%s8729_s9 + $0x3a0] sm:$0xff] }
 0xf49   :  { %2794 = vmatpush.msrb.mxu1 %v6078_v13  ;;  %2817 = vmatpush.msra.mxu2 %v6094_v15  ;;  %v6067_v13 = vld [vmem:[%s8729_s9 + $0x300] sm:$0xff]  ;;  %v6086_v15 = vld [vmem:[%s8729_s9 + $0x398] sm:$0xff] }
 0xf4b   :  { %2795 = vmatpush.msrb.mxu1 %v6077_v19  ;;  %2818 = vmatpush.msra.mxu2 %v6093_v17  ;;  %v6085_v19 = vld [vmem:[%s8729_s9 + $0x390] sm:$0xff]  ;;  %v6084_v17 = vld [vmem:[%s8729_s9 + $0x388] sm:$0xff] }
 0xf4d   :  { %2796 = vmatpush.msrb.mxu1 %v6076_v18  ;;  %2819 = vmatpush.msra.mxu2 %v6092_v40  ;;  %v6083_v18 = vld [vmem:[%s8729_s9 + $0x380] sm:$0xff] }
 0xf4f   :  { %2797 = vmatpush.msrb.mxu1 %v6075_v52  ;;  %2820 = vmatpush.msra.mxu2 %v6091_v46 }
 0xf51   :  { %2798 = vmatpush.msrb.mxu1 %v6074_v30  ;;  %2821 = vmatpush.msra.mxu2 %v6090_v33 }
 0xf53   :  { %2799 = vmatpush.msrb.mxu1 %v6073_v56  ;;  %2822 = vmatpush.msra.mxu2 %v6089_v26 }
 0xf55   :  { %2800 = vmatpush.msrb.mxu1 %v6072_v45  ;;  %2823 = vmatpush.msra.mxu2 %v6088_v55 }
 0xf57   :  { %2801 = vmatpush.msrb.mxu1 %v6071_v48  ;;  %2824 = vmatpush.msra.mxu2 %v6087_v4 }
 0xf59   :  { %2802 = vmatpush.msrb.mxu1 %v6070_v53  ;;  %2825 = vmatpush.msra.mxu2 %v6086_v15 }
 0xf5b   :  { %2803 = vmatpush.msrb.mxu1 %v6069_v32  ;;  %2826 = vmatpush.msra.mxu2 %v6085_v19 }
 0xf5d   :  { %2804 = vmatpush.msrb.mxu1 %v6068_v59  ;;  %2827 = vmatpush.msra.mxu2 %v6084_v17 }
 0xf5f   :  { %2805 = vmatpush.msrb.mxu1 %v6067_v13  ;;  %2828 = vmatpush.msra.mxu2 %v6083_v18 }
 0xfa3   :  { %v7592_v49 = vpop.f32.mrf.mxu1 }
 0xfa4   :  { %v7700_v30 = vpop.f32.mrf.mxu0 }
 0xfa9   :  { %v7615_v54 = vpop.f32.mrf.mxu2 }
 0xfaa   :  { %v7698_v52 = vpop.f32.mrf.mxu3 }
 0xfab   :  { %v7623_v16 = vpop.f32.mrf.mxu1 }
 0xfac   :  { %8759 = vst [vmem:[#allocation37_spill] sm:$0xff] %v7623_v16 }
 0xfb1   :  { %v7637_v58 = vpop.f32.mrf.mxu2 }
 0xfb3   :  { %v2570_v21 = vpop.f32.mrf.mxu1 }
 0xfb4   :  { %6063 = vmatmul.msk.f32.vlgmr.msra.gmra.mxu3 %vm276_vm3, %v2570_v21  ;;  %6065 = vmatmul.msk.f32.vlgmr.msra.gmra.mxu0 %vm276_vm3, %v2570_v21  ;;  %v7702_v21 = vpop.f32.mrf.mxu3 }
 0xfb5   :  { %8760 = vst [vmem:[#allocation38_spill] sm:$0xff] %v7702_v21 }
 0xfb9   :  { %v2593_v29 = vpop.f32.mrf.mxu2 }
 0xfba   :  { %6059 = vmatmul.msk.f32.vlgmr.msra.gmra.mxu1 %vm276_vm3, %v2593_v29  ;;  %6061 = vmatmul.msk.f32.vlgmr.msrb.gmra.mxu2 %vm276_vm3, %v2593_v29  ;;  %v7704_v29 = vpop.f32.mrf.mxu0 }
 0xfbb   :  { %v2573_v38 = vpop.f32.mrf.mxu1  ;;  %8761 = vst [vmem:[#allocation39_spill] sm:$0xff] %v7704_v29 }
 0xfbc   :  { %6064 = vmatmul.msk.f32.gmra.mxu3 %vm276_vm3, %v2573_v38  ;;  %6066 = vmatmul.msk.f32.gmra.mxu0 %vm276_vm3, %v2573_v38  ;;  %v2738_v38 = vld [vmem:[#allocation11 + $0x6] sm:$0x3] }
 0xfbd   :  { %v2741_v53 = vperm.slane %v2738_v38, 1 }
 0xfc1   :  { %v2596_v43 = vpop.f32.mrf.mxu2 }
 0xfc2   :  { %6060 = vmatmul.msk.f32.gmra.mxu1 %vm276_vm3, %v2596_v43  ;;  %6062 = vmatmul.msk.f32.gmra.mxu2 %vm276_vm3, %v2596_v43  ;;  %v2740_v43 = vperm.slane %v2738_v38, 0 }
0x1031   :  { %v2731_v48 = vpop.f32.mrf.mxu0 }
0x1037   :  { %v2656_v56 = vpop.f32.mrf.mxu1  ;;  %v2708_v40 = vpop.f32.mrf.mxu3 }
0x1038   :  { %v2709_v45 = vadd.f32 %v2708_v40, %v2656_v56 }
0x1039   :  { %v2734_v18 = vpop.f32.mrf.mxu0 }
0x103a   :  { %v2744_v46 = vadd.f32 %v2740_v43, %v2709_v45 }
0x103c   :  { %v2748_v33 = vmax.f32 %v2744_v46, 0.0  ;;  %v6407_v46 = vld [vmem:[#allocation13 + $0x3] ss:$0 sm:$0xff] }
0x103d   :  { %v2679_v26 = vpop.f32.mrf.mxu2 }
0x103e   :  { %v2732_v32 = vadd.f32 %v2731_v48, %v2679_v26  ;;  %2806 = vmatmul.f32.vlgmr.msrb.gmra.mxu1 %v2748_v33 }
0x103f   :  { %v2659_v55 = vpop.f32.mrf.mxu1  ;;  %v2711_v59 = vpop.f32.mrf.mxu3 }
0x1040   :  { %v2745_v4 = vadd.f32 %v2741_v53, %v2732_v32  ;;  %v2712_v13 = vadd.f32 %v2711_v59, %v2659_v55 }
0x1042   :  { %v2749_v15 = vmax.f32 %v2745_v4, 0.0  ;;  %v2746_v19 = vadd.f32 %v2740_v43, %v2712_v13 }
0x1044   :  { %2829 = vmatmul.f32.vlgmr.msra.gmra.mxu2 %v2749_v15  ;;  %v2750_v17 = vmax.f32 %v2746_v19, 0.0 }
0x1045   :  { %v2682_v29 = vpop.f32.mrf.mxu2 }
0x1046   :  { %v2735_v31 = vadd.f32 %v2734_v18, %v2682_v29  ;;  %2809 = vmatmul.f32.gmra.mxu1 %v2750_v17 }
0x1048   :  { %v2747_v56 = vadd.f32 %v2741_v53, %v2735_v31 }
0x104a   :  { %v2751_v40 = vmax.f32 %v2747_v56, 0.0 }
0x104c   :  { %2832 = vmatmul.f32.gmra.mxu2 %v2751_v40 }
0x10bb   :  { %v2807_v45 = vpop.f32.mrf.mxu1 }
0x10bc   :  { %v2808_v33 = vadd.f32 %v6407_v46, %v2807_v45 }
0x10c3   :  { %v2810_v48 = vpop.f32.mrf.mxu1 }
0x10c4   :  { %v2811_v26 = vadd.f32 %v6407_v46, %v2810_v48 }
0x10c7   :  { %v2830_v38 = vpop.f32.mrf.mxu2 }
0x10c8   :  { %v7706_v12 = vadd.f32 %v2830_v38, %v2808_v33 }
0x10ca   :  { %v2836_v43 = vmul.f32 %v7706_v12, %v7706_v12 }
0x10cf   :  { %v2833_v32 = vpop.f32.mrf.mxu2 }
0x10d0   :  { %v7708_v55 = vadd.f32 %v2833_v32, %v2811_v26 }
0x10d2   :  { %v2837_v29 = vmul.f32 %v7708_v55, %v7708_v55 }
0x10d4   :  { %v6378_v31 = vpack.i.bf16 %v2836_v43, %v2837_v29 }
0x10d6   :  { %6379 = vrot.lane.b32.xlu0 %v6378_v31, %s6706_s27 }
0x1148   :  { %v6380_v53 = vpop.permute.xlu0 %6379 }
0x1149   :  { %v6382_v59 = vunpack.i.h.bf16 %v6380_v53  ;;  %v6381_v4 = vunpack.i.l.bf16 %v6380_v53 }
0x114b   :  { %v2847_v13 = vsel %vm276_vm3, %v7708_v55, %v6381_v4  ;;  %v2846_v15 = vsel %vm276_vm3, %v7706_v12, %v6382_v59  ;;  %v7728_v59 = vld [vmem:[%s8723_s3] sm:$0xff]  ;;  %v7735_v4 = vld [vmem:[%s8723_s3 + $0x8] sm:$0xff] }
0x114c   :  { %2862 = vmatpush.msrb.mxu3 %v2847_v13 }
0x114e   :  { %2863 = vmatpush.msrb.mxu3 %v2846_v15 }
0x114f   :  { %6099 = vmatmul.msk.f32.vlgmr.msrb.gmra.mxu3 %vm226_vm0, %v6998_v11 }
0x11d2   :  { %v2865_v19 = vpop.f32.mrf.mxu3 }
0x11d3   :  { %v2868_v17 = vmul.f32 %v2865_v19, %v2865_v19 }
0x11d5   :  { %2870 = vrot.lane.b32.xlu2 %v2868_v17, %s6706_s27  ;;  %v3027_v17 = vld [vmem:[#allocation14 + $0x9c8] sm:$0xff] }
0x122f   :  { %v2871_v18 = vpop.permute.xlu2 %2870 }
0x1230   :  { %v2873_v56 = vsub.f32 %v2865_v19, %v2871_v18  ;;  %v3018_v18 = vld [vmem:[#allocation14 + $0x980] sm:$0xff] }
0x1232   :  { %v2874_v40 = vmax.f32 %v2873_v56, 0.0  ;;  %v3019_v56 = vld [vmem:[#allocation14 + $0x988] sm:$0xff] }
0x1234   :  { %v2875_v45 = vadd.f32 1e-05, %v2874_v40  ;;  %v3010_v40 = vld [vmem:[#allocation14 + $0x940] sm:$0xff] }
0x1236   :  { %6419 = vrsqrt.f32 %v2875_v45  ;;  %vm2882_vm8 = vweird.f32 %v2875_v45 }
0x123c   :  { %v6420_v38 = vpop.eup %6419 }
0x123d   :  { %v2877_v46 = vmul.f32 %v6420_v38, %v2875_v45  ;;  %vm2883_vm7 = vweird.f32 %v6420_v38  ;;  %v3011_v45 = vld [vmem:[#allocation14 + $0x948] sm:$0xff] }
0x123e   :  { %vm2884_vm5 = vmor %vm2882_vm8, %vm2883_vm7 }
0x123f   :  { %v2878_v48 = vmul.f32 %v6420_v38, %v2877_v46  ;;  %v3003_v46 = vld [vmem:[#allocation14 + $0x908] sm:$0xff] }
0x1241   :  { %v2879_v33 = vmul.f32 0.5, %v2878_v48  ;;  %v2994_v48 = vld [vmem:[#allocation14 + $0x8c0] sm:$0xff] }
0x1243   :  { %v2880_v26 = vsub.f32 1.5, %v2879_v33  ;;  %v2995_v33 = vld [vmem:[#allocation14 + $0x8c8] sm:$0xff] }
0x1245   :  { %v2881_v32 = vmul.f32 %v6420_v38, %v2880_v26  ;;  %v3028_v26 = vld [vmem:[#allocation14 + $0x9d0] sm:$0xff] }
0x1246   :  { %3085 = vmatpush.msra.mxu1 %v3028_v26  ;;  %v2996_v26 = vld [vmem:[#allocation14 + $0x8d0] sm:$0xff] }
0x1247   :  { %v2885_v43 = vsel %vm2884_vm5, %v6420_v38, %v2881_v32  ;;  %v3002_v38 = vld [vmem:[#allocation14 + $0x900] sm:$0xff]  ;;  %v3029_v32 = vld [vmem:[#allocation14 + $0x9d8] sm:$0xff] }
0x1248   :  { %2887 = vrot.lane.b32.xlu0 %v2885_v43, %s6706_s27  ;;  %3105 = vmatpush.msrb.mxu2 %v3029_v32  ;;  %v2997_v32 = vld [vmem:[#allocation14 + $0x8d8] sm:$0xff] }
0x12ba   :  { %v2888_v29 = vpop.permute.xlu0 %2887 }
0x12bb   :  { %v2890_v31 = vmul.f32 %v2888_v29, %v2865_v19  ;;  %v3026_v19 = vld [vmem:[#allocation14 + $0x9c0] sm:$0xff]  ;;  %v2987_v29 = vld [vmem:[#allocation14 + $0x888] sm:$0xff] }
0x12bc   :  { %3045 = vmatpush.msra.mxu3 %v3026_v19  ;;  %v2978_v19 = vld [vmem:[#allocation14 + $0x840] sm:$0xff] }
0x12bd   :  { %v2891_v53 = vsel %vm276_vm3, %v2890_v31, %v2885_v43  ;;  %v2986_v43 = vld [vmem:[#allocation14 + $0x880] sm:$0xff]  ;;  %v3020_v31 = vld [vmem:[#allocation14 + $0x990] sm:$0xff] }
0x12be   :  { %6100 = vmatpush.msk.msrb.mxu0 %vm780_vm9, %v2891_v53  ;;  %3046 = vmatpush.msra.mxu3 %v3018_v18  ;;  %v3021_v53 = vld [vmem:[#allocation14 + $0x998] sm:$0xff]  ;;  %v3012_v18 = vld [vmem:[#allocation14 + $0x950] sm:$0xff] }
0x12bf   :  { %6101 = vmatmul.msk.f32.vlgmr.msrb.gmra.mxu0 %vm773_vm10, %v7728_v59  ;;  %3086 = vmatpush.msra.mxu1 %v3020_v31  ;;  %v2988_v31 = vld [vmem:[#allocation14 + $0x890] sm:$0xff] }
0x12c0   :  { %3065 = vmatpush.msra.mxu0 %v3027_v17  ;;  %3047 = vmatpush.msra.mxu3 %v3010_v40  ;;  %v2979_v17 = vld [vmem:[#allocation14 + $0x848] sm:$0xff]  ;;  %v2970_v40 = vld [vmem:[#allocation14 + $0x800] sm:$0xff] }
0x12c1   :  { %3106 = vmatpush.msrb.mxu2 %v3021_v53  ;;  %3087 = vmatpush.msra.mxu1 %v3012_v18  ;;  %v2989_v53 = vld [vmem:[#allocation14 + $0x898] sm:$0xff]  ;;  %v2980_v18 = vld [vmem:[#allocation14 + $0x850] sm:$0xff] }
0x12c2   :  { %3066 = vmatpush.msra.mxu0 %v3019_v56  ;;  %3048 = vmatpush.msra.mxu3 %v3002_v38  ;;  %v3013_v56 = vld [vmem:[#allocation14 + $0x958] sm:$0xff]  ;;  %v3004_v38 = vld [vmem:[#allocation14 + $0x910] sm:$0xff] }
0x12c3   :  { %3107 = vmatpush.msrb.mxu2 %v3013_v56  ;;  %3088 = vmatpush.msra.mxu1 %v3004_v38  ;;  %v3007_v38 = vld [vmem:[#allocation14 + $0x928] sm:$0xff] }
0x12c4   :  { %3067 = vmatpush.msra.mxu0 %v3011_v45  ;;  %3049 = vmatpush.msra.mxu3 %v2994_v48  ;;  %v2971_v45 = vld [vmem:[#allocation14 + $0x808] sm:$0xff]  ;;  %v3030_v48 = vld [vmem:[#allocation14 + $0x9e0] sm:$0xff] }
0x12c5   :  { %3089 = vmatpush.msra.mxu1 %v2996_v26 }
0x12c6   :  { %3068 = vmatpush.msra.mxu0 %v3003_v46  ;;  %3050 = vmatpush.msra.mxu3 %v2986_v43  ;;  %v3005_v46 = vld [vmem:[#allocation14 + $0x918] sm:$0xff]  ;;  %v3022_v43 = vld [vmem:[#allocation14 + $0x9a0] sm:$0xff] }
0x12c7   :  { %6102 = vmatmul.msk.f32.gmra.mxu0 %vm773_vm10, %v7735_v4  ;;  %3108 = vmatpush.msrb.mxu2 %v3005_v46  ;;  %v2972_v46 = vld [vmem:[#allocation14 + $0x810] sm:$0xff] }
0x12c8   :  { %3069 = vmatpush.msra.mxu0 %v2995_v33  ;;  %3051 = vmatpush.msra.mxu3 %v2978_v19  ;;  %v3031_v33 = vld [vmem:[#allocation14 + $0x9e8] sm:$0xff]  ;;  %v3014_v19 = vld [vmem:[#allocation14 + $0x960] sm:$0xff] }
0x12c9   :  { %3109 = vmatpush.msrb.mxu2 %v2997_v32  ;;  %3090 = vmatpush.msra.mxu1 %v2988_v31  ;;  %v2999_v32 = vld [vmem:[#allocation14 + $0x8e8] sm:$0xff]  ;;  %v2990_v31 = vld [vmem:[#allocation14 + $0x8a0] sm:$0xff] }
0x12ca   :  { %3070 = vmatpush.msra.mxu0 %v2987_v29  ;;  %3052 = vmatpush.msra.mxu3 %v2970_v40  ;;  %v3023_v29 = vld [vmem:[#allocation14 + $0x9a8] sm:$0xff]  ;;  %v2981_v40 = vld [vmem:[#allocation14 + $0x858] sm:$0xff] }
0x12cb   :  { %3110 = vmatpush.msrb.mxu2 %v2989_v53  ;;  %3091 = vmatpush.msra.mxu1 %v2980_v18  ;;  %v2991_v53 = vld [vmem:[#allocation14 + $0x8a8] sm:$0xff]  ;;  %v2982_v18 = vld [vmem:[#allocation14 + $0x860] sm:$0xff] }
0x12cc   :  { %3071 = vmatpush.msra.mxu0 %v2979_v17  ;;  %3125 = vmatpush.msrb.mxu3 %v3030_v48  ;;  %v3015_v17 = vld [vmem:[#allocation14 + $0x968] sm:$0xff]  ;;  %v2973_v48 = vld [vmem:[#allocation14 + $0x818] sm:$0xff] }
0x12cd   :  { %3111 = vmatpush.msrb.mxu2 %v2981_v40  ;;  %3092 = vmatpush.msra.mxu1 %v2972_v46  ;;  %v3017_v40 = vld [vmem:[#allocation14 + $0x978] sm:$0xff]  ;;  %v3008_v46 = vld [vmem:[#allocation14 + $0x930] sm:$0xff] }
0x12ce   :  { %3072 = vmatpush.msra.mxu0 %v2971_v45  ;;  %3126 = vmatpush.msrb.mxu3 %v3022_v43  ;;  %v3006_v45 = vld [vmem:[#allocation14 + $0x920] sm:$0xff]  ;;  %v3032_v43 = vld [vmem:[#allocation14 + $0x9f0] sm:$0xff] }
0x12cf   :  { %3112 = vmatpush.msrb.mxu2 %v2973_v48  ;;  %3165 = vmatpush.msrb.mxu1 %v3032_v43  ;;  %v3009_v48 = vld [vmem:[#allocation14 + $0x938] sm:$0xff] }
0x12d0   :  { %3145 = vmatpush.msrb.mxu0 %v3031_v33  ;;  %3127 = vmatpush.msrb.mxu3 %v3014_v19  ;;  %v2998_v33 = vld [vmem:[#allocation14 + $0x8e0] sm:$0xff]  ;;  %v3024_v19 = vld [vmem:[#allocation14 + $0x9b0] sm:$0xff] }
0x12d1   :  { %3166 = vmatpush.msrb.mxu1 %v3024_v19  ;;  %v2984_v19 = vld [vmem:[#allocation14 + $0x870] sm:$0xff] }
0x12d2   :  { %3146 = vmatpush.msrb.mxu0 %v3023_v29  ;;  %3128 = vmatpush.msrb.mxu3 %v3006_v45  ;;  %v3033_v29 = vld [vmem:[#allocation14 + $0x9f8] sm:$0xff]  ;;  %v2974_v45 = vld [vmem:[#allocation14 + $0x820] sm:$0xff] }
0x12d3   :  { %3185 = vmatpush.msra.mxu2 %v3033_v29  ;;  %v2993_v29 = vld [vmem:[#allocation14 + $0x8b8] sm:$0xff] }
0x12d4   :  { %3147 = vmatpush.msrb.mxu0 %v3015_v17  ;;  %3129 = vmatpush.msrb.mxu3 %v2998_v33  ;;  %v3025_v17 = vld [vmem:[#allocation14 + $0x9b8] sm:$0xff] }
0x12d5   :  { %3186 = vmatpush.msra.mxu2 %v3025_v17  ;;  %v2985_v17 = vld [vmem:[#allocation14 + $0x878] sm:$0xff] }
0x12d6   :  { %3148 = vmatpush.msrb.mxu0 %v3007_v38  ;;  %3130 = vmatpush.msrb.mxu3 %v2990_v31  ;;  %v2975_v38 = vld [vmem:[#allocation14 + $0x828] sm:$0xff] }
0x12d7   :  { %3187 = vmatpush.msra.mxu2 %v3017_v40 }
0x12d8   :  { %3149 = vmatpush.msrb.mxu0 %v2999_v32  ;;  %3131 = vmatpush.msrb.mxu3 %v2982_v18  ;;  %v2992_v32 = vld [vmem:[#allocation14 + $0x8b0] sm:$0xff]  ;;  %v2977_v18 = vld [vmem:[#allocation14 + $0x838] sm:$0xff] }
0x12d9   :  { %3188 = vmatpush.msra.mxu2 %v3009_v48 }
0x12da   :  { %3150 = vmatpush.msrb.mxu0 %v2991_v53  ;;  %3132 = vmatpush.msrb.mxu3 %v2974_v45 }
0x133c   :  { %v7739_v13 = vpop.f32.mrf.mxu0 }
0x133d   :  { %2920 = vrot.lane.b32.xlu2 %v7739_v13, %s6706_s27 }
0x1344   :  { %v7743_v15 = vpop.f32.mrf.mxu0 }
0x1345   :  { %2922 = vrot.lane.b32.xlu1 %v7743_v15, %s6706_s27 }
0x1397   :  { %v2921_v56 = vpop.permute.xlu2 %2920 }
0x1398   :  { %v2926_v26 = vmul.f32 %v2921_v56, %v7706_v12  ;;  %v2983_v12 = vld [vmem:[#allocation14 + $0x868] sm:$0xff]  ;;  %v3016_v56 = vld [vmem:[#allocation14 + $0x970] sm:$0xff] }
0x1399   :  { %3151 = vmatpush.msrb.mxu0 %v2983_v12  ;;  %3167 = vmatpush.msrb.mxu1 %v3016_v56 }
0x139a   :  { %v2928_v2 = vsub.f32 %v2926_v26, %v7739_v13  ;;  %v3000_v13 = vld [vmem:[#allocation14 + $0x8f0] sm:$0xff]  ;;  %v3001_v26 = vld [vmem:[#allocation14 + $0x8f8] sm:$0xff] }
0x139b   :  { %3152 = vmatpush.msrb.mxu0 %v2975_v38  ;;  %3168 = vmatpush.msrb.mxu1 %v3008_v46 }
0x139c   :  { %v2930_v33 = vadd.f32 %v2928_v2, %v7543_v20  ;;  %3189 = vmatpush.msra.mxu2 %v3001_v26  ;;  %v2976_v20 = vld [vmem:[#allocation14 + $0x830] sm:$0xff] }
0x139d   :  { %3169 = vmatpush.msrb.mxu1 %v3000_v13 }
0x139e   :  { %v7750_v31 = vmax.f32 %v2930_v33, 0.0  ;;  %3190 = vmatpush.msra.mxu2 %v2993_v29 }
0x139f   :  { %3170 = vmatpush.msrb.mxu1 %v2992_v32 }
0x13a0   :  { %v2934_v12 = vsel %vm272_vm12, %v7750_v31, -1e+30  ;;  %v2945_v56 = vsel %vm292_vm13, %v7750_v31, -1e+30  ;;  %3191 = vmatpush.msra.mxu2 %v2985_v17 }
0x13a1   :  { %3171 = vmatpush.msrb.mxu1 %v2984_v19  ;;  %v2936_v45 = vsel %vm276_vm3, %v2934_v12, -inf  ;;  %v2947_v38 = vsel %vm276_vm3, %v2945_v56, -inf }
0x13a2   :  { %3192 = vmatpush.msra.mxu2 %v2977_v18 }
0x13a3   :  { %3172 = vmatpush.msrb.mxu1 %v2976_v20 }
0x13b7   :  { %v2923_v43 = vpop.permute.xlu1 %2922 }
0x13b8   :  { %v2927_v53 = vmul.f32 %v2923_v43, %v7708_v55 }
0x13ba   :  { %v2929_v2 = vsub.f32 %v2927_v53, %v7743_v15  ;;  %v2956_v15 = vsel %vm311_vm11, %v7750_v31, -1e+30 }
0x13bb   :  { %v2958_v33 = vsel %vm276_vm3, %v2956_v15, -inf }
0x13bc   :  { %v2931_v55 = vadd.f32 %v2929_v2, %v7529_v5 }
0x13be   :  { %v7764_v40 = vmax.f32 %v2931_v55, 0.0 }
0x13c0   :  { %v2935_v46 = vsel %vm273_vm14, %v7764_v40, -1e+30  ;;  %v2946_v5 = vsel %vm293_vm1, %v7764_v40, -1e+30  ;;  %v2957_v48 = vsel %vm312_vm15, %v7764_v40, -1e+30 }
0x13c1   :  { %v2937_v13 = vsel %vm276_vm3, %v2935_v46, -inf  ;;  %v2948_v26 = vsel %vm276_vm3, %v2946_v5, -inf  ;;  %v2959_v32 = vsel %vm276_vm3, %v2957_v48, -inf }
0x13c2   :  { %v2938_v43 = vmax.f32 %v2936_v45, %v2937_v13  ;;  %v2949_v29 = vmax.f32 %v2947_v38, %v2948_v26  ;;  %v2960_v53 = vmax.f32 %v2958_v33, %v2959_v32  ;;  %v3280_v13 = vld [vmem:[#allocation10 + $0x258] sm:$0xff]  ;;  %v3277_v26 = vld [vmem:[#allocation10 + $0x240] sm:$0xff]  ;;  %v3266_v32 = vld [vmem:[#allocation8 + $0x270] sm:$0xff] }
0x13c4   :  { %v2939_v19 = vrot.slane %v2938_v43, 4  ;;  %v2950_v17 = vrot.slane %v2949_v29, 4  ;;  %v2961_v2 = vrot.slane %v2960_v53, 4 }
0x13c6   :  { %v2940_v20 = vmax.f32 %v2938_v43, %v2939_v19  ;;  %v2951_v18 = vmax.f32 %v2949_v29, %v2950_v17  ;;  %v2962_v12 = vmax.f32 %v2960_v53, %v2961_v2  ;;  %v3267_v43 = vld [vmem:[#allocation8 + $0x278] sm:$0xff]  ;;  %v3275_v29 = vld [vmem:[#allocation10 + $0x230] sm:$0xff]  ;;  %v3264_v53 = vld [vmem:[#allocation8 + $0x260] sm:$0xff] }
0x13c7   :  { %v3265_v19 = vld [vmem:[#allocation8 + $0x268] sm:$0xff]  ;;  %v3273_v17 = vld [vmem:[#allocation10 + $0x220] sm:$0xff] }
0x13c8   :  { %v2941_v56 = vrot.slane %v2940_v20, 2  ;;  %v2952_v55 = vrot.slane %v2951_v18, 2  ;;  %v2963_v21 = vrot.slane %v2962_v12, 2  ;;  %v3274_v2 = vld [vmem:[#allocation10 + $0x228] sm:$0xff] }
0x13ca   :  { %v2942_v24 = vmax.f32 %v2940_v20, %v2941_v56  ;;  %v2953_v15 = vmax.f32 %v2951_v18, %v2952_v55  ;;  %v2964_v9 = vmax.f32 %v2962_v12, %v2963_v21  ;;  %v3279_v21 = vld [vmem:[#allocation10 + $0x250] sm:$0xff]  ;;  %v3263_v18 = vld [vmem:[#allocation8 + $0x258] sm:$0xff]  ;;  %v3260_v55 = vld [vmem:[#allocation8 + $0x240] sm:$0xff] }
0x13cb   :  { %v3262_v20 = vld [vmem:[#allocation8 + $0x250] sm:$0xff]  ;;  %v3272_v56 = vld [vmem:[#allocation10 + $0x218] sm:$0xff] }
0x13cc   :  { %v2943_v46 = vrot.slane %v2942_v24, 1  ;;  %v2954_v60 = vrot.slane %v2953_v15, 1  ;;  %v2965_v5 = vrot.slane %v2964_v9, 1  ;;  %v3271_v12 = vld [vmem:[#allocation10 + $0x210] sm:$0xff] }
0x13ce   :  { %v2944_v16 = vmax.f32 %v2942_v24, %v2943_v46  ;;  %v2955_v48 = vmax.f32 %v2953_v15, %v2954_v60  ;;  %v2966_v45 = vmax.f32 %v2964_v9, %v2965_v5  ;;  %v3283_v60 = vld [vmem:[#allocation10 + $0x270] sm:$0xff]  ;;  %v3284_v9 = vld [vmem:[#allocation10 + $0x278] sm:$0xff]  ;;  %v3281_v24 = vld [vmem:[#allocation10 + $0x260] sm:$0xff] }
0x13cf   :  { %v3261_v15 = vld [vmem:[#allocation8 + $0x248] sm:$0xff]  ;;  %v3269_v46 = vld [vmem:[#allocation10 + $0x200] sm:$0xff] }
0x13d0   :  { %v2967_v38 = vsel %vm324_vm2, %v2944_v16, %v2955_v48  ;;  %v3282_v16 = vld [vmem:[#allocation10 + $0x268] sm:$0xff]  ;;  %v3258_v48 = vld [vmem:[#allocation8 + $0x230] sm:$0xff] }
0x13d1   :  { %v2968_v33 = vsel %vm326_vm4, %v2967_v38, %v2966_v45  ;;  %v3270_v5 = vld [vmem:[#allocation10 + $0x208] sm:$0xff]  ;;  %v3259_v45 = vld [vmem:[#allocation8 + $0x238] sm:$0xff]  ;;  %v3256_v38 = vld [vmem:[#allocation8 + $0x220] sm:$0xff] }
0x13d2   :  { %6103 = vmatmul.msk.f32.vlgmr.msra.gmra.mxu3 %vm276_vm3, %v2968_v33  ;;  %6104 = vmatmul.msk.f32.vlgmr.msra.gmra.mxu0 %vm276_vm3, %v2968_v33 }
0x13d3   :  { %6105 = vmatmul.msk.f32.vlgmr.msra.gmra.mxu1 %vm276_vm3, %v2968_v33  ;;  %6106 = vmatmul.msk.f32.vlgmr.msrb.gmra.mxu2 %vm276_vm3, %v2968_v33 }
0x13d4   :  { %3219 = vmatpush.msra.mxu3 %v7764_v40  ;;  %3242 = vmatpush.msra.mxu0 %v7764_v40 }
0x13d5   :  { %3351 = vmatpush.msra.mxu1 %v3266_v32  ;;  %3374 = vmatpush.msrb.mxu2 %v3267_v43  ;;  %v6136_v32 = vld [vmem:[%s8729_s9 + $0x468] sm:$0xff]  ;;  %v6153_v43 = vld [vmem:[%s8729_s9 + $0x4f0] sm:$0xff] }
0x13d6   :  { %3220 = vmatpush.msra.mxu3 %v7750_v31  ;;  %3243 = vmatpush.msra.mxu0 %v7750_v31 }
0x13d7   :  { %3352 = vmatpush.msra.mxu1 %v3264_v53  ;;  %3375 = vmatpush.msrb.mxu2 %v3265_v19  ;;  %v6151_v53 = vld [vmem:[%s8729_s9 + $0x4e0] sm:$0xff]  ;;  %v6134_v19 = vld [vmem:[%s8729_s9 + $0x458] sm:$0xff] }
0x13d9   :  { %3353 = vmatpush.msra.mxu1 %v3262_v20  ;;  %3376 = vmatpush.msrb.mxu2 %v3263_v18  ;;  %v6133_v20 = vld [vmem:[%s8729_s9 + $0x450] sm:$0xff] }
0x13da   :  { %6107 = vmatmul.msk.f32.vlgmr.msrb.gmra.mxu3 %vm276_vm3, %v2968_v33  ;;  %6108 = vmatmul.msk.f32.vlgmr.msrb.gmra.mxu0 %vm276_vm3, %v2968_v33 }
0x13db   :  { %6109 = vmatmul.msk.f32.vlgmr.msrb.gmra.mxu1 %vm276_vm3, %v2968_v33  ;;  %6110 = vmatmul.msk.f32.vlgmr.msra.gmra.mxu2 %vm276_vm3, %v2968_v33  ;;  %v3257_v33 = vld [vmem:[#allocation8 + $0x228] sm:$0xff] }
0x13dc   :  { %3299 = vmatpush.msrb.mxu3 %v3283_v60  ;;  %3322 = vmatpush.msrb.mxu0 %v3284_v9  ;;  %v3254_v60 = vld [vmem:[#allocation8 + $0x210] sm:$0xff]  ;;  %v3255_v9 = vld [vmem:[#allocation8 + $0x218] sm:$0xff] }
0x13dd   :  { %3354 = vmatpush.msra.mxu1 %v3260_v55  ;;  %3377 = vmatpush.msrb.mxu2 %v3261_v15  ;;  %v6131_v55 = vld [vmem:[%s8729_s9 + $0x440] sm:$0xff]  ;;  %v6130_v15 = vld [vmem:[%s8729_s9 + $0x438] sm:$0xff] }
0x13de   :  { %3300 = vmatpush.msrb.mxu3 %v3281_v24  ;;  %3323 = vmatpush.msrb.mxu0 %v3282_v16  ;;  %v3252_v24 = vld [vmem:[#allocation8 + $0x200] sm:$0xff]  ;;  %v3253_v16 = vld [vmem:[#allocation8 + $0x208] sm:$0xff] }
0x13df   :  { %3355 = vmatpush.msra.mxu1 %v3258_v48  ;;  %3378 = vmatpush.msrb.mxu2 %v3259_v45 }
0x13e0   :  { %3301 = vmatpush.msrb.mxu3 %v3279_v21  ;;  %3324 = vmatpush.msrb.mxu0 %v3280_v13  ;;  %v6138_v21 = vld [vmem:[%s8729_s9 + $0x478] sm:$0xff]  ;;  %v6137_v13 = vld [vmem:[%s8729_s9 + $0x470] sm:$0xff] }
0x13e1   :  { %3356 = vmatpush.msra.mxu1 %v3256_v38  ;;  %3379 = vmatpush.msrb.mxu2 %v3257_v33  ;;  %v6129_v33 = vld [vmem:[%s8729_s9 + $0x430] sm:$0xff] }
0x13e2   :  { %6111 = vmatmul.msk.f32.vlgmr.msra.gmra.mxu3 %vm226_vm0, %v6857_v27  ;;  %6113 = vmatmul.msk.f32.vlgmr.msra.gmra.mxu0 %vm226_vm0, %v7576_v0  ;;  %v3278_v0 = vld [vmem:[#allocation10 + $0x248] sm:$0xff] }
0x13e3   :  { %3302 = vmatpush.msrb.mxu3 %v3277_v26  ;;  %3325 = vmatpush.msrb.mxu0 %v3278_v0  ;;  %v6154_v0 = vld [vmem:[%s8729_s9 + $0x4f8] sm:$0xff] }
0x13e4   :  { %3357 = vmatpush.msra.mxu1 %v3254_v60  ;;  %3380 = vmatpush.msrb.mxu2 %v3255_v9  ;;  %v6148_v60 = vld [vmem:[%s8729_s9 + $0x4c8] sm:$0xff] }
0x13e5   :  { %3303 = vmatpush.msrb.mxu3 %v3275_v29  ;;  %v6152_v29 = vld [vmem:[%s8729_s9 + $0x4e8] sm:$0xff] }
0x13e6   :  { %3358 = vmatpush.msra.mxu1 %v3252_v24  ;;  %3381 = vmatpush.msrb.mxu2 %v3253_v16  ;;  %v6128_v9 = vld [vmem:[%s8729_s9 + $0x428] sm:$0xff]  ;;  %v6147_v24 = vld [vmem:[%s8729_s9 + $0x4c0] sm:$0xff] }
0x13e7   :  { %3304 = vmatpush.msrb.mxu3 %v3273_v17  ;;  %v6127_v16 = vld [vmem:[%s8729_s9 + $0x420] sm:$0xff] }
0x13e9   :  { %3305 = vmatpush.msrb.mxu3 %v3271_v12  ;;  %v6149_v12 = vld [vmem:[%s8729_s9 + $0x4d0] sm:$0xff] }
0x13ea   :  { %6112 = vmatmul.msk.f32.gmra.mxu3 %vm226_vm0, %v6868_v37  ;;  %6114 = vmatmul.msk.f32.gmra.mxu0 %vm226_vm0, %v7582_v42  ;;  %v3276_v42 = vld [vmem:[#allocation10 + $0x238] sm:$0xff] }
0x13eb   :  { %3326 = vmatpush.msrb.mxu0 %v3276_v42  ;;  %3306 = vmatpush.msrb.mxu3 %v3269_v46  ;;  %v6135_v42 = vld [vmem:[%s8729_s9 + $0x460] sm:$0xff] }
0x13ed   :  { %3327 = vmatpush.msrb.mxu0 %v3274_v2  ;;  %3442 = vmatpush.msra.mxu3 %v6138_v21  ;;  %v6150_v2 = vld [vmem:[%s8729_s9 + $0x4d8] sm:$0xff] }
0x13ee   :  { %v6146_v21 = vld [vmem:[%s8729_s9 + $0x4b8] sm:$0xff] }
0x13ef   :  { %3328 = vmatpush.msrb.mxu0 %v3272_v56  ;;  %3443 = vmatpush.msra.mxu3 %v6137_v13  ;;  %v6132_v56 = vld [vmem:[%s8729_s9 + $0x448] sm:$0xff]  ;;  %v6126_v13 = vld [vmem:[%s8729_s9 + $0x418] sm:$0xff] }
0x13f1   :  { %3329 = vmatpush.msrb.mxu0 %v3270_v5  ;;  %3444 = vmatpush.msra.mxu3 %v6136_v32  ;;  %v6125_v32 = vld [vmem:[%s8729_s9 + $0x410] sm:$0xff] }
0x13f3   :  { %3465 = vmatpush.msra.mxu0 %v6154_v0  ;;  %3445 = vmatpush.msra.mxu3 %v6135_v42  ;;  %v6145_v0 = vld [vmem:[%s8729_s9 + $0x4b0] sm:$0xff]  ;;  %v6143_v42 = vld [vmem:[%s8729_s9 + $0x4a0] sm:$0xff] }
0x13f5   :  { %3466 = vmatpush.msra.mxu0 %v6153_v43  ;;  %3446 = vmatpush.msra.mxu3 %v6134_v19  ;;  %v6144_v43 = vld [vmem:[%s8729_s9 + $0x4a8] sm:$0xff]  ;;  %v6142_v19 = vld [vmem:[%s8729_s9 + $0x498] sm:$0xff] }
0x13f7   :  { %3467 = vmatpush.msra.mxu0 %v6152_v29  ;;  %3447 = vmatpush.msra.mxu3 %v6133_v20  ;;  %v6124_v29 = vld [vmem:[%s8729_s9 + $0x408] sm:$0xff] }
0x13f8   :  { %v6140_v20 = vld [vmem:[%s8729_s9 + $0x488] sm:$0xff] }
0x13f9   :  { %3468 = vmatpush.msra.mxu0 %v6151_v53  ;;  %3448 = vmatpush.msra.mxu3 %v6132_v56  ;;  %v6123_v53 = vld [vmem:[%s8729_s9 + $0x400] sm:$0xff] }
0x13fb   :  { %3469 = vmatpush.msra.mxu0 %v6150_v2  ;;  %3449 = vmatpush.msra.mxu3 %v6131_v55  ;;  %v6141_v2 = vld [vmem:[%s8729_s9 + $0x490] sm:$0xff] }
0x13fd   :  { %3470 = vmatpush.msra.mxu0 %v6149_v12  ;;  %3450 = vmatpush.msra.mxu3 %v6130_v15  ;;  %v6139_v12 = vld [vmem:[%s8729_s9 + $0x480] sm:$0xff] }
0x13ff   :  { %3451 = vmatpush.msra.mxu3 %v6129_v33  ;;  %3471 = vmatpush.msra.mxu0 %v6148_v60 }
0x1401   :  { %3452 = vmatpush.msra.mxu3 %v6128_v9  ;;  %3472 = vmatpush.msra.mxu0 %v6147_v24 }
0x1403   :  { %3453 = vmatpush.msra.mxu3 %v6127_v16  ;;  %3473 = vmatpush.msra.mxu0 %v6146_v21 }
0x1405   :  { %3454 = vmatpush.msra.mxu3 %v6126_v13  ;;  %3474 = vmatpush.msra.mxu0 %v6145_v0 }
0x1407   :  { %3455 = vmatpush.msra.mxu3 %v6125_v32  ;;  %3475 = vmatpush.msra.mxu0 %v6144_v43 }
0x1409   :  { %3456 = vmatpush.msra.mxu3 %v6124_v29  ;;  %3476 = vmatpush.msra.mxu0 %v6143_v42 }
0x140b   :  { %3457 = vmatpush.msra.mxu3 %v6123_v53  ;;  %3477 = vmatpush.msra.mxu0 %v6142_v19 }
0x140d   :  { %3478 = vmatpush.msra.mxu0 %v6141_v2 }
0x140f   :  { %3479 = vmatpush.msra.mxu0 %v6140_v20 }
0x1411   :  { %3480 = vmatpush.msra.mxu0 %v6139_v12 }
0x144f   :  { %v7809_v26 = vpop.f32.mrf.mxu0 }
0x1450   :  { %v7915_v56 = vpop.f32.mrf.mxu1 }
0x1455   :  { %v7832_v17 = vpop.f32.mrf.mxu3 }
0x1456   :  { %v7917_v55 = vpop.f32.mrf.mxu2 }
0x1457   :  { %v7840_v18 = vpop.f32.mrf.mxu0 }
0x1458   :  { %v7919_v15 = vpop.f32.mrf.mxu1 }
0x1459   :  { %8763 = vst [vmem:[#allocation41_spill] sm:$0xff] %v7919_v15 }
0x145d   :  { %v7854_v46 = vpop.f32.mrf.mxu3 }
0x145e   :  { %8762 = vst [vmem:[#allocation40_spill] sm:$0xff] %v7854_v46 }
0x145f   :  { %v3245_v5 = vpop.f32.mrf.mxu0 }
0x1460   :  { %6115 = vmatmul.msk.f32.vlgmr.msrb.gmra.mxu3 %vm276_vm3, %v3245_v5  ;;  %6117 = vmatmul.msk.f32.vlgmr.msrb.gmra.mxu0 %vm276_vm3, %v3245_v5  ;;  %v3390_v5 = vld [vmem:[#allocation11 + $0x8] sm:$0x3] }
0x1461   :  { %v3393_v21 = vperm.slane %v3390_v5, 1 }
0x1465   :  { %v3222_v48 = vpop.f32.mrf.mxu3 }
0x1466   :  { %6119 = vmatmul.msk.f32.vlgmr.msra.gmra.mxu1 %vm276_vm3, %v3222_v48  ;;  %6121 = vmatmul.msk.f32.vlgmr.msrb.gmra.mxu2 %vm276_vm3, %v3222_v48  ;;  %v7921_v48 = vpop.f32.mrf.mxu2 }
0x1467   :  { %v3248_v45 = vpop.f32.mrf.mxu0  ;;  %8764 = vst [vmem:[#allocation42_spill] sm:$0xff] %v7921_v48 }
0x1468   :  { %6116 = vmatmul.msk.f32.gmra.mxu3 %vm276_vm3, %v3248_v45  ;;  %6118 = vmatmul.msk.f32.gmra.mxu0 %vm276_vm3, %v3248_v45  ;;  %v3392_v45 = vperm.slane %v3390_v5, 0 }
0x146d   :  { %v3225_v38 = vpop.f32.mrf.mxu3 }
0x146e   :  { %6120 = vmatmul.msk.f32.gmra.mxu1 %vm276_vm3, %v3225_v38  ;;  %6122 = vmatmul.msk.f32.gmra.mxu2 %vm276_vm3, %v3225_v38 }
0x14dd   :  { %v3331_v24 = vpop.f32.mrf.mxu0 }
0x14e3   :  { %v3308_v38 = vpop.f32.mrf.mxu3  ;;  %v3360_v33 = vpop.f32.mrf.mxu1 }
0x14e4   :  { %v3361_v60 = vadd.f32 %v3360_v33, %v3308_v38 }
0x14e5   :  { %v3334_v20 = vpop.f32.mrf.mxu0 }
0x14e6   :  { %v3396_v9 = vadd.f32 %v3392_v45, %v3361_v60 }
0x14e8   :  { %v3400_v16 = vmax.f32 %v3396_v9, 0.0  ;;  %v6408_v9 = vld [vmem:[#allocation13 + $0x4] ss:$0 sm:$0xff] }
0x14e9   :  { %v3383_v13 = vpop.f32.mrf.mxu2 }
0x14ea   :  { %v3384_v0 = vadd.f32 %v3383_v13, %v3331_v24  ;;  %3458 = vmatmul.f32.vlgmr.msra.gmra.mxu3 %v3400_v16 }
0x14eb   :  { %v3311_v32 = vpop.f32.mrf.mxu3  ;;  %v3363_v43 = vpop.f32.mrf.mxu1 }
0x14ec   :  { %v3397_v29 = vadd.f32 %v3393_v21, %v3384_v0  ;;  %v3364_v42 = vadd.f32 %v3363_v43, %v3311_v32 }
0x14ee   :  { %v3401_v53 = vmax.f32 %v3397_v29, 0.0  ;;  %v3398_v19 = vadd.f32 %v3392_v45, %v3364_v42 }
0x14f0   :  { %3481 = vmatmul.f32.vlgmr.msra.gmra.mxu0 %v3401_v53  ;;  %v3402_v2 = vmax.f32 %v3398_v19, 0.0 }
0x14f1   :  { %v3386_v12 = vpop.f32.mrf.mxu2 }
0x14f2   :  { %v3387_v48 = vadd.f32 %v3386_v12, %v3334_v20  ;;  %3461 = vmatmul.f32.gmra.mxu3 %v3402_v2 }
0x14f4   :  { %v3399_v38 = vadd.f32 %v3393_v21, %v3387_v48 }
0x14f6   :  { %v3403_v33 = vmax.f32 %v3399_v38, 0.0 }
0x14f8   :  { %3484 = vmatmul.f32.gmra.mxu0 %v3403_v33 }
0x156d   :  { %v3459_v60 = vpop.f32.mrf.mxu3  ;;  %v3482_v5 = vpop.f32.mrf.mxu0 }
0x156e   :  { %v3460_v24 = vadd.f32 %v6408_v9, %v3459_v60 }
0x1570   :  { %v7923_v13 = vadd.f32 %v3482_v5, %v3460_v24 }
0x1572   :  { %v3488_v45 = vmul.f32 %v7923_v13, %v7923_v13 }
0x1575   :  { %v3462_v16 = vpop.f32.mrf.mxu3  ;;  %v3485_v32 = vpop.f32.mrf.mxu0 }
0x1576   :  { %v3463_v0 = vadd.f32 %v6408_v9, %v3462_v16 }
0x1578   :  { %v7925_v43 = vadd.f32 %v3485_v32, %v3463_v0 }
0x157a   :  { %v3489_v29 = vmul.f32 %v7925_v43, %v7925_v43 }
0x157c   :  { %v6383_v48 = vpack.i.bf16 %v3488_v45, %v3489_v29 }
0x157e   :  { %6384 = vrot.lane.b32.xlu0 %v6383_v48, %s6706_s27 }
0x15f0   :  { %v6385_v21 = vpop.permute.xlu0 %6384 }
0x15f1   :  { %v6387_v42 = vunpack.i.h.bf16 %v6385_v21  ;;  %v6386_v53 = vunpack.i.l.bf16 %v6385_v21 }
0x15f3   :  { %v3499_v19 = vsel %vm276_vm3, %v7925_v43, %v6386_v53  ;;  %v3498_v2 = vsel %vm276_vm3, %v7923_v13, %v6387_v42 }
0x15f4   :  { %3514 = vmatpush.msrb.mxu1 %v3499_v19 }
0x15f6   :  { %3515 = vmatpush.msrb.mxu1 %v3498_v2  ;;  %v3678_v2 = vld [vmem:[#allocation14 + $0xbc0] sm:$0xff] }
0x15f7   :  { %6155 = vmatmul.msk.f32.vlgmr.msrb.gmra.mxu1 %vm226_vm0, %v6998_v11 }
0x15f8   :  { %3697 = vmatpush.msra.mxu1 %v3678_v2  ;;  %v3665_v2 = vld [vmem:[#allocation14 + $0xb58] sm:$0xff] }
0x1674   :  { %v3517_v20 = vpop.f32.mrf.mxu1 }
0x1675   :  { %v3520_v12 = vmul.f32 %v3517_v20, %v3517_v20 }
0x1677   :  { %3522 = vrot.lane.b32.xlu2 %v3520_v12, %s6706_s27  ;;  %v3670_v12 = vld [vmem:[#allocation14 + $0xb80] sm:$0xff] }
0x1678   :  { %3698 = vmatpush.msra.mxu1 %v3670_v12  ;;  %v3623_v12 = vld [vmem:[#allocation14 + $0xa08] sm:$0xff] }
0x16d1   :  { %v3523_v38 = vpop.permute.xlu2 %3522 }
0x16d2   :  { %v3525_v33 = vsub.f32 %v3517_v20, %v3523_v38  ;;  %v3671_v38 = vld [vmem:[#allocation14 + $0xb88] sm:$0xff] }
0x16d4   :  { %v3526_v60 = vmax.f32 %v3525_v33, 0.0  ;;  %v3654_v33 = vld [vmem:[#allocation14 + $0xb00] sm:$0xff] }
0x16d6   :  { %v3527_v5 = vadd.f32 1e-05, %v3526_v60  ;;  %v3655_v60 = vld [vmem:[#allocation14 + $0xb08] sm:$0xff] }
0x16d8   :  { %6421 = vrsqrt.f32 %v3527_v5  ;;  %vm3534_vm7 = vweird.f32 %v3527_v5 }
0x16de   :  { %v6422_v9 = vpop.eup %6421 }
0x16df   :  { %v3529_v24 = vmul.f32 %v6422_v9, %v3527_v5  ;;  %vm3535_vm6 = vweird.f32 %v6422_v9  ;;  %v3646_v5 = vld [vmem:[#allocation14 + $0xac0] sm:$0xff] }
0x16e0   :  { %vm3536_vm8 = vmor %vm3534_vm7, %vm3535_vm6 }
0x16e1   :  { %v3530_v16 = vmul.f32 %v6422_v9, %v3529_v24  ;;  %v3680_v24 = vld [vmem:[#allocation14 + $0xbd0] sm:$0xff] }
0x16e2   :  { %3737 = vmatpush.msrb.mxu3 %v3680_v24  ;;  %v3675_v24 = vld [vmem:[#allocation14 + $0xba8] sm:$0xff] }
0x16e3   :  { %v3531_v0 = vmul.f32 0.5, %v3530_v16  ;;  %v3681_v16 = vld [vmem:[#allocation14 + $0xbd8] sm:$0xff] }
0x16e4   :  { %3757 = vmatpush.msrb.mxu0 %v3681_v16  ;;  %v3640_v16 = vld [vmem:[#allocation14 + $0xa90] sm:$0xff] }
0x16e5   :  { %v3532_v32 = vsub.f32 1.5, %v3531_v0  ;;  %v3638_v0 = vld [vmem:[#allocation14 + $0xa80] sm:$0xff] }
0x16e7   :  { %v3533_v45 = vmul.f32 %v6422_v9, %v3532_v32  ;;  %v3639_v32 = vld [vmem:[#allocation14 + $0xa88] sm:$0xff] }
0x16e9   :  { %v3537_v29 = vsel %vm3536_vm8, %v6422_v9, %v3533_v45  ;;  %v3647_v9 = vld [vmem:[#allocation14 + $0xac8] sm:$0xff]  ;;  %v3672_v45 = vld [vmem:[#allocation14 + $0xb90] sm:$0xff] }
0x16ea   :  { %3539 = vrot.lane.b32.xlu1 %v3537_v29, %s6706_s27  ;;  %3738 = vmatpush.msrb.mxu3 %v3672_v45  ;;  %v3667_v45 = vld [vmem:[#allocation14 + $0xb68] sm:$0xff] }
0x175c   :  { %v3540_v48 = vpop.permute.xlu1 %3539 }
0x175d   :  { %v3542_v21 = vmul.f32 %v3540_v48, %v3517_v20  ;;  %v3679_v20 = vld [vmem:[#allocation14 + $0xbc8] sm:$0xff]  ;;  %v3630_v48 = vld [vmem:[#allocation14 + $0xa40] sm:$0xff] }
0x175f   :  { %v3543_v42 = vsel %vm276_vm3, %v3542_v21, %v3537_v29  ;;  %v3673_v29 = vld [vmem:[#allocation14 + $0xb98] sm:$0xff]  ;;  %v3631_v21 = vld [vmem:[#allocation14 + $0xa48] sm:$0xff] }
0x1760   :  { %6156 = vmatpush.msk.msra.mxu2 %vm780_vm9, %v3543_v42  ;;  %3758 = vmatpush.msrb.mxu0 %v3673_v29  ;;  %v3664_v42 = vld [vmem:[#allocation14 + $0xb50] sm:$0xff] }
0x1761   :  { %6157 = vmatmul.msk.f32.vlgmr.msra.gmra.mxu2 %vm773_vm10, %v7728_v59  ;;  %v3662_v59 = vld [vmem:[#allocation14 + $0xb40] sm:$0xff]  ;;  %3739 = vmatpush.msrb.mxu3 %v3664_v42  ;;  %v3632_v29 = vld [vmem:[#allocation14 + $0xa50] sm:$0xff] }
0x1762   :  { %3717 = vmatpush.msrb.mxu2 %v3679_v20  ;;  %3699 = vmatpush.msra.mxu1 %v3662_v59  ;;  %v3622_v20 = vld [vmem:[#allocation14 + $0xa00] sm:$0xff]  ;;  %v3657_v59 = vld [vmem:[#allocation14 + $0xb18] sm:$0xff] }
0x1763   :  { %3759 = vmatpush.msrb.mxu0 %v3665_v2  ;;  %v3658_v42 = vld [vmem:[#allocation14 + $0xb20] sm:$0xff]  ;;  %v3659_v2 = vld [vmem:[#allocation14 + $0xb28] sm:$0xff] }
0x1764   :  { %3718 = vmatpush.msrb.mxu2 %v3671_v38  ;;  %3700 = vmatpush.msra.mxu1 %v3654_v33  ;;  %v3656_v38 = vld [vmem:[#allocation14 + $0xb10] sm:$0xff]  ;;  %v3683_v33 = vld [vmem:[#allocation14 + $0xbe8] sm:$0xff] }
0x1765   :  { %3740 = vmatpush.msrb.mxu3 %v3656_v38  ;;  %3760 = vmatpush.msrb.mxu0 %v3657_v59  ;;  %v3650_v38 = vld [vmem:[#allocation14 + $0xae0] sm:$0xff]  ;;  %v3651_v59 = vld [vmem:[#allocation14 + $0xae8] sm:$0xff] }
0x1766   :  { %3701 = vmatpush.msra.mxu1 %v3646_v5  ;;  %v3649_v5 = vld [vmem:[#allocation14 + $0xad8] sm:$0xff] }
0x1767   :  { %3761 = vmatpush.msrb.mxu0 %v3649_v5  ;;  %v3642_v5 = vld [vmem:[#allocation14 + $0xaa0] sm:$0xff] }
0x1768   :  { %3702 = vmatpush.msra.mxu1 %v3638_v0  ;;  %v3641_v0 = vld [vmem:[#allocation14 + $0xa98] sm:$0xff] }
0x1769   :  { %6158 = vmatmul.msk.f32.gmra.mxu2 %vm773_vm10, %v7735_v4  ;;  %v3663_v4 = vld [vmem:[#allocation14 + $0xb48] sm:$0xff]  ;;  %3762 = vmatpush.msrb.mxu0 %v3641_v0  ;;  %v3634_v0 = vld [vmem:[#allocation14 + $0xa60] sm:$0xff] }
0x176a   :  { %3719 = vmatpush.msrb.mxu2 %v3663_v4  ;;  %3703 = vmatpush.msra.mxu1 %v3630_v48  ;;  %v3682_v4 = vld [vmem:[#allocation14 + $0xbe0] sm:$0xff]  ;;  %v3633_v48 = vld [vmem:[#allocation14 + $0xa58] sm:$0xff] }
0x176b   :  { %3763 = vmatpush.msrb.mxu0 %v3633_v48  ;;  %v3626_v48 = vld [vmem:[#allocation14 + $0xa20] sm:$0xff] }
0x176c   :  { %3720 = vmatpush.msrb.mxu2 %v3655_v60  ;;  %3704 = vmatpush.msra.mxu1 %v3622_v20  ;;  %v3648_v60 = vld [vmem:[#allocation14 + $0xad0] sm:$0xff] }
0x176d   :  { %3741 = vmatpush.msrb.mxu3 %v3648_v60  ;;  %v3624_v20 = vld [vmem:[#allocation14 + $0xa10] sm:$0xff]  ;;  %v3685_v60 = vld [vmem:[#allocation14 + $0xbf8] sm:$0xff] }
0x176e   :  { %3721 = vmatpush.msrb.mxu2 %v3647_v9  ;;  %v3674_v9 = vld [vmem:[#allocation14 + $0xba0] sm:$0xff]  ;;  %3777 = vmatpush.msrb.mxu1 %v3682_v4 }
0x176f   :  { %3742 = vmatpush.msrb.mxu3 %v3640_v16  ;;  %v3677_v16 = vld [vmem:[#allocation14 + $0xbb8] sm:$0xff] }
0x1770   :  { %3722 = vmatpush.msrb.mxu2 %v3639_v32  ;;  %v3666_v32 = vld [vmem:[#allocation14 + $0xb60] sm:$0xff]  ;;  %3778 = vmatpush.msrb.mxu1 %v3674_v9  ;;  %v3643_v9 = vld [vmem:[#allocation14 + $0xaa8] sm:$0xff] }
0x1771   :  { %3743 = vmatpush.msrb.mxu3 %v3632_v29  ;;  %v3669_v29 = vld [vmem:[#allocation14 + $0xb78] sm:$0xff] }
0x1772   :  { %3723 = vmatpush.msrb.mxu2 %v3631_v21  ;;  %3779 = vmatpush.msrb.mxu1 %v3666_v32  ;;  %v3635_v32 = vld [vmem:[#allocation14 + $0xa68] sm:$0xff] }
0x1773   :  { %3744 = vmatpush.msrb.mxu3 %v3624_v20 }
0x1774   :  { %3724 = vmatpush.msrb.mxu2 %v3623_v12  ;;  %v3625_v12 = vld [vmem:[#allocation14 + $0xa18] sm:$0xff]  ;;  %3780 = vmatpush.msrb.mxu1 %v3658_v42  ;;  %v3660_v42 = vld [vmem:[#allocation14 + $0xb30] sm:$0xff] }
0x1775   :  { %3764 = vmatpush.msrb.mxu0 %v3625_v12  ;;  %v3652_v12 = vld [vmem:[#allocation14 + $0xaf0] sm:$0xff] }
0x1776   :  { %3797 = vmatpush.msra.mxu2 %v3683_v33  ;;  %v3684_v33 = vld [vmem:[#allocation14 + $0xbf0] sm:$0xff]  ;;  %3781 = vmatpush.msrb.mxu1 %v3650_v38 }
0x1777   :  { %3817 = vmatpush.msra.mxu3 %v3684_v33  ;;  %3837 = vmatpush.msra.mxu0 %v3685_v60  ;;  %v3644_v38 = vld [vmem:[#allocation14 + $0xab0] sm:$0xff] }
0x1778   :  { %3798 = vmatpush.msra.mxu2 %v3675_v24  ;;  %v3676_v24 = vld [vmem:[#allocation14 + $0xbb0] sm:$0xff]  ;;  %3782 = vmatpush.msrb.mxu1 %v3642_v5 }
0x1779   :  { %3818 = vmatpush.msra.mxu3 %v3676_v24  ;;  %3838 = vmatpush.msra.mxu0 %v3677_v16  ;;  %v3636_v5 = vld [vmem:[#allocation14 + $0xa70] sm:$0xff]  ;;  %v3629_v16 = vld [vmem:[#allocation14 + $0xa38] sm:$0xff] }
0x177a   :  { %3799 = vmatpush.msra.mxu2 %v3667_v45  ;;  %3783 = vmatpush.msrb.mxu1 %v3634_v0  ;;  %v3628_v24 = vld [vmem:[#allocation14 + $0xa30] sm:$0xff] }
0x177b   :  { %3839 = vmatpush.msra.mxu0 %v3669_v29 }
0x177c   :  { %3800 = vmatpush.msra.mxu2 %v3659_v2  ;;  %v3661_v2 = vld [vmem:[#allocation14 + $0xb38] sm:$0xff]  ;;  %3784 = vmatpush.msrb.mxu1 %v3626_v48 }
0x177d   :  { %3840 = vmatpush.msra.mxu0 %v3661_v2 }
0x177e   :  { %3801 = vmatpush.msra.mxu2 %v3651_v59  ;;  %v3645_v59 = vld [vmem:[#allocation14 + $0xab8] sm:$0xff] }
0x1780   :  { %3802 = vmatpush.msra.mxu2 %v3643_v9  ;;  %v3637_v9 = vld [vmem:[#allocation14 + $0xa78] sm:$0xff] }
0x1782   :  { %3803 = vmatpush.msra.mxu2 %v3635_v32 }
0x17e4   :  { %v7946_v53 = vpop.f32.mrf.mxu2 }
0x17e5   :  { %3572 = vrot.lane.b32.xlu0 %v7946_v53, %s6706_s27 }
0x17ec   :  { %v7950_v19 = vpop.f32.mrf.mxu2 }
0x17ed   :  { %3574 = vrot.lane.b32.xlu2 %v7950_v19, %s6706_s27 }
0x1847   :  { %v3575_v21 = vpop.permute.xlu2 %3574 }
0x1848   :  { %v3579_v4 = vmul.f32 %v3575_v21, %v7925_v43  ;;  %v3668_v43 = vld [vmem:[#allocation14 + $0xb70] sm:$0xff]  ;;  %v3627_v21 = vld [vmem:[#allocation14 + $0xa28] sm:$0xff] }
0x1849   :  { %3819 = vmatpush.msra.mxu3 %v3668_v43  ;;  %3804 = vmatpush.msra.mxu2 %v3627_v21 }
0x184a   :  { %v3581_v45 = vsub.f32 %v3579_v4, %v7950_v19  ;;  %v3653_v19 = vld [vmem:[#allocation14 + $0xaf8] sm:$0xff] }
0x184b   :  { %3820 = vmatpush.msra.mxu3 %v3660_v42  ;;  %3841 = vmatpush.msra.mxu0 %v3653_v19 }
0x184c   :  { %v3583_v20 = vadd.f32 %v3581_v45, %v7764_v40 }
0x184d   :  { %3821 = vmatpush.msra.mxu3 %v3652_v12  ;;  %3842 = vmatpush.msra.mxu0 %v3645_v59 }
0x184e   :  { %v7957_v33 = vmax.f32 %v3583_v20, 0.0 }
0x184f   :  { %3822 = vmatpush.msra.mxu3 %v3644_v38  ;;  %3843 = vmatpush.msra.mxu0 %v3637_v9 }
0x1850   :  { %v3587_v0 = vsel %vm273_vm14, %v7957_v33, -1e+30  ;;  %v3598_v32 = vsel %vm293_vm1, %v7957_v33, -1e+30 }
0x1851   :  { %3823 = vmatpush.msra.mxu3 %v3636_v5  ;;  %3844 = vmatpush.msra.mxu0 %v3629_v16  ;;  %v3589_v43 = vsel %vm276_vm3, %v3587_v0, -inf  ;;  %v3600_v29 = vsel %vm276_vm3, %v3598_v32, -inf }
0x1853   :  { %3824 = vmatpush.msra.mxu3 %v3628_v24 }
0x1857   :  { %v3573_v4 = vpop.permute.xlu0 %3572 }
0x1858   :  { %v3578_v60 = vmul.f32 %v3573_v4, %v7923_v13 }
0x185a   :  { %v3580_v40 = vsub.f32 %v3578_v60, %v7946_v53  ;;  %v3609_v53 = vsel %vm312_vm15, %v7957_v33, -1e+30 }
0x185b   :  { %v3611_v42 = vsel %vm276_vm3, %v3609_v53, -inf }
0x185c   :  { %v3582_v13 = vadd.f32 %v3580_v40, %v7750_v31 }
0x185e   :  { %v7971_v45 = vmax.f32 %v3582_v13, 0.0 }
0x1860   :  { %v3586_v48 = vsel %vm272_vm12, %v7971_v45, -1e+30  ;;  %v3597_v31 = vsel %vm292_vm13, %v7971_v45, -1e+30  ;;  %v3608_v21 = vsel %vm311_vm11, %v7971_v45, -1e+30 }
0x1861   :  { %v3588_v2 = vsel %vm276_vm3, %v3586_v48, -inf  ;;  %v3599_v20 = vsel %vm276_vm3, %v3597_v31, -inf  ;;  %v3610_v12 = vsel %vm276_vm3, %v3608_v21, -inf }
0x1862   :  { %v3590_v19 = vmax.f32 %v3588_v2, %v3589_v43  ;;  %v3601_v38 = vmax.f32 %v3599_v20, %v3600_v29  ;;  %v3612_v59 = vmax.f32 %v3610_v12, %v3611_v42  ;;  %v3919_v2 = vld [vmem:[#allocation8 + $0x2f8] sm:$0xff]  ;;  %v3916_v20 = vld [vmem:[#allocation8 + $0x2e0] sm:$0xff]  ;;  %v3917_v12 = vld [vmem:[#allocation8 + $0x2e8] sm:$0xff] }
0x1864   :  { %v3591_v4 = vrot.slane %v3590_v19, 4  ;;  %v3602_v60 = vrot.slane %v3601_v38, 4  ;;  %v3613_v5 = vrot.slane %v3612_v59, 4 }
0x1866   :  { %v3592_v9 = vmax.f32 %v3590_v19, %v3591_v4  ;;  %v3603_v40 = vmax.f32 %v3601_v38, %v3602_v60  ;;  %v3614_v24 = vmax.f32 %v3612_v59, %v3613_v5  ;;  %v3914_v19 = vld [vmem:[#allocation8 + $0x2d0] sm:$0xff]  ;;  %v3915_v38 = vld [vmem:[#allocation8 + $0x2d8] sm:$0xff]  ;;  %v3912_v60 = vld [vmem:[#allocation8 + $0x2c0] sm:$0xff] }
0x1867   :  { %v3935_v59 = vld [vmem:[#allocation10 + $0x2f0] sm:$0xff]  ;;  %v3936_v4 = vld [vmem:[#allocation10 + $0x2f8] sm:$0xff]  ;;  %v3913_v5 = vld [vmem:[#allocation8 + $0x2c8] sm:$0xff] }
0x1868   :  { %v3593_v16 = vrot.slane %v3592_v9, 2  ;;  %v3604_v0 = vrot.slane %v3603_v40, 2  ;;  %v3615_v32 = vrot.slane %v3614_v24, 2 }
0x186a   :  { %v3594_v13 = vmax.f32 %v3592_v9, %v3593_v16  ;;  %v3605_v53 = vmax.f32 %v3603_v40, %v3604_v0  ;;  %v3616_v15 = vmax.f32 %v3614_v24, %v3615_v32  ;;  %v3933_v9 = vld [vmem:[#allocation10 + $0x2e0] sm:$0xff]  ;;  %v3934_v40 = vld [vmem:[#allocation10 + $0x2e8] sm:$0xff]  ;;  %v3910_v24 = vld [vmem:[#allocation8 + $0x2b0] sm:$0xff] }
0x186b   :  { %v3911_v16 = vld [vmem:[#allocation8 + $0x2b8] sm:$0xff]  ;;  %v3931_v0 = vld [vmem:[#allocation10 + $0x2d0] sm:$0xff] }
0x186c   :  { %v3595_v48 = vrot.slane %v3594_v13, 1  ;;  %v3606_v46 = vrot.slane %v3605_v53, 1  ;;  %v3617_v31 = vrot.slane %v3616_v15, 1  ;;  %v3932_v32 = vld [vmem:[#allocation10 + $0x2d8] sm:$0xff] }
0x186e   :  { %v3596_v41 = vmax.f32 %v3594_v13, %v3595_v48  ;;  %v3607_v21 = vmax.f32 %v3605_v53, %v3606_v46  ;;  %v3618_v43 = vmax.f32 %v3616_v15, %v3617_v31  ;;  %v8010_v46 = vld [vmem:[#allocation3 + $0x8] sm:$0xff]  ;;  %v3918_v15 = vld [vmem:[#allocation8 + $0x2f0] sm:$0xff] }
0x186f   :  { %v3908_v13 = vld [vmem:[#allocation8 + $0x2a0] sm:$0xff]  ;;  %v3909_v53 = vld [vmem:[#allocation8 + $0x2a8] sm:$0xff] }
0x1870   :  { %v3619_v29 = vsel %vm324_vm2, %v3596_v41, %v3607_v21  ;;  %v8004_v41 = vld [vmem:[#allocation3] sm:$0xff]  ;;  %v3930_v31 = vld [vmem:[#allocation10 + $0x2c8] sm:$0xff]  ;;  %v3906_v21 = vld [vmem:[#allocation8 + $0x290] sm:$0xff] }
0x1871   :  { %v3620_v42 = vsel %vm326_vm4, %v3619_v29, %v3618_v43  ;;  %v3929_v48 = vld [vmem:[#allocation10 + $0x2c0] sm:$0xff]  ;;  %v3907_v43 = vld [vmem:[#allocation8 + $0x298] sm:$0xff]  ;;  %v3927_v29 = vld [vmem:[#allocation10 + $0x2b0] sm:$0xff] }
0x1872   :  { %6159 = vmatmul.msk.f32.vlgmr.msra.gmra.mxu1 %vm276_vm3, %v3620_v42  ;;  %6160 = vmatmul.msk.f32.vlgmr.msrb.gmra.mxu2 %vm276_vm3, %v3620_v42 }
0x1873   :  { %6161 = vmatmul.msk.f32.vlgmr.msrb.gmra.mxu3 %vm276_vm3, %v3620_v42  ;;  %6162 = vmatmul.msk.f32.vlgmr.msrb.gmra.mxu0 %vm276_vm3, %v3620_v42 }
0x1874   :  { %3871 = vmatpush.msra.mxu1 %v7957_v33  ;;  %3894 = vmatpush.msrb.mxu2 %v7957_v33 }
0x1875   :  { %4003 = vmatpush.msrb.mxu3 %v3918_v15  ;;  %4026 = vmatpush.msrb.mxu0 %v3919_v2  ;;  %v3904_v15 = vld [vmem:[#allocation8 + $0x280] sm:$0xff]  ;;  %v3905_v2 = vld [vmem:[#allocation8 + $0x288] sm:$0xff] }
0x1876   :  { %3872 = vmatpush.msra.mxu1 %v7971_v45  ;;  %3895 = vmatpush.msrb.mxu2 %v7971_v45 }
0x1877   :  { %4004 = vmatpush.msrb.mxu3 %v3916_v20  ;;  %4027 = vmatpush.msrb.mxu0 %v3917_v12  ;;  %v3925_v20 = vld [vmem:[#allocation10 + $0x2a0] sm:$0xff]  ;;  %v3926_v12 = vld [vmem:[#allocation10 + $0x2a8] sm:$0xff] }
0x1879   :  { %4005 = vmatpush.msrb.mxu3 %v3914_v19  ;;  %4028 = vmatpush.msrb.mxu0 %v3915_v38  ;;  %v3923_v19 = vld [vmem:[#allocation10 + $0x290] sm:$0xff]  ;;  %v3924_v38 = vld [vmem:[#allocation10 + $0x298] sm:$0xff] }
0x187a   :  { %6163 = vmatmul.msk.f32.vlgmr.msrb.gmra.mxu1 %vm276_vm3, %v3620_v42  ;;  %6164 = vmatmul.msk.f32.vlgmr.msra.gmra.mxu2 %vm276_vm3, %v3620_v42 }
0x187b   :  { %6165 = vmatmul.msk.f32.vlgmr.msra.gmra.mxu3 %vm276_vm3, %v3620_v42  ;;  %6166 = vmatmul.msk.f32.vlgmr.msra.gmra.mxu0 %vm276_vm3, %v3620_v42  ;;  %v3928_v42 = vld [vmem:[#allocation10 + $0x2b8] sm:$0xff] }
0x187c   :  { %3951 = vmatpush.msrb.mxu1 %v3935_v59  ;;  %3974 = vmatpush.msra.mxu2 %v3936_v4  ;;  %v3921_v59 = vld [vmem:[#allocation10 + $0x280] sm:$0xff]  ;;  %v3922_v4 = vld [vmem:[#allocation10 + $0x288] sm:$0xff] }
0x187d   :  { %4006 = vmatpush.msrb.mxu3 %v3912_v60  ;;  %4029 = vmatpush.msrb.mxu0 %v3913_v5  ;;  %v6194_v60 = vld [vmem:[%s8729_s9 + $0x578] sm:$0xff]  ;;  %v6193_v5 = vld [vmem:[%s8729_s9 + $0x570] sm:$0xff] }
0x187e   :  { %3952 = vmatpush.msrb.mxu1 %v3933_v9  ;;  %3975 = vmatpush.msra.mxu2 %v3934_v40  ;;  %v6210_v40 = vld [vmem:[%s8729_s9 + $0x5f8] sm:$0xff] }
0x187f   :  { %4007 = vmatpush.msrb.mxu3 %v3910_v24  ;;  %4030 = vmatpush.msrb.mxu0 %v3911_v16  ;;  %v6192_v24 = vld [vmem:[%s8729_s9 + $0x568] sm:$0xff]  ;;  %v6209_v16 = vld [vmem:[%s8729_s9 + $0x5f0] sm:$0xff] }
0x1880   :  { %3953 = vmatpush.msrb.mxu1 %v3931_v0  ;;  %3976 = vmatpush.msra.mxu2 %v3932_v32  ;;  %v6208_v0 = vld [vmem:[%s8729_s9 + $0x5e8] sm:$0xff]  ;;  %v6191_v32 = vld [vmem:[%s8729_s9 + $0x560] sm:$0xff] }
0x1881   :  { %4008 = vmatpush.msrb.mxu3 %v3908_v13  ;;  %4031 = vmatpush.msrb.mxu0 %v3909_v53  ;;  %v6207_v13 = vld [vmem:[%s8729_s9 + $0x5e0] sm:$0xff]  ;;  %v6190_v53 = vld [vmem:[%s8729_s9 + $0x558] sm:$0xff] }
0x1882   :  { %6167 = vmatmul.msk.f32.vlgmr.msra.gmra.mxu1 %vm226_vm0, %v6857_v27  ;;  %6169 = vmatmul.msk.f32.vlgmr.msrb.gmra.mxu2 %vm226_vm0, %v8004_v41 }
0x1883   :  { %3954 = vmatpush.msrb.mxu1 %v3929_v48  ;;  %3977 = vmatpush.msra.mxu2 %v3930_v31  ;;  %v6206_v31 = vld [vmem:[%s8729_s9 + $0x5d8] sm:$0xff] }
0x1884   :  { %4009 = vmatpush.msrb.mxu3 %v3906_v21  ;;  %4032 = vmatpush.msrb.mxu0 %v3907_v43  ;;  %v6189_v21 = vld [vmem:[%s8729_s9 + $0x550] sm:$0xff] }
0x1885   :  { %3955 = vmatpush.msrb.mxu1 %v3927_v29  ;;  %3978 = vmatpush.msra.mxu2 %v3928_v42  ;;  %v6205_v29 = vld [vmem:[%s8729_s9 + $0x5d0] sm:$0xff]  ;;  %v6188_v42 = vld [vmem:[%s8729_s9 + $0x548] sm:$0xff] }
0x1886   :  { %4010 = vmatpush.msrb.mxu3 %v3904_v15  ;;  %4033 = vmatpush.msrb.mxu0 %v3905_v2  ;;  %v6187_v15 = vld [vmem:[%s8729_s9 + $0x540] sm:$0xff]  ;;  %v6186_v2 = vld [vmem:[%s8729_s9 + $0x538] sm:$0xff] }
0x1887   :  { %3956 = vmatpush.msrb.mxu1 %v3925_v20  ;;  %3979 = vmatpush.msra.mxu2 %v3926_v12 }
0x1889   :  { %3957 = vmatpush.msrb.mxu1 %v3923_v19  ;;  %3980 = vmatpush.msra.mxu2 %v3924_v38 }
0x188a   :  { %6168 = vmatmul.msk.f32.gmra.mxu1 %vm226_vm0, %v6868_v37  ;;  %6170 = vmatmul.msk.f32.gmra.mxu2 %vm226_vm0, %v8010_v46 }
0x188b   :  { %3958 = vmatpush.msrb.mxu1 %v3921_v59  ;;  %3981 = vmatpush.msra.mxu2 %v3922_v4  ;;  %v6185_v4 = vld [vmem:[%s8729_s9 + $0x530] sm:$0xff] }
0x188d   :  { %4094 = vmatpush.msra.mxu1 %v6194_v60  ;;  %4117 = vmatpush.msrb.mxu2 %v6210_v40  ;;  %v6204_v60 = vld [vmem:[%s8729_s9 + $0x5c8] sm:$0xff]  ;;  %v6203_v40 = vld [vmem:[%s8729_s9 + $0x5c0] sm:$0xff] }
0x188f   :  { %4095 = vmatpush.msra.mxu1 %v6193_v5  ;;  %4118 = vmatpush.msrb.mxu2 %v6209_v16  ;;  %v6184_v5 = vld [vmem:[%s8729_s9 + $0x528] sm:$0xff]  ;;  %v6202_v16 = vld [vmem:[%s8729_s9 + $0x5b8] sm:$0xff] }
0x1891   :  { %4096 = vmatpush.msra.mxu1 %v6192_v24  ;;  %4119 = vmatpush.msrb.mxu2 %v6208_v0  ;;  %v6183_v24 = vld [vmem:[%s8729_s9 + $0x520] sm:$0xff]  ;;  %v6182_v0 = vld [vmem:[%s8729_s9 + $0x518] sm:$0xff] }
0x1893   :  { %4097 = vmatpush.msra.mxu1 %v6191_v32  ;;  %4120 = vmatpush.msrb.mxu2 %v6207_v13  ;;  %v6201_v32 = vld [vmem:[%s8729_s9 + $0x5b0] sm:$0xff] }
0x1894   :  { %v6181_v13 = vld [vmem:[%s8729_s9 + $0x510] sm:$0xff] }
0x1895   :  { %4098 = vmatpush.msra.mxu1 %v6190_v53  ;;  %4121 = vmatpush.msrb.mxu2 %v6206_v31  ;;  %v6200_v53 = vld [vmem:[%s8729_s9 + $0x5a8] sm:$0xff] }
0x1896   :  { %v6180_v31 = vld [vmem:[%s8729_s9 + $0x508] sm:$0xff] }
0x1897   :  { %4099 = vmatpush.msra.mxu1 %v6189_v21  ;;  %4122 = vmatpush.msrb.mxu2 %v6205_v29  ;;  %v6199_v21 = vld [vmem:[%s8729_s9 + $0x5a0] sm:$0xff] }
0x1898   :  { %v6179_v29 = vld [vmem:[%s8729_s9 + $0x500] sm:$0xff] }
0x1899   :  { %4100 = vmatpush.msra.mxu1 %v6188_v42  ;;  %4123 = vmatpush.msrb.mxu2 %v6204_v60  ;;  %v6198_v42 = vld [vmem:[%s8729_s9 + $0x598] sm:$0xff]  ;;  %v4042_v60 = vld [vmem:[#allocation11 + $0xa] sm:$0x3] }
0x189b   :  { %4101 = vmatpush.msra.mxu1 %v6187_v15  ;;  %4124 = vmatpush.msrb.mxu2 %v6203_v40  ;;  %v6197_v15 = vld [vmem:[%s8729_s9 + $0x590] sm:$0xff] }
0x189d   :  { %4102 = vmatpush.msra.mxu1 %v6186_v2  ;;  %4125 = vmatpush.msrb.mxu2 %v6202_v16  ;;  %v6196_v2 = vld [vmem:[%s8729_s9 + $0x588] sm:$0xff] }
0x189f   :  { %4103 = vmatpush.msra.mxu1 %v6185_v4  ;;  %4126 = vmatpush.msrb.mxu2 %v6201_v32 }
0x18a1   :  { %4104 = vmatpush.msra.mxu1 %v6184_v5  ;;  %4127 = vmatpush.msrb.mxu2 %v6200_v53  ;;  %v4044_v5 = vperm.slane %v4042_v60, 0  ;;  %v4045_v53 = vperm.slane %v4042_v60, 1 }
0x18a3   :  { %4105 = vmatpush.msra.mxu1 %v6183_v24  ;;  %4128 = vmatpush.msrb.mxu2 %v6199_v21 }
0x18a5   :  { %4106 = vmatpush.msra.mxu1 %v6182_v0  ;;  %4129 = vmatpush.msrb.mxu2 %v6198_v42 }
0x18a7   :  { %4107 = vmatpush.msra.mxu1 %v6181_v13  ;;  %4130 = vmatpush.msrb.mxu2 %v6197_v15 }
0x18a9   :  { %4108 = vmatpush.msra.mxu1 %v6180_v31  ;;  %4131 = vmatpush.msrb.mxu2 %v6196_v2 }
0x18ab   :  { %4109 = vmatpush.msra.mxu1 %v6179_v29 }
0x18ef   :  { %v8020_v9 = vpop.f32.mrf.mxu1 }
0x18f0   :  { %8765 = vst [vmem:[#allocation43_spill] sm:$0xff] %v8020_v9 }
0x18f5   :  { %v8043_v48 = vpop.f32.mrf.mxu2 }
0x18f7   :  { %v8051_v43 = vpop.f32.mrf.mxu1 }
0x18f8   :  { %8766 = vst [vmem:[#allocation44_spill] sm:$0xff] %v8051_v43 }
0x18fd   :  { %v8065_v20 = vpop.f32.mrf.mxu2 }
0x18fe   :  { %8767 = vst [vmem:[#allocation45_spill] sm:$0xff] %v8065_v20 }
0x18ff   :  { %v3874_v12 = vpop.f32.mrf.mxu1 }
0x1900   :  { %6175 = vmatmul.msk.f32.vlgmr.msrb.gmra.mxu3 %vm276_vm3, %v3874_v12  ;;  %6177 = vmatmul.msk.f32.vlgmr.msrb.gmra.mxu0 %vm276_vm3, %v3874_v12  ;;  %v6195_v12 = vld [vmem:[%s8729_s9 + $0x580] sm:$0xff] }
0x1901   :  { %4132 = vmatpush.msrb.mxu2 %v6195_v12 }
0x1905   :  { %v3897_v19 = vpop.f32.mrf.mxu2 }
0x1906   :  { %6171 = vmatmul.msk.f32.vlgmr.msrb.gmra.mxu1 %vm276_vm3, %v3897_v19  ;;  %6173 = vmatmul.msk.f32.vlgmr.msra.gmra.mxu2 %vm276_vm3, %v3897_v19  ;;  %v8126_v19 = vpop.f32.mrf.mxu3 }
0x1907   :  { %v3877_v38 = vpop.f32.mrf.mxu1 }
0x1908   :  { %6176 = vmatmul.msk.f32.gmra.mxu3 %vm276_vm3, %v3877_v38  ;;  %6178 = vmatmul.msk.f32.gmra.mxu0 %vm276_vm3, %v3877_v38  ;;  %v8128_v38 = vpop.f32.mrf.mxu0 }
0x1909   :  { %8768 = vst [vmem:[#allocation46_spill] sm:$0xff] %v8128_v38 }
0x190d   :  { %v3900_v59 = vpop.f32.mrf.mxu2 }
0x190e   :  { %6172 = vmatmul.msk.f32.gmra.mxu1 %vm276_vm3, %v3900_v59  ;;  %6174 = vmatmul.msk.f32.gmra.mxu2 %vm276_vm3, %v3900_v59  ;;  %v8130_v59 = vpop.f32.mrf.mxu3 }
0x190f   :  { %8769 = vst [vmem:[#allocation47_spill] sm:$0xff] %v8130_v59 }
0x1910   :  { %v8132_v4 = vpop.f32.mrf.mxu0 }
0x1911   :  { %8770 = vst [vmem:[#allocation48_spill] sm:$0xff] %v8132_v4 }
0x197d   :  { %v4035_v32 = vpop.f32.mrf.mxu0 }
0x1983   :  { %v3960_v40 = vpop.f32.mrf.mxu1  ;;  %v4012_v24 = vpop.f32.mrf.mxu3 }
0x1984   :  { %v4013_v16 = vadd.f32 %v4012_v24, %v3960_v40 }
0x1985   :  { %v4038_v4 = vpop.f32.mrf.mxu0 }
0x1986   :  { %v4048_v0 = vadd.f32 %v4044_v5, %v4013_v16 }
0x1988   :  { %v4052_v13 = vmax.f32 %v4048_v0, 0.0  ;;  %v6409_v0 = vld [vmem:[#allocation13 + $0x5] ss:$0 sm:$0xff] }
0x1989   :  { %v3983_v31 = vpop.f32.mrf.mxu2 }
0x198a   :  { %v4036_v21 = vadd.f32 %v4035_v32, %v3983_v31  ;;  %4110 = vmatmul.f32.vlgmr.msra.gmra.mxu1 %v4052_v13 }
0x198b   :  { %v3963_v29 = vpop.f32.mrf.mxu1  ;;  %v4015_v42 = vpop.f32.mrf.mxu3 }
0x198c   :  { %v4049_v15 = vadd.f32 %v4045_v53, %v4036_v21  ;;  %v4016_v2 = vadd.f32 %v4015_v42, %v3963_v29 }
0x198e   :  { %v4053_v12 = vmax.f32 %v4049_v15, 0.0  ;;  %v4050_v59 = vadd.f32 %v4044_v5, %v4016_v2 }
0x1990   :  { %v4054_v43 = vmax.f32 %v4050_v59, 0.0  ;;  %4133 = vmatmul.f32.vlgmr.msrb.gmra.mxu2 %v4053_v12 }
0x1991   :  { %v3986_v20 = vpop.f32.mrf.mxu2 }
0x1992   :  { %v4039_v38 = vadd.f32 %v4038_v4, %v3986_v20  ;;  %4113 = vmatmul.f32.gmra.mxu1 %v4054_v43 }
0x1994   :  { %v4051_v40 = vadd.f32 %v4045_v53, %v4039_v38 }
0x1996   :  { %v4055_v24 = vmax.f32 %v4051_v40, 0.0 }
0x1998   :  { %4136 = vmatmul.f32.gmra.mxu2 %v4055_v24 }
0x1a07   :  { %v4111_v16 = vpop.f32.mrf.mxu1 }
0x1a08   :  { %v4112_v13 = vadd.f32 %v6409_v0, %v4111_v16 }
0x1a0f   :  { %v4114_v32 = vpop.f32.mrf.mxu1 }
0x1a10   :  { %v4115_v31 = vadd.f32 %v6409_v0, %v4114_v32 }
0x1a13   :  { %v4134_v60 = vpop.f32.mrf.mxu2 }
0x1a14   :  { %v8134_v9 = vadd.f32 %v4134_v60, %v4112_v13 }
0x1a16   :  { %v4140_v59 = vmul.f32 %v8134_v9, %v8134_v9 }
0x1a1b   :  { %v4137_v21 = vpop.f32.mrf.mxu2 }
0x1a1c   :  { %v8136_v29 = vadd.f32 %v4137_v21, %v4115_v31 }
0x1a1e   :  { %v4141_v43 = vmul.f32 %v8136_v29, %v8136_v29 }
0x1a20   :  { %v6388_v20 = vpack.i.bf16 %v4140_v59, %v4141_v43 }
0x1a22   :  { %6389 = vrot.lane.b32.xlu1 %v6388_v20, %s6706_s27 }
0x1a94   :  { %v6390_v38 = vpop.permute.xlu1 %6389 }
0x1a95   :  { %v6392_v4 = vunpack.i.h.bf16 %v6390_v38  ;;  %v6391_v5 = vunpack.i.l.bf16 %v6390_v38 }
0x1a97   :  { %v4151_v53 = vsel %vm276_vm3, %v8136_v29, %v6391_v5  ;;  %v4150_v42 = vsel %vm276_vm3, %v8134_v9, %v6392_v4  ;;  %v8156_v4 = vld [vmem:[%s8723_s3] sm:$0xff]  ;;  %v8163_v5 = vld [vmem:[%s8723_s3 + $0x8] sm:$0xff] }
0x1a98   :  { %4166 = vmatpush.msra.mxu3 %v4151_v53  ;;  %8771 = vst [vmem:[#allocation49_spill] sm:$0xff] %v8163_v5 }
0x1a9a   :  { %4167 = vmatpush.msra.mxu3 %v4150_v42 }
0x1a9b   :  { %6211 = vmatmul.msk.f32.vlgmr.msra.gmra.mxu3 %vm226_vm0, %v6998_v11 }
0x1b1e   :  { %v4169_v15 = vpop.f32.mrf.mxu3 }
0x1b1f   :  { %v4172_v2 = vmul.f32 %v4169_v15, %v4169_v15 }
0x1b21   :  { %4174 = vrot.lane.b32.xlu0 %v4172_v2, %s6706_s27  ;;  %v4331_v2 = vld [vmem:[#allocation14 + $0xdc8] sm:$0xff] }
0x1b93   :  { %v4175_v12 = vpop.permute.xlu0 %4174 }
0x1b94   :  { %v4177_v40 = vsub.f32 %v4169_v15, %v4175_v12  ;;  %v4322_v12 = vld [vmem:[#allocation14 + $0xd80] sm:$0xff] }
0x1b96   :  { %v4178_v24 = vmax.f32 %v4177_v40, 0.0  ;;  %v4323_v40 = vld [vmem:[#allocation14 + $0xd88] sm:$0xff] }
0x1b98   :  { %v4179_v16 = vadd.f32 1e-05, %v4178_v24  ;;  %v4314_v24 = vld [vmem:[#allocation14 + $0xd40] sm:$0xff] }
0x1b9a   :  { %6423 = vrsqrt.f32 %v4179_v16  ;;  %vm4186_vm6 = vweird.f32 %v4179_v16 }
0x1ba0   :  { %v6424_v60 = vpop.eup %6423 }
0x1ba1   :  { %v4181_v0 = vmul.f32 %v6424_v60, %v4179_v16  ;;  %vm4187_vm5 = vweird.f32 %v6424_v60  ;;  %v4315_v16 = vld [vmem:[#allocation14 + $0xd48] sm:$0xff] }
0x1ba2   :  { %vm4188_vm7 = vmor %vm4186_vm6, %vm4187_vm5 }
0x1ba3   :  { %v4182_v32 = vmul.f32 %v6424_v60, %v4181_v0  ;;  %v4307_v0 = vld [vmem:[#allocation14 + $0xd08] sm:$0xff] }
0x1ba5   :  { %v4183_v13 = vmul.f32 0.5, %v4182_v32  ;;  %v4298_v32 = vld [vmem:[#allocation14 + $0xcc0] sm:$0xff] }
0x1ba7   :  { %v4184_v31 = vsub.f32 1.5, %v4183_v13  ;;  %v4299_v13 = vld [vmem:[#allocation14 + $0xcc8] sm:$0xff] }
0x1ba9   :  { %v4185_v21 = vmul.f32 %v6424_v60, %v4184_v31  ;;  %v4332_v31 = vld [vmem:[#allocation14 + $0xdd0] sm:$0xff] }
0x1baa   :  { %4389 = vmatpush.msrb.mxu1 %v4332_v31  ;;  %v4300_v31 = vld [vmem:[#allocation14 + $0xcd0] sm:$0xff] }
0x1bab   :  { %v4189_v59 = vsel %vm4188_vm7, %v6424_v60, %v4185_v21  ;;  %v4306_v60 = vld [vmem:[#allocation14 + $0xd00] sm:$0xff]  ;;  %v4333_v21 = vld [vmem:[#allocation14 + $0xdd8] sm:$0xff] }
0x1bac   :  { %4191 = vrot.lane.b32.xlu2 %v4189_v59, %s6706_s27  ;;  %4409 = vmatpush.msra.mxu2 %v4333_v21  ;;  %v4301_v21 = vld [vmem:[#allocation14 + $0xcd8] sm:$0xff] }
0x1c06   :  { %v4192_v43 = vpop.permute.xlu2 %4191 }
0x1c07   :  { %v4194_v20 = vmul.f32 %v4192_v43, %v4169_v15  ;;  %v4330_v15 = vld [vmem:[#allocation14 + $0xdc0] sm:$0xff]  ;;  %v4291_v43 = vld [vmem:[#allocation14 + $0xc88] sm:$0xff] }
0x1c08   :  { %4349 = vmatpush.msrb.mxu3 %v4330_v15  ;;  %v4282_v15 = vld [vmem:[#allocation14 + $0xc40] sm:$0xff] }
0x1c09   :  { %v4195_v38 = vsel %vm276_vm3, %v4194_v20, %v4189_v59  ;;  %v4290_v59 = vld [vmem:[#allocation14 + $0xc80] sm:$0xff]  ;;  %v4324_v20 = vld [vmem:[#allocation14 + $0xd90] sm:$0xff] }
0x1c0a   :  { %6212 = vmatpush.msk.msra.mxu0 %vm780_vm9, %v4195_v38  ;;  %4350 = vmatpush.msrb.mxu3 %v4322_v12  ;;  %v4325_v38 = vld [vmem:[#allocation14 + $0xd98] sm:$0xff]  ;;  %v4316_v12 = vld [vmem:[#allocation14 + $0xd50] sm:$0xff] }
0x1c0b   :  { %6213 = vmatmul.msk.f32.vlgmr.msra.gmra.mxu0 %vm773_vm10, %v8156_v4  ;;  %4390 = vmatpush.msrb.mxu1 %v4324_v20  ;;  %v4292_v20 = vld [vmem:[#allocation14 + $0xc90] sm:$0xff] }
0x1c0c   :  { %4369 = vmatpush.msrb.mxu0 %v4331_v2  ;;  %4351 = vmatpush.msrb.mxu3 %v4314_v24  ;;  %v4283_v2 = vld [vmem:[#allocation14 + $0xc48] sm:$0xff]  ;;  %v4274_v24 = vld [vmem:[#allocation14 + $0xc00] sm:$0xff] }
0x1c0d   :  { %4410 = vmatpush.msra.mxu2 %v4325_v38  ;;  %4391 = vmatpush.msrb.mxu1 %v4316_v12  ;;  %v4293_v38 = vld [vmem:[#allocation14 + $0xc98] sm:$0xff]  ;;  %v4284_v12 = vld [vmem:[#allocation14 + $0xc50] sm:$0xff] }
0x1c0e   :  { %4370 = vmatpush.msrb.mxu0 %v4323_v40  ;;  %4352 = vmatpush.msrb.mxu3 %v4306_v60  ;;  %v4317_v40 = vld [vmem:[#allocation14 + $0xd58] sm:$0xff]  ;;  %v4308_v60 = vld [vmem:[#allocation14 + $0xd10] sm:$0xff] }
0x1c0f   :  { %4411 = vmatpush.msra.mxu2 %v4317_v40  ;;  %4392 = vmatpush.msrb.mxu1 %v4308_v60  ;;  %v4285_v40 = vld [vmem:[#allocation14 + $0xc58] sm:$0xff]  ;;  %v4276_v60 = vld [vmem:[#allocation14 + $0xc10] sm:$0xff] }
0x1c10   :  { %4371 = vmatpush.msrb.mxu0 %v4315_v16  ;;  %4353 = vmatpush.msrb.mxu3 %v4298_v32  ;;  %v4275_v16 = vld [vmem:[#allocation14 + $0xc08] sm:$0xff]  ;;  %v4334_v32 = vld [vmem:[#allocation14 + $0xde0] sm:$0xff] }
0x1c11   :  { %4393 = vmatpush.msrb.mxu1 %v4300_v31  ;;  %v4336_v31 = vld [vmem:[#allocation14 + $0xdf0] sm:$0xff] }
0x1c12   :  { %4372 = vmatpush.msrb.mxu0 %v4307_v0  ;;  %4354 = vmatpush.msrb.mxu3 %v4290_v59  ;;  %v4309_v0 = vld [vmem:[#allocation14 + $0xd18] sm:$0xff]  ;;  %v4326_v59 = vld [vmem:[#allocation14 + $0xda0] sm:$0xff] }
0x1c13   :  { %6214 = vmatmul.msk.f32.gmra.mxu0 %vm773_vm10, %v8163_v5  ;;  %4412 = vmatpush.msra.mxu2 %v4309_v0  ;;  %v4277_v0 = vld [vmem:[#allocation14 + $0xc18] sm:$0xff] }
0x1c14   :  { %4373 = vmatpush.msrb.mxu0 %v4299_v13  ;;  %4355 = vmatpush.msrb.mxu3 %v4282_v15  ;;  %v4335_v13 = vld [vmem:[#allocation14 + $0xde8] sm:$0xff]  ;;  %v4318_v15 = vld [vmem:[#allocation14 + $0xd60] sm:$0xff]  ;;  %v4313_v5 = vld [vmem:[#allocation14 + $0xd38] sm:$0xff] }
0x1c15   :  { %4413 = vmatpush.msra.mxu2 %v4301_v21  ;;  %4394 = vmatpush.msrb.mxu1 %v4292_v20  ;;  %v4337_v21 = vld [vmem:[#allocation14 + $0xdf8] sm:$0xff]  ;;  %v4328_v20 = vld [vmem:[#allocation14 + $0xdb0] sm:$0xff] }
0x1c16   :  { %4374 = vmatpush.msrb.mxu0 %v4291_v43  ;;  %4356 = vmatpush.msrb.mxu3 %v4274_v24  ;;  %v4327_v43 = vld [vmem:[#allocation14 + $0xda8] sm:$0xff]  ;;  %v4310_v24 = vld [vmem:[#allocation14 + $0xd20] sm:$0xff] }
0x1c17   :  { %4414 = vmatpush.msra.mxu2 %v4293_v38  ;;  %4395 = vmatpush.msrb.mxu1 %v4284_v12  ;;  %v4329_v38 = vld [vmem:[#allocation14 + $0xdb8] sm:$0xff]  ;;  %v4287_v12 = vld [vmem:[#allocation14 + $0xc68] sm:$0xff] }
0x1c18   :  { %4375 = vmatpush.msrb.mxu0 %v4283_v2  ;;  %4429 = vmatpush.msra.mxu3 %v4334_v32  ;;  %v4319_v2 = vld [vmem:[#allocation14 + $0xd68] sm:$0xff]  ;;  %v4302_v32 = vld [vmem:[#allocation14 + $0xce0] sm:$0xff] }
0x1c19   :  { %4415 = vmatpush.msra.mxu2 %v4285_v40  ;;  %4396 = vmatpush.msrb.mxu1 %v4276_v60  ;;  %v4278_v60 = vld [vmem:[#allocation14 + $0xc20] sm:$0xff] }
0x1c1a   :  { %4376 = vmatpush.msrb.mxu0 %v4275_v16  ;;  %4430 = vmatpush.msra.mxu3 %v4326_v59  ;;  %v4311_v16 = vld [vmem:[#allocation14 + $0xd28] sm:$0xff]  ;;  %v4294_v59 = vld [vmem:[#allocation14 + $0xca0] sm:$0xff] }
0x1c1b   :  { %4416 = vmatpush.msra.mxu2 %v4277_v0  ;;  %4469 = vmatpush.msra.mxu1 %v4336_v31  ;;  %v4279_v0 = vld [vmem:[#allocation14 + $0xc28] sm:$0xff] }
0x1c1c   :  { %4449 = vmatpush.msra.mxu0 %v4335_v13  ;;  %4431 = vmatpush.msra.mxu3 %v4318_v15  ;;  %v4303_v13 = vld [vmem:[#allocation14 + $0xce8] sm:$0xff] }
0x1c1d   :  { %4489 = vmatpush.msrb.mxu2 %v4337_v21  ;;  %4470 = vmatpush.msra.mxu1 %v4328_v20  ;;  %v4305_v21 = vld [vmem:[#allocation14 + $0xcf8] sm:$0xff] }
0x1c1e   :  { %4450 = vmatpush.msra.mxu0 %v4327_v43  ;;  %4432 = vmatpush.msra.mxu3 %v4310_v24  ;;  %v4295_v43 = vld [vmem:[#allocation14 + $0xca8] sm:$0xff]  ;;  %v4320_v24 = vld [vmem:[#allocation14 + $0xd70] sm:$0xff] }
0x1c1f   :  { %4490 = vmatpush.msrb.mxu2 %v4329_v38  ;;  %4471 = vmatpush.msra.mxu1 %v4320_v24 }
0x1c20   :  { %4451 = vmatpush.msra.mxu0 %v4319_v2  ;;  %4433 = vmatpush.msra.mxu3 %v4302_v32  ;;  %v4286_v2 = vld [vmem:[#allocation14 + $0xc60] sm:$0xff] }
0x1c22   :  { %4452 = vmatpush.msra.mxu0 %v4311_v16  ;;  %4434 = vmatpush.msra.mxu3 %v4294_v59  ;;  %v4321_v16 = vld [vmem:[#allocation14 + $0xd78] sm:$0xff]  ;;  %v4296_v59 = vld [vmem:[#allocation14 + $0xcb0] sm:$0xff] }
0x1c23   :  { %4491 = vmatpush.msrb.mxu2 %v4321_v16 }
0x1c24   :  { %4453 = vmatpush.msra.mxu0 %v4303_v13  ;;  %4435 = vmatpush.msra.mxu3 %v4286_v2  ;;  %v4312_v13 = vld [vmem:[#allocation14 + $0xd30] sm:$0xff]  ;;  %v4289_v2 = vld [vmem:[#allocation14 + $0xc78] sm:$0xff] }
0x1c25   :  { %4472 = vmatpush.msra.mxu1 %v4312_v13  ;;  %4492 = vmatpush.msrb.mxu2 %v4313_v5 }
0x1c26   :  { %4454 = vmatpush.msra.mxu0 %v4295_v43  ;;  %4436 = vmatpush.msra.mxu3 %v4278_v60  ;;  %v4297_v43 = vld [vmem:[#allocation14 + $0xcb8] sm:$0xff] }
0x1c27   :  { %4493 = vmatpush.msrb.mxu2 %v4305_v21 }
0x1c28   :  { %4455 = vmatpush.msra.mxu0 %v4287_v12  ;;  %v4280_v12 = vld [vmem:[#allocation14 + $0xc30] sm:$0xff] }
0x1c29   :  { %4494 = vmatpush.msrb.mxu2 %v4297_v43 }
0x1c2a   :  { %4456 = vmatpush.msra.mxu0 %v4279_v0 }
0x1c2b   :  { %4495 = vmatpush.msrb.mxu2 %v4289_v2 }
0x1c88   :  { %v8167_v53 = vpop.f32.mrf.mxu0 }
0x1c89   :  { %4224 = vrot.lane.b32.xlu1 %v8167_v53, %s6706_s27 }
0x1c90   :  { %v8171_v42 = vpop.f32.mrf.mxu0 }
0x1c91   :  { %4226 = vrot.lane.b32.xlu0 %v8171_v42, %s6706_s27 }
0x1cfb   :  { %v4225_v15 = vpop.permute.xlu1 %4224 }
0x1cfc   :  { %v4230_v40 = vmul.f32 %v4225_v15, %v8134_v9  ;;  %v4304_v9 = vld [vmem:[#allocation14 + $0xcf0] sm:$0xff] }
0x1cfd   :  { %4473 = vmatpush.msra.mxu1 %v4304_v9  ;;  %v4288_v15 = vld [vmem:[#allocation14 + $0xc70] sm:$0xff] }
0x1cfe   :  { %v4232_v32 = vsub.f32 %v4230_v40, %v8167_v53  ;;  %v4281_v40 = vld [vmem:[#allocation14 + $0xc38] sm:$0xff] }
0x1cff   :  { %4474 = vmatpush.msra.mxu1 %v4296_v59  ;;  %4496 = vmatpush.msrb.mxu2 %v4281_v40 }
0x1d00   :  { %v4234_v31 = vadd.f32 %v4232_v32, %v7971_v45 }
0x1d01   :  { %4475 = vmatpush.msra.mxu1 %v4288_v15 }
0x1d02   :  { %v8178_v53 = vmax.f32 %v4234_v31, 0.0 }
0x1d03   :  { %v4227_v20 = vpop.permute.xlu0 %4226  ;;  %4476 = vmatpush.msra.mxu1 %v4280_v12 }
0x1d04   :  { %v4231_v38 = vmul.f32 %v4227_v20, %v8136_v29  ;;  %v4238_v5 = vsel %vm272_vm12, %v8178_v53, -1e+30  ;;  %v4249_v24 = vsel %vm292_vm13, %v8178_v53, -1e+30 }
0x1d05   :  { %v4240_v60 = vsel %vm276_vm3, %v4238_v5, -inf  ;;  %v4251_v0 = vsel %vm276_vm3, %v4249_v24, -inf }
0x1d06   :  { %v4233_v45 = vsub.f32 %v4231_v38, %v8171_v42  ;;  %v4260_v42 = vsel %vm311_vm11, %v8178_v53, -1e+30 }
0x1d07   :  { %v4262_v31 = vsel %vm276_vm3, %v4260_v42, -inf }
0x1d08   :  { %v4235_v29 = vadd.f32 %v4233_v45, %v7957_v33 }
0x1d0a   :  { %v8192_v16 = vmax.f32 %v4235_v29, 0.0 }
0x1d0c   :  { %v4239_v32 = vsel %vm273_vm14, %v8192_v16, -1e+30  ;;  %v4250_v33 = vsel %vm293_vm1, %v8192_v16, -1e+30  ;;  %v4261_v13 = vsel %vm312_vm15, %v8192_v16, -1e+30 }
0x1d0d   :  { %v4241_v9 = vsel %vm276_vm3, %v4239_v32, -inf  ;;  %v4252_v21 = vsel %vm276_vm3, %v4250_v33, -inf  ;;  %v4263_v59 = vsel %vm276_vm3, %v4261_v13, -inf }
0x1d0e   :  { %v4242_v43 = vmax.f32 %v4240_v60, %v4241_v9  ;;  %v4253_v20 = vmax.f32 %v4251_v0, %v4252_v21  ;;  %v4264_v38 = vmax.f32 %v4262_v31, %v4263_v59  ;;  %v4584_v9 = vld [vmem:[#allocation10 + $0x358] sm:$0xff]  ;;  %v4581_v21 = vld [vmem:[#allocation10 + $0x340] sm:$0xff]  ;;  %v4570_v59 = vld [vmem:[#allocation8 + $0x370] sm:$0xff] }
0x1d10   :  { %v4243_v15 = vrot.slane %v4242_v43, 4  ;;  %v4254_v2 = vrot.slane %v4253_v20, 4  ;;  %v4265_v45 = vrot.slane %v4264_v38, 4 }
0x1d12   :  { %v4244_v12 = vmax.f32 %v4242_v43, %v4243_v15  ;;  %v4255_v40 = vmax.f32 %v4253_v20, %v4254_v2  ;;  %v4266_v5 = vmax.f32 %v4264_v38, %v4265_v45  ;;  %v4571_v43 = vld [vmem:[#allocation8 + $0x378] sm:$0xff]  ;;  %v4579_v20 = vld [vmem:[#allocation10 + $0x330] sm:$0xff]  ;;  %v4568_v38 = vld [vmem:[#allocation8 + $0x360] sm:$0xff] }
0x1d13   :  { %v4569_v15 = vld [vmem:[#allocation8 + $0x368] sm:$0xff]  ;;  %v4577_v2 = vld [vmem:[#allocation10 + $0x320] sm:$0xff] }
0x1d14   :  { %v4245_v24 = vrot.slane %v4244_v12, 2  ;;  %v4256_v29 = vrot.slane %v4255_v40, 2  ;;  %v4267_v57 = vrot.slane %v4266_v5, 2  ;;  %v4578_v45 = vld [vmem:[#allocation10 + $0x328] sm:$0xff] }
0x1d16   :  { %v4246_v63 = vmax.f32 %v4244_v12, %v4245_v24  ;;  %v4257_v42 = vmax.f32 %v4255_v40, %v4256_v29  ;;  %v4268_v39 = vmax.f32 %v4266_v5, %v4267_v57  ;;  %v4586_v57 = vld [vmem:[#allocation10 + $0x368] sm:$0xff]  ;;  %v4566_v12 = vld [vmem:[#allocation8 + $0x350] sm:$0xff]  ;;  %v4567_v40 = vld [vmem:[#allocation8 + $0x358] sm:$0xff] }
0x1d17   :  { %v4575_v5 = vld [vmem:[#allocation10 + $0x310] sm:$0xff]  ;;  %v4576_v24 = vld [vmem:[#allocation10 + $0x318] sm:$0xff]  ;;  %v4564_v29 = vld [vmem:[#allocation8 + $0x340] sm:$0xff] }
0x1d18   :  { %v4247_v32 = vrot.slane %v4246_v63, 1  ;;  %v4258_v47 = vrot.slane %v4257_v42, 1  ;;  %v4269_v33 = vrot.slane %v4268_v39, 1 }
0x1d1a   :  { %v4248_v62 = vmax.f32 %v4246_v63, %v4247_v32  ;;  %v4259_v13 = vmax.f32 %v4257_v42, %v4258_v47  ;;  %v4270_v60 = vmax.f32 %v4268_v39, %v4269_v33  ;;  %v4588_v39 = vld [vmem:[#allocation10 + $0x378] sm:$0xff]  ;;  %v4585_v47 = vld [vmem:[#allocation10 + $0x360] sm:$0xff]  ;;  %v4583_v63 = vld [vmem:[#allocation10 + $0x350] sm:$0xff] }
0x1d1b   :  { %v4565_v42 = vld [vmem:[#allocation8 + $0x348] sm:$0xff]  ;;  %v4573_v32 = vld [vmem:[#allocation10 + $0x300] sm:$0xff] }
0x1d1c   :  { %v4271_v0 = vsel %vm324_vm2, %v4248_v62, %v4259_v13  ;;  %v4587_v62 = vld [vmem:[#allocation10 + $0x370] sm:$0xff]  ;;  %v4574_v33 = vld [vmem:[#allocation10 + $0x308] sm:$0xff] }
0x1d1d   :  { %v4272_v31 = vsel %vm326_vm4, %v4271_v0, %v4270_v60  ;;  %v4562_v13 = vld [vmem:[#allocation8 + $0x330] sm:$0xff]  ;;  %v4563_v60 = vld [vmem:[#allocation8 + $0x338] sm:$0xff]  ;;  %v4560_v0 = vld [vmem:[#allocation8 + $0x320] sm:$0xff] }
0x1d1e   :  { %6215 = vmatmul.msk.f32.vlgmr.msrb.gmra.mxu3 %vm276_vm3, %v4272_v31  ;;  %6216 = vmatmul.msk.f32.vlgmr.msrb.gmra.mxu0 %vm276_vm3, %v4272_v31 }
0x1d1f   :  { %6217 = vmatmul.msk.f32.vlgmr.msrb.gmra.mxu1 %vm276_vm3, %v4272_v31  ;;  %6218 = vmatmul.msk.f32.vlgmr.msra.gmra.mxu2 %vm276_vm3, %v4272_v31 }
0x1d20   :  { %4523 = vmatpush.msrb.mxu3 %v8192_v16  ;;  %4546 = vmatpush.msrb.mxu0 %v8192_v16 }
0x1d21   :  { %4655 = vmatpush.msrb.mxu1 %v4570_v59  ;;  %4678 = vmatpush.msra.mxu2 %v4571_v43 }
0x1d22   :  { %4524 = vmatpush.msrb.mxu3 %v8178_v53  ;;  %4547 = vmatpush.msrb.mxu0 %v8178_v53 }
0x1d23   :  { %4656 = vmatpush.msrb.mxu1 %v4568_v38  ;;  %4679 = vmatpush.msra.mxu2 %v4569_v15  ;;  %v6247_v38 = vld [vmem:[%s8729_s9 + $0x660] sm:$0xff] }
0x1d25   :  { %4657 = vmatpush.msrb.mxu1 %v4566_v12  ;;  %4680 = vmatpush.msra.mxu2 %v4567_v40  ;;  %v8773_v40 = vld [vmem:[#allocation46_spill] sm:$0xff] }
0x1d26   :  { %6219 = vmatmul.msk.f32.vlgmr.msra.gmra.mxu3 %vm276_vm3, %v4272_v31  ;;  %6220 = vmatmul.msk.f32.vlgmr.msra.gmra.mxu0 %vm276_vm3, %v4272_v31 }
0x1d27   :  { %6221 = vmatmul.msk.f32.vlgmr.msra.gmra.mxu1 %vm276_vm3, %v4272_v31  ;;  %6222 = vmatmul.msk.f32.vlgmr.msrb.gmra.mxu2 %vm276_vm3, %v4272_v31  ;;  %v4561_v31 = vld [vmem:[#allocation8 + $0x328] sm:$0xff] }
0x1d28   :  { %4603 = vmatpush.msra.mxu3 %v4587_v62  ;;  %4626 = vmatpush.msra.mxu0 %v4588_v39  ;;  %v4558_v62 = vld [vmem:[#allocation8 + $0x310] sm:$0xff]  ;;  %v4559_v39 = vld [vmem:[#allocation8 + $0x318] sm:$0xff] }
0x1d29   :  { %4658 = vmatpush.msrb.mxu1 %v4564_v29  ;;  %4681 = vmatpush.msra.mxu2 %v4565_v42  ;;  %v8774_v29 = vld [vmem:[#allocation34_spill] sm:$0xff] }
0x1d2a   :  { %4604 = vmatpush.msra.mxu3 %v4585_v47  ;;  %4627 = vmatpush.msra.mxu0 %v4586_v57  ;;  %v4556_v47 = vld [vmem:[#allocation8 + $0x300] sm:$0xff]  ;;  %v4557_v57 = vld [vmem:[#allocation8 + $0x308] sm:$0xff] }
0x1d2b   :  { %4659 = vmatpush.msrb.mxu1 %v4562_v13  ;;  %4682 = vmatpush.msra.mxu2 %v4563_v60 }
0x1d2c   :  { %4605 = vmatpush.msra.mxu3 %v4583_v63  ;;  %4628 = vmatpush.msra.mxu0 %v4584_v9  ;;  %v1127_v63 = vadd.f32 %v7179_v22, %v7144_v3  ;;  %v1147_v9 = vadd.f32 %v7270_v6, %v7223_v28  ;;  %v1167_v22 = vadd.f32 %v7272_v8, %v7231_v51 }
0x1d2d   :  { %4660 = vmatpush.msrb.mxu1 %v4560_v0  ;;  %4683 = vmatpush.msra.mxu2 %v4561_v31  ;;  %v1207_v6 = vadd.f32 %v7201_v36, %v7148_v10  ;;  %v6266_v10 = vld [vmem:[%s8729_s9 + $0x6f8] sm:$0xff]  ;;  %v6261_v0 = vld [vmem:[%s8729_s9 + $0x6d0] sm:$0xff] }
0x1d2e   :  { %6223 = vmatmul.msk.f32.vlgmr.msrb.gmra.mxu3 %vm226_vm0, %v6857_v27  ;;  %6225 = vmatmul.msk.f32.vlgmr.msrb.gmra.mxu0 %vm226_vm0, %v8004_v41  ;;  %v4582_v41 = vld [vmem:[#allocation10 + $0x348] sm:$0xff] }
0x1d2f   :  { %4606 = vmatpush.msra.mxu3 %v4581_v21  ;;  %4629 = vmatpush.msra.mxu0 %v4582_v41  ;;  %v1894_v21 = vadd.f32 %v7381_v34, %v1127_v63  ;;  %v1895_v41 = vadd.f32 %v7487_v23, %v1147_v9  ;;  %v1898_v36 = vadd.f32 %v7412_v35, %v1207_v6  ;;  %v6264_v35 = vld [vmem:[%s8729_s9 + $0x6e8] sm:$0xff]  ;;  %v6243_v9 = vld [vmem:[%s8729_s9 + $0x640] sm:$0xff] }
0x1d30   :  { %4661 = vmatpush.msrb.mxu1 %v4558_v62  ;;  %4684 = vmatpush.msra.mxu2 %v4559_v39  ;;  %v8776_v31 = vld [vmem:[#allocation37_spill] sm:$0xff] }
0x1d31   :  { %4607 = vmatpush.msra.mxu3 %v4579_v20  ;;  %v2546_v59 = vadd.f32 %v7615_v54, %v1894_v21  ;;  %v2547_v43 = vadd.f32 %v7698_v52, %v1895_v41  ;;  %v1107_v20 = vadd.f32 %v7156_v14, %v7142_v50  ;;  %v6250_v54 = vld [vmem:[%s8729_s9 + $0x678] sm:$0xff]  ;;  %v6249_v50 = vld [vmem:[%s8729_s9 + $0x670] sm:$0xff]  ;;  %v1896_v14 = vadd.f32 %v7489_v61, %v1167_v22  ;;  %v8778_v21 = vld [vmem:[#allocation44_spill] sm:$0xff] }
0x1d32   :  { %4662 = vmatpush.msrb.mxu1 %v4556_v47  ;;  %4685 = vmatpush.msra.mxu2 %v4557_v57  ;;  %v6265_v61 = vld [vmem:[%s8729_s9 + $0x6f0] sm:$0xff]  ;;  %v6244_v47 = vld [vmem:[%s8729_s9 + $0x648] sm:$0xff] }
0x1d33   :  { %4608 = vmatpush.msra.mxu3 %v4577_v2  ;;  %v3198_v3 = vadd.f32 %v7809_v26, %v2546_v59  ;;  %v3199_v28 = vadd.f32 %v7915_v56, %v2547_v43  ;;  %v1893_v34 = vadd.f32 %v7404_v1, %v1107_v20  ;;  %v6248_v56 = vld [vmem:[%s8729_s9 + $0x668] sm:$0xff]  ;;  %v1187_v2 = vadd.f32 %v7187_v25, %v7146_v7  ;;  %v6242_v59 = vld [vmem:[%s8729_s9 + $0x638] sm:$0xff] }
0x1d34   :  { %v8775_v7 = vld [vmem:[#allocation45_spill] sm:$0xff]  ;;  %v8777_v57 = vld [vmem:[#allocation40_spill] sm:$0xff] }
0x1d35   :  { %4609 = vmatpush.msra.mxu3 %v4575_v5  ;;  %v3850_v23 = vadd.f32 %v8043_v48, %v3198_v3  ;;  %v3851_v51 = vadd.f32 %v8126_v19, %v3199_v28  ;;  %v2545_v1 = vadd.f32 %v7592_v49, %v1893_v34  ;;  %v2548_v48 = vadd.f32 %v7700_v30, %v1896_v14  ;;  %v6263_v30 = vld [vmem:[%s8729_s9 + $0x6e0] sm:$0xff]  ;;  %v6241_v34 = vld [vmem:[%s8729_s9 + $0x630] sm:$0xff] }
0x1d36   :  { %6224 = vmatmul.msk.f32.gmra.mxu3 %vm226_vm0, %v6868_v37  ;;  %6226 = vmatmul.msk.f32.gmra.mxu0 %vm226_vm0, %v8010_v46  ;;  %v4580_v46 = vld [vmem:[#allocation10 + $0x338] sm:$0xff]  ;;  %v2550_v49 = vadd.f32 %v7637_v58, %v1898_v36  ;;  %v1897_v42 = vadd.f32 %v8774_v29, %v1187_v2  ;;  %v6237_v36 = vld [vmem:[%s8729_s9 + $0x610] sm:$0xff] }
0x1d37   :  { %4630 = vmatpush.msra.mxu0 %v4580_v46  ;;  %4610 = vmatpush.msra.mxu3 %v4573_v32  ;;  %v3197_v46 = vadd.f32 %v7832_v17, %v2545_v1  ;;  %v3200_v15 = vadd.f32 %v7917_v55, %v2548_v48  ;;  %v8772_v58 = vld [vmem:[#allocation43_spill] sm:$0xff]  ;;  %v6256_v1 = vld [vmem:[%s8729_s9 + $0x6a8] sm:$0xff] }
0x1d38   :  { %v6246_v17 = vld [vmem:[%s8729_s9 + $0x658] sm:$0xff]  ;;  %v2549_v62 = vadd.f32 %v8776_v31, %v1897_v42  ;;  %v6239_v14 = vld [vmem:[%s8729_s9 + $0x620] sm:$0xff] }
0x1d39   :  { %4631 = vmatpush.msra.mxu0 %v4578_v45  ;;  %4746 = vmatpush.msrb.mxu3 %v6250_v54  ;;  %v3202_v45 = vadd.f32 %v7840_v18, %v2550_v49  ;;  %v3849_v12 = vadd.f32 %v8772_v58, %v3197_v46  ;;  %v3852_v5 = vadd.f32 %v8773_v40, %v3200_v15  ;;  %v6240_v54 = vld [vmem:[%s8729_s9 + $0x628] sm:$0xff]  ;;  %v6254_v48 = vld [vmem:[%s8729_s9 + $0x698] sm:$0xff]  ;;  %v6251_v46 = vld [vmem:[%s8729_s9 + $0x680] sm:$0xff] }
0x1d3a   :  { %v3201_v63 = vadd.f32 %v8777_v57, %v2549_v62  ;;  %v6252_v49 = vld [vmem:[%s8729_s9 + $0x688] sm:$0xff]  ;;  %v4694_v15 = vld [vmem:[#allocation11 + $0xc] sm:$0x3] }
0x1d3b   :  { %4632 = vmatpush.msra.mxu0 %v4576_v24  ;;  %4747 = vmatpush.msrb.mxu3 %v6249_v50  ;;  %v6262_v24 = vld [vmem:[%s8729_s9 + $0x6d8] sm:$0xff]  ;;  %v3854_v25 = vadd.f32 %v8775_v7, %v3202_v45  ;;  %v6259_v50 = vld [vmem:[%s8729_s9 + $0x6c0] sm:$0xff]  ;;  %v4696_v2 = vperm.slane %v4694_v15, 0 }
0x1d3c   :  { %v3853_v41 = vadd.f32 %v8778_v21, %v3201_v63 }
0x1d3d   :  { %4633 = vmatpush.msra.mxu0 %v4574_v33  ;;  %4748 = vmatpush.msrb.mxu3 %v6248_v56  ;;  %v6245_v33 = vld [vmem:[%s8729_s9 + $0x650] sm:$0xff]  ;;  %v6255_v56 = vld [vmem:[%s8729_s9 + $0x6a0] sm:$0xff] }
0x1d3f   :  { %4769 = vmatpush.msrb.mxu0 %v6266_v10  ;;  %4749 = vmatpush.msrb.mxu3 %v6247_v38  ;;  %v6257_v10 = vld [vmem:[%s8729_s9 + $0x6b0] sm:$0xff] }
0x1d41   :  { %4770 = vmatpush.msrb.mxu0 %v6265_v61  ;;  %4750 = vmatpush.msrb.mxu3 %v6246_v17  ;;  %v6235_v61 = vld [vmem:[%s8729_s9 + $0x600] sm:$0xff] }
0x1d43   :  { %4771 = vmatpush.msrb.mxu0 %v6264_v35  ;;  %4751 = vmatpush.msrb.mxu3 %v6245_v33  ;;  %v6253_v35 = vld [vmem:[%s8729_s9 + $0x690] sm:$0xff] }
0x1d45   :  { %4772 = vmatpush.msrb.mxu0 %v6263_v30  ;;  %4752 = vmatpush.msrb.mxu3 %v6244_v47 }
0x1d47   :  { %4773 = vmatpush.msrb.mxu0 %v6262_v24  ;;  %4753 = vmatpush.msrb.mxu3 %v6243_v9 }
0x1d49   :  { %4774 = vmatpush.msrb.mxu0 %v6261_v0  ;;  %4754 = vmatpush.msrb.mxu3 %v6242_v59 }
0x1d4b   :  { %4755 = vmatpush.msrb.mxu3 %v6241_v34 }
0x1d4d   :  { %4756 = vmatpush.msrb.mxu3 %v6240_v54 }
0x1d4f   :  { %4757 = vmatpush.msrb.mxu3 %v6239_v14 }
0x1d9b   :  { %v4378_v8 = vpop.f32.mrf.mxu0 }
0x1d9c   :  { %v8262_v52 = vadd.f32 %v4378_v8, %v3850_v23  ;;  %v4398_v26 = vpop.f32.mrf.mxu1  ;;  %v6260_v23 = vld [vmem:[%s8729_s9 + $0x6c8] sm:$0xff]  ;;  %v6238_v8 = vld [vmem:[%s8729_s9 + $0x618] sm:$0xff] }
0x1d9d   :  { %v8271_v19 = vadd.f32 %v4398_v26, %v3851_v51  ;;  %4775 = vmatpush.msrb.mxu0 %v6260_v23  ;;  %v6258_v51 = vld [vmem:[%s8729_s9 + $0x6b8] sm:$0xff]  ;;  %4758 = vmatpush.msrb.mxu3 %v6238_v8  ;;  %v6236_v26 = vld [vmem:[%s8729_s9 + $0x608] sm:$0xff] }
0x1d9f   :  { %4776 = vmatpush.msrb.mxu0 %v6259_v50  ;;  %4759 = vmatpush.msrb.mxu3 %v6237_v36 }
0x1da1   :  { %v4358_v55 = vpop.f32.mrf.mxu3  ;;  %4777 = vmatpush.msrb.mxu0 %v6258_v51  ;;  %4760 = vmatpush.msrb.mxu3 %v6236_v26 }
0x1da2   :  { %v8298_v18 = vadd.f32 %v4358_v55, %v3849_v12  ;;  %v4418_v32 = vpop.f32.mrf.mxu2  ;;  %v4697_v55 = vperm.slane %v4694_v15, 1 }
0x1da3   :  { %v8303_v13 = vadd.f32 %v4418_v32, %v3852_v5  ;;  %v4458_v60 = vpop.f32.mrf.mxu0  ;;  %4778 = vmatpush.msrb.mxu0 %v6257_v10  ;;  %4761 = vmatpush.msrb.mxu3 %v6235_v61 }
0x1da4   :  { %v8309_v39 = vadd.f32 %v4458_v60, %v3854_v25  ;;  %v8383_v38 = vpop.f32.mrf.mxu1 }
0x1da5   :  { %4779 = vmatpush.msrb.mxu0 %v6256_v1 }
0x1da7   :  { %4780 = vmatpush.msrb.mxu0 %v6255_v56 }
0x1da9   :  { %v4438_v43 = vpop.f32.mrf.mxu3  ;;  %4781 = vmatpush.msrb.mxu0 %v6254_v48 }
0x1daa   :  { %v8322_v20 = vadd.f32 %v4438_v43, %v3853_v41  ;;  %v8385_v30 = vpop.f32.mrf.mxu2  ;;  %v6410_v41 = vld [vmem:[#allocation13 + $0x6] ss:$0 sm:$0xff] }
0x1dab   :  { %v4549_v3 = vpop.f32.mrf.mxu0  ;;  %4782 = vmatpush.msrb.mxu0 %v6253_v35 }
0x1dac   :  { %6227 = vmatmul.msk.f32.vlgmr.msra.gmra.mxu3 %vm276_vm3, %v4549_v3  ;;  %6229 = vmatmul.msk.f32.vlgmr.msra.gmra.mxu0 %vm276_vm3, %v4549_v3 }
0x1dad   :  { %4783 = vmatpush.msrb.mxu0 %v6252_v49 }
0x1daf   :  { %4784 = vmatpush.msrb.mxu0 %v6251_v46 }
0x1db1   :  { %v4526_v22 = vpop.f32.mrf.mxu3 }
0x1db2   :  { %6231 = vmatmul.msk.f32.vlgmr.msrb.gmra.mxu1 %vm276_vm3, %v4526_v22  ;;  %6233 = vmatmul.msk.f32.vlgmr.msra.gmra.mxu2 %vm276_vm3, %v4526_v22 }
0x1db3   :  { %v4552_v28 = vpop.f32.mrf.mxu0 }
0x1db4   :  { %6228 = vmatmul.msk.f32.gmra.mxu3 %vm276_vm3, %v4552_v28  ;;  %6230 = vmatmul.msk.f32.gmra.mxu0 %vm276_vm3, %v4552_v28 }
0x1db9   :  { %v4529_v6 = vpop.f32.mrf.mxu3 }
0x1dba   :  { %6232 = vmatmul.msk.f32.gmra.mxu1 %vm276_vm3, %v4529_v6  ;;  %6234 = vmatmul.msk.f32.gmra.mxu2 %vm276_vm3, %v4529_v6 }
0x1e29   :  { %v4635_v40 = vpop.f32.mrf.mxu0 }
0x1e2f   :  { %v4612_v45 = vpop.f32.mrf.mxu3  ;;  %v4664_v58 = vpop.f32.mrf.mxu1 }
0x1e30   :  { %v4665_v12 = vadd.f32 %v4664_v58, %v4612_v45 }
0x1e31   :  { %v4638_v31 = vpop.f32.mrf.mxu0 }
0x1e32   :  { %v4700_v17 = vadd.f32 %v4696_v2, %v4665_v12 }
0x1e34   :  { %v4704_v5 = vmax.f32 %v4700_v17, 0.0 }
0x1e35   :  { %v4687_v24 = vpop.f32.mrf.mxu2 }
0x1e36   :  { %v4688_v29 = vadd.f32 %v4687_v24, %v4635_v40  ;;  %4762 = vmatmul.f32.vlgmr.msrb.gmra.mxu3 %v4704_v5  ;;  %v8779_v5 = vld [vmem:[#allocation49_spill] sm:$0xff] }
0x1e37   :  { %v4615_v42 = vpop.f32.mrf.mxu3  ;;  %v4667_v7 = vpop.f32.mrf.mxu1 }
0x1e38   :  { %v4701_v25 = vadd.f32 %v4697_v55, %v4688_v29  ;;  %v4668_v32 = vadd.f32 %v4667_v7, %v4615_v42  ;;  %v4982_v29 = vld [vmem:[#allocation14 + $0xfc0] sm:$0xff]  ;;  %v4983_v42 = vld [vmem:[#allocation14 + $0xfc8] sm:$0xff] }
0x1e39   :  { %v4974_v7 = vld [vmem:[#allocation14 + $0xf80] sm:$0xff] }
0x1e3a   :  { %v4705_v33 = vmax.f32 %v4701_v25, 0.0  ;;  %v4702_v60 = vadd.f32 %v4696_v2, %v4668_v32  ;;  %v4975_v25 = vld [vmem:[#allocation14 + $0xf88] sm:$0xff] }
0x1e3b   :  { %v4967_v32 = vld [vmem:[#allocation14 + $0xf48] sm:$0xff] }
0x1e3c   :  { %v4706_v0 = vmax.f32 %v4702_v60, 0.0  ;;  %4785 = vmatmul.f32.vlgmr.msrb.gmra.mxu0 %v4705_v33  ;;  %v4958_v33 = vld [vmem:[#allocation14 + $0xf00] sm:$0xff]  ;;  %v4959_v60 = vld [vmem:[#allocation14 + $0xf08] sm:$0xff] }
0x1e3d   :  { %v4690_v62 = vpop.f32.mrf.mxu2 }
0x1e3e   :  { %v4691_v47 = vadd.f32 %v4690_v62, %v4638_v31  ;;  %4765 = vmatmul.f32.gmra.mxu3 %v4706_v0  ;;  %v4950_v0 = vld [vmem:[#allocation14 + $0xec0] sm:$0xff]  ;;  %v4951_v31 = vld [vmem:[#allocation14 + $0xec8] sm:$0xff]  ;;  %v4984_v62 = vld [vmem:[#allocation14 + $0xfd0] sm:$0xff] }
0x1e3f   :  { %5041 = vmatpush.msra.mxu3 %v4984_v62  ;;  %v4964_v62 = vld [vmem:[#allocation14 + $0xf30] sm:$0xff] }
0x1e40   :  { %v4703_v57 = vadd.f32 %v4697_v55, %v4691_v47  ;;  %v4985_v47 = vld [vmem:[#allocation14 + $0xfd8] sm:$0xff] }
0x1e41   :  { %5061 = vmatpush.msra.mxu0 %v4985_v47  ;;  %v4965_v47 = vld [vmem:[#allocation14 + $0xf38] sm:$0xff] }
0x1e42   :  { %v4707_v63 = vmax.f32 %v4703_v57, 0.0  ;;  %v4942_v57 = vld [vmem:[#allocation14 + $0xe80] sm:$0xff] }
0x1e44   :  { %4788 = vmatmul.f32.gmra.mxu0 %v4707_v63  ;;  %v4943_v63 = vld [vmem:[#allocation14 + $0xe88] sm:$0xff] }
0x1eb9   :  { %v4763_v9 = vpop.f32.mrf.mxu3  ;;  %v4786_v21 = vpop.f32.mrf.mxu0 }
0x1eba   :  { %v4764_v59 = vadd.f32 %v6410_v41, %v4763_v9  ;;  %v4976_v9 = vld [vmem:[#allocation14 + $0xf90] sm:$0xff] }
0x1ebb   :  { %5042 = vmatpush.msra.mxu3 %v4976_v9  ;;  %v4948_v9 = vld [vmem:[#allocation14 + $0xeb0] sm:$0xff] }
0x1ebc   :  { %v8387_v3 = vadd.f32 %v4786_v21, %v4764_v59  ;;  %v4977_v21 = vld [vmem:[#allocation14 + $0xf98] sm:$0xff]  ;;  %v4935_v59 = vld [vmem:[#allocation14 + $0xe48] sm:$0xff] }
0x1ebd   :  { %5062 = vmatpush.msra.mxu0 %v4977_v21 }
0x1ebe   :  { %v4792_v34 = vmul.f32 %v8387_v3, %v8387_v3 }
0x1ec1   :  { %v4766_v43 = vpop.f32.mrf.mxu3  ;;  %v4789_v28 = vpop.f32.mrf.mxu0 }
0x1ec2   :  { %v4767_v22 = vadd.f32 %v6410_v41, %v4766_v43  ;;  %v4934_v41 = vld [vmem:[#allocation14 + $0xe40] sm:$0xff]  ;;  %v4968_v43 = vld [vmem:[#allocation14 + $0xf50] sm:$0xff] }
0x1ec3   :  { %5043 = vmatpush.msra.mxu3 %v4968_v43 }
0x1ec4   :  { %v8389_v6 = vadd.f32 %v4789_v28, %v4767_v22  ;;  %v4969_v22 = vld [vmem:[#allocation14 + $0xf58] sm:$0xff]  ;;  %v4926_v28 = vld [vmem:[#allocation14 + $0xe00] sm:$0xff] }
0x1ec5   :  { %5063 = vmatpush.msra.mxu0 %v4969_v22  ;;  %v4940_v22 = vld [vmem:[#allocation14 + $0xe70] sm:$0xff] }
0x1ec6   :  { %v4793_v23 = vmul.f32 %v8389_v6, %v8389_v6 }
0x1ec8   :  { %v6393_v54 = vpack.i.bf16 %v4792_v34, %v4793_v23  ;;  %v4927_v34 = vld [vmem:[#allocation14 + $0xe08] sm:$0xff]  ;;  %v4960_v23 = vld [vmem:[#allocation14 + $0xf10] sm:$0xff] }
0x1ec9   :  { %5044 = vmatpush.msra.mxu3 %v4960_v23  ;;  %v4933_v23 = vld [vmem:[#allocation14 + $0xe38] sm:$0xff] }
0x1eca   :  { %6394 = vrot.lane.b32.xlu2 %v6393_v54, %s6706_s27  ;;  %v4961_v54 = vld [vmem:[#allocation14 + $0xf18] sm:$0xff] }
0x1ecb   :  { %5064 = vmatpush.msra.mxu0 %v4961_v54 }
0x1f24   :  { %v6395_v50 = vpop.permute.xlu2 %6394 }
0x1f25   :  { %v6397_v14 = vunpack.i.h.bf16 %v6395_v50  ;;  %v6396_v51 = vunpack.i.l.bf16 %v6395_v50  ;;  %v4986_v50 = vld [vmem:[#allocation14 + $0xfe0] sm:$0xff] }
0x1f27   :  { %v4803_v8 = vsel %vm276_vm3, %v8389_v6, %v6396_v51  ;;  %v4802_v10 = vsel %vm276_vm3, %v8387_v3, %v6397_v14  ;;  %v4987_v14 = vld [vmem:[#allocation14 + $0xfe8] sm:$0xff]  ;;  %v4952_v51 = vld [vmem:[#allocation14 + $0xed0] sm:$0xff] }
0x1f28   :  { %4818 = vmatpush.msra.mxu1 %v4803_v8  ;;  %v4953_v8 = vld [vmem:[#allocation14 + $0xed8] sm:$0xff]  ;;  %5045 = vmatpush.msra.mxu3 %v4952_v51 }
0x1f29   :  { %5065 = vmatpush.msra.mxu0 %v4953_v8 }
0x1f2a   :  { %4819 = vmatpush.msra.mxu1 %v4802_v10  ;;  %v4978_v10 = vld [vmem:[#allocation14 + $0xfa0] sm:$0xff] }
0x1f2b   :  { %6267 = vmatmul.msk.f32.vlgmr.msra.gmra.mxu1 %vm226_vm0, %v6998_v11 }
0x1f2c   :  { %5001 = vmatpush.msrb.mxu1 %v4982_v29  ;;  %v4946_v29 = vld [vmem:[#allocation14 + $0xea0] sm:$0xff] }
0x1f2e   :  { %5002 = vmatpush.msrb.mxu1 %v4974_v7  ;;  %v4980_v7 = vld [vmem:[#allocation14 + $0xfb0] sm:$0xff] }
0x1fa8   :  { %v4821_v36 = vpop.f32.mrf.mxu1 }
0x1fa9   :  { %v4824_v1 = vmul.f32 %v4821_v36, %v4821_v36 }
0x1fab   :  { %4826 = vrot.lane.b32.xlu1 %v4824_v1, %s6706_s27  ;;  %v4944_v1 = vld [vmem:[#allocation14 + $0xe90] sm:$0xff] }
0x1fac   :  { %5046 = vmatpush.msra.mxu3 %v4944_v1 }
0x201d   :  { %v4827_v26 = vpop.permute.xlu1 %4826 }
0x201e   :  { %v4829_v56 = vsub.f32 %v4821_v36, %v4827_v26  ;;  %v4945_v26 = vld [vmem:[#allocation14 + $0xe98] sm:$0xff] }
0x201f   :  { %5066 = vmatpush.msra.mxu0 %v4945_v26 }
0x2020   :  { %v4830_v61 = vmax.f32 %v4829_v56, 0.0  ;;  %v4970_v56 = vld [vmem:[#allocation14 + $0xf60] sm:$0xff] }
0x2022   :  { %v4831_v48 = vadd.f32 1e-05, %v4830_v61  ;;  %v4971_v61 = vld [vmem:[#allocation14 + $0xf68] sm:$0xff] }
0x2024   :  { %6425 = vrsqrt.f32 %v4831_v48  ;;  %vm4838_vm5 = vweird.f32 %v4831_v48 }
0x202a   :  { %v6426_v35 = vpop.eup %6425 }
0x202b   :  { %v4833_v49 = vmul.f32 %v6426_v35, %v4831_v48  ;;  %vm4839_vm8 = vweird.f32 %v6426_v35  ;;  %v4936_v48 = vld [vmem:[#allocation14 + $0xe50] sm:$0xff] }
0x202c   :  { %vm4840_vm6 = vmor %vm4838_vm5, %vm4839_vm8  ;;  %5047 = vmatpush.msra.mxu3 %v4936_v48 }
0x202d   :  { %v4834_v46 = vmul.f32 %v6426_v35, %v4833_v49  ;;  %v4937_v49 = vld [vmem:[#allocation14 + $0xe58] sm:$0xff] }
0x202e   :  { %5067 = vmatpush.msra.mxu0 %v4937_v49 }
0x202f   :  { %v4835_v15 = vmul.f32 0.5, %v4834_v46  ;;  %v4962_v46 = vld [vmem:[#allocation14 + $0xf20] sm:$0xff] }
0x2031   :  { %v4836_v2 = vsub.f32 1.5, %v4835_v15  ;;  %v4963_v15 = vld [vmem:[#allocation14 + $0xf28] sm:$0xff] }
0x2033   :  { %v4837_v45 = vmul.f32 %v6426_v35, %v4836_v2  ;;  %v4928_v2 = vld [vmem:[#allocation14 + $0xe10] sm:$0xff] }
0x2034   :  { %5048 = vmatpush.msra.mxu3 %v4928_v2 }
0x2035   :  { %v4841_v58 = vsel %vm4840_vm6, %v6426_v35, %v4837_v45  ;;  %v4929_v45 = vld [vmem:[#allocation14 + $0xe18] sm:$0xff] }
0x2036   :  { %4843 = vrot.lane.b32.xlu0 %v4841_v58, %s6706_s27  ;;  %5068 = vmatpush.msra.mxu0 %v4929_v45 }
0x20a8   :  { %v4844_v12 = vpop.permute.xlu0 %4843 }
0x20a9   :  { %v4846_v17 = vmul.f32 %v4844_v12, %v4821_v36  ;;  %v4979_v36 = vld [vmem:[#allocation14 + $0xfa8] sm:$0xff] }
0x20ab   :  { %v4847_v40 = vsel %vm276_vm3, %v4846_v17, %v4841_v58  ;;  %v4954_v58 = vld [vmem:[#allocation14 + $0xee0] sm:$0xff]  ;;  %v4955_v17 = vld [vmem:[#allocation14 + $0xee8] sm:$0xff] }
0x20ac   :  { %6268 = vmatpush.msk.msrb.mxu2 %vm780_vm9, %v4847_v40  ;;  %v4988_v40 = vld [vmem:[#allocation14 + $0xff0] sm:$0xff] }
0x20ad   :  { %6269 = vmatmul.msk.f32.vlgmr.msrb.gmra.mxu2 %vm773_vm10, %v8156_v4  ;;  %v4966_v4 = vld [vmem:[#allocation14 + $0xf40] sm:$0xff]  ;;  %5121 = vmatpush.msrb.mxu3 %v4988_v40 }
0x20ae   :  { %5021 = vmatpush.msra.mxu2 %v4983_v42  ;;  %5003 = vmatpush.msrb.mxu1 %v4966_v4  ;;  %v4947_v42 = vld [vmem:[#allocation14 + $0xea8] sm:$0xff]  ;;  %v4938_v4 = vld [vmem:[#allocation14 + $0xe60] sm:$0xff] }
0x20af   :  { %5122 = vmatpush.msrb.mxu3 %v4980_v7 }
0x20b0   :  { %5022 = vmatpush.msra.mxu2 %v4975_v25  ;;  %5004 = vmatpush.msrb.mxu1 %v4958_v33  ;;  %v4981_v25 = vld [vmem:[#allocation14 + $0xfb8] sm:$0xff]  ;;  %v4972_v33 = vld [vmem:[#allocation14 + $0xf70] sm:$0xff] }
0x20b1   :  { %5123 = vmatpush.msrb.mxu3 %v4972_v33 }
0x20b2   :  { %5023 = vmatpush.msra.mxu2 %v4967_v32  ;;  %5005 = vmatpush.msrb.mxu1 %v4950_v0  ;;  %v4930_v0 = vld [vmem:[#allocation14 + $0xe20] sm:$0xff] }
0x20b3   :  { %5124 = vmatpush.msrb.mxu3 %v4964_v62 }
0x20b4   :  { %5024 = vmatpush.msra.mxu2 %v4959_v60  ;;  %5006 = vmatpush.msrb.mxu1 %v4942_v57  ;;  %v4973_v60 = vld [vmem:[#allocation14 + $0xf78] sm:$0xff] }
0x20b5   :  { %6270 = vmatmul.msk.f32.gmra.mxu2 %vm773_vm10, %v8779_v5  ;;  %v4989_v5 = vld [vmem:[#allocation14 + $0xff8] sm:$0xff] }
0x20b6   :  { %5025 = vmatpush.msra.mxu2 %v4951_v31  ;;  %5007 = vmatpush.msrb.mxu1 %v4934_v41  ;;  %v4931_v31 = vld [vmem:[#allocation14 + $0xe28] sm:$0xff]  ;;  %v4949_v41 = vld [vmem:[#allocation14 + $0xeb8] sm:$0xff] }
0x20b7   :  { %5141 = vmatpush.msrb.mxu0 %v4989_v5 }
0x20b8   :  { %5026 = vmatpush.msra.mxu2 %v4943_v63  ;;  %5008 = vmatpush.msrb.mxu1 %v4926_v28  ;;  %v4957_v63 = vld [vmem:[#allocation14 + $0xef8] sm:$0xff] }
0x20b9   :  { %5142 = vmatpush.msrb.mxu0 %v4981_v25  ;;  %v4941_v28 = vld [vmem:[#allocation14 + $0xe78] sm:$0xff] }
0x20ba   :  { %5027 = vmatpush.msra.mxu2 %v4935_v59  ;;  %5081 = vmatpush.msra.mxu1 %v4986_v50 }
0x20bb   :  { %5143 = vmatpush.msrb.mxu0 %v4973_v60 }
0x20bc   :  { %5028 = vmatpush.msra.mxu2 %v4927_v34  ;;  %5082 = vmatpush.msra.mxu1 %v4978_v10  ;;  %v4932_v34 = vld [vmem:[#allocation14 + $0xe30] sm:$0xff] }
0x20bd   :  { %5144 = vmatpush.msrb.mxu0 %v4965_v47 }
0x20be   :  { %5101 = vmatpush.msrb.mxu2 %v4987_v14  ;;  %5083 = vmatpush.msra.mxu1 %v4970_v56 }
0x20bf   :  { %5145 = vmatpush.msrb.mxu0 %v4957_v63 }
0x20c0   :  { %5102 = vmatpush.msrb.mxu2 %v4979_v36  ;;  %5084 = vmatpush.msra.mxu1 %v4962_v46 }
0x20c1   :  { %5146 = vmatpush.msrb.mxu0 %v4949_v41  ;;  %v5222_v41 = vld [vmem:[#allocation8 + $0x3f0] sm:$0xff] }
0x20c2   :  { %5103 = vmatpush.msrb.mxu2 %v4971_v61  ;;  %5085 = vmatpush.msra.mxu1 %v4954_v58 }
0x20c3   :  { %5147 = vmatpush.msrb.mxu0 %v4941_v28  ;;  %v5221_v28 = vld [vmem:[#allocation8 + $0x3e8] sm:$0xff] }
0x20c4   :  { %5104 = vmatpush.msrb.mxu2 %v4963_v15  ;;  %5086 = vmatpush.msra.mxu1 %v4946_v29 }
0x20c5   :  { %5148 = vmatpush.msrb.mxu0 %v4933_v23  ;;  %v5240_v23 = vld [vmem:[#allocation10 + $0x3f8] sm:$0xff] }
0x20c6   :  { %5105 = vmatpush.msrb.mxu2 %v4955_v17  ;;  %5087 = vmatpush.msra.mxu1 %v4938_v4 }
0x20c8   :  { %5106 = vmatpush.msrb.mxu2 %v4947_v42  ;;  %5088 = vmatpush.msra.mxu1 %v4930_v0 }
0x2130   :  { %v8410_v55 = vpop.f32.mrf.mxu2 }
0x2131   :  { %4876 = vrot.lane.b32.xlu2 %v8410_v55, %s6706_s27 }
0x2138   :  { %v8414_v24 = vpop.f32.mrf.mxu2 }
0x2139   :  { %4878 = vrot.lane.b32.xlu1 %v8414_v24, %s6706_s27 }
0x218b   :  { %v4877_v35 = vpop.permute.xlu2 %4876 }
0x218c   :  { %v4882_v12 = vmul.f32 %v4877_v35, %v8387_v3  ;;  %v4939_v3 = vld [vmem:[#allocation14 + $0xe68] sm:$0xff] }
0x218d   :  { %5107 = vmatpush.msrb.mxu2 %v4939_v3 }
0x218e   :  { %v4884_v32 = vsub.f32 %v4882_v12, %v8410_v55  ;;  %v4956_v55 = vld [vmem:[#allocation14 + $0xef0] sm:$0xff] }
0x218f   :  { %5108 = vmatpush.msrb.mxu2 %v4931_v31  ;;  %5125 = vmatpush.msrb.mxu3 %v4956_v55 }
0x2190   :  { %v4886_v57 = vadd.f32 %v4884_v32, %v8178_v53 }
0x2191   :  { %5126 = vmatpush.msrb.mxu3 %v4948_v9  ;;  %v6441_v9 = vld [vmem:[#allocation3] sm:$0xff] }
0x2192   :  { %v8421_v59 = vmax.f32 %v4886_v57, 0.0 }
0x2193   :  { %5127 = vmatpush.msrb.mxu3 %v4940_v22  ;;  %v5220_v22 = vld [vmem:[#allocation8 + $0x3e0] sm:$0xff] }
0x2194   :  { %v4890_v54 = vsel %vm272_vm12, %v8421_v59, -1e+30  ;;  %v4901_v14 = vsel %vm292_vm13, %v8421_v59, -1e+30 }
0x2195   :  { %5128 = vmatpush.msrb.mxu3 %v4932_v34  ;;  %v4892_v10 = vsel %vm276_vm3, %v4890_v54, -inf  ;;  %v4903_v36 = vsel %vm276_vm3, %v4901_v14, -inf  ;;  %v5219_v34 = vld [vmem:[#allocation8 + $0x3d8] sm:$0xff]  ;;  %v5216_v54 = vld [vmem:[#allocation8 + $0x3c0] sm:$0xff] }
0x2196   :  { %v5237_v14 = vld [vmem:[#allocation10 + $0x3e0] sm:$0xff] }
0x21ab   :  { %v4879_v21 = vpop.permute.xlu1 %4878 }
0x21ac   :  { %v4883_v43 = vmul.f32 %v4879_v21, %v8389_v6  ;;  %v6442_v21 = vld [vmem:[#allocation3 + $0x8] sm:$0xff] }
0x21ae   :  { %v4885_v53 = vsub.f32 %v4883_v43, %v8414_v24  ;;  %v4912_v24 = vsel %vm311_vm11, %v8421_v59, -1e+30  ;;  %v5223_v43 = vld [vmem:[#allocation8 + $0x3f8] sm:$0xff] }
0x21af   :  { %v4914_v35 = vsel %vm276_vm3, %v4912_v24, -inf  ;;  %v5214_v24 = vld [vmem:[#allocation8 + $0x3b0] sm:$0xff] }
0x21b0   :  { %v4887_v6 = vadd.f32 %v4885_v53, %v8192_v16  ;;  %v5218_v53 = vld [vmem:[#allocation8 + $0x3d0] sm:$0xff] }
0x21b2   :  { %v8435_v8 = vmax.f32 %v4887_v6, 0.0  ;;  %v5238_v6 = vld [vmem:[#allocation10 + $0x3e8] sm:$0xff] }
0x21b4   :  { %v4891_v26 = vsel %vm273_vm14, %v8435_v8, -1e+30  ;;  %v4902_v16 = vsel %vm293_vm1, %v8435_v8, -1e+30  ;;  %v4913_v48 = vsel %vm312_vm15, %v8435_v8, -1e+30 }
0x21b5   :  { %v4893_v49 = vsel %vm276_vm3, %v4891_v26, -inf  ;;  %v4904_v46 = vsel %vm276_vm3, %v4902_v16, -inf  ;;  %v4915_v15 = vsel %vm276_vm3, %v4913_v48, -inf  ;;  %v5236_v26 = vld [vmem:[#allocation10 + $0x3d8] sm:$0xff]  ;;  %v5212_v16 = vld [vmem:[#allocation8 + $0x3a0] sm:$0xff]  ;;  %v5213_v48 = vld [vmem:[#allocation8 + $0x3a8] sm:$0xff] }
0x21b6   :  { %v4894_v2 = vmax.f32 %v4892_v10, %v4893_v49  ;;  %v4905_v45 = vmax.f32 %v4903_v36, %v4904_v46  ;;  %v4916_v58 = vmax.f32 %v4914_v35, %v4915_v15  ;;  %v5215_v10 = vld [vmem:[#allocation8 + $0x3b8] sm:$0xff]  ;;  %v5235_v36 = vld [vmem:[#allocation10 + $0x3d0] sm:$0xff]  ;;  %v5233_v35 = vld [vmem:[#allocation10 + $0x3c0] sm:$0xff] }
0x21b7   :  { %v5234_v49 = vld [vmem:[#allocation10 + $0x3c8] sm:$0xff]  ;;  %v5210_v46 = vld [vmem:[#allocation8 + $0x390] sm:$0xff]  ;;  %v5211_v15 = vld [vmem:[#allocation8 + $0x398] sm:$0xff] }
0x21b8   :  { %v4895_v12 = vrot.slane %v4894_v2, 4  ;;  %v4906_v17 = vrot.slane %v4905_v45, 4  ;;  %v4917_v40 = vrot.slane %v4916_v58, 4 }
0x21ba   :  { %v4896_v5 = vmax.f32 %v4894_v2, %v4895_v12  ;;  %v4907_v29 = vmax.f32 %v4905_v45, %v4906_v17  ;;  %v4918_v42 = vmax.f32 %v4916_v58, %v4917_v40  ;;  %v5231_v2 = vld [vmem:[#allocation10 + $0x3b0] sm:$0xff]  ;;  %v5232_v45 = vld [vmem:[#allocation10 + $0x3b8] sm:$0xff]  ;;  %v5208_v58 = vld [vmem:[#allocation8 + $0x380] sm:$0xff] }
0x21bb   :  { %v5209_v12 = vld [vmem:[#allocation8 + $0x388] sm:$0xff]  ;;  %v5229_v17 = vld [vmem:[#allocation10 + $0x3a0] sm:$0xff] }
0x21bc   :  { %v4897_v7 = vrot.slane %v4896_v5, 2  ;;  %v4908_v25 = vrot.slane %v4907_v29, 2  ;;  %v4919_v4 = vrot.slane %v4918_v42, 2  ;;  %v5230_v40 = vld [vmem:[#allocation10 + $0x3a8] sm:$0xff] }
0x21be   :  { %v4898_v32 = vmax.f32 %v4896_v5, %v4897_v7  ;;  %v4909_v3 = vmax.f32 %v4907_v29, %v4908_v25  ;;  %v4920_v33 = vmax.f32 %v4918_v42, %v4919_v4  ;;  %v5227_v5 = vld [vmem:[#allocation10 + $0x390] sm:$0xff]  ;;  %v5228_v29 = vld [vmem:[#allocation10 + $0x398] sm:$0xff]  ;;  %v5225_v42 = vld [vmem:[#allocation10 + $0x380] sm:$0xff] }
0x21bf   :  { %v5226_v7 = vld [vmem:[#allocation10 + $0x388] sm:$0xff]  ;;  %v6306_v25 = vld [vmem:[%s8729_s9 + $0x778] sm:$0xff] }
0x21c0   :  { %v4899_v60 = vrot.slane %v4898_v32, 1  ;;  %v4910_v0 = vrot.slane %v4909_v3, 1  ;;  %v4921_v31 = vrot.slane %v4920_v33, 1  ;;  %v6305_v4 = vld [vmem:[%s8729_s9 + $0x770] sm:$0xff] }
0x21c2   :  { %v4900_v62 = vmax.f32 %v4898_v32, %v4899_v60  ;;  %v4911_v47 = vmax.f32 %v4909_v3, %v4910_v0  ;;  %v4922_v57 = vmax.f32 %v4920_v33, %v4921_v31  ;;  %v6322_v3 = vld [vmem:[%s8729_s9 + $0x7f8] sm:$0xff]  ;;  %v6304_v0 = vld [vmem:[%s8729_s9 + $0x768] sm:$0xff]  ;;  %v6321_v31 = vld [vmem:[%s8729_s9 + $0x7f0] sm:$0xff] }
0x21c4   :  { %v4923_v55 = vsel %vm324_vm2, %v4900_v62, %v4911_v47  ;;  %v6320_v47 = vld [vmem:[%s8729_s9 + $0x7e8] sm:$0xff] }
0x21c5   :  { %v4924_v63 = vsel %vm326_vm4, %v4923_v55, %v4922_v57  ;;  %v6319_v57 = vld [vmem:[%s8729_s9 + $0x7e0] sm:$0xff] }
0x21c6   :  { %6271 = vmatmul.msk.f32.vlgmr.msrb.gmra.mxu1 %vm276_vm3, %v4924_v63  ;;  %6272 = vmatmul.msk.f32.vlgmr.msra.gmra.mxu2 %vm276_vm3, %v4924_v63 }
0x21c7   :  { %6273 = vmatmul.msk.f32.vlgmr.msra.gmra.mxu3 %vm276_vm3, %v4924_v63  ;;  %6274 = vmatmul.msk.f32.vlgmr.msra.gmra.mxu0 %vm276_vm3, %v4924_v63 }
0x21c8   :  { %5175 = vmatpush.msrb.mxu1 %v8435_v8  ;;  %5198 = vmatpush.msra.mxu2 %v8435_v8 }
0x21c9   :  { %5307 = vmatpush.msra.mxu3 %v5222_v41  ;;  %5330 = vmatpush.msra.mxu0 %v5223_v43  ;;  %v6301_v41 = vld [vmem:[%s8729_s9 + $0x750] sm:$0xff] }
0x21ca   :  { %5176 = vmatpush.msrb.mxu1 %v8421_v59  ;;  %5199 = vmatpush.msra.mxu2 %v8421_v59 }
0x21cb   :  { %5308 = vmatpush.msra.mxu3 %v5220_v22  ;;  %5331 = vmatpush.msra.mxu0 %v5221_v28  ;;  %v6317_v28 = vld [vmem:[%s8729_s9 + $0x7d0] sm:$0xff] }
0x21cd   :  { %5309 = vmatpush.msra.mxu3 %v5218_v53  ;;  %5332 = vmatpush.msra.mxu0 %v5219_v34  ;;  %v6298_v34 = vld [vmem:[%s8729_s9 + $0x738] sm:$0xff] }
0x21ce   :  { %6275 = vmatmul.msk.f32.vlgmr.msra.gmra.mxu1 %vm276_vm3, %v4924_v63  ;;  %6276 = vmatmul.msk.f32.vlgmr.msrb.gmra.mxu2 %vm276_vm3, %v4924_v63 }
0x21cf   :  { %6277 = vmatmul.msk.f32.vlgmr.msrb.gmra.mxu3 %vm276_vm3, %v4924_v63  ;;  %6278 = vmatmul.msk.f32.vlgmr.msrb.gmra.mxu0 %vm276_vm3, %v4924_v63  ;;  %v6318_v63 = vld [vmem:[%s8729_s9 + $0x7d8] sm:$0xff] }
0x21d0   :  { %5278 = vmatpush.msrb.mxu2 %v5240_v23  ;;  %5310 = vmatpush.msra.mxu3 %v5216_v54 }
0x21d2   :  { %5279 = vmatpush.msrb.mxu2 %v5238_v6  ;;  %5311 = vmatpush.msra.mxu3 %v5214_v24  ;;  %v6316_v6 = vld [vmem:[%s8729_s9 + $0x7c8] sm:$0xff] }
0x21d3   :  { %v6296_v24 = vld [vmem:[%s8729_s9 + $0x728] sm:$0xff] }
0x21d4   :  { %5280 = vmatpush.msrb.mxu2 %v5236_v26  ;;  %5312 = vmatpush.msra.mxu3 %v5212_v16  ;;  %v6314_v26 = vld [vmem:[%s8729_s9 + $0x7b8] sm:$0xff] }
0x21d5   :  { %v6294_v16 = vld [vmem:[%s8729_s9 + $0x718] sm:$0xff] }
0x21d6   :  { %6279 = vmatmul.msk.f32.vlgmr.msrb.gmra.mxu1 %vm226_vm0, %v6857_v27  ;;  %6281 = vmatmul.msk.f32.vlgmr.msra.gmra.mxu2 %vm226_vm0, %v6441_v9  ;;  %v5239_v27 = vld [vmem:[#allocation10 + $0x3f0] sm:$0xff] }
0x21d7   :  { %5255 = vmatpush.msra.mxu1 %v5239_v27  ;;  %5281 = vmatpush.msrb.mxu2 %v5234_v49  ;;  %v6312_v49 = vld [vmem:[%s8729_s9 + $0x7a8] sm:$0xff] }
0x21d8   :  { %5313 = vmatpush.msra.mxu3 %v5210_v46  ;;  %v6292_v46 = vld [vmem:[%s8729_s9 + $0x708] sm:$0xff] }
0x21d9   :  { %5256 = vmatpush.msra.mxu1 %v5237_v14  ;;  %5282 = vmatpush.msrb.mxu2 %v5232_v45  ;;  %v6310_v45 = vld [vmem:[%s8729_s9 + $0x798] sm:$0xff] }
0x21da   :  { %5314 = vmatpush.msra.mxu3 %v5208_v58  ;;  %v6309_v58 = vld [vmem:[%s8729_s9 + $0x790] sm:$0xff] }
0x21db   :  { %5257 = vmatpush.msra.mxu1 %v5235_v36  ;;  %5283 = vmatpush.msrb.mxu2 %v5230_v40  ;;  %v6295_v36 = vld [vmem:[%s8729_s9 + $0x720] sm:$0xff] }
0x21dd   :  { %5258 = vmatpush.msra.mxu1 %v5233_v35  ;;  %5284 = vmatpush.msrb.mxu2 %v5228_v29  ;;  %v6293_v35 = vld [vmem:[%s8729_s9 + $0x710] sm:$0xff] }
0x21de   :  { %6280 = vmatmul.msk.f32.gmra.mxu1 %vm226_vm0, %v6868_v37  ;;  %6282 = vmatmul.msk.f32.gmra.mxu2 %vm226_vm0, %v6442_v21  ;;  %v5217_v37 = vld [vmem:[#allocation8 + $0x3c8] sm:$0xff] }
0x21df   :  { %5333 = vmatpush.msra.mxu0 %v5217_v37  ;;  %5259 = vmatpush.msra.mxu1 %v5231_v2  ;;  %v6291_v2 = vld [vmem:[%s8729_s9 + $0x700] sm:$0xff]  ;;  %v5346_v29 = vld [vmem:[#allocation11 + $0xe] sm:$0x3] }
0x21e0   :  { %5285 = vmatpush.msrb.mxu2 %v5226_v7 }
0x21e1   :  { %5334 = vmatpush.msra.mxu0 %v5215_v10  ;;  %5260 = vmatpush.msra.mxu1 %v5229_v17  ;;  %v6315_v10 = vld [vmem:[%s8729_s9 + $0x7c0] sm:$0xff] }
0x21e2   :  { %5421 = vmatpush.msra.mxu2 %v6322_v3  ;;  %v6307_v17 = vld [vmem:[%s8729_s9 + $0x780] sm:$0xff] }
0x21e3   :  { %5335 = vmatpush.msra.mxu0 %v5213_v48  ;;  %5261 = vmatpush.msra.mxu1 %v5227_v5  ;;  %v6313_v48 = vld [vmem:[%s8729_s9 + $0x7b0] sm:$0xff] }
0x21e4   :  { %5422 = vmatpush.msra.mxu2 %v6321_v31 }
0x21e5   :  { %5336 = vmatpush.msra.mxu0 %v5211_v15  ;;  %5262 = vmatpush.msra.mxu1 %v5225_v42  ;;  %v6311_v15 = vld [vmem:[%s8729_s9 + $0x7a0] sm:$0xff]  ;;  %v5348_v42 = vperm.slane %v5346_v29, 0 }
0x21e6   :  { %5423 = vmatpush.msra.mxu2 %v6320_v47 }
0x21e7   :  { %5337 = vmatpush.msra.mxu0 %v5209_v12  ;;  %5398 = vmatpush.msrb.mxu1 %v6306_v25  ;;  %v6308_v12 = vld [vmem:[%s8729_s9 + $0x788] sm:$0xff] }
0x21e8   :  { %5424 = vmatpush.msra.mxu2 %v6319_v57 }
0x21e9   :  { %5399 = vmatpush.msrb.mxu1 %v6305_v4 }
0x21ea   :  { %5425 = vmatpush.msra.mxu2 %v6318_v63 }
0x21eb   :  { %5400 = vmatpush.msrb.mxu1 %v6304_v0  ;;  %v5349_v0 = vperm.slane %v5346_v29, 1 }
0x21ec   :  { %5426 = vmatpush.msra.mxu2 %v6317_v28 }
0x21ee   :  { %5427 = vmatpush.msra.mxu2 %v6316_v6 }
0x21f0   :  { %5428 = vmatpush.msra.mxu2 %v6315_v10 }
0x21f2   :  { %5429 = vmatpush.msra.mxu2 %v6314_v26 }
0x21f4   :  { %5430 = vmatpush.msra.mxu2 %v6313_v48 }
0x21f6   :  { %5431 = vmatpush.msra.mxu2 %v6312_v49 }
0x21f8   :  { %5432 = vmatpush.msra.mxu2 %v6311_v15 }
0x21fa   :  { %5433 = vmatpush.msra.mxu2 %v6310_v45 }
0x21fc   :  { %5434 = vmatpush.msra.mxu2 %v6309_v58 }
0x21fe   :  { %5435 = vmatpush.msra.mxu2 %v6308_v12 }
0x2200   :  { %5436 = vmatpush.msra.mxu2 %v6307_v17 }
0x2243   :  { %v5010_v32 = vpop.f32.mrf.mxu1 }
0x2244   :  { %v8482_v33 = vadd.f32 %v5010_v32, %v8298_v18  ;;  %v5070_v60 = vpop.f32.mrf.mxu0  ;;  %v6303_v18 = vld [vmem:[%s8729_s9 + $0x760] sm:$0xff] }
0x2245   :  { %v8491_v62 = vadd.f32 %v5070_v60, %v8303_v13  ;;  %v6302_v13 = vld [vmem:[%s8729_s9 + $0x758] sm:$0xff]  ;;  %5401 = vmatpush.msrb.mxu1 %v6303_v18 }
0x2247   :  { %5402 = vmatpush.msrb.mxu1 %v6302_v13 }
0x2249   :  { %v5030_v55 = vpop.f32.mrf.mxu2  ;;  %5403 = vmatpush.msrb.mxu1 %v6301_v41 }
0x224a   :  { %v8509_v9 = vadd.f32 %v5030_v55, %v8262_v52  ;;  %v5050_v21 = vpop.f32.mrf.mxu3  ;;  %v6300_v52 = vld [vmem:[%s8729_s9 + $0x748] sm:$0xff] }
0x224b   :  { %v8515_v43 = vadd.f32 %v5050_v21, %v8271_v19  ;;  %v5090_v22 = vpop.f32.mrf.mxu1  ;;  %v6299_v19 = vld [vmem:[%s8729_s9 + $0x740] sm:$0xff]  ;;  %5404 = vmatpush.msrb.mxu1 %v6300_v52 }
0x224c   :  { %v8521_v53 = vadd.f32 %v5090_v22, %v8322_v20  ;;  %v8596_v5 = vpop.f32.mrf.mxu0 }
0x224d   :  { %5405 = vmatpush.msrb.mxu1 %v6299_v19 }
0x224f   :  { %5406 = vmatpush.msrb.mxu1 %v6298_v34 }
0x2251   :  { %v5110_v27 = vpop.f32.mrf.mxu2 }
0x2252   :  { %v8533_v20 = vadd.f32 %v5110_v27, %v8309_v39  ;;  %v6297_v39 = vld [vmem:[%s8729_s9 + $0x730] sm:$0xff]  ;;  %v8594_v40 = vpop.f32.mrf.mxu3 }
0x2253   :  { %v5178_v23 = vpop.f32.mrf.mxu1  ;;  %5407 = vmatpush.msrb.mxu1 %v6297_v39 }
0x2254   :  { %6287 = vmatmul.msk.f32.vlgmr.msra.gmra.mxu3 %vm276_vm3, %v5178_v23  ;;  %6289 = vmatmul.msk.f32.vlgmr.msra.gmra.mxu0 %vm276_vm3, %v5178_v23 }
0x2255   :  { %5408 = vmatpush.msrb.mxu1 %v6296_v24 }
0x2257   :  { %5409 = vmatpush.msrb.mxu1 %v6295_v36 }
0x2259   :  { %v5201_v54 = vpop.f32.mrf.mxu2  ;;  %5410 = vmatpush.msrb.mxu1 %v6294_v16 }
0x225a   :  { %6283 = vmatmul.msk.f32.vlgmr.msra.gmra.mxu1 %vm276_vm3, %v5201_v54  ;;  %6285 = vmatmul.msk.f32.vlgmr.msrb.gmra.mxu2 %vm276_vm3, %v5201_v54  ;;  %v6411_v54 = vld [vmem:[#allocation13 + $0x7] ss:$0 sm:$0xff] }
0x225b   :  { %v5181_v37 = vpop.f32.mrf.mxu1  ;;  %5411 = vmatpush.msrb.mxu1 %v6293_v35 }
0x225c   :  { %6288 = vmatmul.msk.f32.gmra.mxu3 %vm276_vm3, %v5181_v37  ;;  %6290 = vmatmul.msk.f32.gmra.mxu0 %vm276_vm3, %v5181_v37 }
0x225d   :  { %5412 = vmatpush.msrb.mxu1 %v6292_v46 }
0x225f   :  { %5413 = vmatpush.msrb.mxu1 %v6291_v2 }
0x2261   :  { %v5204_v14 = vpop.f32.mrf.mxu2 }
0x2262   :  { %6284 = vmatmul.msk.f32.gmra.mxu1 %vm276_vm3, %v5204_v14  ;;  %6286 = vmatmul.msk.f32.gmra.mxu2 %vm276_vm3, %v5204_v14 }
0x22d1   :  { %v5339_v3 = vpop.f32.mrf.mxu0 }
0x22d7   :  { %v5264_v7 = vpop.f32.mrf.mxu1  ;;  %v5316_v25 = vpop.f32.mrf.mxu3 }
0x22d8   :  { %v5317_v4 = vadd.f32 %v5316_v25, %v5264_v7 }
0x22d9   :  { %v5342_v22 = vpop.f32.mrf.mxu0 }
0x22da   :  { %v5352_v32 = vadd.f32 %v5348_v42, %v5317_v4 }
0x22dc   :  { %v5356_v60 = vmax.f32 %v5352_v32, 0.0 }
0x22dd   :  { %v5287_v31 = vpop.f32.mrf.mxu2 }
0x22de   :  { %v5340_v47 = vadd.f32 %v5339_v3, %v5287_v31  ;;  %5414 = vmatmul.f32.vlgmr.msrb.gmra.mxu1 %v5356_v60 }
0x22df   :  { %v5267_v18 = vpop.f32.mrf.mxu1  ;;  %v5319_v57 = vpop.f32.mrf.mxu3 }
0x22e0   :  { %v5353_v13 = vadd.f32 %v5349_v0, %v5340_v47  ;;  %v5320_v55 = vadd.f32 %v5319_v57, %v5267_v18  ;;  %v6443_v47 = vld [vmem:[%s8723_s3] sm:$0xff]  ;;  %v6444_v18 = vld [vmem:[%s8723_s3 + $0x8] sm:$0xff] }
0x22e2   :  { %v5357_v63 = vmax.f32 %v5353_v13, 0.0  ;;  %v5354_v21 = vadd.f32 %v5348_v42, %v5320_v55  ;;  %v5634_v55 = vld [vmem:[#allocation14 + $0x11c0] sm:$0xff] }
0x22e4   :  { %v5358_v41 = vmax.f32 %v5354_v21, 0.0  ;;  %5437 = vmatmul.f32.vlgmr.msra.gmra.mxu2 %v5357_v63  ;;  %v5635_v63 = vld [vmem:[#allocation14 + $0x11c8] sm:$0xff]  ;;  %v5636_v21 = vld [vmem:[#allocation14 + $0x11d0] sm:$0xff] }
0x22e5   :  { %v5290_v28 = vpop.f32.mrf.mxu2  ;;  %5693 = vmatpush.msra.mxu1 %v5636_v21  ;;  %v5624_v21 = vld [vmem:[#allocation14 + $0x1170] sm:$0xff] }
0x22e6   :  { %v5343_v52 = vadd.f32 %v5342_v22, %v5290_v28  ;;  %5417 = vmatmul.f32.gmra.mxu1 %v5358_v41  ;;  %v5637_v41 = vld [vmem:[#allocation14 + $0x11d8] sm:$0xff]  ;;  %v5626_v22 = vld [vmem:[#allocation14 + $0x1180] sm:$0xff]  ;;  %v5627_v28 = vld [vmem:[#allocation14 + $0x1188] sm:$0xff] }
0x22e7   :  { %5713 = vmatpush.msrb.mxu2 %v5637_v41  ;;  %v5625_v41 = vld [vmem:[#allocation14 + $0x1178] sm:$0xff] }
0x22e8   :  { %v5355_v19 = vadd.f32 %v5349_v0, %v5343_v52  ;;  %v5628_v52 = vld [vmem:[#allocation14 + $0x1190] sm:$0xff] }
0x22e9   :  { %5694 = vmatpush.msra.mxu1 %v5628_v52  ;;  %v5616_v52 = vld [vmem:[#allocation14 + $0x1130] sm:$0xff] }
0x22ea   :  { %v5359_v34 = vmax.f32 %v5355_v19, 0.0  ;;  %v5629_v19 = vld [vmem:[#allocation14 + $0x1198] sm:$0xff] }
0x22eb   :  { %5714 = vmatpush.msrb.mxu2 %v5629_v19  ;;  %v5617_v19 = vld [vmem:[#allocation14 + $0x1138] sm:$0xff] }
0x22ec   :  { %5440 = vmatmul.f32.gmra.mxu2 %v5359_v34  ;;  %v5618_v34 = vld [vmem:[#allocation14 + $0x1140] sm:$0xff] }
0x235b   :  { %v5415_v27 = vpop.f32.mrf.mxu1 }
0x235c   :  { %v5416_v14 = vadd.f32 %v6411_v54, %v5415_v27  ;;  %v5619_v27 = vld [vmem:[#allocation14 + $0x1148] sm:$0xff] }
0x2363   :  { %v5418_v37 = vpop.f32.mrf.mxu1 }
0x2364   :  { %v5419_v39 = vadd.f32 %v6411_v54, %v5418_v37  ;;  %v5621_v54 = vld [vmem:[#allocation14 + $0x1158] sm:$0xff]  ;;  %v5610_v37 = vld [vmem:[#allocation14 + $0x1100] sm:$0xff] }
0x2365   :  { %5715 = vmatpush.msrb.mxu2 %v5621_v54  ;;  %v5609_v54 = vld [vmem:[#allocation14 + $0x10f8] sm:$0xff] }
0x2367   :  { %v5438_v23 = vpop.f32.mrf.mxu2 }
0x2368   :  { %v8598_v6 = vadd.f32 %v5438_v23, %v5416_v14  ;;  %v5620_v23 = vld [vmem:[#allocation14 + $0x1150] sm:$0xff]  ;;  %v5611_v14 = vld [vmem:[#allocation14 + $0x1108] sm:$0xff] }
0x2369   :  { %5695 = vmatpush.msra.mxu1 %v5620_v23 }
0x236a   :  { %v5444_v36 = vmul.f32 %v8598_v6, %v8598_v6 }
0x236f   :  { %v5441_v24 = vpop.f32.mrf.mxu2 }
0x2370   :  { %v8600_v10 = vadd.f32 %v5441_v24, %v5419_v39  ;;  %v5612_v39 = vld [vmem:[#allocation14 + $0x1110] sm:$0xff]  ;;  %v5613_v24 = vld [vmem:[#allocation14 + $0x1118] sm:$0xff] }
0x2371   :  { %5696 = vmatpush.msra.mxu1 %v5612_v39  ;;  %5716 = vmatpush.msrb.mxu2 %v5613_v24  ;;  %v5600_v39 = vld [vmem:[#allocation14 + $0x10b0] sm:$0xff]  ;;  %v5601_v24 = vld [vmem:[#allocation14 + $0x10b8] sm:$0xff] }
0x2372   :  { %v5445_v26 = vmul.f32 %v8600_v10, %v8600_v10 }
0x2374   :  { %v6398_v16 = vpack.i.bf16 %v5444_v36, %v5445_v26  ;;  %v5602_v36 = vld [vmem:[#allocation14 + $0x10c0] sm:$0xff]  ;;  %v5603_v26 = vld [vmem:[#allocation14 + $0x10c8] sm:$0xff] }
0x2376   :  { %6399 = vrot.lane.b32.xlu0 %v6398_v16, %s6706_s27  ;;  %v5604_v16 = vld [vmem:[#allocation14 + $0x10d0] sm:$0xff] }
0x2377   :  { %5697 = vmatpush.msra.mxu1 %v5604_v16  ;;  %v5591_v16 = vld [vmem:[#allocation14 + $0x1068] sm:$0xff] }
0x23e8   :  { %v6400_v48 = vpop.permute.xlu0 %6399 }
0x23e9   :  { %v6402_v35 = vunpack.i.h.bf16 %v6400_v48  ;;  %v6401_v49 = vunpack.i.l.bf16 %v6400_v48  ;;  %v5605_v48 = vld [vmem:[#allocation14 + $0x10d8] sm:$0xff] }
0x23ea   :  { %5717 = vmatpush.msrb.mxu2 %v5605_v48 }
0x23eb   :  { %v5455_v46 = vsel %vm276_vm3, %v8600_v10, %v6401_v49  ;;  %v5454_v15 = vsel %vm276_vm3, %v8598_v6, %v6402_v35  ;;  %v5594_v35 = vld [vmem:[#allocation14 + $0x1080] sm:$0xff]  ;;  %v5595_v49 = vld [vmem:[#allocation14 + $0x1088] sm:$0xff] }
0x23ec   :  { %5470 = vmatpush.msrb.mxu3 %v5455_v46  ;;  %v5596_v46 = vld [vmem:[#allocation14 + $0x1090] sm:$0xff] }
0x23ed   :  { %5698 = vmatpush.msra.mxu1 %v5596_v46  ;;  %v5582_v46 = vld [vmem:[#allocation14 + $0x1020] sm:$0xff] }
0x23ee   :  { %5471 = vmatpush.msrb.mxu3 %v5454_v15  ;;  %v5597_v15 = vld [vmem:[#allocation14 + $0x1098] sm:$0xff] }
0x23ef   :  { %6323 = vmatmul.msk.f32.vlgmr.msrb.gmra.mxu3 %vm226_vm0, %v6998_v11  ;;  %5718 = vmatpush.msrb.mxu2 %v5597_v15  ;;  %v5583_v15 = vld [vmem:[#allocation14 + $0x1028] sm:$0xff]  ;;  %vm5895_vm0 = vcmask 2048  }
0x23f0   :  { %5653 = vmatpush.msra.mxu3 %v5634_v55  ;;  %v5622_v55 = vld [vmem:[#allocation14 + $0x1160] sm:$0xff] }
0x23f2   :  { %5654 = vmatpush.msra.mxu3 %v5626_v22  ;;  %v5614_v22 = vld [vmem:[#allocation14 + $0x1120] sm:$0xff] }
0x23f4   :  { %5655 = vmatpush.msra.mxu3 %v5618_v34  ;;  %v5606_v34 = vld [vmem:[#allocation14 + $0x10e0] sm:$0xff] }
0x23f6   :  { %5656 = vmatpush.msra.mxu3 %v5610_v37  ;;  %v5598_v37 = vld [vmem:[#allocation14 + $0x10a0] sm:$0xff] }
0x23f8   :  { %5657 = vmatpush.msra.mxu3 %v5602_v36 }
0x23fa   :  { %5658 = vmatpush.msra.mxu3 %v5594_v35  ;;  %v5592_v35 = vld [vmem:[#allocation14 + $0x1070] sm:$0xff] }
0x2472   :  { %v5473_v2 = vpop.f32.mrf.mxu3 }
0x2473   :  { %v5476_v45 = vmul.f32 %v5473_v2, %v5473_v2 }
0x2475   :  { %5478 = vrot.lane.b32.xlu2 %v5476_v45, %s6706_s27  ;;  %v5586_v45 = vld [vmem:[#allocation14 + $0x1040] sm:$0xff] }
0x2476   :  { %5659 = vmatpush.msra.mxu3 %v5586_v45  ;;  %v5584_v45 = vld [vmem:[#allocation14 + $0x1030] sm:$0xff] }
0x24cf   :  { %v5479_v58 = vpop.permute.xlu2 %5478 }
0x24d0   :  { %v5481_v12 = vsub.f32 %v5473_v2, %v5479_v58  ;;  %v5587_v58 = vld [vmem:[#allocation14 + $0x1048] sm:$0xff] }
0x24d2   :  { %v5482_v17 = vmax.f32 %v5481_v12, 0.0  ;;  %v5588_v12 = vld [vmem:[#allocation14 + $0x1050] sm:$0xff] }
0x24d3   :  { %5699 = vmatpush.msra.mxu1 %v5588_v12 }
0x24d4   :  { %v5483_v29 = vadd.f32 1e-05, %v5482_v17  ;;  %v5589_v17 = vld [vmem:[#allocation14 + $0x1058] sm:$0xff] }
0x24d5   :  { %5719 = vmatpush.msrb.mxu2 %v5589_v17 }
0x24d6   :  { %6427 = vrsqrt.f32 %v5483_v29  ;;  %vm5490_vm8 = vweird.f32 %v5483_v29 }
0x24dc   :  { %v6428_v42 = vpop.eup %6427 }
0x24dd   :  { %v5485_v7 = vmul.f32 %v6428_v42, %v5483_v29  ;;  %vm5491_vm7 = vweird.f32 %v6428_v42  ;;  %v5578_v29 = vld [vmem:[#allocation14 + $0x1000] sm:$0xff] }
0x24de   :  { %vm5492_vm5 = vmor %vm5490_vm8, %vm5491_vm7  ;;  %5660 = vmatpush.msra.mxu3 %v5578_v29 }
0x24df   :  { %v5486_v25 = vmul.f32 %v6428_v42, %v5485_v7  ;;  %v5580_v7 = vld [vmem:[#allocation14 + $0x1010] sm:$0xff] }
0x24e0   :  { %5700 = vmatpush.msra.mxu1 %v5580_v7 }
0x24e1   :  { %v5487_v4 = vmul.f32 0.5, %v5486_v25 }
0x24e3   :  { %v5488_v32 = vsub.f32 1.5, %v5487_v4  ;;  %v5581_v4 = vld [vmem:[#allocation14 + $0x1018] sm:$0xff] }
0x24e4   :  { %5720 = vmatpush.msrb.mxu2 %v5581_v4 }
0x24e5   :  { %v5489_v3 = vmul.f32 %v6428_v42, %v5488_v32  ;;  %v5638_v32 = vld [vmem:[#allocation14 + $0x11e0] sm:$0xff] }
0x24e6   :  { %5733 = vmatpush.msrb.mxu3 %v5638_v32 }
0x24e7   :  { %v5493_v60 = vsel %vm5492_vm5, %v6428_v42, %v5489_v3  ;;  %v5579_v42 = vld [vmem:[#allocation14 + $0x1008] sm:$0xff] }
0x24e8   :  { %5495 = vrot.lane.b32.xlu1 %v5493_v60, %s6706_s27  ;;  %v5639_v3 = vld [vmem:[#allocation14 + $0x11e8] sm:$0xff] }
0x255a   :  { %v5496_v11 = vpop.permute.xlu1 %5495 }
0x255b   :  { %v5498_v0 = vmul.f32 %v5496_v11, %v5473_v2  ;;  %v5641_v11 = vld [vmem:[#allocation14 + $0x11f8] sm:$0xff] }
0x255c   :  { %5793 = vmatpush.msra.mxu2 %v5641_v11 }
0x255d   :  { %v5499_v31 = vsel %vm276_vm3, %v5498_v0, %v5493_v60  ;;  %v5640_v60 = vld [vmem:[#allocation14 + $0x11f0] sm:$0xff]  ;;  %v5630_v0 = vld [vmem:[#allocation14 + $0x11a0] sm:$0xff] }
0x255e   :  { %6324 = vmatpush.msk.msrb.mxu0 %vm780_vm9, %v5499_v31  ;;  %v5631_v31 = vld [vmem:[#allocation14 + $0x11a8] sm:$0xff]  ;;  %5773 = vmatpush.msrb.mxu1 %v5640_v60 }
0x255f   :  { %6325 = vmatmul.msk.f32.vlgmr.msrb.gmra.mxu0 %vm773_vm10, %v6443_v47  ;;  %v5632_v47 = vld [vmem:[#allocation14 + $0x11b0] sm:$0xff]  ;;  %5734 = vmatpush.msrb.mxu3 %v5630_v0 }
0x2560   :  { %5673 = vmatpush.msra.mxu0 %v5635_v63  ;;  %v5623_v63 = vld [vmem:[#allocation14 + $0x1168] sm:$0xff]  ;;  %5774 = vmatpush.msrb.mxu1 %v5632_v47 }
0x2561   :  { %5735 = vmatpush.msrb.mxu3 %v5622_v55 }
0x2562   :  { %5674 = vmatpush.msra.mxu0 %v5627_v28  ;;  %v5615_v28 = vld [vmem:[#allocation14 + $0x1128] sm:$0xff]  ;;  %5775 = vmatpush.msrb.mxu1 %v5624_v21 }
0x2563   :  { %5736 = vmatpush.msrb.mxu3 %v5614_v22 }
0x2564   :  { %5675 = vmatpush.msra.mxu0 %v5619_v27  ;;  %v5607_v27 = vld [vmem:[#allocation14 + $0x10e8] sm:$0xff]  ;;  %5776 = vmatpush.msrb.mxu1 %v5616_v52 }
0x2565   :  { %5737 = vmatpush.msrb.mxu3 %v5606_v34 }
0x2566   :  { %5676 = vmatpush.msra.mxu0 %v5611_v14  ;;  %v5599_v14 = vld [vmem:[#allocation14 + $0x10a8] sm:$0xff] }
0x2567   :  { %6326 = vmatmul.msk.f32.gmra.mxu0 %vm773_vm10, %v6444_v18  ;;  %v5633_v18 = vld [vmem:[#allocation14 + $0x11b8] sm:$0xff]  ;;  %5738 = vmatpush.msrb.mxu3 %v5598_v37  ;;  %v8786_v37 = vld [vmem:[#allocation32_spill] sm:$0xff] }
0x2568   :  { %5677 = vmatpush.msra.mxu0 %v5603_v26  ;;  %5794 = vmatpush.msra.mxu2 %v5633_v18  ;;  %v5590_v26 = vld [vmem:[#allocation14 + $0x1060] sm:$0xff] }
0x2569   :  { %5739 = vmatpush.msrb.mxu3 %v5590_v26 }
0x256a   :  { %5678 = vmatpush.msra.mxu0 %v5595_v49  ;;  %5795 = vmatpush.msra.mxu2 %v5625_v41  ;;  %v5593_v49 = vld [vmem:[#allocation14 + $0x1078] sm:$0xff] }
0x256b   :  { %5740 = vmatpush.msrb.mxu3 %v5582_v46 }
0x256c   :  { %5679 = vmatpush.msra.mxu0 %v5587_v58  ;;  %5796 = vmatpush.msra.mxu2 %v5617_v19  ;;  %v5585_v58 = vld [vmem:[#allocation14 + $0x1038] sm:$0xff] }
0x256e   :  { %5680 = vmatpush.msra.mxu0 %v5579_v42  ;;  %5797 = vmatpush.msra.mxu2 %v5609_v54  ;;  %v8785_v54 = vld [vmem:[#allocation30_spill] sm:$0xff] }
0x2570   :  { %5753 = vmatpush.msrb.mxu0 %v5639_v3  ;;  %5798 = vmatpush.msra.mxu2 %v5601_v24  ;;  %v8787_v24 = vld [vmem:[#allocation35_spill] sm:$0xff] }
0x2572   :  { %5754 = vmatpush.msrb.mxu0 %v5631_v31  ;;  %5799 = vmatpush.msra.mxu2 %v5593_v49  ;;  %v8790_v49 = vld [vmem:[#allocation33_spill] sm:$0xff] }
0x2574   :  { %5755 = vmatpush.msrb.mxu0 %v5623_v63  ;;  %5800 = vmatpush.msra.mxu2 %v5585_v58  ;;  %v8791_v58 = vld [vmem:[#allocation41_spill] sm:$0xff] }
0x2576   :  { %5756 = vmatpush.msrb.mxu0 %v5615_v28 }
0x2578   :  { %5757 = vmatpush.msrb.mxu0 %v5607_v27 }
0x257a   :  { %5758 = vmatpush.msrb.mxu0 %v5599_v14  ;;  %v1227_v14 = vadd.f32 %v8786_v37, %v8785_v54 }
0x257c   :  { %5759 = vmatpush.msrb.mxu0 %v5591_v16  ;;  %v8788_v16 = vld [vmem:[#allocation38_spill] sm:$0xff] }
0x257e   :  { %5760 = vmatpush.msrb.mxu0 %v5583_v15 }
0x25dc   :  { %v8625_v57 = vpop.f32.mrf.mxu0 }
0x25dd   :  { %5528 = vrot.lane.b32.xlu0 %v8625_v57, %s6706_s27 }
0x25e4   :  { %v8629_v13 = vpop.f32.mrf.mxu0 }
0x25e5   :  { %5530 = vrot.lane.b32.xlu2 %v8629_v13, %s6706_s27 }
0x263f   :  { %v5531_v2 = vpop.permute.xlu2 %5530 }
0x2640   :  { %v5535_v25 = vmul.f32 %v5531_v2, %v8600_v10 }
0x2642   :  { %v5537_v10 = vsub.f32 %v5535_v25, %v8629_v13  ;;  %v5608_v13 = vld [vmem:[#allocation14 + $0x10f0] sm:$0xff] }
0x2643   :  { %5777 = vmatpush.msrb.mxu1 %v5608_v13 }
0x2644   :  { %v5539_v23 = vadd.f32 %v5537_v10, %v8435_v8 }
0x2645   :  { %5778 = vmatpush.msrb.mxu1 %v5600_v39  ;;  %v8669_v39 = vld [vmem:[#allocation16] sm:$0xff] }
0x2646   :  { %v5541_v48 = vmax.f32 %v5539_v23, 0.0  ;;  %v5816_v26 = vperm.slane %v8669_v39, 1 }
0x2647   :  { %5779 = vmatpush.msrb.mxu1 %v5592_v35  ;;  %v8789_v35 = vld [vmem:[#allocation31_spill] sm:$0xff] }
0x2648   :  { %v5543_v12 = vsel %vm273_vm14, %v5541_v48, -1e+30  ;;  %v1247_v46 = vadd.f32 %v8790_v49, %v8789_v35 }
0x2649   :  { %5780 = vmatpush.msrb.mxu1 %v5584_v45  ;;  %v5545_v42 = vsel %vm276_vm3, %v5543_v12, -inf  ;;  %v5817_v45 = vperm.slane %v8669_v39, 2 }
0x264f   :  { %v5529_v36 = vpop.permute.xlu0 %5528 }
0x2650   :  { %v5534_v8 = vmul.f32 %v5529_v36, %v8598_v6  ;;  %v5554_v6 = vsel %vm293_vm1, %v5541_v48, -1e+30  ;;  %v1899_v36 = vadd.f32 %v8787_v24, %v1227_v14 }
0x2651   :  { %v5556_v7 = vsel %vm276_vm3, %v5554_v6, -inf }
0x2652   :  { %v5536_v2 = vsub.f32 %v5534_v8, %v8625_v57  ;;  %v5565_v57 = vsel %vm312_vm15, %v5541_v48, -1e+30  ;;  %v2551_v48 = vadd.f32 %v8788_v16, %v1899_v36  ;;  %v5822_v36 = vperm.slane %v8669_v39, 7 }
0x2653   :  { %v5567_v25 = vsel %vm276_vm3, %v5565_v57, -inf }
0x2654   :  { %v5538_v17 = vadd.f32 %v5536_v2, %v8421_v59  ;;  %v3203_v12 = vadd.f32 %v8791_v58, %v2551_v48 }
0x2656   :  { %v5540_v29 = vmax.f32 %v5538_v17, 0.0  ;;  %v8792_v17 = vld [vmem:[#allocation36_spill] sm:$0xff] }
0x2657   :  { %v1900_v57 = vadd.f32 %v8792_v17, %v1247_v46 }
0x2658   :  { %v5542_v1 = vsel %vm272_vm12, %v5540_v29, -1e+30  ;;  %v5553_v56 = vsel %vm292_vm13, %v5540_v29, -1e+30  ;;  %v5564_v59 = vsel %vm311_vm11, %v5540_v29, -1e+30 }
0x2659   :  { %v5544_v4 = vsel %vm276_vm3, %v5542_v1, -inf  ;;  %v5555_v61 = vsel %vm276_vm3, %v5553_v56, -inf  ;;  %v5566_v32 = vsel %vm276_vm3, %v5564_v59, -inf  ;;  %v8794_v56 = vld [vmem:[#allocation39_spill] sm:$0xff] }
0x265a   :  { %v5546_v3 = vmax.f32 %v5544_v4, %v5545_v42  ;;  %v5557_v60 = vmax.f32 %v5555_v61, %v5556_v7  ;;  %v5568_v11 = vmax.f32 %v5566_v32, %v5567_v25  ;;  %v8681_v42 = vld [vmem:[#allocation17] sm:$0xff]  ;;  %v8793_v7 = vld [vmem:[#allocation47_spill] sm:$0xff]  ;;  %v2552_v59 = vadd.f32 %v8794_v56, %v1900_v57 }
0x265b   :  { %v3855_v1 = vadd.f32 %v8793_v7, %v3203_v12  ;;  %v5815_v4 = vperm.slane %v8669_v39, 0  ;;  %v5850_v32 = vperm.slane %v8681_v42, 1  ;;  %v5854_v49 = vperm.slane %v8681_v42, 5 }
0x265c   :  { %v5547_v0 = vrot.slane %v5546_v3, 4  ;;  %v5558_v44 = vrot.slane %v5557_v60, 4  ;;  %v5569_v31 = vrot.slane %v5568_v11, 4  ;;  %v5855_v17 = vperm.slane %v8681_v42, 6 }
0x265d   :  { %v5856_v56 = vperm.slane %v8681_v42, 7 }
0x265e   :  { %v5548_v47 = vmax.f32 %v5546_v3, %v5547_v0  ;;  %v5559_v50 = vmax.f32 %v5557_v60, %v5558_v44  ;;  %v5570_v18 = vmax.f32 %v5568_v11, %v5569_v31  ;;  %v8795_v60 = vld [vmem:[#allocation42_spill] sm:$0xff] }
0x265f   :  { %v3204_v11 = vadd.f32 %v8795_v60, %v2552_v59 }
0x2660   :  { %v5549_v55 = vrot.slane %v5548_v47, 2  ;;  %v5560_v51 = vrot.slane %v5559_v50, 2  ;;  %v5571_v63 = vrot.slane %v5570_v18, 2 }
0x2662   :  { %v5550_v10 = vmax.f32 %v5548_v47, %v5549_v55  ;;  %v5561_v21 = vmax.f32 %v5559_v50, %v5560_v51  ;;  %v5572_v41 = vmax.f32 %v5570_v18, %v5571_v63  ;;  %v5851_v47 = vperm.slane %v8681_v42, 2 }
0x2663   :  { %v5849_v50 = vperm.slane %v8681_v42, 0 }
0x2664   :  { %v5551_v22 = vrot.slane %v5550_v10, 1  ;;  %v5562_v28 = vrot.slane %v5561_v21, 1  ;;  %v5573_v52 = vrot.slane %v5572_v41, 1 }
0x2666   :  { %v5552_v19 = vmax.f32 %v5550_v10, %v5551_v22  ;;  %v5563_v34 = vmax.f32 %v5561_v21, %v5562_v28  ;;  %v5574_v27 = vmax.f32 %v5572_v41, %v5573_v52  ;;  %v5820_v10 = vperm.slane %v8669_v39, 5  ;;  %v8796_v41 = vld [vmem:[#allocation48_spill] sm:$0xff] }
0x2667   :  { %v3856_v22 = vadd.f32 %v8796_v41, %v3204_v11 }
0x2668   :  { %v5575_v23 = vsel %vm324_vm2, %v5552_v19, %v5563_v34  ;;  %v5821_v34 = vperm.slane %v8669_v39, 6 }
0x2669   :  { %v5576_v13 = vsel %vm326_vm4, %v5575_v23, %v5574_v27 }
0x266a   :  { %6327 = vmatmul.msk.f32.vlgmr.msra.gmra.mxu3 %vm276_vm3, %v5576_v13  ;;  %6328 = vmatmul.msk.f32.vlgmr.msra.gmra.mxu0 %vm276_vm3, %v5576_v13 }
0x266b   :  { %6329 = vmatmul.msk.f32.vlgmr.msra.gmra.mxu1 %vm276_vm3, %v5576_v13  ;;  %6330 = vmatmul.msk.f32.vlgmr.msrb.gmra.mxu2 %vm276_vm3, %v5576_v13 }
0x2672   :  { %6331 = vmatmul.msk.f32.vlgmr.msrb.gmra.mxu3 %vm276_vm3, %v5576_v13  ;;  %6332 = vmatmul.msk.f32.vlgmr.msrb.gmra.mxu0 %vm276_vm3, %v5576_v13 }
0x2673   :  { %6333 = vmatmul.msk.f32.vlgmr.msrb.gmra.mxu1 %vm276_vm3, %v5576_v13  ;;  %6334 = vmatmul.msk.f32.vlgmr.msra.gmra.mxu2 %vm276_vm3, %v5576_v13 }
0x26e7   :  { %v5682_v8 = vpop.f32.mrf.mxu0 }
0x26e8   :  { %v5806_v15 = vadd.f32 %v5682_v8, %v8509_v9  ;;  %v5702_v2 = vpop.f32.mrf.mxu1  ;;  %v4507_v9 = vadd.f32 %v8383_v38, %v3855_v1 }
0x26e9   :  { %v5807_v6 = vadd.f32 %v5702_v2, %v8515_v43  ;;  %v5818_v43 = vperm.slane %v8669_v39, 3 }
0x26ea   :  { %v5832_v29 = vadd.f32 %v5816_v26, %v5806_v15  ;;  %v5159_v31 = vadd.f32 %v8594_v40, %v4507_v9  ;;  %v5852_v40 = vperm.slane %v8681_v42, 3 }
0x26eb   :  { %v5833_v25 = vadd.f32 %v5817_v45, %v5807_v6  ;;  %v5853_v45 = vperm.slane %v8681_v42, 4 }
0x26ec   :  { %v5840_v61 = vmax.f32 %v5832_v29, 0.0 }
0x26ed   :  { %v5662_v3 = vpop.f32.mrf.mxu3  ;;  %v5841_v55 = vmax.f32 %v5833_v25, 0.0 }
0x26ee   :  { %v5805_v0 = vadd.f32 %v5662_v3, %v8482_v33  ;;  %v5722_v44 = vpop.f32.mrf.mxu2  ;;  %v5866_v33 = vmul.f32 %v5850_v32, %v5840_v61 }
0x26ef   :  { %v5808_v18 = vadd.f32 %v5722_v44, %v8491_v62  ;;  %v5762_v38 = vpop.f32.mrf.mxu0  ;;  %v4508_v62 = vadd.f32 %v8385_v30, %v3856_v22  ;;  %v5867_v23 = vmul.f32 %v5851_v47, %v5841_v55 }
0x26f0   :  { %v5831_v51 = vadd.f32 %v5815_v4, %v5805_v0  ;;  %v5810_v63 = vadd.f32 %v5762_v38, %v8533_v20  ;;  %v5782_v21 = vpop.f32.mrf.mxu1  ;;  %v5819_v20 = vperm.slane %v8669_v39, 4  ;;  %v5874_v14 = vsel %vm780_vm9, %v5866_v33, 0.0  ;;  %v6412_v0 = vld [vmem:[#allocation2] ss:$0 sm:$0xff] }
0x26f1   :  { %v5834_v28 = vadd.f32 %v5818_v43, %v5808_v18  ;;  %v5811_v19 = vadd.f32 %v5782_v21, %v5159_v31  ;;  %v5160_v37 = vadd.f32 %v8596_v5, %v4508_v62  ;;  %v5876_v15 = vsel %vm780_vm9, %v5867_v23, 0.0 }
0x26f2   :  { %v5839_v52 = vmax.f32 %v5831_v51, 0.0  ;;  %v5836_v54 = vadd.f32 %v5820_v10, %v5810_v63 }
0x26f3   :  { %v5842_v27 = vmax.f32 %v5834_v28, 0.0  ;;  %v5837_v48 = vadd.f32 %v5821_v34, %v5811_v19 }
0x26f4   :  { %v5865_v13 = vmul.f32 %v5849_v50, %v5839_v52  ;;  %v5844_v2 = vmax.f32 %v5836_v54, 0.0 }
0x26f5   :  { %v5742_v24 = vpop.f32.mrf.mxu3  ;;  %v5868_v16 = vmul.f32 %v5852_v40, %v5842_v27  ;;  %v5845_v6 = vmax.f32 %v5837_v48, 0.0 }
0x26f6   :  { %v5873_v26 = vsel %vm780_vm9, %v5865_v13, 0.0  ;;  %v5809_v8 = vadd.f32 %v5742_v24, %v8521_v53  ;;  %v5802_v30 = vpop.f32.mrf.mxu2  ;;  %v5870_v29 = vmul.f32 %v5854_v49, %v5844_v2 }
0x26f7   :  { %v5875_v35 = vadd.f32 %v5874_v14, %v5873_v26  ;;  %v5812_v46 = vadd.f32 %v5802_v30, %v5160_v37  ;;  %v5878_v39 = vsel %vm780_vm9, %v5868_v16, 0.0  ;;  %v5871_v59 = vmul.f32 %v5855_v17, %v5845_v6 }
0x26f8   :  { %v5835_v5 = vadd.f32 %v5819_v20, %v5809_v8  ;;  %v5882_v61 = vsel %vm780_vm9, %v5870_v29, 0.0 }
0x26f9   :  { %v5877_v58 = vadd.f32 %v5876_v15, %v5875_v35  ;;  %v5838_v12 = vadd.f32 %v5822_v36, %v5812_v46  ;;  %v5884_v3 = vsel %vm780_vm9, %v5871_v59, 0.0 }
0x26fa   :  { %v5843_v57 = vmax.f32 %v5835_v5, 0.0 }
0x26fb   :  { %v5879_v53 = vadd.f32 %v5878_v39, %v5877_v58  ;;  %v5846_v1 = vmax.f32 %v5838_v12, 0.0 }
0x26fc   :  { %v5869_v7 = vmul.f32 %v5853_v45, %v5843_v57 }
0x26fd   :  { %v5872_v9 = vmul.f32 %v5856_v56, %v5846_v1 }
0x26fe   :  { %v5880_v25 = vsel %vm780_vm9, %v5869_v7, 0.0 }
0x26ff   :  { %v5881_v4 = vadd.f32 %v5880_v25, %v5879_v53  ;;  %v5886_v60 = vsel %vm780_vm9, %v5872_v9, 0.0 }
0x2701   :  { %v5883_v32 = vadd.f32 %v5882_v61, %v5881_v4 }
0x2703   :  { %v5885_v43 = vadd.f32 %v5884_v3, %v5883_v32 }
0x2705   :  { %v5887_v11 = vadd.f32 %v5886_v60, %v5885_v43 }
0x2707   :  { %5888 = vadd.xlane.f32.xlu1 %v5887_v11 }
0x277a   :  { %v5889_v44 = vpop.xlane.xlu1 %5888 }
0x277b   :  { %v5894_v31 = vadd.f32 %v6412_v0, %v5889_v44 }
0x277d   :  { %5896 = vst.msk [vmem:[%s8735_s15] sm:$0x7] %vm5895_vm0, %v5894_v31 }
0x277e   :  { %5901 = vsyncpa [#allocation4], 1 }
0x277f   :  { %5902 = vsyncpa [#allocation6], 1 }
0x2780   :  { %5903 = vsyncpa [#allocation9], 1 }
0x2781   :  { %5904 = vsyncpa [#allocation12], 1 }
0x2782   :  { %5905 = vsyncpa [#allocation15], 1 }
0x2783   :  { %5906 = vsyncpa [#allocation18], 1 }

</bundles_post_ra>
